<compile_context>
chip_gen: v5e
topology: v5e:2x2
jax: 0.10.0
libtpu: 0.0.40
codegen_flags: <defaults>
</compile_context>

<pallas_src>
import functools
import numpy as np

import jax
import jax.numpy as jnp
from jax.experimental import pallas as pl
from jax.experimental.pallas import tpu as pltpu


def conv_out(n, k, s):
    return (n - k) // s + 1


# ----------------------------------------------------------------------------
# Fused kernel: conv1 -> conv2 -> conv3 -> linear (+ReLUs) for B_tile samples.
#
# Activation layout: "slabs" of shape (B_tile * n_m, cols) where n_m = H/8 and
# sample b owns rows [b*n_m, (b+1)*n_m).  Rows past a layer's valid out_h are
# finite garbage and are never read by valid downstream rows.
# ----------------------------------------------------------------------------
def _fused_cnn_kernel(obs_ref, n1_ref, b1_ref, n2_ref, b2_ref, n3_ref, b3_ref,
                      wl_ref, bl_ref, sel_ref, out_ref):
    f32, bf16 = jnp.float32, jnp.bfloat16

    def shift_up(z, q):
        # out[j] = z[j + q]; rows that wrap to the bottom only ever land on
        # per-sample padding rows that are never read downstream.
        return z if q == 0 else jnp.roll(z, -q, axis=0)

    def mm(a, b):
        return jnp.dot(a, b, preferred_element_type=f32)

    # ---- conv1: 8x8, stride 4 ----------------------------------------------
    # Input arrives pre-split into 8 row phases (phase r = image rows r, r+8,
    # r+16, ...), each a (B_tile*n_m, C*W) uint8 slab.  Output row
    # oh1 = 2m + p is sum_i x[8m + 4p + i] @ N1[i], so:
    #   parity 0 : phase i      at slab row m       (no shift)
    #   parity 1 : phase (i+4)%8 at slab row m + (i+4)//8
    n_phase = obs_ref.shape[1]
    assert n_phase == 8, "conv1 phase split assumes kernel 8 / stride 4"
    acc_p0 = None     # parity 0, shift 0
    acc_p1a = None    # parity 1, shift 0  (taps i = 0..3)
    acc_p1b = None    # parity 1, shift 1  (taps i = 4..7)
    for r in range(n_phase):
        x_r = obs_ref[0, r].astype(jnp.int32).astype(f32).astype(bf16)
        z = mm(x_r, n1_ref[r])                       # parity-0 tap i = r
        acc_p0 = z if acc_p0 is None else acc_p0 + z
        if r >= 4:                                   # parity-1 tap i = r - 4
            z = mm(x_r, n1_ref[r - 4])
            acc_p1a = z if acc_p1a is None else acc_p1a + z
        else:                                        # parity-1 tap i = r + 4
            z = mm(x_r, n1_ref[r + 4])
            acc_p1b = z if acc_p1b is None else acc_p1b + z
    h1 = (
        jnp.maximum(acc_p0 + b1_ref[...], 0.0).astype(bf16),
        jnp.maximum(acc_p1a + shift_up(acc_p1b, 1) + b1_ref[...],
                    0.0).astype(bf16),
    )
    # h1[p] slab row (b*n_m + m) == conv1 output row oh1 = 2m + p.

    # ---- conv2: 4x4, stride 2 ----------------------------------------------
    # out[oh2] = sum_i h1_row[2*oh2 + i] @ N2[i]; row 2*oh2+i has parity i%2
    # and slab offset oh2 + i//2.
    acc_a = None
    acc_b = None
    for i in range(n2_ref.shape[0]):                 # 4 taps
        z = mm(h1[i % 2], n2_ref[i])
        if i // 2 == 0:
            acc_a = z if acc_a is None else acc_a + z
        else:
            acc_b = z if acc_b is None else acc_b + z
    h2 = jnp.maximum(acc_a + shift_up(acc_b, 1) + b2_ref[...],
                     0.0).astype(bf16)

    # ---- conv3: 3x3, stride 1 ----------------------------------------------
    acc3 = None
    for q in range(n3_ref.shape[0]):                 # 3 taps
        z = shift_up(mm(h2, n3_ref[q]), q)
        acc3 = z if acc3 is None else acc3 + z
    h3 = jnp.maximum(acc3 + b3_ref[...], 0.0).astype(bf16)

    # ---- flatten (NCHW order folded into wl) + linear + relu ----------------
    row_cols = h3.shape[1]                           # OW3 * 64
    acc_l = None
    for h in range(sel_ref.shape[0]):                # OH3 output rows
        xh = mm(sel_ref[h], h3).astype(bf16)         # (B_tile, OW3*64)
        z = mm(xh, wl_ref[pl.ds(h * row_cols, row_cols), :])
        acc_l = z if acc_l is None else acc_l + z
    out_ref[...] = jnp.maximum(acc_l + bl_ref[...], 0.0)


# ----------------------------------------------------------------------------
# Offline weight packing (plain numpy, runs once at init)
# ----------------------------------------------------------------------------
def _conv_tap_matrices(w_oihw, stride, in_w, *, channel_major_in, scale=1.0,
                       dtype=jnp.bfloat16):
    """N_i[(input col for w,ci), ow*Cout+co] = W[co,ci,i, w - stride*ow]."""
    w_np = np.asarray(w_oihw, np.float32) * scale
    cout, cin, kh, kw = w_np.shape
    out_w = conv_out(in_w, kw, stride)
    n = np.zeros((kh, in_w * cin, out_w * cout), np.float32)
    for i in range(kh):
        for j in range(kw):
            for ow in range(out_w):
                wcol = stride * ow + j
                for ci in range(cin):
                    row = ci * in_w + wcol if channel_major_in else wcol * cin + ci
                    n[i, row, ow * cout:(ow + 1) * cout] = w_np[:, ci, i, j]
    return jnp.asarray(n, dtype)


def init_params(key, n_input_channels, n_flatten, features_dim):
    """Torch-equivalent layout: conv (Cout,Cin,kh,kw), linear (out,in).
    Kaiming normal, mode='fan_out', relu; zero biases."""
    k1, k2, k3, k4 = jax.random.split(key, 4)

    def kaiming(k, shape, fan_out):
        return ((2.0 / fan_out) ** 0.5
                * jax.random.normal(k, shape, dtype=jnp.float32))

    return {
        "w1": kaiming(k1, (16, n_input_channels, 8, 8), 16 * 8 * 8),
        "b1": jnp.zeros((16,), jnp.float32),
        "w2": kaiming(k2, (32, 16, 4, 4), 32 * 4 * 4),
        "b2": jnp.zeros((32,), jnp.float32),
        "w3": kaiming(k3, (64, 32, 3, 3), 64 * 3 * 3),
        "b3": jnp.zeros((64,), jnp.float32),
        "wl": kaiming(k4, (features_dim, n_flatten), features_dim),
        "bl": jnp.zeros((features_dim,), jnp.float32),
    }


def pack_params(params, h, w):
    oh1, ow1 = conv_out(h, 8, 4), conv_out(w, 8, 4)
    oh2, ow2 = conv_out(oh1, 4, 2), conv_out(ow1, 4, 2)
    oh3, ow3 = conv_out(oh2, 3, 1), conv_out(ow2, 3, 1)
    c3 = params["w3"].shape[0]
    f = params["wl"].shape[0]

    packed = {
        # conv1 input columns are channel-major (c*W + w); /255 folded in.
        "n1": _conv_tap_matrices(params["w1"], 4, w,
                                 channel_major_in=True, scale=1.0 / 255.0),
        "b1": jnp.tile(params["b1"], ow1)[None, :].astype(jnp.float32),
        "n2": _conv_tap_matrices(params["w2"], 2, ow1, channel_major_in=False),
        "b2": jnp.tile(params["b2"], ow2)[None, :].astype(jnp.float32),
        "n3": _conv_tap_matrices(params["w3"], 1, ow2, channel_major_in=False),
        "b3": jnp.tile(params["b3"], ow3)[None, :].astype(jnp.float32),
        "bl": params["bl"][None, :].astype(jnp.float32),
    }
    # Fold the NCHW flatten permutation into the linear weight:
    # packed_wl[h*(OW3*C3) + w*C3 + c, fo] = wl[fo, c*(OH3*OW3) + h*OW3 + w]
    wl4 = params["wl"].reshape(f, c3, oh3, ow3)
    packed["wl"] = jnp.transpose(wl4, (2, 3, 1, 0)).reshape(
        oh3 * ow3 * c3, f).astype(jnp.bfloat16)
    return packed


# ----------------------------------------------------------------------------
# Forward pass (single fused pallas_call over sample blocks)
# ----------------------------------------------------------------------------
@functools.partial(jax.jit, static_argnames=("block_b",))
def cnn_feature_extractor(packed, observations_nchw, *, block_b=16):
    b, c, h, w = observations_nchw.shape
    feat_dim = packed["bl"].shape[1]

    n_phase = 8                                    # 2 * conv1 stride
    h_pad = ((h + n_phase - 1) // n_phase) * n_phase
    n_m = h_pad // n_phase

    bt = int(min(block_b, b))                      # samples per grid step
    b_pad = ((b + bt - 1) // bt) * bt
    n_blk = b_pad // bt

    oh1 = conv_out(h, 8, 4)
    oh2 = conv_out(oh1, 4, 2)
    oh3 = conv_out(oh2, 3, 1)
    # Shifted reads must stay inside each sample's n_m-row slab.
    assert (oh1 - 2) // 2 + 1 <= n_m - 1
    assert (oh2 - 1) + 1 <= n_m - 1
    assert (oh3 - 1) + 2 <= n_m - 1

    # ---- input layout prep (pure uint8 XLA layout ops, outside the kernel) --
    # NCHW -> (n_blk, 8 phases, B_tile*n_m, C*W); phase r = rows r, r+8, ...
    x = observations_nchw
    if b_pad != b:
        x = jnp.pad(x, ((0, b_pad - b), (0, 0), (0, 0), (0, 0)))
    x = jnp.transpose(x, (0, 2, 1, 3)).reshape(b_pad, h, c * w)
    if h_pad != h:
        x = jnp.pad(x, ((0, 0), (0, h_pad - h), (0, 0)))
    x = x.reshape(n_blk, bt, n_m, n_phase, c * w)
    x = jnp.transpose(x, (0, 3, 1, 2, 4)).reshape(n_blk, n_phase,
                                                  bt * n_m, c * w)

    # 0/1 row-selection for the final per-sample flatten (tiny constant).
    sel_np = np.zeros((oh3, bt, bt * n_m), np.float32)
    for hh in range(oh3):
        sel_np[hh, np.arange(bt), np.arange(bt) * n_m + hh] = 1.0
    sel = jnp.asarray(sel_np, jnp.bfloat16)

    order = ["n1", "b1", "n2", "b2", "n3", "b3", "wl", "bl"]
    consts = [packed[k] for k in order] + [sel]

    def const_spec(arr):
        return pl.BlockSpec(arr.shape, lambda i, _nd=arr.ndim: (0,) * _nd)

    # Advisory cost estimate for XLA scheduling.
    m_rows = bt * n_m
    k1, n1c = packed["n1"].shape[1], packed["n1"].shape[2]
    k2, n2c = packed["n2"].shape[1], packed["n2"].shape[2]
    k3, n3c = packed["n3"].shape[1], packed["n3"].shape[2]
    flops_blk = (2 * m_rows * (16 * k1 * n1c + 4 * k2 * n2c + 3 * k3 * n3c)
                 + oh3 * 2 * bt * (m_rows * n3c + n3c * feat_dim))
    flops = int(flops_blk * n_blk)
    bytes_accessed = int(x.size
                         + sum(p.size * p.dtype.itemsize for p in consts)
                         + b_pad * feat_dim * 4)

    out = pl.pallas_call(
        _fused_cnn_kernel,
        out_shape=jax.ShapeDtypeStruct((b_pad, feat_dim), jnp.float32),
        grid=(n_blk,),
        in_specs=([pl.BlockSpec((1, n_phase, bt * n_m, c * w),
                                lambda i: (i, 0, 0, 0))]
                  + [const_spec(p) for p in consts]),
        out_specs=pl.BlockSpec((bt, feat_dim), lambda i: (i, 0)),
        compiler_params=pltpu.CompilerParams(
            dimension_semantics=("parallel",)),
        cost_estimate=pl.CostEstimate(flops=flops, transcendentals=0,
                                      bytes_accessed=bytes_accessed),
    )(x, *consts)
    return out[:b]


# ----------------------------------------------------------------------------
# Pure-JAX reference (mirrors the PyTorch module, eval mode) for validation
# ----------------------------------------------------------------------------
@jax.jit
def reference_forward(params, obs_nchw):
    x = obs_nchw.astype(jnp.float32) / 255.0

    def conv(x, wgt, bias, stride):
        y = jax.lax.conv_general_dilated(
            x, wgt, window_strides=(stride, stride), padding="VALID",
            dimension_numbers=("NCHW", "OIHW", "NCHW"))
        return jax.nn.relu(y + bias[None, :, None, None])

    x = conv(x, params["w1"], params["b1"], 4)
    x = conv(x, params["w2"], params["b2"], 2)
    x = conv(x, params["w3"], params["b3"], 1)
    flat = x.reshape(x.shape[0], -1)                 # torch NCHW flatten order
    return jax.nn.relu(flat @ params["wl"].T + params["bl"])


if __name__ == "__main__":
    # Observation space: (k=4, H=48, W=48) uint8; batch 32 (2 grid blocks of
    # 16 samples each); features_dim=256.
    B, C_IN, H, W = 32, 4, 48, 48
    FEATURES_DIM = 256

    oh1, ow1 = conv_out(H, 8, 4), conv_out(W, 8, 4)
    oh2, ow2 = conv_out(oh1, 4, 2), conv_out(ow1, 4, 2)
    oh3, ow3 = conv_out(oh2, 3, 1), conv_out(ow2, 3, 1)
    n_flatten = 64 * oh3 * ow3

    key = jax.random.PRNGKey(0)
    k_obs, k_par = jax.random.split(key)
    obs = jax.random.randint(k_obs, (B, C_IN, H, W), 0, 256,
                             dtype=jnp.int32).astype(jnp.uint8)

    params = init_params(k_par, C_IN, n_flatten, FEATURES_DIM)
    packed = pack_params(params, H, W)

    feats = jax.block_until_ready(cnn_feature_extractor(packed, obs))
    assert feats.shape == (B, FEATURES_DIM), feats.shape
    assert feats.dtype == jnp.float32

    ref = jax.block_until_ready(reference_forward(params, obs))
    max_err = float(jnp.max(jnp.abs(feats - ref)))
    # bf16 MXU operands with f32 accumulation: expect ~1e-3 level error.
    assert jnp.allclose(feats, ref, atol=3e-2, rtol=3e-2), \
        f"kernel/reference mismatch: max|diff|={max_err}"

    print("KERNEL_OK")
</pallas_src>

<mosaic_0001>
module attributes {stable_mosaic.version = 11 : i64} {
  func.func @_fused_cnn_kernel(%arg0: i32, %arg1: memref<1x8x96x192xi8, #tpu.memory_space<vmem>>, %arg2: memref<8x192x176xbf16, #tpu.memory_space<vmem>>, %arg3: memref<1x176xf32, #tpu.memory_space<vmem>>, %arg4: memref<4x176x128xbf16, #tpu.memory_space<vmem>>, %arg5: memref<1x128xf32, #tpu.memory_space<vmem>>, %arg6: memref<3x128x128xbf16, #tpu.memory_space<vmem>>, %arg7: memref<1x128xf32, #tpu.memory_space<vmem>>, %arg8: memref<256x256xbf16, #tpu.memory_space<vmem>>, %arg9: memref<1x256xf32, #tpu.memory_space<vmem>>, %arg10: memref<2x16x96xbf16, #tpu.memory_space<vmem>>, %arg11: memref<16x256xf32, #tpu.memory_space<vmem>>) attributes {dimension_semantics = [#tpu.dimension_semantics<parallel>], iteration_bounds = array<i64: 2>, scalar_prefetch = 0 : i64, scratch_operands = 0 : i64, tpu.core_type = #tpu.core_type<tc>, window_params = [{transform_indices = @transform_0, window_bounds = array<i64: 1, 8, 96, 192>}, {pipeline_mode = #tpu.pipeline_mode<synchronous>, transform_indices = @transform_1, window_bounds = array<i64: 8, 192, 176>}, {pipeline_mode = #tpu.pipeline_mode<synchronous>, transform_indices = @transform_2, window_bounds = array<i64: 1, 176>}, {pipeline_mode = #tpu.pipeline_mode<synchronous>, transform_indices = @transform_3, window_bounds = array<i64: 4, 176, 128>}, {pipeline_mode = #tpu.pipeline_mode<synchronous>, transform_indices = @transform_4, window_bounds = array<i64: 1, 128>}, {pipeline_mode = #tpu.pipeline_mode<synchronous>, transform_indices = @transform_5, window_bounds = array<i64: 3, 128, 128>}, {pipeline_mode = #tpu.pipeline_mode<synchronous>, transform_indices = @transform_6, window_bounds = array<i64: 1, 128>}, {pipeline_mode = #tpu.pipeline_mode<synchronous>, transform_indices = @transform_7, window_bounds = array<i64: 256, 256>}, {pipeline_mode = #tpu.pipeline_mode<synchronous>, transform_indices = @transform_8, window_bounds = array<i64: 1, 256>}, {pipeline_mode = #tpu.pipeline_mode<synchronous>, transform_indices = @transform_9, window_bounds = array<i64: 2, 16, 96>}, {transform_indices = @transform_10, window_bounds = array<i64: 16, 256>}]} {
    %c0 = arith.constant 0 : index
    %c0_0 = arith.constant 0 : index
    %c0_1 = arith.constant 0 : index
    %c0_2 = arith.constant 0 : index
    %0 = vector.load %arg1[%c0, %c0_0, %c0_1, %c0_2] : memref<1x8x96x192xi8, #tpu.memory_space<vmem>>, vector<1x1x96x192xi8>
    %1 = vector.shape_cast %0 : vector<1x1x96x192xi8> to vector<96x192xi8>
    %2 = arith.extui %1 : vector<96x192xi8> to vector<96x192xi32>
    %3 = arith.sitofp %2 : vector<96x192xi32> to vector<96x192xf32>
    %4 = arith.truncf %3 : vector<96x192xf32> to vector<96x192xbf16>
    %c0_3 = arith.constant 0 : index
    %c0_4 = arith.constant 0 : index
    %c0_5 = arith.constant 0 : index
    %5 = vector.load %arg2[%c0_3, %c0_4, %c0_5] : memref<8x192x176xbf16, #tpu.memory_space<vmem>>, vector<1x192x176xbf16>
    %6 = vector.shape_cast %5 : vector<1x192x176xbf16> to vector<192x176xbf16>
    %cst = arith.constant dense<0.000000e+00> : vector<96x176xf32>
    %7 = tpu.matmul %4, %6, %cst {dimension_numbers = #tpu.dot_dimension_numbers<[1], [0], [0], [1], [0, 0, 1, 1], [], []>} : vector<96x192xbf16>, vector<192x176xbf16>, vector<96x176xf32> -> vector<96x176xf32>
    %c4 = arith.constant 4 : index
    %c0_6 = arith.constant 0 : index
    %c0_7 = arith.constant 0 : index
    %8 = vector.load %arg2[%c4, %c0_6, %c0_7] : memref<8x192x176xbf16, #tpu.memory_space<vmem>>, vector<1x192x176xbf16>
    %9 = vector.shape_cast %8 : vector<1x192x176xbf16> to vector<192x176xbf16>
    %cst_8 = arith.constant dense<0.000000e+00> : vector<96x176xf32>
    %10 = tpu.matmul %4, %9, %cst_8 {dimension_numbers = #tpu.dot_dimension_numbers<[1], [0], [0], [1], [0, 0, 1, 1], [], []>} : vector<96x192xbf16>, vector<192x176xbf16>, vector<96x176xf32> -> vector<96x176xf32>
    %c0_9 = arith.constant 0 : index
    %c1 = arith.constant 1 : index
    %c0_10 = arith.constant 0 : index
    %c0_11 = arith.constant 0 : index
    %11 = vector.load %arg1[%c0_9, %c1, %c0_10, %c0_11] : memref<1x8x96x192xi8, #tpu.memory_space<vmem>>, vector<1x1x96x192xi8>
    %12 = vector.shape_cast %11 : vector<1x1x96x192xi8> to vector<96x192xi8>
    %13 = arith.extui %12 : vector<96x192xi8> to vector<96x192xi32>
    %14 = arith.sitofp %13 : vector<96x192xi32> to vector<96x192xf32>
    %15 = arith.truncf %14 : vector<96x192xf32> to vector<96x192xbf16>
    %c1_12 = arith.constant 1 : index
    %c0_13 = arith.constant 0 : index
    %c0_14 = arith.constant 0 : index
    %16 = vector.load %arg2[%c1_12, %c0_13, %c0_14] : memref<8x192x176xbf16, #tpu.memory_space<vmem>>, vector<1x192x176xbf16>
    %17 = vector.shape_cast %16 : vector<1x192x176xbf16> to vector<192x176xbf16>
    %cst_15 = arith.constant dense<0.000000e+00> : vector<96x176xf32>
    %18 = tpu.matmul %15, %17, %cst_15 {dimension_numbers = #tpu.dot_dimension_numbers<[1], [0], [0], [1], [0, 0, 1, 1], [], []>} : vector<96x192xbf16>, vector<192x176xbf16>, vector<96x176xf32> -> vector<96x176xf32>
    %19 = arith.addf %7, %18 : vector<96x176xf32>
    %c5 = arith.constant 5 : index
    %c0_16 = arith.constant 0 : index
    %c0_17 = arith.constant 0 : index
    %20 = vector.load %arg2[%c5, %c0_16, %c0_17] : memref<8x192x176xbf16, #tpu.memory_space<vmem>>, vector<1x192x176xbf16>
    %21 = vector.shape_cast %20 : vector<1x192x176xbf16> to vector<192x176xbf16>
    %cst_18 = arith.constant dense<0.000000e+00> : vector<96x176xf32>
    %22 = tpu.matmul %15, %21, %cst_18 {dimension_numbers = #tpu.dot_dimension_numbers<[1], [0], [0], [1], [0, 0, 1, 1], [], []>} : vector<96x192xbf16>, vector<192x176xbf16>, vector<96x176xf32> -> vector<96x176xf32>
    %23 = arith.addf %10, %22 : vector<96x176xf32>
    %c0_19 = arith.constant 0 : index
    %c2 = arith.constant 2 : index
    %c0_20 = arith.constant 0 : index
    %c0_21 = arith.constant 0 : index
    %24 = vector.load %arg1[%c0_19, %c2, %c0_20, %c0_21] : memref<1x8x96x192xi8, #tpu.memory_space<vmem>>, vector<1x1x96x192xi8>
    %25 = vector.shape_cast %24 : vector<1x1x96x192xi8> to vector<96x192xi8>
    %26 = arith.extui %25 : vector<96x192xi8> to vector<96x192xi32>
    %27 = arith.sitofp %26 : vector<96x192xi32> to vector<96x192xf32>
    %28 = arith.truncf %27 : vector<96x192xf32> to vector<96x192xbf16>
    %c2_22 = arith.constant 2 : index
    %c0_23 = arith.constant 0 : index
    %c0_24 = arith.constant 0 : index
    %29 = vector.load %arg2[%c2_22, %c0_23, %c0_24] : memref<8x192x176xbf16, #tpu.memory_space<vmem>>, vector<1x192x176xbf16>
    %30 = vector.shape_cast %29 : vector<1x192x176xbf16> to vector<192x176xbf16>
    %cst_25 = arith.constant dense<0.000000e+00> : vector<96x176xf32>
    %31 = tpu.matmul %28, %30, %cst_25 {dimension_numbers = #tpu.dot_dimension_numbers<[1], [0], [0], [1], [0, 0, 1, 1], [], []>} : vector<96x192xbf16>, vector<192x176xbf16>, vector<96x176xf32> -> vector<96x176xf32>
    %32 = arith.addf %19, %31 : vector<96x176xf32>
    %c6 = arith.constant 6 : index
    %c0_26 = arith.constant 0 : index
    %c0_27 = arith.constant 0 : index
    %33 = vector.load %arg2[%c6, %c0_26, %c0_27] : memref<8x192x176xbf16, #tpu.memory_space<vmem>>, vector<1x192x176xbf16>
    %34 = vector.shape_cast %33 : vector<1x192x176xbf16> to vector<192x176xbf16>
    %cst_28 = arith.constant dense<0.000000e+00> : vector<96x176xf32>
    %35 = tpu.matmul %28, %34, %cst_28 {dimension_numbers = #tpu.dot_dimension_numbers<[1], [0], [0], [1], [0, 0, 1, 1], [], []>} : vector<96x192xbf16>, vector<192x176xbf16>, vector<96x176xf32> -> vector<96x176xf32>
    %36 = arith.addf %23, %35 : vector<96x176xf32>
    %c0_29 = arith.constant 0 : index
    %c3 = arith.constant 3 : index
    %c0_30 = arith.constant 0 : index
    %c0_31 = arith.constant 0 : index
    %37 = vector.load %arg1[%c0_29, %c3, %c0_30, %c0_31] : memref<1x8x96x192xi8, #tpu.memory_space<vmem>>, vector<1x1x96x192xi8>
    %38 = vector.shape_cast %37 : vector<1x1x96x192xi8> to vector<96x192xi8>
    %39 = arith.extui %38 : vector<96x192xi8> to vector<96x192xi32>
    %40 = arith.sitofp %39 : vector<96x192xi32> to vector<96x192xf32>
    %41 = arith.truncf %40 : vector<96x192xf32> to vector<96x192xbf16>
    %c3_32 = arith.constant 3 : index
    %c0_33 = arith.constant 0 : index
    %c0_34 = arith.constant 0 : index
    %42 = vector.load %arg2[%c3_32, %c0_33, %c0_34] : memref<8x192x176xbf16, #tpu.memory_space<vmem>>, vector<1x192x176xbf16>
    %43 = vector.shape_cast %42 : vector<1x192x176xbf16> to vector<192x176xbf16>
    %cst_35 = arith.constant dense<0.000000e+00> : vector<96x176xf32>
    %44 = tpu.matmul %41, %43, %cst_35 {dimension_numbers = #tpu.dot_dimension_numbers<[1], [0], [0], [1], [0, 0, 1, 1], [], []>} : vector<96x192xbf16>, vector<192x176xbf16>, vector<96x176xf32> -> vector<96x176xf32>
    %45 = arith.addf %32, %44 : vector<96x176xf32>
    %c7 = arith.constant 7 : index
    %c0_36 = arith.constant 0 : index
    %c0_37 = arith.constant 0 : index
    %46 = vector.load %arg2[%c7, %c0_36, %c0_37] : memref<8x192x176xbf16, #tpu.memory_space<vmem>>, vector<1x192x176xbf16>
    %47 = vector.shape_cast %46 : vector<1x192x176xbf16> to vector<192x176xbf16>
    %cst_38 = arith.constant dense<0.000000e+00> : vector<96x176xf32>
    %48 = tpu.matmul %41, %47, %cst_38 {dimension_numbers = #tpu.dot_dimension_numbers<[1], [0], [0], [1], [0, 0, 1, 1], [], []>} : vector<96x192xbf16>, vector<192x176xbf16>, vector<96x176xf32> -> vector<96x176xf32>
    %49 = arith.addf %36, %48 : vector<96x176xf32>
    %c0_39 = arith.constant 0 : index
    %c4_40 = arith.constant 4 : index
    %c0_41 = arith.constant 0 : index
    %c0_42 = arith.constant 0 : index
    %50 = vector.load %arg1[%c0_39, %c4_40, %c0_41, %c0_42] : memref<1x8x96x192xi8, #tpu.memory_space<vmem>>, vector<1x1x96x192xi8>
    %51 = vector.shape_cast %50 : vector<1x1x96x192xi8> to vector<96x192xi8>
    %52 = arith.extui %51 : vector<96x192xi8> to vector<96x192xi32>
    %53 = arith.sitofp %52 : vector<96x192xi32> to vector<96x192xf32>
    %54 = arith.truncf %53 : vector<96x192xf32> to vector<96x192xbf16>
    %c4_43 = arith.constant 4 : index
    %c0_44 = arith.constant 0 : index
    %c0_45 = arith.constant 0 : index
    %55 = vector.load %arg2[%c4_43, %c0_44, %c0_45] : memref<8x192x176xbf16, #tpu.memory_space<vmem>>, vector<1x192x176xbf16>
    %56 = vector.shape_cast %55 : vector<1x192x176xbf16> to vector<192x176xbf16>
    %cst_46 = arith.constant dense<0.000000e+00> : vector<96x176xf32>
    %57 = tpu.matmul %54, %56, %cst_46 {dimension_numbers = #tpu.dot_dimension_numbers<[1], [0], [0], [1], [0, 0, 1, 1], [], []>} : vector<96x192xbf16>, vector<192x176xbf16>, vector<96x176xf32> -> vector<96x176xf32>
    %58 = arith.addf %45, %57 : vector<96x176xf32>
    %c0_47 = arith.constant 0 : index
    %c0_48 = arith.constant 0 : index
    %c0_49 = arith.constant 0 : index
    %59 = vector.load %arg2[%c0_47, %c0_48, %c0_49] : memref<8x192x176xbf16, #tpu.memory_space<vmem>>, vector<1x192x176xbf16>
    %60 = vector.shape_cast %59 : vector<1x192x176xbf16> to vector<192x176xbf16>
    %cst_50 = arith.constant dense<0.000000e+00> : vector<96x176xf32>
    %61 = tpu.matmul %54, %60, %cst_50 {dimension_numbers = #tpu.dot_dimension_numbers<[1], [0], [0], [1], [0, 0, 1, 1], [], []>} : vector<96x192xbf16>, vector<192x176xbf16>, vector<96x176xf32> -> vector<96x176xf32>
    %c0_51 = arith.constant 0 : index
    %c5_52 = arith.constant 5 : index
    %c0_53 = arith.constant 0 : index
    %c0_54 = arith.constant 0 : index
    %62 = vector.load %arg1[%c0_51, %c5_52, %c0_53, %c0_54] : memref<1x8x96x192xi8, #tpu.memory_space<vmem>>, vector<1x1x96x192xi8>
    %63 = vector.shape_cast %62 : vector<1x1x96x192xi8> to vector<96x192xi8>
    %64 = arith.extui %63 : vector<96x192xi8> to vector<96x192xi32>
    %65 = arith.sitofp %64 : vector<96x192xi32> to vector<96x192xf32>
    %66 = arith.truncf %65 : vector<96x192xf32> to vector<96x192xbf16>
    %c5_55 = arith.constant 5 : index
    %c0_56 = arith.constant 0 : index
    %c0_57 = arith.constant 0 : index
    %67 = vector.load %arg2[%c5_55, %c0_56, %c0_57] : memref<8x192x176xbf16, #tpu.memory_space<vmem>>, vector<1x192x176xbf16>
    %68 = vector.shape_cast %67 : vector<1x192x176xbf16> to vector<192x176xbf16>
    %cst_58 = arith.constant dense<0.000000e+00> : vector<96x176xf32>
    %69 = tpu.matmul %66, %68, %cst_58 {dimension_numbers = #tpu.dot_dimension_numbers<[1], [0], [0], [1], [0, 0, 1, 1], [], []>} : vector<96x192xbf16>, vector<192x176xbf16>, vector<96x176xf32> -> vector<96x176xf32>
    %70 = arith.addf %58, %69 : vector<96x176xf32>
    %c1_59 = arith.constant 1 : index
    %c0_60 = arith.constant 0 : index
    %c0_61 = arith.constant 0 : index
    %71 = vector.load %arg2[%c1_59, %c0_60, %c0_61] : memref<8x192x176xbf16, #tpu.memory_space<vmem>>, vector<1x192x176xbf16>
    %72 = vector.shape_cast %71 : vector<1x192x176xbf16> to vector<192x176xbf16>
    %cst_62 = arith.constant dense<0.000000e+00> : vector<96x176xf32>
    %73 = tpu.matmul %66, %72, %cst_62 {dimension_numbers = #tpu.dot_dimension_numbers<[1], [0], [0], [1], [0, 0, 1, 1], [], []>} : vector<96x192xbf16>, vector<192x176xbf16>, vector<96x176xf32> -> vector<96x176xf32>
    %74 = arith.addf %61, %73 : vector<96x176xf32>
    %c0_63 = arith.constant 0 : index
    %c6_64 = arith.constant 6 : index
    %c0_65 = arith.constant 0 : index
    %c0_66 = arith.constant 0 : index
    %75 = vector.load %arg1[%c0_63, %c6_64, %c0_65, %c0_66] : memref<1x8x96x192xi8, #tpu.memory_space<vmem>>, vector<1x1x96x192xi8>
    %76 = vector.shape_cast %75 : vector<1x1x96x192xi8> to vector<96x192xi8>
    %77 = arith.extui %76 : vector<96x192xi8> to vector<96x192xi32>
    %78 = arith.sitofp %77 : vector<96x192xi32> to vector<96x192xf32>
    %79 = arith.truncf %78 : vector<96x192xf32> to vector<96x192xbf16>
    %c6_67 = arith.constant 6 : index
    %c0_68 = arith.constant 0 : index
    %c0_69 = arith.constant 0 : index
    %80 = vector.load %arg2[%c6_67, %c0_68, %c0_69] : memref<8x192x176xbf16, #tpu.memory_space<vmem>>, vector<1x192x176xbf16>
    %81 = vector.shape_cast %80 : vector<1x192x176xbf16> to vector<192x176xbf16>
    %cst_70 = arith.constant dense<0.000000e+00> : vector<96x176xf32>
    %82 = tpu.matmul %79, %81, %cst_70 {dimension_numbers = #tpu.dot_dimension_numbers<[1], [0], [0], [1], [0, 0, 1, 1], [], []>} : vector<96x192xbf16>, vector<192x176xbf16>, vector<96x176xf32> -> vector<96x176xf32>
    %83 = arith.addf %70, %82 : vector<96x176xf32>
    %c2_71 = arith.constant 2 : index
    %c0_72 = arith.constant 0 : index
    %c0_73 = arith.constant 0 : index
    %84 = vector.load %arg2[%c2_71, %c0_72, %c0_73] : memref<8x192x176xbf16, #tpu.memory_space<vmem>>, vector<1x192x176xbf16>
    %85 = vector.shape_cast %84 : vector<1x192x176xbf16> to vector<192x176xbf16>
    %cst_74 = arith.constant dense<0.000000e+00> : vector<96x176xf32>
    %86 = tpu.matmul %79, %85, %cst_74 {dimension_numbers = #tpu.dot_dimension_numbers<[1], [0], [0], [1], [0, 0, 1, 1], [], []>} : vector<96x192xbf16>, vector<192x176xbf16>, vector<96x176xf32> -> vector<96x176xf32>
    %87 = arith.addf %74, %86 : vector<96x176xf32>
    %c0_75 = arith.constant 0 : index
    %c7_76 = arith.constant 7 : index
    %c0_77 = arith.constant 0 : index
    %c0_78 = arith.constant 0 : index
    %88 = vector.load %arg1[%c0_75, %c7_76, %c0_77, %c0_78] : memref<1x8x96x192xi8, #tpu.memory_space<vmem>>, vector<1x1x96x192xi8>
    %89 = vector.shape_cast %88 : vector<1x1x96x192xi8> to vector<96x192xi8>
    %90 = arith.extui %89 : vector<96x192xi8> to vector<96x192xi32>
    %91 = arith.sitofp %90 : vector<96x192xi32> to vector<96x192xf32>
    %92 = arith.truncf %91 : vector<96x192xf32> to vector<96x192xbf16>
    %c7_79 = arith.constant 7 : index
    %c0_80 = arith.constant 0 : index
    %c0_81 = arith.constant 0 : index
    %93 = vector.load %arg2[%c7_79, %c0_80, %c0_81] : memref<8x192x176xbf16, #tpu.memory_space<vmem>>, vector<1x192x176xbf16>
    %94 = vector.shape_cast %93 : vector<1x192x176xbf16> to vector<192x176xbf16>
    %cst_82 = arith.constant dense<0.000000e+00> : vector<96x176xf32>
    %95 = tpu.matmul %92, %94, %cst_82 {dimension_numbers = #tpu.dot_dimension_numbers<[1], [0], [0], [1], [0, 0, 1, 1], [], []>} : vector<96x192xbf16>, vector<192x176xbf16>, vector<96x176xf32> -> vector<96x176xf32>
    %96 = arith.addf %83, %95 : vector<96x176xf32>
    %c3_83 = arith.constant 3 : index
    %c0_84 = arith.constant 0 : index
    %c0_85 = arith.constant 0 : index
    %97 = vector.load %arg2[%c3_83, %c0_84, %c0_85] : memref<8x192x176xbf16, #tpu.memory_space<vmem>>, vector<1x192x176xbf16>
    %98 = vector.shape_cast %97 : vector<1x192x176xbf16> to vector<192x176xbf16>
    %cst_86 = arith.constant dense<0.000000e+00> : vector<96x176xf32>
    %99 = tpu.matmul %92, %98, %cst_86 {dimension_numbers = #tpu.dot_dimension_numbers<[1], [0], [0], [1], [0, 0, 1, 1], [], []>} : vector<96x192xbf16>, vector<192x176xbf16>, vector<96x176xf32> -> vector<96x176xf32>
    %100 = arith.addf %87, %99 : vector<96x176xf32>
    %c0_87 = arith.constant 0 : index
    %c0_88 = arith.constant 0 : index
    %101 = vector.load %arg3[%c0_87, %c0_88] : memref<1x176xf32, #tpu.memory_space<vmem>>, vector<1x176xf32>
    %102 = vector.broadcast %101 : vector<1x176xf32> to vector<96x176xf32>
    %103 = arith.addf %96, %102 : vector<96x176xf32>
    %cst_89 = arith.constant 0.000000e+00 : f32
    %104 = vector.broadcast %cst_89 : f32 to vector<96x176xf32>
    %105 = arith.maximumf %103, %104 : vector<96x176xf32>
    %106 = arith.truncf %105 : vector<96x176xf32> to vector<96x176xbf16>
    %107 = vector.extract_strided_slice %49 {offsets = [1, 0], sizes = [95, 176], strides = [1, 1]} : vector<96x176xf32> to vector<95x176xf32>
    %108 = vector.extract_strided_slice %49 {offsets = [0, 0], sizes = [1, 176], strides = [1, 1]} : vector<96x176xf32> to vector<1x176xf32>
    %109 = tpu.concatenate %107, %108 in 0 : vector<95x176xf32>, vector<1x176xf32> -> vector<96x176xf32>
    %110 = arith.addf %100, %109 : vector<96x176xf32>
    %c0_90 = arith.constant 0 : index
    %c0_91 = arith.constant 0 : index
    %111 = vector.load %arg3[%c0_90, %c0_91] : memref<1x176xf32, #tpu.memory_space<vmem>>, vector<1x176xf32>
    %112 = vector.broadcast %111 : vector<1x176xf32> to vector<96x176xf32>
    %113 = arith.addf %110, %112 : vector<96x176xf32>
    %cst_92 = arith.constant 0.000000e+00 : f32
    %114 = vector.broadcast %cst_92 : f32 to vector<96x176xf32>
    %115 = arith.maximumf %113, %114 : vector<96x176xf32>
    %116 = arith.truncf %115 : vector<96x176xf32> to vector<96x176xbf16>
    %c0_93 = arith.constant 0 : index
    %c0_94 = arith.constant 0 : index
    %c0_95 = arith.constant 0 : index
    %117 = vector.load %arg4[%c0_93, %c0_94, %c0_95] : memref<4x176x128xbf16, #tpu.memory_space<vmem>>, vector<1x176x128xbf16>
    %118 = vector.shape_cast %117 : vector<1x176x128xbf16> to vector<176x128xbf16>
    %cst_96 = arith.constant dense<0.000000e+00> : vector<96x128xf32>
    %119 = tpu.matmul %106, %118, %cst_96 {dimension_numbers = #tpu.dot_dimension_numbers<[1], [0], [0], [1], [0, 0, 1, 1], [], []>} : vector<96x176xbf16>, vector<176x128xbf16>, vector<96x128xf32> -> vector<96x128xf32>
    %c1_97 = arith.constant 1 : index
    %c0_98 = arith.constant 0 : index
    %c0_99 = arith.constant 0 : index
    %120 = vector.load %arg4[%c1_97, %c0_98, %c0_99] : memref<4x176x128xbf16, #tpu.memory_space<vmem>>, vector<1x176x128xbf16>
    %121 = vector.shape_cast %120 : vector<1x176x128xbf16> to vector<176x128xbf16>
    %cst_100 = arith.constant dense<0.000000e+00> : vector<96x128xf32>
    %122 = tpu.matmul %116, %121, %cst_100 {dimension_numbers = #tpu.dot_dimension_numbers<[1], [0], [0], [1], [0, 0, 1, 1], [], []>} : vector<96x176xbf16>, vector<176x128xbf16>, vector<96x128xf32> -> vector<96x128xf32>
    %123 = arith.addf %119, %122 : vector<96x128xf32>
    %c2_101 = arith.constant 2 : index
    %c0_102 = arith.constant 0 : index
    %c0_103 = arith.constant 0 : index
    %124 = vector.load %arg4[%c2_101, %c0_102, %c0_103] : memref<4x176x128xbf16, #tpu.memory_space<vmem>>, vector<1x176x128xbf16>
    %125 = vector.shape_cast %124 : vector<1x176x128xbf16> to vector<176x128xbf16>
    %cst_104 = arith.constant dense<0.000000e+00> : vector<96x128xf32>
    %126 = tpu.matmul %106, %125, %cst_104 {dimension_numbers = #tpu.dot_dimension_numbers<[1], [0], [0], [1], [0, 0, 1, 1], [], []>} : vector<96x176xbf16>, vector<176x128xbf16>, vector<96x128xf32> -> vector<96x128xf32>
    %c3_105 = arith.constant 3 : index
    %c0_106 = arith.constant 0 : index
    %c0_107 = arith.constant 0 : index
    %127 = vector.load %arg4[%c3_105, %c0_106, %c0_107] : memref<4x176x128xbf16, #tpu.memory_space<vmem>>, vector<1x176x128xbf16>
    %128 = vector.shape_cast %127 : vector<1x176x128xbf16> to vector<176x128xbf16>
    %cst_108 = arith.constant dense<0.000000e+00> : vector<96x128xf32>
    %129 = tpu.matmul %116, %128, %cst_108 {dimension_numbers = #tpu.dot_dimension_numbers<[1], [0], [0], [1], [0, 0, 1, 1], [], []>} : vector<96x176xbf16>, vector<176x128xbf16>, vector<96x128xf32> -> vector<96x128xf32>
    %130 = arith.addf %126, %129 : vector<96x128xf32>
    %131 = vector.extract_strided_slice %130 {offsets = [1, 0], sizes = [95, 128], strides = [1, 1]} : vector<96x128xf32> to vector<95x128xf32>
    %132 = vector.extract_strided_slice %130 {offsets = [0, 0], sizes = [1, 128], strides = [1, 1]} : vector<96x128xf32> to vector<1x128xf32>
    %133 = tpu.concatenate %131, %132 in 0 : vector<95x128xf32>, vector<1x128xf32> -> vector<96x128xf32>
    %134 = arith.addf %123, %133 : vector<96x128xf32>
    %c0_109 = arith.constant 0 : index
    %c0_110 = arith.constant 0 : index
    %135 = vector.load %arg5[%c0_109, %c0_110] : memref<1x128xf32, #tpu.memory_space<vmem>>, vector<1x128xf32>
    %136 = vector.broadcast %135 : vector<1x128xf32> to vector<96x128xf32>
    %137 = arith.addf %134, %136 : vector<96x128xf32>
    %cst_111 = arith.constant 0.000000e+00 : f32
    %138 = vector.broadcast %cst_111 : f32 to vector<96x128xf32>
    %139 = arith.maximumf %137, %138 : vector<96x128xf32>
    %140 = arith.truncf %139 : vector<96x128xf32> to vector<96x128xbf16>
    %c0_112 = arith.constant 0 : index
    %c0_113 = arith.constant 0 : index
    %c0_114 = arith.constant 0 : index
    %141 = vector.load %arg6[%c0_112, %c0_113, %c0_114] : memref<3x128x128xbf16, #tpu.memory_space<vmem>>, vector<1x128x128xbf16>
    %142 = vector.shape_cast %141 : vector<1x128x128xbf16> to vector<128x128xbf16>
    %cst_115 = arith.constant dense<0.000000e+00> : vector<96x128xf32>
    %143 = tpu.matmul %140, %142, %cst_115 {dimension_numbers = #tpu.dot_dimension_numbers<[1], [0], [0], [1], [0, 0, 1, 1], [], []>} : vector<96x128xbf16>, vector<128x128xbf16>, vector<96x128xf32> -> vector<96x128xf32>
    %c1_116 = arith.constant 1 : index
    %c0_117 = arith.constant 0 : index
    %c0_118 = arith.constant 0 : index
    %144 = vector.load %arg6[%c1_116, %c0_117, %c0_118] : memref<3x128x128xbf16, #tpu.memory_space<vmem>>, vector<1x128x128xbf16>
    %145 = vector.shape_cast %144 : vector<1x128x128xbf16> to vector<128x128xbf16>
    %cst_119 = arith.constant dense<0.000000e+00> : vector<96x128xf32>
    %146 = tpu.matmul %140, %145, %cst_119 {dimension_numbers = #tpu.dot_dimension_numbers<[1], [0], [0], [1], [0, 0, 1, 1], [], []>} : vector<96x128xbf16>, vector<128x128xbf16>, vector<96x128xf32> -> vector<96x128xf32>
    %147 = vector.extract_strided_slice %146 {offsets = [1, 0], sizes = [95, 128], strides = [1, 1]} : vector<96x128xf32> to vector<95x128xf32>
    %148 = vector.extract_strided_slice %146 {offsets = [0, 0], sizes = [1, 128], strides = [1, 1]} : vector<96x128xf32> to vector<1x128xf32>
    %149 = tpu.concatenate %147, %148 in 0 : vector<95x128xf32>, vector<1x128xf32> -> vector<96x128xf32>
    %150 = arith.addf %143, %149 : vector<96x128xf32>
    %c2_120 = arith.constant 2 : index
    %c0_121 = arith.constant 0 : index
    %c0_122 = arith.constant 0 : index
    %151 = vector.load %arg6[%c2_120, %c0_121, %c0_122] : memref<3x128x128xbf16, #tpu.memory_space<vmem>>, vector<1x128x128xbf16>
    %152 = vector.shape_cast %151 : vector<1x128x128xbf16> to vector<128x128xbf16>
    %cst_123 = arith.constant dense<0.000000e+00> : vector<96x128xf32>
    %153 = tpu.matmul %140, %152, %cst_123 {dimension_numbers = #tpu.dot_dimension_numbers<[1], [0], [0], [1], [0, 0, 1, 1], [], []>} : vector<96x128xbf16>, vector<128x128xbf16>, vector<96x128xf32> -> vector<96x128xf32>
    %154 = vector.extract_strided_slice %153 {offsets = [2, 0], sizes = [94, 128], strides = [1, 1]} : vector<96x128xf32> to vector<94x128xf32>
    %155 = vector.extract_strided_slice %153 {offsets = [0, 0], sizes = [2, 128], strides = [1, 1]} : vector<96x128xf32> to vector<2x128xf32>
    %156 = tpu.concatenate %154, %155 in 0 : vector<94x128xf32>, vector<2x128xf32> -> vector<96x128xf32>
    %157 = arith.addf %150, %156 : vector<96x128xf32>
    %c0_124 = arith.constant 0 : index
    %c0_125 = arith.constant 0 : index
    %158 = vector.load %arg7[%c0_124, %c0_125] : memref<1x128xf32, #tpu.memory_space<vmem>>, vector<1x128xf32>
    %159 = vector.broadcast %158 : vector<1x128xf32> to vector<96x128xf32>
    %160 = arith.addf %157, %159 : vector<96x128xf32>
    %cst_126 = arith.constant 0.000000e+00 : f32
    %161 = vector.broadcast %cst_126 : f32 to vector<96x128xf32>
    %162 = arith.maximumf %160, %161 : vector<96x128xf32>
    %163 = arith.truncf %162 : vector<96x128xf32> to vector<96x128xbf16>
    %c0_127 = arith.constant 0 : index
    %c0_128 = arith.constant 0 : index
    %c0_129 = arith.constant 0 : index
    %164 = vector.load %arg10[%c0_127, %c0_128, %c0_129] : memref<2x16x96xbf16, #tpu.memory_space<vmem>>, vector<1x16x96xbf16>
    %165 = vector.shape_cast %164 : vector<1x16x96xbf16> to vector<16x96xbf16>
    %cst_130 = arith.constant dense<0.000000e+00> : vector<16x128xf32>
    %166 = tpu.matmul %165, %163, %cst_130 {dimension_numbers = #tpu.dot_dimension_numbers<[1], [0], [0], [1], [0, 0, 1, 1], [], []>} : vector<16x96xbf16>, vector<96x128xbf16>, vector<16x128xf32> -> vector<16x128xf32>
    %167 = arith.truncf %166 : vector<16x128xf32> to vector<16x128xbf16>
    %c0_131 = arith.constant 0 : index
    %c0_132 = arith.constant 0 : index
    %168 = vector.load %arg8[%c0_131, %c0_132] : memref<256x256xbf16, #tpu.memory_space<vmem>>, vector<128x256xbf16>
    %cst_133 = arith.constant dense<0.000000e+00> : vector<16x256xf32>
    %169 = tpu.matmul %167, %168, %cst_133 {dimension_numbers = #tpu.dot_dimension_numbers<[1], [0], [0], [1], [0, 0, 1, 1], [], []>} : vector<16x128xbf16>, vector<128x256xbf16>, vector<16x256xf32> -> vector<16x256xf32>
    %c1_134 = arith.constant 1 : index
    %c0_135 = arith.constant 0 : index
    %c0_136 = arith.constant 0 : index
    %170 = vector.load %arg10[%c1_134, %c0_135, %c0_136] : memref<2x16x96xbf16, #tpu.memory_space<vmem>>, vector<1x16x96xbf16>
    %171 = vector.shape_cast %170 : vector<1x16x96xbf16> to vector<16x96xbf16>
    %cst_137 = arith.constant dense<0.000000e+00> : vector<16x128xf32>
    %172 = tpu.matmul %171, %163, %cst_137 {dimension_numbers = #tpu.dot_dimension_numbers<[1], [0], [0], [1], [0, 0, 1, 1], [], []>} : vector<16x96xbf16>, vector<96x128xbf16>, vector<16x128xf32> -> vector<16x128xf32>
    %173 = arith.truncf %172 : vector<16x128xf32> to vector<16x128xbf16>
    %c128 = arith.constant 128 : index
    %c0_138 = arith.constant 0 : index
    %174 = vector.load %arg8[%c128, %c0_138] : memref<256x256xbf16, #tpu.memory_space<vmem>>, vector<128x256xbf16>
    %cst_139 = arith.constant dense<0.000000e+00> : vector<16x256xf32>
    %175 = tpu.matmul %173, %174, %cst_139 {dimension_numbers = #tpu.dot_dimension_numbers<[1], [0], [0], [1], [0, 0, 1, 1], [], []>} : vector<16x128xbf16>, vector<128x256xbf16>, vector<16x256xf32> -> vector<16x256xf32>
    %176 = arith.addf %169, %175 : vector<16x256xf32>
    %c0_140 = arith.constant 0 : index
    %c0_141 = arith.constant 0 : index
    %177 = vector.load %arg9[%c0_140, %c0_141] : memref<1x256xf32, #tpu.memory_space<vmem>>, vector<1x256xf32>
    %178 = vector.broadcast %177 : vector<1x256xf32> to vector<16x256xf32>
    %179 = arith.addf %176, %178 : vector<16x256xf32>
    %cst_142 = arith.constant 0.000000e+00 : f32
    %180 = vector.broadcast %cst_142 : f32 to vector<16x256xf32>
    %181 = arith.maximumf %179, %180 : vector<16x256xf32>
    %c0_143 = arith.constant 0 : index
    %c0_144 = arith.constant 0 : index
    %182 = vector.load %arg11[%c0_143, %c0_144] : memref<16x256xf32, #tpu.memory_space<vmem>>, vector<16x256xf32>
    tpu.vector_store %arg11[%c0_143, %c0_144], %181 {strides = array<i32>} : memref<16x256xf32, #tpu.memory_space<vmem>>, vector<16x256xf32>,
    return
  }
  func.func @transform_0(%arg0: i32) -> (i32, i32, i32, i32) {
    %c0_i32 = arith.constant 0 : i32
    %c0_i32_0 = arith.constant 0 : i32
    %c0_i32_1 = arith.constant 0 : i32
    %c0_i32_2 = arith.constant 0 : i32
    return %arg0, %c0_i32, %c0_i32_0, %c0_i32_1 : i32, i32, i32, i32
  }
  func.func @transform_1(%arg0: i32) -> (i32, i32, i32) {
    %c0_i32 = arith.constant 0 : i32
    %c0_i32_0 = arith.constant 0 : i32
    %c0_i32_1 = arith.constant 0 : i32
    %c0_i32_2 = arith.constant 0 : i32
    return %c0_i32, %c0_i32_0, %c0_i32_1 : i32, i32, i32
  }
  func.func @transform_2(%arg0: i32) -> (i32, i32) {
    %c0_i32 = arith.constant 0 : i32
    %c0_i32_0 = arith.constant 0 : i32
    %c0_i32_1 = arith.constant 0 : i32
    return %c0_i32, %c0_i32_0 : i32, i32
  }
  func.func @transform_3(%arg0: i32) -> (i32, i32, i32) {
    %c0_i32 = arith.constant 0 : i32
    %c0_i32_0 = arith.constant 0 : i32
    %c0_i32_1 = arith.constant 0 : i32
    %c0_i32_2 = arith.constant 0 : i32
    return %c0_i32, %c0_i32_0, %c0_i32_1 : i32, i32, i32
  }
  func.func @transform_4(%arg0: i32) -> (i32, i32) {
    %c0_i32 = arith.constant 0 : i32
    %c0_i32_0 = arith.constant 0 : i32
    %c0_i32_1 = arith.constant 0 : i32
    return %c0_i32, %c0_i32_0 : i32, i32
  }
  func.func @transform_5(%arg0: i32) -> (i32, i32, i32) {
    %c0_i32 = arith.constant 0 : i32
    %c0_i32_0 = arith.constant 0 : i32
    %c0_i32_1 = arith.constant 0 : i32
    %c0_i32_2 = arith.constant 0 : i32
    return %c0_i32, %c0_i32_0, %c0_i32_1 : i32, i32, i32
  }
  func.func @transform_6(%arg0: i32) -> (i32, i32) {
    %c0_i32 = arith.constant 0 : i32
    %c0_i32_0 = arith.constant 0 : i32
    %c0_i32_1 = arith.constant 0 : i32
    return %c0_i32, %c0_i32_0 : i32, i32
  }
  func.func @transform_7(%arg0: i32) -> (i32, i32) {
    %c0_i32 = arith.constant 0 : i32
    %c0_i32_0 = arith.constant 0 : i32
    %c0_i32_1 = arith.constant 0 : i32
    return %c0_i32, %c0_i32_0 : i32, i32
  }
  func.func @transform_8(%arg0: i32) -> (i32, i32) {
    %c0_i32 = arith.constant 0 : i32
    %c0_i32_0 = arith.constant 0 : i32
    %c0_i32_1 = arith.constant 0 : i32
    return %c0_i32, %c0_i32_0 : i32, i32
  }
  func.func @transform_9(%arg0: i32) -> (i32, i32, i32) {
    %c0_i32 = arith.constant 0 : i32
    %c0_i32_0 = arith.constant 0 : i32
    %c0_i32_1 = arith.constant 0 : i32
    %c0_i32_2 = arith.constant 0 : i32
    return %c0_i32, %c0_i32_0, %c0_i32_1 : i32, i32, i32
  }
  func.func @transform_10(%arg0: i32) -> (i32, i32) {
    %c0_i32 = arith.constant 0 : i32
    %c0_i32_0 = arith.constant 0 : i32
    return %arg0, %c0_i32 : i32, i32
  }
}

</mosaic_0001>

<bundles_post_ra>
// kernel: cnn_feature_extractor.1
= control target key start
LH: loop header
LB: loop body
LE: loop exit
PB: predicated region body
PF: predicated region fallthrough
CT: control target
= control target key end

     0   :  { %s13958_s0 = inlined_call_operand.vmem [shape: u8[2,8,96,192], index: 0, kind: input, shape index: {}]   ;;  %s13959_s1 = inlined_call_operand.vmem [shape: bf16[8,192,176], index: 1, kind: input, shape index: {}]   ;;  %s13960_s2 = inlined_call_operand.vmem [shape: f32[1,176], index: 2, kind: input, shape index: {}]   ;;  %s13961_s3 = inlined_call_operand.vmem [shape: bf16[4,176,128], index: 3, kind: input, shape index: {}]   ;;  %s13962_s4 = inlined_call_operand.vmem [shape: f32[1,128], index: 4, kind: input, shape index: {}]   ;;  %s13963_s5 = inlined_call_operand.vmem [shape: bf16[3,128,128], index: 5, kind: input, shape index: {}]   ;;  %s13964_s6 = inlined_call_operand.vmem [shape: f32[1,128], index: 6, kind: input, shape index: {}]   ;;  %s13965_s7 = inlined_call_operand.vmem [shape: bf16[256,256], index: 7, kind: input, shape index: {}]   ;;  %s13966_s8 = inlined_call_operand.vmem [shape: f32[1,256], index: 8, kind: input, shape index: {}]   ;;  %s13967_s9 = inlined_call_operand.vmem [shape: bf16[2,16,96], index: 9, kind: input, shape index: {}]   ;;  %s13968_s10 = inlined_call_operand.hbm [shape: f32[32,256], index: 10, kind: output, shape index: {}]  }
   0x1   :  { %14183 = sst [smem:[#allocation209_spill]] %s13958_s0 }
   0x2   :  { %15 = vsyncpa [#allocation3], 0 }
   0x3   :  { %17 = vsyncpa [#allocation3 + $0x1], 0  ;;  %s9205_s13 = smov 0   ;;  %s9207_s14 = smov 0  }
   0x4   :  { %s9209_s15 = smov 0   ;;  %s9211_s16 = smov 0  }
   0x5 LB: > { %s9226_s17 = sadd.s32 4294967295, %s9146_s16   ;;  %s7028_s18 = sadd.s32 4294967294, %s9146_s16   ;;  %s9146_s16 = sphi %s9211_s16, %s14776_s16   ;;  %s9142_s15 = sphi %s9209_s15, %s14775_s15   ;;  %s9138_s14 = sphi %s9207_s14, %s14774_s14   ;;  %s9134_s13 = sphi %s9205_s13, %s14773_s13  }
   0x6   : > { %s9230_s19 = sadd.s32 1, %s9146_s16   ;;  %s245_s20 = sadd.s32 1, %s9142_s15 }
   0x7   : > { %s242_s21 = ssub.s32 %s9146_s16, %s9230_s19  ;;  %p255_p0 = scmp.ne.s32.totalorder %s9142_s15, %s9138_s14 }
   0x8   : > { %p243_p1 = scmp.eq.s32.totalorder %s242_s21, 0  ;;  %p256_p2 = scmp.eq.s32.totalorder %s9226_s17, 1 }
   0x9   : > { %p261_p3 = scmp.ne.s32.totalorder %s9138_s14, %s9134_s13  ;;  %p262_p4 = scmp.eq.s32.totalorder %s7028_s18, 1 }
   0xa   : > { %s9241_s22 = scalar_select %p243_p1, %s9142_s15, %s245_s20  }
   0xb   : > { %p9243_p5 = por %p256_p2, %p255_p0  ;;  %p9247_p6 = por %p262_p4, %p261_p3 }
   0xc   : > { %14184 = sst [smem:[#allocation5_spill]] %s9241_s22  ;;  %p7031_p7 = scmp.ge.s32.totalorder %s9146_s16, 1 }
   0xd   : > { %p315_p8 = scmp.lt.s32.totalorder %s9146_s16, 3 }
   0xf   : > { %p316_p9 = pnand %p7031_p7, %p315_p8 }
  0x11   : > { %319 = sbr.rel (%p316_p9) target bundleno = 2495 (0x9bf), region = 60 }
  0x16   : > { %v7146_v0 = vld [vmem:[%s13959_s1 + $0x130] sm:$0xf]  ;;  %v8807_v1 = vld [vmem:[%s13959_s1 + $0x134] sm:$0xf0]  ;;  %v8806_v5 = vld [vmem:[%s13959_s1 + $0x134] sm:$0xf] }
  0x17   : > { %v7178_v2 = vld [vmem:[%s13959_s1 + $0x170] sm:$0xf]  ;;  %v9262_v3 = vor.u32 %v8807_v1, %v7146_v0  ;;  %v8815_v4 = vld [vmem:[%s13959_s1 + $0x174] sm:$0xf0]  ;;  %v7148_v6 = vld [vmem:[%s13959_s1 + $0x138] sm:$0xf0] }
  0x18   : > { %v9273_v7 = vor.u32 %v8815_v4, %v7178_v2  ;;  %v9275_v8 = vor.u32 %v8806_v5, %v7148_v6  ;;  %v8814_v9 = vld [vmem:[%s13959_s1 + $0x174] sm:$0xf]  ;;  %v7180_v10 = vld [vmem:[%s13959_s1 + $0x178] sm:$0xf0]  ;;  %v7138_v11 = vld [vmem:[%s13959_s1 + $0x120] sm:$0xf] }
  0x19   : > { %14187 = vst [vmem:[#allocation6_spill] sm:$0xff] %v9262_v3  ;;  %754 = vmatpush.bf16.msra.mxu0 %v9262_v3  ;;  %v9287_v12 = vor.u32 %v8814_v9, %v7180_v10  ;;  %v8805_v13 = vld [vmem:[%s13959_s1 + $0x124] sm:$0xf0]  ;;  %v7170_v14 = vld [vmem:[%s13959_s1 + $0x160] sm:$0xf]  ;;  %p353_p10 = scmp.lt.s32.totalorder %s9226_s17, 1 }
  0x1a   : > { %14188 = vst [vmem:[#allocation7_spill] sm:$0xff] %v9273_v7  ;;  %v8813_v15 = vld [vmem:[%s13959_s1 + $0x164] sm:$0xf0]  ;;  %797 = vmatpush.bf16.msra.mxu1 %v9273_v7  ;;  %832 = vmatpush.bf16.msra.mxu2 %v9275_v8  ;;  %v9300_v16 = vor.u32 %v8805_v13, %v7138_v11  ;;  %v8804_v18 = vld [vmem:[%s13959_s1 + $0x124] sm:$0xf]  ;;  %s14204_s0 = sld [smem:[#allocation209_spill]] }
  0x1b   : > { %14189 = vst [vmem:[#allocation8_spill] sm:$0xff] %v9275_v8  ;;  %v9302_v17 = vor.u32 %v8813_v15, %v7170_v14  ;;  %v7140_v19 = vld [vmem:[%s13959_s1 + $0x128] sm:$0xf0]  ;;  %v8812_v20 = vld [vmem:[%s13959_s1 + $0x164] sm:$0xf]  ;;  %875 = vmatpush.bf16.msra.mxu3 %v9287_v12  ;;  %s354_s20 = scalar_select %p353_p10, %s9226_s17, 1 }
  0x1c   : > { %14190 = vst [vmem:[#allocation9_spill] sm:$0xff] %v9287_v12  ;;  %v9314_v21 = vor.u32 %v8804_v18, %v7140_v19  ;;  %v7172_v22 = vld [vmem:[%s13959_s1 + $0x168] sm:$0xf0]  ;;  %v7130_v23 = vld [vmem:[%s13959_s1 + $0x110] sm:$0xf]  ;;  %vm735_vm0 = vcmask 523264  }
  0x1d   : > { %14191 = vst [vmem:[#allocation10_spill] sm:$0xff] %v9300_v16  ;;  %v8803_v24 = vld [vmem:[%s13959_s1 + $0x114] sm:$0xf0]  ;;  %v9325_v25 = vor.u32 %v8812_v20, %v7172_v22  ;;  %v7162_v26 = vld [vmem:[%s13959_s1 + $0x150] sm:$0xf]  ;;  %755 = vmatpush.bf16.msra.mxu0 %v9300_v16  ;;  %s9040_s12 = smul.u32 384, %s354_s20 }
  0x1e   : > { %14192 = vst [vmem:[#allocation11_spill] sm:$0xff] %v9302_v17  ;;  %v8811_v27 = vld [vmem:[%s13959_s1 + $0x154] sm:$0xf0]  ;;  %v8802_v28 = vld [vmem:[%s13959_s1 + $0x114] sm:$0xf]  ;;  %v9337_v29 = vor.u32 %v8803_v24, %v7130_v23  ;;  %798 = vmatpush.bf16.msra.mxu1 %v9302_v17  ;;  %833 = vmatpush.bf16.msra.mxu2 %v9314_v21  ;;  %vm5217_vm1 = vcmask 1046528  }
  0x1f   : > { %14193 = vst [vmem:[#allocation12_spill] sm:$0xff] %v9314_v21  ;;  %v7132_v30 = vld [vmem:[%s13959_s1 + $0x118] sm:$0xf0]  ;;  %v8810_v31 = vld [vmem:[%s13959_s1 + $0x154] sm:$0xf]  ;;  %v9350_v33 = vor.u32 %v8811_v27, %v7162_v26  ;;  %876 = vmatpush.bf16.msra.mxu3 %v9325_v25  ;;  %vm5487_vm2 = vcmask 392192  }
  0x20   : > { %14194 = vst [vmem:[#allocation13_spill] sm:$0xff] %v9325_v25  ;;  %v7164_v32 = vld [vmem:[%s13959_s1 + $0x158] sm:$0xf0]  ;;  %v9352_v34 = vor.u32 %v8802_v28, %v7132_v30  ;;  %v7122_v35 = vld [vmem:[%s13959_s1 + $0x100] sm:$0xf]  ;;  %s9415_s25 = scalar_lea.vmem %s14204_s0, %s9040_s12  ;;  %vm6547_vm3 = vcmask 1045504  }
  0x21   : > { %14195 = vst [vmem:[#allocation14_spill] sm:$0xff] %v9337_v29  ;;  %v8801_v36 = vld [vmem:[%s13959_s1 + $0x104] sm:$0xf0]  ;;  %v7154_v37 = vld [vmem:[%s13959_s1 + $0x140] sm:$0xf]  ;;  %v9364_v38 = vor.u32 %v8810_v31, %v7164_v32  ;;  %756 = vmatpush.bf16.msra.mxu0 %v9337_v29  ;;  %v7059_v57 = vld [vmem:[%s9415_s25 + $0x38] sm:$0xff] }
  0x22   : > { %14196 = vst [vmem:[#allocation15_spill] sm:$0xff] %v9350_v33  ;;  %v8809_v39 = vld [vmem:[%s13959_s1 + $0x144] sm:$0xf0]  ;;  %v8800_v40 = vld [vmem:[%s13959_s1 + $0x104] sm:$0xf]  ;;  %v9383_v44 = vor.u32 %v8801_v36, %v7122_v35  ;;  %799 = vmatpush.bf16.msra.mxu1 %v9350_v33  ;;  %834 = vmatpush.bf16.msra.mxu2 %v9352_v34  ;;  %v7058_v59 = vld [vmem:[%s9415_s25 + $0x30] sm:$0xff]  ;;  %v507_v60 = vunpack.c.0.s8 %v7059_v57  ;;  %v509_v61 = vunpack.c.1.s8 %v7059_v57  ;;  %v511_v30 = vunpack.c.2.s8 %v7059_v57 }
  0x23   : > { %14197 = vst [vmem:[#allocation16_spill] sm:$0xff] %v9352_v34  ;;  %v7124_v41 = vld [vmem:[%s13959_s1 + $0x108] sm:$0xf0]  ;;  %v8808_v42 = vld [vmem:[%s13959_s1 + $0x144] sm:$0xf]  ;;  %v9387_v45 = vor.u32 %v8809_v39, %v7154_v37  ;;  %877 = vmatpush.bf16.msra.mxu3 %v9364_v38  ;;  %v506_v62 = vunpack.c.0.s8 %v7058_v59  ;;  %v508_v63 = vunpack.c.1.s8 %v7058_v59  ;;  %v513_v31 = vunpack.c.3.s8 %v7059_v57  ;;  %s350_s20 = sand.u32 1, %s9138_s14  }
  0x24   : > { %14198 = vst [vmem:[#allocation17_spill] sm:$0xff] %v9364_v38  ;;  %v7156_v43 = vld [vmem:[%s13959_s1 + $0x148] sm:$0xf0]  ;;  %v9389_v46 = vor.u32 %v8800_v40, %v7124_v41  ;;  %v7114_v47 = vld [vmem:[%s13959_s1 + $0xf0] sm:$0xf]  ;;  %v531_v1 = vand.u32 255, %v507_v60 }
  0x25   : > { %14199 = vst [vmem:[#allocation18_spill] sm:$0xff] %v9383_v44  ;;  %v8799_v48 = vld [vmem:[%s13959_s1 + $0xf4] sm:$0xf0]  ;;  %v9399_v49 = vor.u32 %v8808_v42, %v7156_v43  ;;  %v8798_v50 = vld [vmem:[%s13959_s1 + $0xf4] sm:$0xf]  ;;  %757 = vmatpush.bf16.msra.mxu0 %v9383_v44  ;;  %v533_v2 = vand.u32 255, %v509_v61  ;;  %v510_v42 = vunpack.c.2.s8 %v7058_v59  ;;  %v512_v43 = vunpack.c.3.s8 %v7058_v59 }
  0x26   : > { %14200 = vst [vmem:[#allocation19_spill] sm:$0xff] %v9387_v45  ;;  %v7116_v51 = vld [vmem:[%s13959_s1 + $0xf8] sm:$0xf0]  ;;  %v9408_v52 = vor.u32 %v8799_v48, %v7114_v47  ;;  %800 = vmatpush.bf16.msra.mxu1 %v9387_v45  ;;  %835 = vmatpush.bf16.msra.mxu2 %v9389_v46  ;;  %v7106_v54 = vld [vmem:[%s13959_s1 + $0xe0] sm:$0xf]  ;;  %v555_v11 = vcvt.s32.f32 %v531_v1  ;;  %v530_v14 = vand.u32 255, %v506_v62 }
  0x27   : > { %14201 = vst [vmem:[#allocation20_spill] sm:$0xff] %v9389_v46  ;;  %v9417_v53 = vor.u32 %v8798_v50, %v7116_v51  ;;  %v8797_v55 = vld [vmem:[%s13959_s1 + $0xe4] sm:$0xf0]  ;;  %v8796_v56 = vld [vmem:[%s13959_s1 + $0xe4] sm:$0xf]  ;;  %878 = vmatpush.bf16.msra.mxu3 %v9399_v49  ;;  %v557_v13 = vcvt.s32.f32 %v533_v2  ;;  %v532_v15 = vand.u32 255, %v508_v63 }
  0x28   : > { %14202 = vst [vmem:[#allocation21_spill] sm:$0xff] %v9399_v49  ;;  %v7108_v58 = vld [vmem:[%s13959_s1 + $0xe8] sm:$0xf0]  ;;  %v9435_v0 = vor.u32 %v8797_v55, %v7106_v54  ;;  %v7098_v5 = vld [vmem:[%s13959_s1 + $0xd0] sm:$0xf]  ;;  %v554_v27 = vcvt.s32.f32 %v530_v14  ;;  %v535_v37 = vand.u32 255, %v511_v30 }
  0x29   : > { %14203 = vst [vmem:[#allocation22_spill] sm:$0xff] %v9408_v52  ;;  %758 = vmatpush.bf16.msra.mxu0 %v9408_v52  ;;  %v9438_v4 = vor.u32 %v8796_v56, %v7108_v58  ;;  %v8795_v6 = vld [vmem:[%s13959_s1 + $0xd4] sm:$0xf0]  ;;  %v8794_v9 = vld [vmem:[%s13959_s1 + $0xd4] sm:$0xf]  ;;  %v9455_v19 = vpack.c.bf16 %v557_v13, %v555_v11  ;;  %v556_v28 = vcvt.s32.f32 %v532_v15  ;;  %v537_v39 = vand.u32 255, %v513_v31 }
  0x2a   : > { %14205 = vst [vmem:[#allocation23_spill] sm:$0xff] %v9417_v53  ;;  %836 = vmatpush.bf16.msra.mxu2 %v9417_v53  ;;  %v7100_v10 = vld [vmem:[%s13959_s1 + $0xd8] sm:$0xf0]  ;;  %v9453_v18 = vor.u32 %v8795_v6, %v7098_v5  ;;  %v7090_v22 = vld [vmem:[%s13959_s1 + $0xc0] sm:$0xf]  ;;  %v559_v40 = vcvt.s32.f32 %v535_v37  ;;  %v534_v48 = vand.u32 255, %v510_v42 }
  0x2b   : > { %14206 = vst [vmem:[#allocation24_spill] sm:$0xff] %v9435_v0  ;;  %v9458_v20 = vor.u32 %v8794_v9, %v7100_v10  ;;  %v8793_v23 = vld [vmem:[%s13959_s1 + $0xc4] sm:$0xf0]  ;;  %v8792_v24 = vld [vmem:[%s13959_s1 + $0xc4] sm:$0xf]  ;;  %7184 = vmatmul.msk.bf16.vlgmr.msra.gmra.mxu1 %vm735_vm0, %v9455_v19  ;;  %7190 = vmatmul.msk.bf16.vlgmr.msra.gmra.mxu3 %vm735_vm0, %v9455_v19  ;;  %v9482_v36 = vpack.c.bf16 %v556_v28, %v554_v27  ;;  %v561_v41 = vcvt.s32.f32 %v537_v39  ;;  %v536_v50 = vand.u32 255, %v512_v43 }
  0x2c   : > { %14207 = vst [vmem:[#allocation25_spill] sm:$0xff] %v9438_v4  ;;  %v7092_v26 = vld [vmem:[%s13959_s1 + $0xc8] sm:$0xf0]  ;;  %v9477_v32 = vor.u32 %v8793_v23, %v7090_v22  ;;  %v558_v54 = vcvt.s32.f32 %v534_v48  ;;  %v7060_v61 = vld [vmem:[%s9415_s25 + $0x40] sm:$0xff]  ;;  %v7254_v10 = vld [vmem:[%s13959_s1 + $0x70] sm:$0xf] }
  0x2d   : > { %759 = vmatpush.bf16.msra.mxu0 %v9435_v0  ;;  %14208 = vst [vmem:[#allocation26_spill] sm:$0xff] %v9453_v18  ;;  %v9480_v35 = vor.u32 %v8792_v24, %v7092_v26  ;;  %v9488_v47 = vpack.c.bf16 %v561_v41, %v559_v40  ;;  %v7061_v51 = vld [vmem:[%s9415_s25 + $0x48] sm:$0xff]  ;;  %v560_v55 = vcvt.s32.f32 %v536_v50  ;;  %v514_v1 = vunpack.c.0.s8 %v7060_v61  ;;  %v8759_v11 = vld [vmem:[%s13959_s1 + $0x74] sm:$0xf0]  ;;  %v7246_v24 = vld [vmem:[%s13959_s1 + $0x60] sm:$0xf] }
  0x2e   : > { %837 = vmatpush.bf16.msra.mxu2 %v9438_v4  ;;  %14209 = vst [vmem:[#allocation27_spill] sm:$0xff] %v9458_v20  ;;  %v515_v56 = vunpack.c.0.s8 %v7061_v51  ;;  %v517_v57 = vunpack.c.1.s8 %v7061_v51  ;;  %v516_v2 = vunpack.c.1.s8 %v7060_v61  ;;  %v9508_v13 = vor.u32 %v8759_v11, %v7254_v10  ;;  %v8757_v26 = vld [vmem:[%s13959_s1 + $0x64] sm:$0xf0]  ;;  %v7238_v28 = vld [vmem:[%s13959_s1 + $0x50] sm:$0xf]  ;;  %s7032_s28 = sshll.u32 %s350_s20, 5 }
  0x2f   : > { %14210 = vst [vmem:[#allocation28_spill] sm:$0xff] %v9477_v32  ;;  %v9495_v58 = vpack.c.bf16 %v560_v55, %v558_v54  ;;  %v538_v6 = vand.u32 255, %v514_v1  ;;  %v519_v22 = vunpack.c.2.s8 %v7061_v51  ;;  %v521_v23 = vunpack.c.3.s8 %v7061_v51  ;;  %v8755_v30 = vld [vmem:[%s13959_s1 + $0x54] sm:$0xf0]  ;;  %v7230_v41 = vld [vmem:[%s13959_s1 + $0x40] sm:$0xf] }
  0x30   : > { %14211 = vst [vmem:[#allocation29_spill] sm:$0xff] %v9480_v35  ;;  %v539_v59 = vand.u32 255, %v515_v56  ;;  %v541_v60 = vand.u32 255, %v517_v57  ;;  %v540_v9 = vand.u32 255, %v516_v2  ;;  %1048 = vmatpush.bf16.msrb.mxu1 %v9508_v13  ;;  %v9521_v27 = vor.u32 %v8757_v26, %v7246_v24  ;;  %v8753_v42 = vld [vmem:[%s13959_s1 + $0x44] sm:$0xf0] }
  0x31   : > { %760 = vmatpush.bf16.msra.mxu0 %v9453_v18  ;;  %14212 = vst [vmem:[#allocation30_spill] sm:$0xff] %v9508_v13  ;;  %v562_v14 = vcvt.s32.f32 %v538_v6  ;;  %v543_v37 = vand.u32 255, %v519_v22  ;;  %v545_v39 = vand.u32 255, %v521_v23  ;;  %v9532_v40 = vor.u32 %v8755_v30, %v7238_v28  ;;  %v8767_v6 = vld [vmem:[%s13959_s1 + $0xb4] sm:$0xf0]  ;;  %s352_s29 = scalar_lea.vmem [#allocation2], %s7032_s28 }
  0x32   : > { %838 = vmatpush.bf16.msra.mxu2 %v9458_v20  ;;  %v563_v62 = vcvt.s32.f32 %v539_v59  ;;  %v565_v63 = vcvt.s32.f32 %v541_v60  ;;  %v564_v15 = vcvt.s32.f32 %v540_v9  ;;  %14213 = vst [vmem:[#allocation31_spill] sm:$0xff] %v9521_v27  ;;  %v518_v43 = vunpack.c.2.s8 %v7060_v61  ;;  %v9548_v59 = vld [vmem:[%s9415_s25 + $0x58] sm:$0xff]  ;;  %v7222_v60 = vld [vmem:[%s13959_s1 + $0x30] sm:$0xf]  ;;  %v8758_v9 = vld [vmem:[%s13959_s1 + $0x74] sm:$0xf] }
  0x33   : > { %14214 = vst [vmem:[#allocation32_spill] sm:$0xff] %v9532_v40  ;;  %v520_v48 = vunpack.c.3.s8 %v7060_v61  ;;  %v567_v50 = vcvt.s32.f32 %v543_v37  ;;  %v569_v51 = vcvt.s32.f32 %v545_v39  ;;  %v9543_v54 = vor.u32 %v8753_v42, %v7230_v41  ;;  %v8751_v61 = vld [vmem:[%s13959_s1 + $0x34] sm:$0xf0]  ;;  %v7256_v10 = vld [vmem:[%s13959_s1 + $0x78] sm:$0xf0]  ;;  %v9853_v20 = vld [vmem:[%s9415_s25 + $0x28] sm:$0xff] }
  0x34   : > { %v9500_v5 = vpack.c.bf16 %v565_v63, %v563_v62  ;;  %v9529_v31 = vpack.c.bf16 %v564_v15, %v562_v14  ;;  %1049 = vmatpush.bf16.msrb.mxu1 %v9521_v27  ;;  %v542_v55 = vand.u32 255, %v518_v43  ;;  %v7286_v62 = vld [vmem:[%s13959_s1 + $0xb0] sm:$0xf]  ;;  %v9560_v2 = vor.u32 %v8751_v61, %v7222_v60  ;;  %v7214_v23 = vld [vmem:[%s13959_s1 + $0x20] sm:$0xf]  ;;  %s9039_s30 = sshll.u32 %s9226_s17, 5 }
  0x35   : > { %761 = vmatpush.bf16.msra.mxu0 %v9477_v32  ;;  %14215 = vst [vmem:[#allocation33_spill] sm:$0xff] %v9543_v54  ;;  %v544_v56 = vand.u32 255, %v520_v48  ;;  %v9545_v57 = vpack.c.bf16 %v569_v51, %v567_v50  ;;  %v523_v11 = vunpack.c.0.s8 %v9548_v59  ;;  %v525_v14 = vunpack.c.1.s8 %v9548_v59  ;;  %v8749_v24 = vld [vmem:[%s13959_s1 + $0x24] sm:$0xf0]  ;;  %v7278_v26 = vld [vmem:[%s13959_s1 + $0xa0] sm:$0xf]  ;;  %s6962_s0 = scalar_lea.hbm %s13968_s10, %s9039_s30 }
  0x36   : > { %839 = vmatpush.bf16.msra.mxu2 %v9480_v35  ;;  %v566_v63 = vcvt.s32.f32 %v542_v55  ;;  %14216 = vst [vmem:[#allocation34_spill] sm:$0xff] %v9560_v2  ;;  %v9577_v15 = vor.u32 %v8767_v6, %v7286_v62  ;;  %v9579_v22 = vor.u32 %v8758_v9, %v7256_v10  ;;  %v9591_v28 = vor.u32 %v8749_v24, %v7214_v23  ;;  %v8765_v30 = vld [vmem:[%s13959_s1 + $0xa4] sm:$0xf0]  ;;  %v8756_v37 = vld [vmem:[%s13959_s1 + $0x64] sm:$0xf]  ;;  %v9635_v10 = vld [vmem:[%s9415_s25 + $0x50] sm:$0xff] }
  0x37   : > { %v568_v1 = vcvt.s32.f32 %v544_v56  ;;  %v7248_v39 = vld [vmem:[%s13959_s1 + $0x68] sm:$0xf0]  ;;  %v9604_v41 = vor.u32 %v8765_v30, %v7278_v26  ;;  %v7206_v43 = vld [vmem:[%s13959_s1 + $0x10] sm:$0xf]  ;;  %v8747_v48 = vld [vmem:[%s13959_s1 + $0x14] sm:$0xf0] }
  0x38   : > { %762 = vmatmul.bf16.vlgmr.msra.gmra.mxu0 %v9482_v36  ;;  %1050 = vmatpush.bf16.msrb.mxu1 %v9532_v40  ;;  %14217 = vst [vmem:[#allocation35_spill] sm:$0xff] %v9577_v15  ;;  %v9606_v42 = vor.u32 %v8756_v37, %v7248_v39  ;;  %v7270_v50 = vld [vmem:[%s13959_s1 + $0x90] sm:$0xf]  ;;  %v8763_v51 = vld [vmem:[%s13959_s1 + $0x94] sm:$0xf0]  ;;  %v547_v61 = vand.u32 255, %v523_v11  ;;  %v9638_v23 = vor.u32 %v8747_v48, %v7206_v43 }
  0x39   : > { %840 = vmatmul.bf16.vlgmr.msra.gmra.mxu2 %v9482_v36  ;;  %14218 = vst [vmem:[#allocation36_spill] sm:$0xff] %v9579_v22  ;;  %1091 = vmatpush.bf16.msrb.mxu3 %v9577_v15  ;;  %v8754_v55 = vld [vmem:[%s13959_s1 + $0x54] sm:$0xf]  ;;  %v7240_v56 = vld [vmem:[%s13959_s1 + $0x58] sm:$0xf0]  ;;  %v9626_v60 = vpack.c.bf16 %v568_v1, %v566_v63  ;;  %v549_v62 = vand.u32 255, %v525_v14  ;;  %v9644_v63 = vor.u32 %v8763_v51, %v7270_v50  ;;  %v522_v50 = vunpack.c.0.s8 %v9635_v10 }
  0x3a   : > { %14219 = vst [vmem:[#allocation37_spill] sm:$0xff] %v9591_v28  ;;  %1126 = vmatpush.bf16.msrb.mxu0 %v9579_v22  ;;  %v8766_v6 = vld [vmem:[%s13959_s1 + $0xb4] sm:$0xf]  ;;  %v7288_v9 = vld [vmem:[%s13959_s1 + $0xb8] sm:$0xf0]  ;;  %v9646_v1 = vor.u32 %v8754_v55, %v7240_v56  ;;  %v571_v43 = vcvt.s32.f32 %v547_v61  ;;  %v524_v51 = vunpack.c.1.s8 %v9635_v10  ;;  %vm6638_vm4 = vcmask 785408  }
  0x3b   : > { %7185 = vmatmul.msk.bf16.gmra.mxu1 %vm735_vm0, %v9488_v47  ;;  %7191 = vmatmul.msk.bf16.gmra.mxu3 %vm735_vm0, %v9488_v47  ;;  %14220 = vst [vmem:[#allocation38_spill] sm:$0xff] %v9604_v41  ;;  %v9640_v24 = vor.u32 %v8766_v6, %v7288_v9  ;;  %v7198_v11 = vld [vmem:[%s13959_s1] sm:$0xf]  ;;  %v8745_v14 = vld [vmem:[%s13959_s1 + $0x4] sm:$0xf0]  ;;  %v573_v48 = vcvt.s32.f32 %v549_v62  ;;  %v546_v62 = vand.u32 255, %v522_v50 }
  0x3c   : > { %1051 = vmatpush.bf16.msrb.mxu1 %v9543_v54  ;;  %14221 = vst [vmem:[#allocation39_spill] sm:$0xff] %v9606_v42  ;;  %v7262_v26 = vld [vmem:[%s13959_s1 + $0x80] sm:$0xf]  ;;  %v8761_v30 = vld [vmem:[%s13959_s1 + $0x84] sm:$0xf0]  ;;  %v9672_v55 = vor.u32 %v8745_v14, %v7198_v11  ;;  %v548_v9 = vand.u32 255, %v524_v51 }
  0x3d   : > { %14222 = vst [vmem:[#allocation40_spill] sm:$0xff] %v9638_v23  ;;  %1092 = vmatpush.bf16.msrb.mxu3 %v9604_v41  ;;  %1169 = vmatpush.bf16.msrb.mxu2 %v9640_v24  ;;  %v8752_v37 = vld [vmem:[%s13959_s1 + $0x44] sm:$0xf]  ;;  %v7232_v39 = vld [vmem:[%s13959_s1 + $0x48] sm:$0xf0]  ;;  %v9676_v56 = vor.u32 %v8761_v30, %v7262_v26  ;;  %v9680_v61 = vpack.c.bf16 %v573_v48, %v571_v43  ;;  %v570_v30 = vcvt.s32.f32 %v546_v62  ;;  %v529_v43 = vunpack.c.3.s8 %v9548_v59  ;;  %s6963_s22 = sshll.u32 %s352_s29, 4  ;;  %s6964_s22 = int_to_ptr.vmem [resolvable:$true] %s6963_s22 }
  0x3e   : > { %14223 = vst [vmem:[#allocation41_spill] sm:$0xff] %v9640_v24  ;;  %1127 = vmatpush.bf16.msrb.mxu0 %v9606_v42  ;;  %v9678_v6 = vor.u32 %v8752_v37, %v7232_v39  ;;  %v8750_v11 = vld [vmem:[%s13959_s1 + $0x34] sm:$0xf]  ;;  %v7224_v14 = vld [vmem:[%s13959_s1 + $0x38] sm:$0xf0]  ;;  %v572_v37 = vcvt.s32.f32 %v548_v9  ;;  %v527_v39 = vunpack.c.2.s8 %v9548_v59  ;;  %s6965_s18 = sshll.u32 %s6962_s0, 4  ;;  %s6966_s18 = int_to_ptr.hbm [resolvable:$true] %s6965_s18 }
  0x3f   : > { %14224 = vst [vmem:[#allocation42_spill] sm:$0xff] %v9644_v63  ;;  %v9691_v26 = vor.u32 %v8750_v11, %v7224_v14  ;;  %v8748_v48 = vld [vmem:[%s13959_s1 + $0x24] sm:$0xf]  ;;  %v7216_v50 = vld [vmem:[%s13959_s1 + $0x28] sm:$0xf0]  ;;  %v363_v42 = vld [vmem:[%s9415_s25 + $0x18] sm:$0xff] }
  0x40   : > { %1052 = vmatpush.bf16.msrb.mxu1 %v9560_v2  ;;  %14225 = vst [vmem:[#allocation43_spill] sm:$0xff] %v9646_v1  ;;  %v8764_v51 = vld [vmem:[%s13959_s1 + $0xa4] sm:$0xf]  ;;  %v7280_v62 = vld [vmem:[%s13959_s1 + $0xa8] sm:$0xf0]  ;;  %v9712_v9 = vor.u32 %v8748_v48, %v7216_v50  ;;  %v9728_v48 = vpack.c.bf16 %v572_v37, %v570_v30  ;;  %v551_v50 = vand.u32 255, %v527_v39  ;;  %v526_v30 = vunpack.c.2.s8 %v9635_v10 }
  0x41   : > { %14226 = vst [vmem:[#allocation44_spill] sm:$0xff] %v9672_v55  ;;  %1093 = vmatpush.bf16.msrb.mxu3 %v9644_v63  ;;  %v9714_v59 = vor.u32 %v8764_v51, %v7280_v62  ;;  %v8762_v11 = vld [vmem:[%s13959_s1 + $0x94] sm:$0xf]  ;;  %v7272_v14 = vld [vmem:[%s13959_s1 + $0x98] sm:$0xf0]  ;;  %v553_v51 = vand.u32 255, %v529_v43  ;;  %v528_v37 = vunpack.c.3.s8 %v9635_v10 }
  0x42   : > { %1128 = vmatpush.bf16.msrb.mxu0 %v9646_v1  ;;  %14227 = vst [vmem:[#allocation45_spill] sm:$0xff] %v9676_v56  ;;  %v9731_v62 = vor.u32 %v8762_v11, %v7272_v14  ;;  %v8744_v39 = vld [vmem:[%s13959_s1 + $0x4] sm:$0xf]  ;;  %v7200_v43 = vld [vmem:[%s13959_s1 + $0x8] sm:$0xf0]  ;;  %v575_v11 = vcvt.s32.f32 %v551_v50  ;;  %s6950_s21 = scalar_lea.sflag [#allocation3], %s350_s20 }
  0x43   : > { %14228 = vst [vmem:[#allocation46_spill] sm:$0xff] %v9678_v6  ;;  %1170 = vmatpush.bf16.msrb.mxu2 %v9714_v59  ;;  %v577_v14 = vcvt.s32.f32 %v553_v51  ;;  %v9756_v10 = vor.u32 %v8744_v39, %v7200_v43  ;;  %v360_v2 = vld [vmem:[%s9415_s25] sm:$0xff]  ;;  %v7370_v22 = vld [vmem:[%s13959_s1 + $0x410] sm:$0xf]  ;;  %v8827_v40 = vld [vmem:[%s13959_s1 + $0x414] sm:$0xf0] }
  0x44   : > { %1053 = vmatpush.bf16.msrb.mxu1 %v9591_v28  ;;  %14229 = vst [vmem:[#allocation47_spill] sm:$0xff] %v9691_v26  ;;  %v7346_v53 = vld [vmem:[%s13959_s1 + $0x3e0] sm:$0xf]  ;;  %v8821_v18 = vld [vmem:[%s13959_s1 + $0x3e4] sm:$0xf0]  ;;  %s9098_s17 = sshra.s32 %s6966_s18, 4  ;;  %s9099_s17 = int_to_ptr.hbm [resolvable:$true] %s9098_s17 }
  0x45   : > { %1094 = vmatpush.bf16.msrb.mxu3 %v9676_v56  ;;  %14230 = vst [vmem:[#allocation48_spill] sm:$0xff] %v9712_v9  ;;  %v9758_v1 = vpack.c.bf16 %v577_v14, %v575_v11  ;;  %v7338_v25 = vld [vmem:[%s13959_s1 + $0x3d0] sm:$0xf]  ;;  %v8819_v45 = vld [vmem:[%s13959_s1 + $0x3d4] sm:$0xf0]  ;;  %s9104_s28 = scalar_lea.hbm %s13968_s10, 64  ;;  %p9105_p0 = scmp.lt.s32.totalorder %s9099_s17, %s13968_s10 }
  0x46   : > { %1129 = vmatpush.bf16.msrb.mxu0 %v9678_v6  ;;  %14231 = vst [vmem:[#allocation49_spill] sm:$0xff] %v9714_v59  ;;  %v7264_v6 = vld [vmem:[%s13959_s1 + $0x88] sm:$0xf0] }
  0x47   : > { %14232 = vst [vmem:[#allocation50_spill] sm:$0xff] %v9731_v62  ;;  %1171 = vmatpush.bf16.msrb.mxu2 %v9731_v62  ;;  %v361_v59 = vld [vmem:[%s9415_s25 + $0x8] sm:$0xff] }
  0x48   : > { %767 = vmatmul.bf16.gmra.mxu0 %v9495_v58  ;;  %1054 = vmatpush.bf16.msrb.mxu1 %v9638_v23  ;;  %v8760_v23 = vld [vmem:[%s13959_s1 + $0x84] sm:$0xf]  ;;  %14235 = vst [vmem:[#allocation53_spill] sm:$0xff] %v9756_v10 }
  0x49   : > { %845 = vmatmul.bf16.gmra.mxu2 %v9495_v58 }
  0x4a   : > { %1130 = vmatpush.bf16.msrb.mxu0 %v9691_v26  ;;  %v7208_v26 = vld [vmem:[%s13959_s1 + $0x18] sm:$0xf0] }
  0x4b   : > { %7186 = vmatmul.msk.bf16.gmra.mxu1 %vm735_vm0, %v9500_v5  ;;  %7192 = vmatmul.msk.bf16.gmra.mxu3 %vm735_vm0, %v9500_v5 }
  0x4c   : > { %1055 = vmatpush.bf16.msrb.mxu1 %v9672_v55  ;;  %v8746_v55 = vld [vmem:[%s13959_s1 + $0x14] sm:$0xf] }
  0x4d   : > { %v9740_v28 = vor.u32 %v8746_v55, %v7208_v26  ;;  %v9752_v55 = vor.u32 %v8760_v23, %v7264_v6  ;;  %v550_v26 = vand.u32 255, %v526_v30  ;;  %v366_v23 = vunpack.c.0.s8 %v360_v2 }
  0x4e   : > { %1131 = vmatpush.bf16.msrb.mxu0 %v9712_v9  ;;  %v552_v9 = vand.u32 255, %v528_v37  ;;  %v368_v6 = vunpack.c.1.s8 %v360_v2  ;;  %v367_v30 = vunpack.c.0.s8 %v361_v59  ;;  %v369_v37 = vunpack.c.1.s8 %v361_v59 }
  0x4f   : > { %14233 = vst [vmem:[#allocation51_spill] sm:$0xff] %v9740_v28  ;;  %1172 = vmatpush.bf16.msrb.mxu2 %v9752_v55  ;;  %v574_v50 = vcvt.s32.f32 %v550_v26  ;;  %v390_v43 = vand.u32 255, %v366_v23  ;;  %v371_v23 = vunpack.c.2.s8 %v361_v59 }
  0x50   : > { %14234 = vst [vmem:[#allocation52_spill] sm:$0xff] %v9752_v55  ;;  %v576_v51 = vcvt.s32.f32 %v552_v9  ;;  %v392_v11 = vand.u32 255, %v368_v6  ;;  %v391_v14 = vand.u32 255, %v367_v30  ;;  %v373_v6 = vunpack.c.3.s8 %v361_v59 }
  0x51   : > { %v414_v26 = vcvt.s32.f32 %v390_v43 }
  0x52   : > { %1132 = vmatpush.bf16.msrb.mxu0 %v9740_v28  ;;  %v9768_v39 = vpack.c.bf16 %v576_v51, %v574_v50  ;;  %v393_v28 = vand.u32 255, %v369_v37  ;;  %v416_v9 = vcvt.s32.f32 %v392_v11  ;;  %v370_v50 = vunpack.c.2.s8 %v360_v2 }
  0x53   : > { %v372_v51 = vunpack.c.3.s8 %v360_v2  ;;  %v397_v43 = vand.u32 255, %v373_v6  ;;  %v362_v2 = vld [vmem:[%s9415_s25 + $0x10] sm:$0xff] }
  0x54   : > { %v417_v55 = vcvt.s32.f32 %v393_v28  ;;  %v9772_v62 = vpack.c.bf16 %v416_v9, %v414_v26  ;;  %v394_v30 = vand.u32 255, %v370_v50  ;;  %v395_v28 = vand.u32 255, %v371_v23 }
  0x55   : > { %v396_v37 = vand.u32 255, %v372_v51  ;;  %v374_v59 = vunpack.c.0.s8 %v362_v2  ;;  %v376_v50 = vunpack.c.1.s8 %v362_v2  ;;  %v375_v51 = vunpack.c.0.s8 %v363_v42 }
  0x56   : > { %1133 = vmatpush.bf16.msrb.mxu0 %v9756_v10  ;;  %v415_v10 = vcvt.s32.f32 %v391_v14  ;;  %v418_v11 = vcvt.s32.f32 %v394_v30  ;;  %v419_v26 = vcvt.s32.f32 %v395_v28  ;;  %v377_v23 = vunpack.c.1.s8 %v363_v42 }
  0x57   : > { %v420_v14 = vcvt.s32.f32 %v396_v37  ;;  %v398_v6 = vand.u32 255, %v374_v59  ;;  %v400_v30 = vand.u32 255, %v376_v50  ;;  %v399_v37 = vand.u32 255, %v375_v51  ;;  %v7386_v59 = vld [vmem:[%s13959_s1 + $0x430] sm:$0xf] }
  0x58   : > { %772 = vmatmul.bf16.gmra.mxu0 %v9529_v31  ;;  %v9774_v56 = vpack.c.bf16 %v417_v55, %v415_v10  ;;  %v421_v55 = vcvt.s32.f32 %v397_v43  ;;  %v401_v28 = vand.u32 255, %v377_v23  ;;  %v8831_v50 = vld [vmem:[%s13959_s1 + $0x434] sm:$0xf0]  ;;  %v378_v23 = vunpack.c.2.s8 %v362_v2 }
  0x59   : > { %850 = vmatmul.bf16.gmra.mxu2 %v9529_v31  ;;  %v9782_v10 = vpack.c.bf16 %v420_v14, %v418_v11  ;;  %v422_v43 = vcvt.s32.f32 %v398_v6  ;;  %v424_v11 = vcvt.s32.f32 %v400_v30  ;;  %v423_v14 = vcvt.s32.f32 %v399_v37 }
  0x5a   : > { %v9784_v9 = vpack.c.bf16 %v421_v55, %v419_v26  ;;  %v425_v26 = vcvt.s32.f32 %v401_v28  ;;  %v9804_v51 = vor.u32 %v8831_v50, %v7386_v59  ;;  %v380_v6 = vunpack.c.3.s8 %v362_v2  ;;  %v7378_v28 = vld [vmem:[%s13959_s1 + $0x420] sm:$0xf] }
  0x5b   : > { %7187 = vmatmul.msk.bf16.gmra.mxu1 %vm735_vm0, %v9545_v57  ;;  %7193 = vmatmul.msk.bf16.gmra.mxu3 %vm735_vm0, %v9545_v57  ;;  %v9794_v55 = vpack.c.bf16 %v424_v11, %v422_v43  ;;  %v379_v30 = vunpack.c.2.s8 %v363_v42  ;;  %v381_v37 = vunpack.c.3.s8 %v363_v42  ;;  %v8829_v43 = vld [vmem:[%s13959_s1 + $0x424] sm:$0xf0] }
  0x5c   : > { %v9796_v54 = vpack.c.bf16 %v425_v26, %v423_v14  ;;  %14236 = vst [vmem:[#allocation54_spill] sm:$0xff] %v9804_v51  ;;  %1349 = vmatpush.bf16.msra.mxu1 %v9804_v51  ;;  %v9816_v14 = vor.u32 %v8829_v43, %v7378_v28  ;;  %v402_v26 = vand.u32 255, %v378_v23  ;;  %v404_v59 = vand.u32 255, %v380_v6  ;;  %v9834_v43 = vld [vmem:[%s9415_s25 + $0x20] sm:$0xff] }
  0x5d   : > { %v403_v50 = vand.u32 255, %v379_v30  ;;  %v405_v2 = vand.u32 255, %v381_v37  ;;  %v9827_v28 = vor.u32 %v8827_v40, %v7370_v22  ;;  %v8825_v40 = vld [vmem:[%s13959_s1 + $0x404] sm:$0xf0]  ;;  %v382_v13 = vunpack.c.0.s8 %v9834_v43 }
  0x5e   : > { %14237 = vst [vmem:[#allocation55_spill] sm:$0xff] %v9816_v14  ;;  %v426_v23 = vcvt.s32.f32 %v402_v26  ;;  %v428_v6 = vcvt.s32.f32 %v404_v59  ;;  %v384_v35 = vunpack.c.1.s8 %v9834_v43 }
  0x5f   : > { %14238 = vst [vmem:[#allocation56_spill] sm:$0xff] %v9827_v28  ;;  %v427_v30 = vcvt.s32.f32 %v403_v50  ;;  %v429_v37 = vcvt.s32.f32 %v405_v2 }
  0x60   : > { %1350 = vmatpush.bf16.msra.mxu1 %v9816_v14  ;;  %v9844_v59 = vpack.c.bf16 %v428_v6, %v426_v23  ;;  %v7354_v23 = vld [vmem:[%s13959_s1 + $0x3f0] sm:$0xf]  ;;  %v408_v32 = vand.u32 255, %v384_v35  ;;  %v9899_v35 = vor.u32 %v8821_v18, %v7346_v53 }
  0x61   : > { %v9846_v50 = vpack.c.bf16 %v429_v37, %v427_v30  ;;  %v7418_v6 = vld [vmem:[%s13959_s1 + $0x470] sm:$0xf]  ;;  %v8839_v37 = vld [vmem:[%s13959_s1 + $0x474] sm:$0xf0] }
  0x62   : > { %14243 = vst [vmem:[#allocation61_spill] sm:$0xff] %v9899_v35 }
  0x64   : > { %1351 = vmatpush.bf16.msra.mxu1 %v9827_v28 }
  0x68   : > { %777 = vmatmul.bf16.gmra.mxu0 %v9626_v60 }
  0x69   : > { %855 = vmatmul.bf16.gmra.mxu2 %v9626_v60 }
  0x6b   : > { %7188 = vmatmul.msk.bf16.gmra.mxu1 %vm735_vm0, %v9680_v61  ;;  %7194 = vmatmul.msk.bf16.gmra.mxu3 %vm735_vm0, %v9680_v61 }
  0x78   : > { %782 = vmatmul.bf16.gmra.mxu0 %v9728_v48 }
  0x79   : > { %860 = vmatmul.bf16.gmra.mxu2 %v9728_v48 }
  0x7b   : > { %7189 = vmatmul.msk.bf16.gmra.mxu1 %vm735_vm0, %v9758_v1  ;;  %7195 = vmatmul.msk.bf16.gmra.mxu3 %vm735_vm0, %v9758_v1 }
  0x88   : > { %787 = vmatmul.bf16.gmra.mxu0 %v9768_v39 }
  0x89   : > { %865 = vmatmul.bf16.gmra.mxu2 %v9768_v39 }
  0x8b   : > { %1056 = vmatmul.bf16.vlgmr.msrb.gmra.mxu1 %v9772_v62  ;;  %7292 = vmatmul.msk.bf16.vlgmr.msrb.gmra.mxu3 %vm735_vm0, %v9774_v56 }
  0x98   : > { %1134 = vmatmul.bf16.vlgmr.msrb.gmra.mxu0 %v9772_v62 }
  0x99   : > { %7298 = vmatmul.msk.bf16.vlgmr.msrb.gmra.mxu2 %vm735_vm0, %v9774_v56 }
  0x9b   : > { %1061 = vmatmul.bf16.gmra.mxu1 %v9782_v10  ;;  %7293 = vmatmul.msk.bf16.gmra.mxu3 %vm735_vm0, %v9784_v9 }
  0xa8   : > { %1139 = vmatmul.bf16.gmra.mxu0 %v9782_v10  ;;  %v802_v24 = vpop.f32.mrf.mxu1 }
  0xa9   : > { %7299 = vmatmul.msk.bf16.gmra.mxu2 %vm735_vm0, %v9784_v9 }
  0xab   : > { %1066 = vmatmul.bf16.gmra.mxu1 %v9794_v55  ;;  %7294 = vmatmul.msk.bf16.gmra.mxu3 %vm735_vm0, %v9796_v54 }
  0xae   : > { %v880_v11 = vpop.f32.mrf.mxu3 }
  0xb0   : > { %v804_v63 = vpop.f32.mrf.mxu1 }
  0xb5   : > { %v763_v42 = vpop.f32.mrf.mxu0 }
  0xb6   : > { %v9825_v41 = vadd.f32 %v802_v24, %v763_v42  ;;  %v7362_v24 = vld [vmem:[%s13959_s1 + $0x400] sm:$0xf]  ;;  %v882_v22 = vpop.f32.mrf.mxu3 }
  0xb7   : > { %v9842_v26 = vor.u32 %v8825_v40, %v7362_v24  ;;  %v383_v24 = vunpack.c.0.s8 %v9853_v20  ;;  %v385_v40 = vunpack.c.1.s8 %v9853_v20 }
  0xb8   : > { %1144 = vmatmul.bf16.gmra.mxu0 %v9794_v55  ;;  %v807_v42 = vpop.f32.mrf.mxu1 }
  0xb9   : > { %7300 = vmatmul.msk.bf16.gmra.mxu2 %vm735_vm0, %v9796_v54  ;;  %14239 = vst [vmem:[#allocation57_spill] sm:$0xff] %v9842_v26  ;;  %1352 = vmatpush.bf16.msra.mxu1 %v9842_v26  ;;  %v407_v46 = vand.u32 255, %v383_v24  ;;  %v409_v0 = vand.u32 255, %v385_v40  ;;  %v7402_v24 = vld [vmem:[%s13959_s1 + $0x450] sm:$0xf] }
  0xbb   : > { %1071 = vmatmul.bf16.gmra.mxu1 %v9844_v59  ;;  %7295 = vmatmul.msk.bf16.gmra.mxu3 %vm735_vm0, %v9846_v50  ;;  %v431_v21 = vcvt.s32.f32 %v407_v46  ;;  %v433_v44 = vcvt.s32.f32 %v409_v0  ;;  %v8817_v46 = vld [vmem:[%s13959_s1 + $0x3c4] sm:$0xf0]  ;;  %v7394_v0 = vld [vmem:[%s13959_s1 + $0x440] sm:$0xf] }
  0xbc   : > { %v841_v2 = vpop.f32.mrf.mxu2 }
  0xbd   : > { %v9848_v27 = vadd.f32 %v880_v11, %v841_v2  ;;  %v765_v15 = vpop.f32.mrf.mxu0  ;;  %v8823_v11 = vld [vmem:[%s13959_s1 + $0x3f4] sm:$0xf0]  ;;  %v9883_v2 = vor.u32 %v8839_v37, %v7418_v6  ;;  %v7410_v6 = vld [vmem:[%s13959_s1 + $0x460] sm:$0xf]  ;;  %v8837_v37 = vld [vmem:[%s13959_s1 + $0x464] sm:$0xf0] }
  0xbe   : > { %v9856_v4 = vadd.f32 %v804_v63, %v765_v15  ;;  %v9867_v30 = vor.u32 %v8823_v11, %v7354_v23  ;;  %v8830_v15 = vld [vmem:[%s13959_s1 + $0x434] sm:$0xf]  ;;  %v7388_v63 = vld [vmem:[%s13959_s1 + $0x438] sm:$0xf0]  ;;  %v406_v11 = vand.u32 255, %v382_v13  ;;  %v885_v13 = vpop.f32.mrf.mxu3  ;;  %v9910_v38 = vor.u32 %v8837_v37, %v7410_v6 }
  0xbf   : > { %14241 = vst [vmem:[#allocation59_spill] sm:$0xff] %v9883_v2  ;;  %v9885_v23 = vor.u32 %v8830_v15, %v7388_v63  ;;  %1392 = vmatpush.bf16.msra.mxu3 %v9883_v2  ;;  %v8828_v15 = vld [vmem:[%s13959_s1 + $0x424] sm:$0xf]  ;;  %v7380_v63 = vld [vmem:[%s13959_s1 + $0x428] sm:$0xf0] }
  0xc0   : > { %14240 = vst [vmem:[#allocation58_spill] sm:$0xff] %v9867_v30  ;;  %1353 = vmatpush.bf16.msra.mxu1 %v9867_v30  ;;  %v9912_v34 = vor.u32 %v8828_v15, %v7380_v63  ;;  %v809_v53 = vpop.f32.mrf.mxu1  ;;  %v8826_v6 = vld [vmem:[%s13959_s1 + $0x414] sm:$0xf]  ;;  %v7372_v37 = vld [vmem:[%s13959_s1 + $0x418] sm:$0xf0]  ;;  %v432_v63 = vcvt.s32.f32 %v408_v32 }
  0xc1   : > { %14242 = vst [vmem:[#allocation60_spill] sm:$0xff] %v9885_v23  ;;  %1427 = vmatpush.bf16.msra.mxu0 %v9885_v23  ;;  %v9943_v15 = vor.u32 %v8826_v6, %v7372_v37  ;;  %v8824_v6 = vld [vmem:[%s13959_s1 + $0x404] sm:$0xf]  ;;  %v7364_v37 = vld [vmem:[%s13959_s1 + $0x408] sm:$0xf0] }
  0xc2   : > { %14244 = vst [vmem:[#allocation62_spill] sm:$0xff] %v9910_v38  ;;  %v7478_v23 = vld [vmem:[%s13959_s1 + $0x350] sm:$0xf] }
  0xc3   : > { %14245 = vst [vmem:[#allocation63_spill] sm:$0xff] %v9912_v34  ;;  %1393 = vmatpush.bf16.msra.mxu3 %v9910_v38 }
  0xc4   : > { %v843_v49 = vpop.f32.mrf.mxu2  ;;  %1354 = vmatpush.bf16.msra.mxu1 %v9899_v35  ;;  %14248 = vst [vmem:[#allocation66_spill] sm:$0xff] %v9943_v15 }
  0xc5   : > { %v9914_v18 = vadd.f32 %v882_v22, %v843_v49  ;;  %v768_v52 = vpop.f32.mrf.mxu0  ;;  %1428 = vmatpush.bf16.msra.mxu0 %v9912_v34  ;;  %v9930_v49 = vor.u32 %v8819_v45, %v7338_v25  ;;  %v8835_v22 = vld [vmem:[%s13959_s1 + $0x454] sm:$0xf0]  ;;  %v8838_v25 = vld [vmem:[%s13959_s1 + $0x474] sm:$0xf]  ;;  %v7420_v45 = vld [vmem:[%s13959_s1 + $0x478] sm:$0xf0] }
  0xc6   : > { %v9926_v40 = vadd.f32 %v807_v42, %v768_v52  ;;  %v430_v52 = vcvt.s32.f32 %v406_v11  ;;  %v9941_v42 = vor.u32 %v8835_v22, %v7402_v24  ;;  %v9952_v12 = vor.u32 %v8838_v25, %v7420_v45  ;;  %v7330_v11 = vld [vmem:[%s13959_s1 + $0x3c0] sm:$0xf]  ;;  %v887_v32 = vpop.f32.mrf.mxu3  ;;  %v8833_v22 = vld [vmem:[%s13959_s1 + $0x444] sm:$0xf0] }
  0xc7   : > { %14246 = vst [vmem:[#allocation64_spill] sm:$0xff] %v9930_v49  ;;  %v9969_v24 = vor.u32 %v8817_v46, %v7330_v11  ;;  %v9982_v45 = vpack.c.bf16 %v433_v44, %v431_v21  ;;  %v9984_v8 = vor.u32 %v8833_v22, %v7394_v0  ;;  %v9986_v11 = vor.u32 %v8824_v6, %v7364_v37  ;;  %v8822_v21 = vld [vmem:[%s13959_s1 + $0x3f4] sm:$0xf]  ;;  %v7356_v44 = vld [vmem:[%s13959_s1 + $0x3f8] sm:$0xf0] }
  0xc8   : > { %14247 = vst [vmem:[#allocation65_spill] sm:$0xff] %v9941_v42  ;;  %1149 = vmatmul.bf16.gmra.mxu0 %v9844_v59  ;;  %1355 = vmatpush.bf16.msra.mxu1 %v9930_v49  ;;  %v9980_v25 = vpack.c.bf16 %v432_v63, %v430_v52  ;;  %v812_v46 = vpop.f32.mrf.mxu1  ;;  %v389_v52 = vunpack.c.3.s8 %v9853_v20  ;;  %v8820_v63 = vld [vmem:[%s13959_s1 + $0x3e4] sm:$0xf]  ;;  %v7348_v0 = vld [vmem:[%s13959_s1 + $0x3e8] sm:$0xf0] }
  0xc9   : > { %14249 = vst [vmem:[#allocation67_spill] sm:$0xff] %v9952_v12  ;;  %7301 = vmatmul.msk.bf16.gmra.mxu2 %vm735_vm0, %v9846_v50  ;;  %1394 = vmatpush.bf16.msra.mxu3 %v9941_v42  ;;  %v8836_v22 = vld [vmem:[%s13959_s1 + $0x464] sm:$0xf]  ;;  %v10020_v37 = vor.u32 %v8820_v63, %v7348_v0  ;;  %v7340_v63 = vld [vmem:[%s13959_s1 + $0x3d8] sm:$0xf0] }
  0xca   : > { %1429 = vmatpush.bf16.msra.mxu0 %v9943_v15  ;;  %1470 = vmatpush.bf16.msra.mxu2 %v9952_v12  ;;  %14250 = vst [vmem:[#allocation68_spill] sm:$0xff] %v9969_v24  ;;  %v413_v3 = vand.u32 255, %v389_v52  ;;  %v7404_v52 = vld [vmem:[%s13959_s1 + $0x458] sm:$0xf0] }
  0xcb   : > { %14251 = vst [vmem:[#allocation69_spill] sm:$0xff] %v9984_v8  ;;  %1076 = vmatmul.bf16.gmra.mxu1 %v9980_v25  ;;  %7296 = vmatmul.msk.bf16.gmra.mxu3 %vm735_vm0, %v9982_v45 }
  0xcc   : > { %v846_v33 = vpop.f32.mrf.mxu2  ;;  %14252 = vst [vmem:[#allocation70_spill] sm:$0xff] %v9986_v11  ;;  %1356 = vmatpush.bf16.msra.mxu1 %v9969_v24  ;;  %v437_v15 = vcvt.s32.f32 %v413_v3  ;;  %v8832_v3 = vld [vmem:[%s13959_s1 + $0x444] sm:$0xf] }
  0xcd   : > { %v9988_v29 = vadd.f32 %v885_v13, %v846_v33  ;;  %v770_v17 = vpop.f32.mrf.mxu0  ;;  %1395 = vmatpush.bf16.msra.mxu3 %v9984_v8  ;;  %v386_v33 = vunpack.c.2.s8 %v9834_v43  ;;  %v10002_v13 = vor.u32 %v8822_v21, %v7356_v44  ;;  %14254 = vst [vmem:[#allocation72_spill] sm:$0xff] %v10020_v37 }
  0xce   : > { %v9991_v16 = vadd.f32 %v809_v53, %v770_v17  ;;  %1430 = vmatpush.bf16.msra.mxu0 %v9986_v11  ;;  %v388_v17 = vunpack.c.3.s8 %v9834_v43  ;;  %v387_v53 = vunpack.c.2.s8 %v9853_v20  ;;  %v890_v6 = vpop.f32.mrf.mxu3  ;;  %v7412_v20 = vld [vmem:[%s13959_s1 + $0x468] sm:$0xf0] }
  0xcf   : > { %14253 = vst [vmem:[#allocation71_spill] sm:$0xff] %v10002_v13  ;;  %v410_v43 = vand.u32 255, %v386_v33  ;;  %v8818_v33 = vld [vmem:[%s13959_s1 + $0x3d4] sm:$0xf] }
  0xd0   : > { %v412_v44 = vand.u32 255, %v388_v17  ;;  %v411_v7 = vand.u32 255, %v387_v53  ;;  %v814_v24 = vpop.f32.mrf.mxu1  ;;  %v8834_v17 = vld [vmem:[%s13959_s1 + $0x454] sm:$0xf] }
  0xd1   : > { %v10047_v0 = vor.u32 %v8834_v17, %v7404_v52 }
  0xd2   : > { %1431 = vmatpush.bf16.msra.mxu0 %v10002_v13  ;;  %v10025_v13 = vor.u32 %v8836_v22, %v7412_v20  ;;  %v434_v22 = vcvt.s32.f32 %v410_v43  ;;  %v436_v20 = vcvt.s32.f32 %v412_v44  ;;  %v7396_v44 = vld [vmem:[%s13959_s1 + $0x448] sm:$0xf0] }
  0xd3   : > { %14257 = vst [vmem:[#allocation75_spill] sm:$0xff] %v10047_v0  ;;  %v10072_v52 = vor.u32 %v8832_v3, %v7396_v44 }
  0xd4   : > { %v848_v21 = vpop.f32.mrf.mxu2  ;;  %14255 = vst [vmem:[#allocation73_spill] sm:$0xff] %v10025_v13  ;;  %1471 = vmatpush.bf16.msra.mxu2 %v10025_v13 }
  0xd5   : > { %v10027_v11 = vadd.f32 %v887_v32, %v848_v21  ;;  %v773_v49 = vpop.f32.mrf.mxu0  ;;  %v10042_v32 = vor.u32 %v8818_v33, %v7340_v63  ;;  %v435_v21 = vcvt.s32.f32 %v411_v7  ;;  %v10068_v33 = vpack.c.bf16 %v436_v20, %v434_v22  ;;  %14259 = vst [vmem:[#allocation77_spill] sm:$0xff] %v10072_v52 }
  0xd6   : > { %v10038_v53 = vadd.f32 %v812_v46, %v773_v49  ;;  %1432 = vmatpush.bf16.msra.mxu0 %v10020_v37  ;;  %v8816_v49 = vld [vmem:[%s13959_s1 + $0x3c4] sm:$0xf]  ;;  %v7332_v46 = vld [vmem:[%s13959_s1 + $0x3c8] sm:$0xf0]  ;;  %v892_v7 = vpop.f32.mrf.mxu3 }
  0xd7   : > { %14256 = vst [vmem:[#allocation74_spill] sm:$0xff] %v10042_v32  ;;  %v10063_v43 = vor.u32 %v8816_v49, %v7332_v46  ;;  %v10070_v63 = vpack.c.bf16 %v437_v15, %v435_v21 }
  0xd8   : > { %1154 = vmatmul.bf16.gmra.mxu0 %v9980_v25  ;;  %1472 = vmatpush.bf16.msra.mxu2 %v10047_v0 }
  0xd9   : > { %7302 = vmatmul.msk.bf16.gmra.mxu2 %vm735_vm0, %v9982_v45  ;;  %14258 = vst [vmem:[#allocation76_spill] sm:$0xff] %v10063_v43 }
  0xda   : > { %1433 = vmatpush.bf16.msra.mxu0 %v10042_v32  ;;  %v817_v32 = vpop.f32.mrf.mxu1 }
  0xdb   : > { %1081 = vmatmul.bf16.gmra.mxu1 %v10068_v33  ;;  %7297 = vmatmul.msk.bf16.gmra.mxu3 %vm735_vm0, %v10070_v63 }
  0xdc   : > { %v851_v17 = vpop.f32.mrf.mxu2  ;;  %1473 = vmatpush.bf16.msra.mxu2 %v10072_v52 }
  0xdd   : > { %v10074_v37 = vadd.f32 %v890_v6, %v851_v17  ;;  %v775_v35 = vpop.f32.mrf.mxu0 }
  0xde   : > { %v10076_v0 = vadd.f32 %v814_v24, %v775_v35  ;;  %1434 = vmatpush.bf16.msra.mxu0 %v10063_v43  ;;  %v895_v15 = vpop.f32.mrf.mxu3 }
  0xe2   : > { %v819_v20 = vpop.f32.mrf.mxu1 }
  0xe4   : > { %v853_v22 = vpop.f32.mrf.mxu2 }
  0xe5   : > { %v10083_v21 = vadd.f32 %v892_v7, %v853_v22  ;;  %v778_v49 = vpop.f32.mrf.mxu0 }
  0xe6   : > { %v10085_v6 = vadd.f32 %v817_v32, %v778_v49  ;;  %v897_v35 = vpop.f32.mrf.mxu3 }
  0xe8   : > { %1159 = vmatmul.bf16.gmra.mxu0 %v10068_v33 }
  0xe9   : > { %7303 = vmatmul.msk.bf16.gmra.mxu2 %vm735_vm0, %v10070_v63 }
  0xea   : > { %v822_v46 = vpop.f32.mrf.mxu1 }
  0xeb   : > { %1357 = vmatmul.bf16.vlgmr.msra.gmra.mxu1 %v9482_v36  ;;  %7424 = vmatmul.msk.bf16.vlgmr.msra.gmra.mxu3 %vm735_vm0, %v9455_v19 }
  0xec   : > { %v856_v24 = vpop.f32.mrf.mxu2 }
  0xed   : > { %v10090_v3 = vadd.f32 %v895_v15, %v856_v24  ;;  %v780_v44 = vpop.f32.mrf.mxu0 }
  0xee   : > { %v10092_v17 = vadd.f32 %v819_v20, %v780_v44  ;;  %v900_v32 = vpop.f32.mrf.mxu3 }
  0xf2   : > { %v824_v22 = vpop.f32.mrf.mxu1 }
  0xf4   : > { %v858_v7 = vpop.f32.mrf.mxu2 }
  0xf5   : > { %v10097_v49 = vadd.f32 %v897_v35, %v858_v7  ;;  %v783_v43 = vpop.f32.mrf.mxu0 }
  0xf6   : > { %v10099_v52 = vadd.f32 %v822_v46, %v783_v43  ;;  %v902_v15 = vpop.f32.mrf.mxu3 }
  0xf8   : > { %1435 = vmatmul.bf16.vlgmr.msra.gmra.mxu0 %v9482_v36 }
  0xf9   : > { %7430 = vmatmul.msk.bf16.vlgmr.msra.gmra.mxu2 %vm735_vm0, %v9455_v19 }
  0xfa   : > { %v827_v24 = vpop.f32.mrf.mxu1 }
  0xfb   : > { %1362 = vmatmul.bf16.gmra.mxu1 %v9495_v58  ;;  %7425 = vmatmul.msk.bf16.gmra.mxu3 %vm735_vm0, %v9488_v47 }
  0xfc   : > { %v861_v20 = vpop.f32.mrf.mxu2 }
  0xfd   : > { %v10104_v44 = vadd.f32 %v900_v32, %v861_v20  ;;  %v785_v34 = vpop.f32.mrf.mxu0 }
  0xfe   : > { %v10106_v30 = vadd.f32 %v824_v22, %v785_v34  ;;  %v905_v43 = vpop.f32.mrf.mxu3 }
 0x102   : > { %v829_v46 = vpop.f32.mrf.mxu1 }
 0x104   : > { %v863_v35 = vpop.f32.mrf.mxu2 }
 0x105   : > { %v10111_v36 = vadd.f32 %v902_v15, %v863_v35  ;;  %v788_v7 = vpop.f32.mrf.mxu0  ;;  %v7494_v15 = vld [vmem:[%s13959_s1 + $0x370] sm:$0xf] }
 0x106   : > { %v10113_v19 = vadd.f32 %v827_v24, %v788_v7  ;;  %v907_v34 = vpop.f32.mrf.mxu3 }
 0x108   : > { %1440 = vmatmul.bf16.gmra.mxu0 %v9495_v58  ;;  %v8783_v58 = vld [vmem:[%s13959_s1 + $0x374] sm:$0xf0] }
 0x109   : > { %7431 = vmatmul.msk.bf16.gmra.mxu2 %vm735_vm0, %v9488_v47  ;;  %v10129_v24 = vor.u32 %v8783_v58, %v7494_v15  ;;  %v7486_v47 = vld [vmem:[%s13959_s1 + $0x360] sm:$0xf] }
 0x10a   : > { %v1057_v22 = vpop.f32.mrf.mxu1 }
 0x10b   : > { %v1058_v8 = vadd.f32 %v1057_v22, %v9825_v41  ;;  %14260 = vst [vmem:[#allocation78_spill] sm:$0xff] %v10129_v24  ;;  %1367 = vmatmul.bf16.gmra.mxu1 %v9529_v31  ;;  %7426 = vmatmul.msk.bf16.gmra.mxu3 %vm735_vm0, %v9500_v5  ;;  %v8781_v41 = vld [vmem:[%s13959_s1 + $0x364] sm:$0xf0] }
 0x10c   : > { %v866_v32 = vpop.f32.mrf.mxu2  ;;  %1625 = vmatpush.bf16.msrb.mxu1 %v10129_v24 }
 0x10d   : > { %v10118_v20 = vadd.f32 %v905_v43, %v866_v32  ;;  %v790_v13 = vpop.f32.mrf.mxu0  ;;  %v10141_v43 = vor.u32 %v8781_v41, %v7486_v47 }
 0x10e   : > { %v10121_v26 = vadd.f32 %v829_v46, %v790_v13  ;;  %v1096_v13 = vpop.f32.mrf.mxu3 }
 0x10f   : > { %14261 = vst [vmem:[#allocation79_spill] sm:$0xff] %v10141_v43  ;;  %v10143_v35 = vadd.f32 %v1096_v13, %v1058_v8  ;;  %v8779_v8 = vld [vmem:[%s13959_s1 + $0x354] sm:$0xf0] }
 0x110   : > { %1626 = vmatpush.bf16.msrb.mxu1 %v10141_v43  ;;  %v10156_v47 = vor.u32 %v8779_v8, %v7478_v23  ;;  %v7462_v8 = vld [vmem:[%s13959_s1 + $0x330] sm:$0xf] }
 0x112   : > { %v1059_v7 = vpop.f32.mrf.mxu1  ;;  %14262 = vst [vmem:[#allocation80_spill] sm:$0xff] %v10156_v47 }
 0x113   : > { %v1060_v15 = vadd.f32 %v1059_v7, %v9856_v4  ;;  %v7470_v4 = vld [vmem:[%s13959_s1 + $0x340] sm:$0xf] }
 0x114   : > { %v868_v46 = vpop.f32.mrf.mxu2  ;;  %1627 = vmatpush.bf16.msrb.mxu1 %v10156_v47 }
 0x115   : > { %v10145_v32 = vadd.f32 %v907_v34, %v868_v46  ;;  %v1135_v22 = vpop.f32.mrf.mxu0 }
 0x116   : > { %v1136_v58 = vadd.f32 %v1135_v22, %v9848_v27  ;;  %v8777_v27 = vld [vmem:[%s13959_s1 + $0x344] sm:$0xf0]  ;;  %v1098_v34 = vpop.f32.mrf.mxu3 }
 0x117   : > { %v10168_v41 = vor.u32 %v8777_v27, %v7470_v4  ;;  %v10170_v23 = vadd.f32 %v1098_v34, %v1060_v15  ;;  %v8775_v15 = vld [vmem:[%s13959_s1 + $0x334] sm:$0xf0]  ;;  %v7496_v27 = vld [vmem:[%s13959_s1 + $0x378] sm:$0xf0] }
 0x118   : > { %1445 = vmatmul.bf16.gmra.mxu0 %v9529_v31  ;;  %v10186_v4 = vor.u32 %v8775_v15, %v7462_v8  ;;  %v7518_v8 = vld [vmem:[%s13959_s1 + $0x3a0] sm:$0xf] }
 0x119   : > { %7432 = vmatmul.msk.bf16.gmra.mxu2 %vm735_vm0, %v9500_v5  ;;  %14263 = vst [vmem:[#allocation81_spill] sm:$0xff] %v10168_v41  ;;  %1628 = vmatpush.bf16.msrb.mxu1 %v10168_v41 }
 0x11a   : > { %v1062_v31 = vpop.f32.mrf.mxu1  ;;  %14264 = vst [vmem:[#allocation82_spill] sm:$0xff] %v10186_v4 }
 0x11b   : > { %v1063_v7 = vadd.f32 %v1062_v31, %v9926_v40  ;;  %v8791_v40 = vld [vmem:[%s13959_s1 + $0x3b4] sm:$0xf0]  ;;  %1372 = vmatmul.bf16.gmra.mxu1 %v9626_v60  ;;  %7427 = vmatmul.msk.bf16.gmra.mxu3 %vm735_vm0, %v9545_v57  ;;  %v7454_v31 = vld [vmem:[%s13959_s1 + $0x320] sm:$0xf] }
 0x11c   : > { %v1174_v13 = vpop.f32.mrf.mxu2 }
 0x11d   : > { %v10172_v46 = vadd.f32 %v1174_v13, %v1136_v58  ;;  %v1137_v5 = vpop.f32.mrf.mxu0  ;;  %v7526_v58 = vld [vmem:[%s13959_s1 + $0x3b0] sm:$0xf]  ;;  %1629 = vmatpush.bf16.msrb.mxu1 %v10186_v4 }
 0x11e   : > { %v1138_v22 = vadd.f32 %v1137_v5, %v9914_v18  ;;  %v8782_v18 = vld [vmem:[%s13959_s1 + $0x374] sm:$0xf]  ;;  %v10200_v34 = vor.u32 %v8791_v40, %v7526_v58  ;;  %v8773_v5 = vld [vmem:[%s13959_s1 + $0x324] sm:$0xf0]  ;;  %v1101_v15 = vpop.f32.mrf.mxu3 }
 0x11f   : > { %v10202_v13 = vor.u32 %v8782_v18, %v7496_v27  ;;  %v10216_v58 = vor.u32 %v8773_v5, %v7454_v31  ;;  %v8789_v40 = vld [vmem:[%s13959_s1 + $0x3a4] sm:$0xf0]  ;;  %v8780_v18 = vld [vmem:[%s13959_s1 + $0x364] sm:$0xf]  ;;  %v7488_v27 = vld [vmem:[%s13959_s1 + $0x368] sm:$0xf0]  ;;  %v10227_v12 = vadd.f32 %v1101_v15, %v1063_v7 }
 0x120   : > { %14265 = vst [vmem:[#allocation83_spill] sm:$0xff] %v10200_v34  ;;  %1668 = vmatpush.bf16.msrb.mxu3 %v10200_v34  ;;  %v10229_v28 = vor.u32 %v8789_v40, %v7518_v8  ;;  %v10231_v38 = vor.u32 %v8780_v18, %v7488_v27  ;;  %v7446_v7 = vld [vmem:[%s13959_s1 + $0x310] sm:$0xf]  ;;  %v8790_v18 = vld [vmem:[%s13959_s1 + $0x3b4] sm:$0xf] }
 0x121   : > { %14266 = vst [vmem:[#allocation84_spill] sm:$0xff] %v10202_v13  ;;  %1703 = vmatpush.bf16.msrb.mxu0 %v10202_v13  ;;  %1630 = vmatpush.bf16.msrb.mxu1 %v10216_v58  ;;  %v7528_v27 = vld [vmem:[%s13959_s1 + $0x3b8] sm:$0xf0] }
 0x122   : > { %14267 = vst [vmem:[#allocation85_spill] sm:$0xff] %v10216_v58  ;;  %v1064_v31 = vpop.f32.mrf.mxu1 }
 0x123   : > { %14268 = vst [vmem:[#allocation86_spill] sm:$0xff] %v10229_v28  ;;  %v1065_v2 = vadd.f32 %v1064_v31, %v9991_v16  ;;  %v8787_v16 = vld [vmem:[%s13959_s1 + $0x394] sm:$0xf0]  ;;  %v10274_v31 = vor.u32 %v8790_v18, %v7528_v27 }
 0x124   : > { %v1176_v42 = vpop.f32.mrf.mxu2  ;;  %14269 = vst [vmem:[#allocation87_spill] sm:$0xff] %v10231_v38  ;;  %1669 = vmatpush.bf16.msrb.mxu3 %v10229_v28 }
 0x125   : > { %v10233_v5 = vadd.f32 %v1176_v42, %v1138_v22  ;;  %v1140_v14 = vpop.f32.mrf.mxu0  ;;  %1704 = vmatpush.bf16.msrb.mxu0 %v10231_v38  ;;  %v8771_v42 = vld [vmem:[%s13959_s1 + $0x314] sm:$0xf0]  ;;  %v7510_v22 = vld [vmem:[%s13959_s1 + $0x390] sm:$0xf]  ;;  %14273 = vst [vmem:[#allocation91_spill] sm:$0xff] %v10274_v31  ;;  %1746 = vmatpush.bf16.msrb.mxu2 %v10274_v31 }
 0x126   : > { %v1141_v51 = vadd.f32 %v1140_v14, %v9988_v29  ;;  %v10249_v8 = vor.u32 %v8771_v42, %v7446_v7  ;;  %v8778_v29 = vld [vmem:[%s13959_s1 + $0x354] sm:$0xf]  ;;  %v7480_v14 = vld [vmem:[%s13959_s1 + $0x358] sm:$0xf0]  ;;  %v10261_v15 = vor.u32 %v8787_v16, %v7510_v22  ;;  %v8769_v7 = vld [vmem:[%s13959_s1 + $0x304] sm:$0xf0]  ;;  %v1103_v42 = vpop.f32.mrf.mxu3 }
 0x127   : > { %v10263_v40 = vor.u32 %v8778_v29, %v7480_v14  ;;  %v8785_v16 = vld [vmem:[%s13959_s1 + $0x384] sm:$0xf0]  ;;  %v8776_v29 = vld [vmem:[%s13959_s1 + $0x344] sm:$0xf]  ;;  %v7472_v14 = vld [vmem:[%s13959_s1 + $0x348] sm:$0xf0]  ;;  %v10299_v18 = vadd.f32 %v1103_v42, %v1065_v2 }
 0x128   : > { %14270 = vst [vmem:[#allocation88_spill] sm:$0xff] %v10249_v8  ;;  %1450 = vmatmul.bf16.gmra.mxu0 %v9626_v60  ;;  %1631 = vmatpush.bf16.msrb.mxu1 %v10249_v8  ;;  %v7438_v60 = vld [vmem:[%s13959_s1 + $0x300] sm:$0xf]  ;;  %v10303_v8 = vor.u32 %v8776_v29, %v7472_v14  ;;  %v8774_v2 = vld [vmem:[%s13959_s1 + $0x334] sm:$0xf] }
 0x129   : > { %14271 = vst [vmem:[#allocation89_spill] sm:$0xff] %v10261_v15  ;;  %7433 = vmatmul.msk.bf16.gmra.mxu2 %vm735_vm0, %v9545_v57  ;;  %1670 = vmatpush.bf16.msrb.mxu3 %v10261_v15  ;;  %v7502_v57 = vld [vmem:[%s13959_s1 + $0x380] sm:$0xf]  ;;  %v10288_v22 = vor.u32 %v8769_v7, %v7438_v60  ;;  %v7520_v29 = vld [vmem:[%s13959_s1 + $0x3a8] sm:$0xf0] }
 0x12a   : > { %14272 = vst [vmem:[#allocation90_spill] sm:$0xff] %v10263_v40  ;;  %1705 = vmatpush.bf16.msrb.mxu0 %v10263_v40  ;;  %v10301_v40 = vor.u32 %v8785_v16, %v7502_v57  ;;  %v1067_v60 = vpop.f32.mrf.mxu1 }
 0x12b   : > { %14274 = vst [vmem:[#allocation92_spill] sm:$0xff] %v10288_v22  ;;  %v1068_v58 = vadd.f32 %v1067_v60, %v10038_v53  ;;  %1377 = vmatmul.bf16.gmra.mxu1 %v9728_v48  ;;  %7428 = vmatmul.msk.bf16.gmra.mxu3 %vm735_vm0, %v9680_v61  ;;  %v8788_v53 = vld [vmem:[%s13959_s1 + $0x3a4] sm:$0xf] }
 0x12c   : > { %v1179_v27 = vpop.f32.mrf.mxu2  ;;  %14275 = vst [vmem:[#allocation93_spill] sm:$0xff] %v10301_v40  ;;  %1632 = vmatpush.bf16.msrb.mxu1 %v10288_v22  ;;  %v10340_v60 = vor.u32 %v8788_v53, %v7520_v29  ;;  %v7440_v53 = vld [vmem:[%s13959_s1 + $0x308] sm:$0xf0] }
 0x12d   : > { %14276 = vst [vmem:[#allocation94_spill] sm:$0xff] %v10303_v8  ;;  %v10305_v7 = vadd.f32 %v1179_v27, %v1141_v51  ;;  %v1142_v38 = vpop.f32.mrf.mxu0  ;;  %1671 = vmatpush.bf16.msrb.mxu3 %v10301_v40  ;;  %v7464_v51 = vld [vmem:[%s13959_s1 + $0x338] sm:$0xf0] }
 0x12e   : > { %v1143_v31 = vadd.f32 %v1142_v38, %v10027_v11  ;;  %1706 = vmatpush.bf16.msrb.mxu0 %v10303_v8  ;;  %v10318_v57 = vor.u32 %v8774_v2, %v7464_v51  ;;  %v8772_v38 = vld [vmem:[%s13959_s1 + $0x324] sm:$0xf]  ;;  %v7456_v11 = vld [vmem:[%s13959_s1 + $0x328] sm:$0xf0]  ;;  %v1106_v42 = vpop.f32.mrf.mxu3  ;;  %14279 = vst [vmem:[#allocation97_spill] sm:$0xff] %v10340_v60  ;;  %1747 = vmatpush.bf16.msrb.mxu2 %v10340_v60 }
 0x12f   : > { %v10333_v16 = vor.u32 %v8772_v38, %v7456_v11  ;;  %v10338_v14 = vadd.f32 %v1106_v42, %v1068_v58  ;;  %v8770_v58 = vld [vmem:[%s13959_s1 + $0x314] sm:$0xf]  ;;  %v7448_v38 = vld [vmem:[%s13959_s1 + $0x318] sm:$0xf0] }
 0x130   : > { %14277 = vst [vmem:[#allocation95_spill] sm:$0xff] %v10318_v57  ;;  %v10357_v11 = vor.u32 %v8770_v58, %v7448_v38 }
 0x131   : > { %14278 = vst [vmem:[#allocation96_spill] sm:$0xff] %v10333_v16 }
 0x132   : > { %1707 = vmatpush.bf16.msrb.mxu0 %v10318_v57  ;;  %v1069_v2 = vpop.f32.mrf.mxu1  ;;  %14280 = vst [vmem:[#allocation98_spill] sm:$0xff] %v10357_v11 }
 0x133   : > { %v1070_v8 = vadd.f32 %v1069_v2, %v10076_v0 }
 0x134   : > { %v1181_v27 = vpop.f32.mrf.mxu2 }
 0x135   : > { %v10342_v51 = vadd.f32 %v1181_v27, %v1143_v31  ;;  %v1145_v57 = vpop.f32.mrf.mxu0  ;;  %v8786_v31 = vld [vmem:[%s13959_s1 + $0x394] sm:$0xf] }
 0x136   : > { %v1146_v22 = vadd.f32 %v1145_v57, %v10074_v37  ;;  %1708 = vmatpush.bf16.msrb.mxu0 %v10333_v16  ;;  %v7512_v37 = vld [vmem:[%s13959_s1 + $0x398] sm:$0xf0]  ;;  %v8768_v57 = vld [vmem:[%s13959_s1 + $0x304] sm:$0xf]  ;;  %v1108_v42 = vpop.f32.mrf.mxu3 }
 0x137   : > { %v10363_v0 = vor.u32 %v8786_v31, %v7512_v37  ;;  %v10378_v29 = vor.u32 %v8768_v57, %v7440_v53  ;;  %v10383_v27 = vadd.f32 %v1108_v42, %v1070_v8 }
 0x138   : > { %1455 = vmatmul.bf16.gmra.mxu0 %v9728_v48  ;;  %v8784_v48 = vld [vmem:[%s13959_s1 + $0x384] sm:$0xf] }
 0x139   : > { %14281 = vst [vmem:[#allocation99_spill] sm:$0xff] %v10363_v0  ;;  %7434 = vmatmul.msk.bf16.gmra.mxu2 %vm735_vm0, %v9680_v61  ;;  %v7504_v61 = vld [vmem:[%s13959_s1 + $0x388] sm:$0xf0] }
 0x13a   : > { %1709 = vmatpush.bf16.msrb.mxu0 %v10357_v11  ;;  %1748 = vmatpush.bf16.msrb.mxu2 %v10363_v0  ;;  %14282 = vst [vmem:[#allocation100_spill] sm:$0xff] %v10378_v29  ;;  %v10385_v58 = vor.u32 %v8784_v48, %v7504_v61  ;;  %v1072_v38 = vpop.f32.mrf.mxu1 }
 0x13b   : > { %v1073_v11 = vadd.f32 %v1072_v38, %v10085_v6  ;;  %1382 = vmatmul.bf16.gmra.mxu1 %v9768_v39  ;;  %7429 = vmatmul.msk.bf16.gmra.mxu3 %vm735_vm0, %v9758_v1 }
 0x13c   : > { %v1184_v2 = vpop.f32.mrf.mxu2  ;;  %14283 = vst [vmem:[#allocation101_spill] sm:$0xff] %v10385_v58 }
 0x13d   : > { %v10387_v31 = vadd.f32 %v1184_v2, %v1146_v22  ;;  %v1147_v37 = vpop.f32.mrf.mxu0 }
 0x13e   : > { %v1148_v16 = vadd.f32 %v1147_v37, %v10083_v21  ;;  %1710 = vmatpush.bf16.msrb.mxu0 %v10378_v29  ;;  %1749 = vmatpush.bf16.msrb.mxu2 %v10385_v58  ;;  %v1111_v8 = vpop.f32.mrf.mxu3  ;;  %v7545_v29 = vld [vmem:[%s9415_s25 + $0x68] sm:$0xff] }
 0x13f   : > { %v10396_v57 = vadd.f32 %v1111_v8, %v1073_v11 }
 0x142   : > { %v1074_v22 = vpop.f32.mrf.mxu1 }
 0x143   : > { %v1075_v6 = vadd.f32 %v1074_v22, %v10092_v17 }
 0x144   : > { %v1186_v53 = vpop.f32.mrf.mxu2 }
 0x145   : > { %v10398_v48 = vadd.f32 %v1186_v53, %v1148_v16  ;;  %v1150_v42 = vpop.f32.mrf.mxu0 }
 0x146   : > { %v1151_v21 = vadd.f32 %v1150_v42, %v10090_v3  ;;  %v1113_v61 = vpop.f32.mrf.mxu3 }
 0x147   : > { %v10405_v2 = vadd.f32 %v1113_v61, %v1075_v6 }
 0x148   : > { %1460 = vmatmul.bf16.gmra.mxu0 %v9768_v39 }
 0x149   : > { %7435 = vmatmul.msk.bf16.gmra.mxu2 %vm735_vm0, %v9758_v1  ;;  %14284 = vst [vmem:[#allocation102_spill] sm:$0xff] %v10405_v2 }
 0x14a   : > { %v1077_v11 = vpop.f32.mrf.mxu1 }
 0x14b   : > { %v1078_v16 = vadd.f32 %v1077_v11, %v10099_v52  ;;  %1633 = vmatmul.bf16.vlgmr.msrb.gmra.mxu1 %v9772_v62  ;;  %7532 = vmatmul.msk.bf16.vlgmr.msrb.gmra.mxu3 %vm735_vm0, %v9774_v56 }
 0x14c   : > { %v1189_v38 = vpop.f32.mrf.mxu2 }
 0x14d   : > { %v10407_v37 = vadd.f32 %v1189_v38, %v1151_v21  ;;  %v1152_v8 = vpop.f32.mrf.mxu0 }
 0x14e   : > { %v1153_v53 = vadd.f32 %v1152_v8, %v10097_v49  ;;  %v1116_v39 = vpop.f32.mrf.mxu3 }
 0x14f   : > { %14285 = vst [vmem:[#allocation103_spill] sm:$0xff] %v10407_v37  ;;  %v10414_v3 = vadd.f32 %v1116_v39, %v1078_v16 }
 0x151   : > { %14286 = vst [vmem:[#allocation104_spill] sm:$0xff] %v10414_v3 }
 0x152   : > { %v1079_v17 = vpop.f32.mrf.mxu1 }
 0x153   : > { %v1080_v6 = vadd.f32 %v1079_v17, %v10106_v30 }
 0x154   : > { %v1191_v1 = vpop.f32.mrf.mxu2 }
 0x155   : > { %v10416_v22 = vadd.f32 %v1191_v1, %v1153_v53  ;;  %v1155_v42 = vpop.f32.mrf.mxu0 }
 0x156   : > { %v1156_v21 = vadd.f32 %v1155_v42, %v10104_v44  ;;  %v1118_v52 = vpop.f32.mrf.mxu3 }
 0x157   : > { %14287 = vst [vmem:[#allocation105_spill] sm:$0xff] %v10416_v22  ;;  %v10423_v49 = vadd.f32 %v1118_v52, %v1080_v6 }
 0x158   : > { %1711 = vmatmul.bf16.vlgmr.msrb.gmra.mxu0 %v9772_v62 }
 0x159   : > { %7538 = vmatmul.msk.bf16.vlgmr.msrb.gmra.mxu2 %vm735_vm0, %v9774_v56  ;;  %14288 = vst [vmem:[#allocation106_spill] sm:$0xff] %v10423_v49 }
 0x15a   : > { %v1082_v38 = vpop.f32.mrf.mxu1 }
 0x15b   : > { %v1083_v16 = vadd.f32 %v1082_v38, %v10113_v19  ;;  %1638 = vmatmul.bf16.gmra.mxu1 %v9782_v10  ;;  %7533 = vmatmul.msk.bf16.gmra.mxu3 %vm735_vm0, %v9784_v9 }
 0x15c   : > { %v1194_v61 = vpop.f32.mrf.mxu2 }
 0x15d   : > { %v10425_v11 = vadd.f32 %v1194_v61, %v1156_v21  ;;  %v1157_v8 = vpop.f32.mrf.mxu0 }
 0x15e   : > { %v1158_v53 = vadd.f32 %v1157_v8, %v10111_v36  ;;  %v1121_v62 = vpop.f32.mrf.mxu3 }
 0x15f   : > { %14289 = vst [vmem:[#allocation107_spill] sm:$0xff] %v10425_v11  ;;  %v10432_v30 = vadd.f32 %v1121_v62, %v1083_v16 }
 0x161   : > { %14290 = vst [vmem:[#allocation108_spill] sm:$0xff] %v10432_v30 }
 0x162   : > { %v1084_v44 = vpop.f32.mrf.mxu1 }
 0x163   : > { %v1085_v17 = vadd.f32 %v1084_v44, %v10121_v26  ;;  %v7632_v26 = vld [vmem:[%s13959_s1 + $0x1f0] sm:$0xf] }
 0x164   : > { %v1196_v56 = vpop.f32.mrf.mxu2 }
 0x165   : > { %v10434_v39 = vadd.f32 %v1196_v56, %v1158_v53  ;;  %v1160_v1 = vpop.f32.mrf.mxu0 }
 0x166   : > { %v1161_v42 = vadd.f32 %v1160_v1, %v10118_v20  ;;  %v1123_v36 = vpop.f32.mrf.mxu3 }
 0x167   : > { %14291 = vst [vmem:[#allocation109_spill] sm:$0xff] %v10434_v39  ;;  %v10441_v19 = vadd.f32 %v1123_v36, %v1085_v17  ;;  %v7616_v17 = vld [vmem:[%s13959_s1 + $0x1d0] sm:$0xf] }
 0x168   : > { %1716 = vmatmul.bf16.gmra.mxu0 %v9782_v10  ;;  %v8855_v10 = vld [vmem:[%s13959_s1 + $0x1f4] sm:$0xf0] }
 0x169   : > { %7539 = vmatmul.msk.bf16.gmra.mxu2 %vm735_vm0, %v9784_v9  ;;  %14292 = vst [vmem:[#allocation110_spill] sm:$0xff] %v10441_v19  ;;  %v10452_v20 = vor.u32 %v8855_v10, %v7632_v26  ;;  %v7624_v9 = vld [vmem:[%s13959_s1 + $0x1e0] sm:$0xf] }
 0x16a   : > { %v1358_v21 = vpop.f32.mrf.mxu1 }
 0x16b   : > { %14294 = vst [vmem:[#allocation112_spill] sm:$0xff] %v10452_v20  ;;  %1643 = vmatmul.bf16.gmra.mxu1 %v9794_v55  ;;  %7534 = vmatmul.msk.bf16.gmra.mxu3 %vm735_vm0, %v9796_v54 }
 0x16c   : > { %v1199_v6 = vpop.f32.mrf.mxu2  ;;  %2035 = vmatpush.bf16.msra.mxu1 %v10452_v20  ;;  %v8842_v20 = vld [vmem:[%s13959_s1 + $0x194] sm:$0xf] }
 0x16d   : > { %v10443_v52 = vadd.f32 %v1199_v6, %v1161_v42  ;;  %v1162_v61 = vpop.f32.mrf.mxu0  ;;  %v8851_v42 = vld [vmem:[%s13959_s1 + $0x1d4] sm:$0xf0]  ;;  %v7608_v6 = vld [vmem:[%s13959_s1 + $0x1c0] sm:$0xf] }
 0x16e   : > { %v1163_v38 = vadd.f32 %v1162_v61, %v10145_v32  ;;  %v8853_v32 = vld [vmem:[%s13959_s1 + $0x1e4] sm:$0xf0]  ;;  %v1397_v8 = vpop.f32.mrf.mxu3  ;;  %v10477_v36 = vor.u32 %v8851_v42, %v7616_v17  ;;  %v8854_v17 = vld [vmem:[%s13959_s1 + $0x1f4] sm:$0xf]  ;;  %v7634_v42 = vld [vmem:[%s13959_s1 + $0x1f8] sm:$0xf0] }
 0x16f   : > { %14293 = vst [vmem:[#allocation111_spill] sm:$0xff] %v10443_v52  ;;  %v10464_v16 = vor.u32 %v8853_v32, %v7624_v9  ;;  %v10466_v53 = vadd.f32 %v1397_v8, %v1358_v21  ;;  %v8849_v21 = vld [vmem:[%s13959_s1 + $0x1c4] sm:$0xf0]  ;;  %v7600_v32 = vld [vmem:[%s13959_s1 + $0x1b0] sm:$0xf] }
 0x170   : > { %14297 = vst [vmem:[#allocation115_spill] sm:$0xff] %v10477_v36  ;;  %v8847_v8 = vld [vmem:[%s13959_s1 + $0x1b4] sm:$0xf0] }
 0x171   : > { %14295 = vst [vmem:[#allocation113_spill] sm:$0xff] %v10464_v16  ;;  %2036 = vmatpush.bf16.msra.mxu1 %v10464_v16 }
 0x172   : > { %v1360_v56 = vpop.f32.mrf.mxu1 }
 0x174   : > { %v1201_v62 = vpop.f32.mrf.mxu2 }
 0x175   : > { %v10468_v44 = vadd.f32 %v1201_v62, %v1163_v38  ;;  %v1436_v1 = vpop.f32.mrf.mxu0  ;;  %2037 = vmatpush.bf16.msra.mxu1 %v10477_v36  ;;  %v10489_v38 = vor.u32 %v8849_v21, %v7608_v6  ;;  %v7664_v62 = vld [vmem:[%s13959_s1 + $0x230] sm:$0xf]  ;;  %v10521_v21 = vor.u32 %v8854_v17, %v7634_v42  ;;  %v8852_v17 = vld [vmem:[%s13959_s1 + $0x1e4] sm:$0xf]  ;;  %v7626_v42 = vld [vmem:[%s13959_s1 + $0x1e8] sm:$0xf0] }
 0x176   : > { %v1399_v61 = vpop.f32.mrf.mxu3  ;;  %v10550_v36 = vor.u32 %v8852_v17, %v7626_v42 }
 0x177   : > { %14296 = vst [vmem:[#allocation114_spill] sm:$0xff] %v10468_v44  ;;  %v10491_v26 = vadd.f32 %v1399_v61, %v1360_v56  ;;  %v10505_v56 = vor.u32 %v8847_v8, %v7600_v32  ;;  %2113 = vmatpush.bf16.msra.mxu0 %v10521_v21  ;;  %v7592_v61 = vld [vmem:[%s13959_s1 + $0x1a0] sm:$0xf] }
 0x178   : > { %1721 = vmatmul.bf16.gmra.mxu0 %v9794_v55  ;;  %14298 = vst [vmem:[#allocation116_spill] sm:$0xff] %v10489_v38  ;;  %v7656_v32 = vld [vmem:[%s13959_s1 + $0x220] sm:$0xf] }
 0x179   : > { %7540 = vmatmul.msk.bf16.gmra.mxu2 %vm735_vm0, %v9796_v54  ;;  %2038 = vmatpush.bf16.msra.mxu1 %v10489_v38  ;;  %14299 = vst [vmem:[#allocation117_spill] sm:$0xff] %v10505_v56 }
 0x17a   : > { %v1363_v55 = vpop.f32.mrf.mxu1  ;;  %14301 = vst [vmem:[#allocation119_spill] sm:$0xff] %v10521_v21 }
 0x17b   : > { %1648 = vmatmul.bf16.gmra.mxu1 %v9844_v59  ;;  %7535 = vmatmul.msk.bf16.gmra.mxu3 %vm735_vm0, %v9846_v50  ;;  %14304 = vst [vmem:[#allocation122_spill] sm:$0xff] %v10550_v36 }
 0x17c   : > { %v1475_v10 = vpop.f32.mrf.mxu2  ;;  %2114 = vmatpush.bf16.msra.mxu0 %v10550_v36 }
 0x17d   : > { %v10493_v9 = vadd.f32 %v1475_v10, %v1436_v1  ;;  %v1438_v54 = vpop.f32.mrf.mxu0  ;;  %v8863_v1 = vld [vmem:[%s13959_s1 + $0x234] sm:$0xf0]  ;;  %2039 = vmatpush.bf16.msra.mxu1 %v10505_v56  ;;  %v8845_v10 = vld [vmem:[%s13959_s1 + $0x1a4] sm:$0xf0] }
 0x17e   : > { %v10519_v6 = vor.u32 %v8863_v1, %v7664_v62  ;;  %v1402_v8 = vpop.f32.mrf.mxu3  ;;  %v10535_v62 = vor.u32 %v8845_v10, %v7592_v61  ;;  %v8861_v1 = vld [vmem:[%s13959_s1 + $0x224] sm:$0xf0] }
 0x17f   : > { %v10546_v56 = vadd.f32 %v1402_v8, %v1363_v55  ;;  %v10548_v21 = vor.u32 %v8861_v1, %v7656_v32  ;;  %v8843_v55 = vld [vmem:[%s13959_s1 + $0x194] sm:$0xf0]  ;;  %v7648_v32 = vld [vmem:[%s13959_s1 + $0x210] sm:$0xf]  ;;  %v8850_v8 = vld [vmem:[%s13959_s1 + $0x1d4] sm:$0xf] }
 0x180   : > { %14300 = vst [vmem:[#allocation118_spill] sm:$0xff] %v10519_v6  ;;  %2078 = vmatpush.bf16.msra.mxu3 %v10519_v6  ;;  %v7584_v6 = vld [vmem:[%s13959_s1 + $0x190] sm:$0xf]  ;;  %v7618_v1 = vld [vmem:[%s13959_s1 + $0x1d8] sm:$0xf0] }
 0x181   : > { %14302 = vst [vmem:[#allocation120_spill] sm:$0xff] %v10535_v62  ;;  %2040 = vmatpush.bf16.msra.mxu1 %v10535_v62  ;;  %v10579_v42 = vor.u32 %v8850_v8, %v7618_v1  ;;  %v8857_v1 = vld [vmem:[%s13959_s1 + $0x204] sm:$0xf0] }
 0x182   : > { %14303 = vst [vmem:[#allocation121_spill] sm:$0xff] %v10548_v21  ;;  %v1365_v61 = vpop.f32.mrf.mxu1 }
 0x183   : > { %14307 = vst [vmem:[#allocation125_spill] sm:$0xff] %v10579_v42  ;;  %2115 = vmatpush.bf16.msra.mxu0 %v10579_v42 }
 0x184   : > { %v1477_v38 = vpop.f32.mrf.mxu2  ;;  %2079 = vmatpush.bf16.msra.mxu3 %v10548_v21 }
 0x185   : > { %v10552_v10 = vadd.f32 %v1477_v38, %v1438_v54  ;;  %v1441_v16 = vpop.f32.mrf.mxu0  ;;  %v10566_v38 = vor.u32 %v8843_v55, %v7584_v6  ;;  %v8859_v54 = vld [vmem:[%s13959_s1 + $0x214] sm:$0xf0]  ;;  %v8862_v6 = vld [vmem:[%s13959_s1 + $0x234] sm:$0xf]  ;;  %v7666_v55 = vld [vmem:[%s13959_s1 + $0x238] sm:$0xf0] }
 0x186   : > { %v10577_v17 = vor.u32 %v8859_v54, %v7648_v32  ;;  %v10588_v62 = vor.u32 %v8862_v6, %v7666_v55  ;;  %v7576_v32 = vld [vmem:[%s13959_s1 + $0x180] sm:$0xf]  ;;  %v8841_v54 = vld [vmem:[%s13959_s1 + $0x184] sm:$0xf0]  ;;  %v1404_v8 = vpop.f32.mrf.mxu3  ;;  %v8848_v6 = vld [vmem:[%s13959_s1 + $0x1c4] sm:$0xf] }
 0x187   : > { %14305 = vst [vmem:[#allocation123_spill] sm:$0xff] %v10566_v38  ;;  %2041 = vmatpush.bf16.msra.mxu1 %v10566_v38  ;;  %v7610_v55 = vld [vmem:[%s13959_s1 + $0x1c8] sm:$0xf0]  ;;  %v10616_v38 = vadd.f32 %v1404_v8, %v1365_v61  ;;  %v8846_v61 = vld [vmem:[%s13959_s1 + $0x1b4] sm:$0xf] }
 0x188   : > { %14306 = vst [vmem:[#allocation124_spill] sm:$0xff] %v10577_v17  ;;  %1726 = vmatmul.bf16.gmra.mxu0 %v9844_v59  ;;  %2080 = vmatpush.bf16.msra.mxu3 %v10577_v17  ;;  %v7640_v59 = vld [vmem:[%s13959_s1 + $0x200] sm:$0xf] }
 0x189   : > { %14308 = vst [vmem:[#allocation126_spill] sm:$0xff] %v10588_v62  ;;  %7541 = vmatmul.msk.bf16.gmra.mxu2 %vm735_vm0, %v9846_v50  ;;  %v10605_v50 = vor.u32 %v8841_v54, %v7576_v32  ;;  %v10618_v36 = vor.u32 %v8857_v1, %v7640_v59  ;;  %v7602_v59 = vld [vmem:[%s13959_s1 + $0x1b8] sm:$0xf0]  ;;  %v8860_v1 = vld [vmem:[%s13959_s1 + $0x224] sm:$0xf] }
 0x18a   : > { %2156 = vmatpush.bf16.msra.mxu2 %v10588_v62  ;;  %v10620_v62 = vor.u32 %v8848_v6, %v7610_v55  ;;  %v1368_v32 = vpop.f32.mrf.mxu1  ;;  %v10633_v8 = vor.u32 %v8846_v61, %v7602_v59  ;;  %v7658_v61 = vld [vmem:[%s13959_s1 + $0x228] sm:$0xf0] }
 0x18b   : > { %14309 = vst [vmem:[#allocation127_spill] sm:$0xff] %v10605_v50  ;;  %2042 = vmatpush.bf16.msra.mxu1 %v10605_v50  ;;  %7536 = vmatmul.msk.bf16.gmra.mxu3 %vm735_vm0, %v9982_v45 }
 0x18c   : > { %v1480_v42 = vpop.f32.mrf.mxu2  ;;  %14310 = vst [vmem:[#allocation128_spill] sm:$0xff] %v10618_v36  ;;  %2081 = vmatpush.bf16.msra.mxu3 %v10618_v36  ;;  %2116 = vmatpush.bf16.msra.mxu0 %v10620_v62 }
 0x18d   : > { %14311 = vst [vmem:[#allocation129_spill] sm:$0xff] %v10620_v62  ;;  %v10622_v54 = vadd.f32 %v1480_v42, %v1441_v16  ;;  %v1443_v17 = vpop.f32.mrf.mxu0  ;;  %1653 = vmatmul.bf16.gmra.mxu1 %v9980_v25  ;;  %v8844_v16 = vld [vmem:[%s13959_s1 + $0x1a4] sm:$0xf]  ;;  %v7594_v42 = vld [vmem:[%s13959_s1 + $0x1a8] sm:$0xf0] }
 0x18e   : > { %14312 = vst [vmem:[#allocation130_spill] sm:$0xff] %v10633_v8  ;;  %v1407_v6 = vpop.f32.mrf.mxu3  ;;  %v10648_v55 = vor.u32 %v8844_v16, %v7594_v42  ;;  %v7586_v16 = vld [vmem:[%s13959_s1 + $0x198] sm:$0xf0] }
 0x18f   : > { %v10653_v59 = vadd.f32 %v1407_v6, %v1368_v32  ;;  %v8858_v32 = vld [vmem:[%s13959_s1 + $0x214] sm:$0xf] }
 0x190   : > { %2117 = vmatpush.bf16.msra.mxu0 %v10633_v8  ;;  %14313 = vst [vmem:[#allocation131_spill] sm:$0xff] %v10648_v55  ;;  %v10655_v8 = vor.u32 %v8860_v1, %v7658_v61  ;;  %v7578_v1 = vld [vmem:[%s13959_s1 + $0x188] sm:$0xf0] }
 0x192   : > { %14314 = vst [vmem:[#allocation132_spill] sm:$0xff] %v10655_v8  ;;  %v1370_v62 = vpop.f32.mrf.mxu1  ;;  %2157 = vmatpush.bf16.msra.mxu2 %v10655_v8 }
 0x194   : > { %v1482_v50 = vpop.f32.mrf.mxu2  ;;  %2118 = vmatpush.bf16.msra.mxu0 %v10648_v55 }
 0x195   : > { %v10657_v36 = vadd.f32 %v1482_v50, %v1443_v17  ;;  %v1446_v21 = vpop.f32.mrf.mxu0  ;;  %v10670_v17 = vor.u32 %v8842_v20, %v7586_v16  ;;  %v7650_v50 = vld [vmem:[%s13959_s1 + $0x218] sm:$0xf0]  ;;  %v8840_v20 = vld [vmem:[%s13959_s1 + $0x184] sm:$0xf] }
 0x196   : > { %v10675_v42 = vor.u32 %v8858_v32, %v7650_v50  ;;  %v1409_v6 = vpop.f32.mrf.mxu3  ;;  %v10691_v61 = vor.u32 %v8840_v20, %v7578_v1  ;;  %v7544_v50 = vld [vmem:[%s9415_s25 + $0x60] sm:$0xff]  ;;  %v1789_v1 = vunpack.c.0.s8 %v7545_v29 }
 0x197   : > { %14315 = vst [vmem:[#allocation133_spill] sm:$0xff] %v10670_v17  ;;  %v10696_v16 = vadd.f32 %v1409_v6, %v1370_v62  ;;  %v1788_v20 = vunpack.c.0.s8 %v7544_v50  ;;  %v1790_v62 = vunpack.c.1.s8 %v7544_v50  ;;  %v1791_v6 = vunpack.c.1.s8 %v7545_v29 }
 0x198   : > { %14316 = vst [vmem:[#allocation134_spill] sm:$0xff] %v10675_v42  ;;  %1731 = vmatmul.bf16.gmra.mxu0 %v9980_v25  ;;  %2158 = vmatpush.bf16.msra.mxu2 %v10675_v42  ;;  %v8856_v25 = vld [vmem:[%s13959_s1 + $0x204] sm:$0xf]  ;;  %v1813_v0 = vand.u32 255, %v1789_v1 }
 0x199   : > { %7542 = vmatmul.msk.bf16.gmra.mxu2 %vm735_vm0, %v9982_v45  ;;  %2119 = vmatpush.bf16.msra.mxu0 %v10670_v17  ;;  %14317 = vst [vmem:[#allocation135_spill] sm:$0xff] %v10691_v61  ;;  %v7642_v45 = vld [vmem:[%s13959_s1 + $0x208] sm:$0xf0]  ;;  %v1815_v60 = vand.u32 255, %v1791_v6 }
 0x19a   : > { %v10699_v17 = vor.u32 %v8856_v25, %v7642_v45  ;;  %v1373_v55 = vpop.f32.mrf.mxu1  ;;  %v1812_v45 = vand.u32 255, %v1788_v20  ;;  %v1837_v41 = vcvt.s32.f32 %v1813_v0  ;;  %v1795_v0 = vunpack.c.3.s8 %v7545_v29 }
 0x19b   : > { %7537 = vmatmul.msk.bf16.gmra.mxu3 %vm735_vm0, %v10070_v63  ;;  %v1839_v15 = vcvt.s32.f32 %v1815_v60  ;;  %v1794_v60 = vunpack.c.3.s8 %v7544_v50 }
 0x19c   : > { %v1485_v32 = vpop.f32.mrf.mxu2  ;;  %14318 = vst [vmem:[#allocation136_spill] sm:$0xff] %v10699_v17  ;;  %2159 = vmatpush.bf16.msra.mxu2 %v10699_v17  ;;  %v1836_v4 = vcvt.s32.f32 %v1812_v45 }
 0x19d   : > { %v10701_v42 = vadd.f32 %v1485_v32, %v1446_v21  ;;  %v1448_v8 = vpop.f32.mrf.mxu0  ;;  %2120 = vmatpush.bf16.msra.mxu0 %v10691_v61  ;;  %1658 = vmatmul.bf16.gmra.mxu1 %v10068_v33  ;;  %v1814_v32 = vand.u32 255, %v1790_v62  ;;  %v10720_v62 = vpack.c.bf16 %v1839_v15, %v1837_v41  ;;  %v1818_v15 = vand.u32 255, %v1794_v60 }
 0x19e   : > { %v1412_v25 = vpop.f32.mrf.mxu3 }
 0x19f   : > { %v10709_v58 = vadd.f32 %v1412_v25, %v1373_v55  ;;  %v1838_v40 = vcvt.s32.f32 %v1814_v32  ;;  %v1842_v28 = vcvt.s32.f32 %v1818_v15 }
 0x1a1   : > { %v10718_v25 = vpack.c.bf16 %v1838_v40, %v1836_v4 }
 0x1a2   : > { %v1375_v61 = vpop.f32.mrf.mxu1 }
 0x1a4   : > { %v1487_v21 = vpop.f32.mrf.mxu2 }
 0x1a5   : > { %v10711_v13 = vadd.f32 %v1487_v21, %v1448_v8  ;;  %v1451_v17 = vpop.f32.mrf.mxu0 }
 0x1a6   : > { %v1414_v20 = vpop.f32.mrf.mxu3 }
 0x1a7   : > { %v10716_v55 = vadd.f32 %v1414_v20, %v1375_v61 }
 0x1a8   : > { %1736 = vmatmul.bf16.gmra.mxu0 %v10068_v33  ;;  %v1792_v33 = vunpack.c.2.s8 %v7544_v50 }
 0x1a9   : > { %7543 = vmatmul.msk.bf16.gmra.mxu2 %vm735_vm0, %v10070_v63  ;;  %v1793_v63 = vunpack.c.2.s8 %v7545_v29 }
 0x1aa   : > { %v1378_v8 = vpop.f32.mrf.mxu1  ;;  %v1816_v45 = vand.u32 255, %v1792_v33 }
 0x1ab   : > { %7670 = vmatmul.msk.bf16.vlgmr.msra.gmra.mxu3 %vm735_vm0, %v10720_v62  ;;  %v1817_v40 = vand.u32 255, %v1793_v63  ;;  %v7546_v63 = vld [vmem:[%s9415_s25 + $0x70] sm:$0xff] }
 0x1ac   : > { %v1490_v1 = vpop.f32.mrf.mxu2  ;;  %v1840_v47 = vcvt.s32.f32 %v1816_v45  ;;  %v1796_v15 = vunpack.c.0.s8 %v7546_v63 }
 0x1ad   : > { %v10722_v6 = vadd.f32 %v1490_v1, %v1451_v17  ;;  %v1453_v21 = vpop.f32.mrf.mxu0  ;;  %2043 = vmatmul.bf16.vlgmr.msra.gmra.mxu1 %v10718_v25  ;;  %v1819_v17 = vand.u32 255, %v1795_v0  ;;  %v1841_v43 = vcvt.s32.f32 %v1817_v40  ;;  %v1798_v40 = vunpack.c.1.s8 %v7546_v63 }
 0x1ae   : > { %v1417_v61 = vpop.f32.mrf.mxu3  ;;  %v10736_v33 = vpack.c.bf16 %v1842_v28, %v1840_v47  ;;  %v1820_v47 = vand.u32 255, %v1796_v15 }
 0x1af   : > { %v10727_v4 = vadd.f32 %v1417_v61, %v1378_v8  ;;  %v1843_v50 = vcvt.s32.f32 %v1819_v17 }
 0x1b0   : > { %v1844_v52 = vcvt.s32.f32 %v1820_v47 }
 0x1b1   : > { %v10738_v60 = vpack.c.bf16 %v1843_v50, %v1841_v43 }
 0x1b2   : > { %v1380_v32 = vpop.f32.mrf.mxu1 }
 0x1b4   : > { %v1492_v41 = vpop.f32.mrf.mxu2 }
 0x1b5   : > { %v10729_v20 = vadd.f32 %v1492_v41, %v1453_v21  ;;  %v1456_v1 = vpop.f32.mrf.mxu0  ;;  %v7547_v41 = vld [vmem:[%s9415_s25 + $0x78] sm:$0xff] }
 0x1b6   : > { %v1419_v29 = vpop.f32.mrf.mxu3  ;;  %v1797_v17 = vunpack.c.0.s8 %v7547_v41 }
 0x1b7   : > { %v10734_v8 = vadd.f32 %v1419_v29, %v1380_v32  ;;  %v1799_v32 = vunpack.c.1.s8 %v7547_v41  ;;  %v1822_v29 = vand.u32 255, %v1798_v40 }
 0x1b8   : > { %2121 = vmatmul.bf16.vlgmr.msra.gmra.mxu0 %v10718_v25  ;;  %v1821_v34 = vand.u32 255, %v1797_v17 }
 0x1b9   : > { %7676 = vmatmul.msk.bf16.vlgmr.msra.gmra.mxu2 %vm735_vm0, %v10720_v62  ;;  %v1846_v19 = vcvt.s32.f32 %v1822_v29  ;;  %v8879_v29 = vld [vmem:[%s13959_s1 + $0x4f4] sm:$0xf0] }
 0x1ba   : > { %v1383_v0 = vpop.f32.mrf.mxu1  ;;  %v1845_v39 = vcvt.s32.f32 %v1821_v34 }
 0x1bb   : > { %7671 = vmatmul.msk.bf16.gmra.mxu3 %vm735_vm0, %v10738_v60 }
 0x1bc   : > { %v1495_v21 = vpop.f32.mrf.mxu2 }
 0x1bd   : > { %v10741_v61 = vadd.f32 %v1495_v21, %v1456_v1  ;;  %v1458_v45 = vpop.f32.mrf.mxu0  ;;  %2048 = vmatmul.bf16.gmra.mxu1 %v10736_v33  ;;  %v1823_v1 = vand.u32 255, %v1799_v32 }
 0x1be   : > { %v1422_v28 = vpop.f32.mrf.mxu3 }
 0x1bf   : > { %v10747_v43 = vadd.f32 %v1422_v28, %v1383_v0  ;;  %v1847_v30 = vcvt.s32.f32 %v1823_v1  ;;  %v10756_v28 = vpack.c.bf16 %v1846_v19, %v1844_v52  ;;  %v1800_v1 = vunpack.c.2.s8 %v7546_v63 }
 0x1c0   : > { %v1803_v52 = vunpack.c.3.s8 %v7547_v41 }
 0x1c1   : > { %v10758_v40 = vpack.c.bf16 %v1847_v30, %v1845_v39  ;;  %v1802_v30 = vunpack.c.3.s8 %v7546_v63  ;;  %v1801_v39 = vunpack.c.2.s8 %v7547_v41 }
 0x1c2   : > { %v1385_v21 = vpop.f32.mrf.mxu1  ;;  %v1827_v41 = vand.u32 255, %v1803_v52 }
 0x1c3   : > { %v1826_v63 = vand.u32 255, %v1802_v30  ;;  %v8875_v30 = vld [vmem:[%s13959_s1 + $0x4d4] sm:$0xf0] }
 0x1c4   : > { %v1497_v50 = vpop.f32.mrf.mxu2 }
 0x1c5   : > { %v10749_v24 = vadd.f32 %v1497_v50, %v1458_v45  ;;  %v1461_v44 = vpop.f32.mrf.mxu0  ;;  %v7764_v50 = vld [vmem:[%s13959_s1 + $0x4f0] sm:$0xf]  ;;  %v1850_v52 = vcvt.s32.f32 %v1826_v63 }
 0x1c6   : > { %v1424_v15 = vpop.f32.mrf.mxu3  ;;  %v10769_v19 = vor.u32 %v8879_v29, %v7764_v50  ;;  %v1825_v29 = vand.u32 255, %v1801_v39 }
 0x1c7   : > { %v10754_v0 = vadd.f32 %v1424_v15, %v1385_v21  ;;  %v1824_v15 = vand.u32 255, %v1800_v1 }
 0x1c8   : > { %2126 = vmatmul.bf16.gmra.mxu0 %v10736_v33  ;;  %14319 = vst [vmem:[#allocation137_spill] sm:$0xff] %v10769_v19  ;;  %2360 = vmatpush.bf16.msrb.mxu1 %v10769_v19 }
 0x1c9   : > { %7677 = vmatmul.msk.bf16.gmra.mxu2 %vm735_vm0, %v10738_v60 }
 0x1ca   : > { %v1634_v45 = vpop.f32.mrf.mxu1 }
 0x1cb   : > { %v1635_v34 = vadd.f32 %v1634_v45, %v10466_v53  ;;  %7672 = vmatmul.msk.bf16.gmra.mxu3 %vm735_vm0, %v10758_v40  ;;  %v7756_v53 = vld [vmem:[%s13959_s1 + $0x4e0] sm:$0xf] }
 0x1cc   : > { %v1500_v17 = vpop.f32.mrf.mxu2 }
 0x1cd   : > { %v10760_v32 = vadd.f32 %v1500_v17, %v1461_v44  ;;  %v1463_v47 = vpop.f32.mrf.mxu0  ;;  %2053 = vmatmul.bf16.gmra.mxu1 %v10756_v28  ;;  %v8877_v44 = vld [vmem:[%s13959_s1 + $0x4e4] sm:$0xf0] }
 0x1ce   : > { %v1673_v21 = vpop.f32.mrf.mxu3  ;;  %v10781_v17 = vor.u32 %v8877_v44, %v7756_v53  ;;  %v1849_v53 = vcvt.s32.f32 %v1825_v29  ;;  %v1851_v44 = vcvt.s32.f32 %v1827_v41 }
 0x1cf   : > { %v10783_v45 = vadd.f32 %v1673_v21, %v1635_v34  ;;  %v7748_v34 = vld [vmem:[%s13959_s1 + $0x4d0] sm:$0xf] }
 0x1d0   : > { %14320 = vst [vmem:[#allocation138_spill] sm:$0xff] %v10781_v17  ;;  %2361 = vmatpush.bf16.msrb.mxu1 %v10781_v17  ;;  %v10796_v39 = vor.u32 %v8875_v30, %v7748_v34  ;;  %v10820_v29 = vpack.c.bf16 %v1851_v44, %v1849_v53  ;;  %v7796_v53 = vld [vmem:[%s13959_s1 + $0x530] sm:$0xf] }
 0x1d1   : > { %14321 = vst [vmem:[#allocation139_spill] sm:$0xff] %v10783_v45 }
 0x1d2   : > { %v1636_v19 = vpop.f32.mrf.mxu1  ;;  %14322 = vst [vmem:[#allocation140_spill] sm:$0xff] %v10796_v39 }
 0x1d3   : > { %v1637_v22 = vadd.f32 %v1636_v19, %v10491_v26  ;;  %v10806_v26 = vld [vmem:[%s9415_s25 + $0x88] sm:$0xff] }
 0x1d4   : > { %v1502_v50 = vpop.f32.mrf.mxu2  ;;  %2362 = vmatpush.bf16.msrb.mxu1 %v10796_v39  ;;  %v8873_v19 = vld [vmem:[%s13959_s1 + $0x4c4] sm:$0xf0]  ;;  %v1805_v3 = vunpack.c.0.s8 %v10806_v26 }
 0x1d5   : > { %v10785_v11 = vadd.f32 %v1502_v50, %v1463_v47  ;;  %v1712_v49 = vpop.f32.mrf.mxu0  ;;  %v1848_v47 = vcvt.s32.f32 %v1824_v15 }
 0x1d6   : > { %v1713_v1 = vadd.f32 %v1712_v49, %v10493_v9  ;;  %v10802_v49 = vld [vmem:[%s9415_s25 + $0x80] sm:$0xff]  ;;  %v1675_v21 = vpop.f32.mrf.mxu3 }
 0x1d7   : > { %v7740_v9 = vld [vmem:[%s13959_s1 + $0x4c0] sm:$0xf]  ;;  %v10816_v50 = vadd.f32 %v1675_v21, %v1637_v22  ;;  %v10818_v63 = vpack.c.bf16 %v1850_v52, %v1848_v47  ;;  %v1804_v17 = vunpack.c.0.s8 %v10802_v49  ;;  %v1806_v45 = vunpack.c.1.s8 %v10802_v49  ;;  %v7732_v52 = vld [vmem:[%s13959_s1 + $0x4b0] sm:$0xf] }
 0x1d8   : > { %2131 = vmatmul.bf16.gmra.mxu0 %v10756_v28  ;;  %v10814_v15 = vor.u32 %v8873_v19, %v7740_v9  ;;  %v1807_v9 = vunpack.c.1.s8 %v10806_v26 }
 0x1d9   : > { %7678 = vmatmul.msk.bf16.gmra.mxu2 %vm735_vm0, %v10758_v40  ;;  %14324 = vst [vmem:[#allocation142_spill] sm:$0xff] %v10816_v50 }
 0x1da   : > { %14323 = vst [vmem:[#allocation141_spill] sm:$0xff] %v10814_v15  ;;  %v1639_v34 = vpop.f32.mrf.mxu1  ;;  %2363 = vmatpush.bf16.msrb.mxu1 %v10814_v15 }
 0x1db   : > { %v1640_v22 = vadd.f32 %v1639_v34, %v10546_v56  ;;  %v8887_v56 = vld [vmem:[%s13959_s1 + $0x534] sm:$0xf0]  ;;  %7673 = vmatmul.msk.bf16.gmra.mxu3 %vm735_vm0, %v10820_v29  ;;  %v1830_v34 = vand.u32 255, %v1806_v45 }
 0x1dc   : > { %v1751_v41 = vpop.f32.mrf.mxu2  ;;  %v10854_v19 = vor.u32 %v8887_v56, %v7796_v53  ;;  %v8869_v53 = vld [vmem:[%s13959_s1 + $0x4a4] sm:$0xf0] }
 0x1dd   : > { %v10822_v30 = vadd.f32 %v1751_v41, %v1713_v1  ;;  %v1714_v39 = vpop.f32.mrf.mxu0  ;;  %v8871_v1 = vld [vmem:[%s13959_s1 + $0x4b4] sm:$0xf0]  ;;  %2058 = vmatmul.bf16.gmra.mxu1 %v10818_v63  ;;  %v1828_v41 = vand.u32 255, %v1804_v17  ;;  %v7788_v17 = vld [vmem:[%s13959_s1 + $0x520] sm:$0xf] }
 0x1de   : > { %v1715_v47 = vadd.f32 %v1714_v39, %v10552_v10  ;;  %v10839_v44 = vor.u32 %v8871_v1, %v7732_v52  ;;  %v8878_v10 = vld [vmem:[%s13959_s1 + $0x4f4] sm:$0xf]  ;;  %v7766_v39 = vld [vmem:[%s13959_s1 + $0x4f8] sm:$0xf0]  ;;  %14327 = vst [vmem:[#allocation145_spill] sm:$0xff] %v10854_v19  ;;  %v1829_v52 = vand.u32 255, %v1805_v3  ;;  %2403 = vmatpush.bf16.msrb.mxu3 %v10854_v19  ;;  %v1678_v45 = vpop.f32.mrf.mxu3 }
 0x1df   : > { %14325 = vst [vmem:[#allocation143_spill] sm:$0xff] %v10822_v30  ;;  %v10856_v21 = vor.u32 %v8878_v10, %v7766_v39  ;;  %v7724_v1 = vld [vmem:[%s13959_s1 + $0x4a0] sm:$0xf]  ;;  %v8885_v56 = vld [vmem:[%s13959_s1 + $0x524] sm:$0xf0] }
 0x1e0   : > { %14326 = vst [vmem:[#allocation144_spill] sm:$0xff] %v10839_v44  ;;  %2364 = vmatpush.bf16.msrb.mxu1 %v10839_v44  ;;  %v10870_v3 = vor.u32 %v8869_v53, %v7724_v1  ;;  %v8876_v10 = vld [vmem:[%s13959_s1 + $0x4e4] sm:$0xf]  ;;  %v7758_v39 = vld [vmem:[%s13959_s1 + $0x4e8] sm:$0xf0]  ;;  %v10881_v44 = vadd.f32 %v1678_v45, %v1640_v22  ;;  %v10883_v19 = vor.u32 %v8885_v56, %v7788_v17  ;;  %v1853_v56 = vcvt.s32.f32 %v1829_v52 }
 0x1e1   : > { %14328 = vst [vmem:[#allocation146_spill] sm:$0xff] %v10856_v21  ;;  %2438 = vmatpush.bf16.msrb.mxu0 %v10856_v21  ;;  %v1831_v21 = vand.u32 255, %v1807_v9  ;;  %v10885_v1 = vor.u32 %v8876_v10, %v7758_v39  ;;  %v7716_v22 = vld [vmem:[%s13959_s1 + $0x490] sm:$0xf]  ;;  %v1852_v9 = vcvt.s32.f32 %v1828_v41  ;;  %v7750_v45 = vld [vmem:[%s13959_s1 + $0x4d8] sm:$0xf0] }
 0x1e2   : > { %14329 = vst [vmem:[#allocation147_spill] sm:$0xff] %v10870_v3  ;;  %v1641_v53 = vpop.f32.mrf.mxu1  ;;  %2404 = vmatpush.bf16.msrb.mxu3 %v10883_v19  ;;  %v8886_v39 = vld [vmem:[%s13959_s1 + $0x534] sm:$0xf]  ;;  %v7708_v52 = vld [vmem:[%s13959_s1 + $0x480] sm:$0xf] }
 0x1e3   : > { %14330 = vst [vmem:[#allocation148_spill] sm:$0xff] %v10883_v19  ;;  %v1642_v37 = vadd.f32 %v1641_v53, %v10616_v38  ;;  %v1854_v38 = vcvt.s32.f32 %v1830_v34  ;;  %v1855_v10 = vcvt.s32.f32 %v1831_v21  ;;  %v7798_v53 = vld [vmem:[%s13959_s1 + $0x538] sm:$0xf0] }
 0x1e4   : > { %v1753_v15 = vpop.f32.mrf.mxu2  ;;  %14331 = vst [vmem:[#allocation149_spill] sm:$0xff] %v10885_v1  ;;  %2365 = vmatpush.bf16.msrb.mxu1 %v10870_v3  ;;  %v10928_v21 = vor.u32 %v8886_v39, %v7798_v53  ;;  %v8872_v39 = vld [vmem:[%s13959_s1 + $0x4c4] sm:$0xf]  ;;  %v7742_v53 = vld [vmem:[%s13959_s1 + $0x4c8] sm:$0xf0] }
 0x1e5   : > { %v10887_v30 = vadd.f32 %v1753_v15, %v1715_v47  ;;  %v1717_v50 = vpop.f32.mrf.mxu0  ;;  %2439 = vmatpush.bf16.msrb.mxu0 %v10885_v1  ;;  %v8867_v15 = vld [vmem:[%s13959_s1 + $0x494] sm:$0xf0]  ;;  %v7780_v47 = vld [vmem:[%s13959_s1 + $0x510] sm:$0xf] }
 0x1e6   : > { %v1718_v2 = vadd.f32 %v1717_v50, %v10622_v54  ;;  %v10903_v17 = vor.u32 %v8867_v15, %v7716_v22  ;;  %v8883_v54 = vld [vmem:[%s13959_s1 + $0x514] sm:$0xf0]  ;;  %v8874_v50 = vld [vmem:[%s13959_s1 + $0x4d4] sm:$0xf]  ;;  %14335 = vst [vmem:[#allocation153_spill] sm:$0xff] %v10928_v21  ;;  %2481 = vmatpush.bf16.msrb.mxu2 %v10928_v21 }
 0x1e7   : > { %v10915_v41 = vor.u32 %v8883_v54, %v7780_v47  ;;  %v10917_v34 = vor.u32 %v8874_v50, %v7750_v45  ;;  %v8865_v22 = vld [vmem:[%s13959_s1 + $0x484] sm:$0xf0]  ;;  %v7772_v15 = vld [vmem:[%s13959_s1 + $0x500] sm:$0xf]  ;;  %v1680_v47 = vpop.f32.mrf.mxu3  ;;  %v10941_v54 = vpack.c.bf16 %v1854_v38, %v1852_v9  ;;  %v10957_v9 = vpack.c.bf16 %v1855_v10, %v1853_v56 }
 0x1e8   : > { %14332 = vst [vmem:[#allocation150_spill] sm:$0xff] %v10903_v17  ;;  %2136 = vmatmul.bf16.gmra.mxu0 %v10818_v63  ;;  %2366 = vmatpush.bf16.msrb.mxu1 %v10903_v17  ;;  %v10944_v50 = vor.u32 %v8865_v22, %v7708_v52  ;;  %v8881_v45 = vld [vmem:[%s13959_s1 + $0x504] sm:$0xf0]  ;;  %v10955_v17 = vadd.f32 %v1680_v47, %v1642_v37  ;;  %v8870_v37 = vld [vmem:[%s13959_s1 + $0x4b4] sm:$0xf]  ;;  %v1808_v56 = vunpack.c.2.s8 %v10802_v49  ;;  %v1810_v10 = vunpack.c.3.s8 %v10802_v49 }
 0x1e9   : > { %14333 = vst [vmem:[#allocation151_spill] sm:$0xff] %v10915_v41  ;;  %7679 = vmatmul.msk.bf16.gmra.mxu2 %vm735_vm0, %v10820_v29  ;;  %2405 = vmatpush.bf16.msrb.mxu3 %v10915_v41  ;;  %v10959_v3 = vor.u32 %v8881_v45, %v7772_v15  ;;  %v10961_v52 = vor.u32 %v8872_v39, %v7742_v53  ;;  %v7726_v49 = vld [vmem:[%s13959_s1 + $0x4a8] sm:$0xf0]  ;;  %v8884_v47 = vld [vmem:[%s13959_s1 + $0x524] sm:$0xf] }
 0x1ea   : > { %14334 = vst [vmem:[#allocation152_spill] sm:$0xff] %v10917_v34  ;;  %2440 = vmatpush.bf16.msrb.mxu0 %v10917_v34  ;;  %v1644_v22 = vpop.f32.mrf.mxu1  ;;  %v1832_v39 = vand.u32 255, %v1808_v56  ;;  %v1834_v53 = vand.u32 255, %v1810_v10 }
 0x1eb   : > { %14336 = vst [vmem:[#allocation154_spill] sm:$0xff] %v10944_v50  ;;  %v1645_v21 = vadd.f32 %v1644_v22, %v10653_v59  ;;  %7674 = vmatmul.msk.bf16.gmra.mxu3 %vm735_vm0, %v10957_v9  ;;  %v1811_v59 = vunpack.c.3.s8 %v10806_v26 }
 0x1ec   : > { %v1756_v38 = vpop.f32.mrf.mxu2  ;;  %14337 = vst [vmem:[#allocation155_spill] sm:$0xff] %v10959_v3  ;;  %2367 = vmatpush.bf16.msrb.mxu1 %v10944_v50 }
 0x1ed   : > { %14338 = vst [vmem:[#allocation156_spill] sm:$0xff] %v10961_v52  ;;  %v10963_v34 = vadd.f32 %v1756_v38, %v1718_v2  ;;  %v1719_v1 = vpop.f32.mrf.mxu0  ;;  %2406 = vmatpush.bf16.msrb.mxu3 %v10959_v3  ;;  %v7734_v2 = vld [vmem:[%s13959_s1 + $0x4b8] sm:$0xf0]  ;;  %2063 = vmatmul.bf16.gmra.mxu1 %v10941_v54  ;;  %v1835_v50 = vand.u32 255, %v1811_v59  ;;  %v1856_v59 = vcvt.s32.f32 %v1832_v39 }
 0x1ee   : > { %v1720_v41 = vadd.f32 %v1719_v1, %v10657_v36  ;;  %2441 = vmatpush.bf16.msrb.mxu0 %v10961_v52  ;;  %v10978_v15 = vor.u32 %v8870_v37, %v7734_v2  ;;  %v1809_v36 = vunpack.c.2.s8 %v10806_v26  ;;  %v8868_v1 = vld [vmem:[%s13959_s1 + $0x4a4] sm:$0xf]  ;;  %v7790_v26 = vld [vmem:[%s13959_s1 + $0x528] sm:$0xf0] }
 0x1ef   : > { %v1683_v45 = vpop.f32.mrf.mxu3  ;;  %v10995_v38 = vor.u32 %v8868_v1, %v7726_v49  ;;  %v1859_v1 = vcvt.s32.f32 %v1835_v50  ;;  %v8880_v50 = vld [vmem:[%s13959_s1 + $0x504] sm:$0xf] }
 0x1f0   : > { %14339 = vst [vmem:[#allocation157_spill] sm:$0xff] %v10978_v15  ;;  %v11000_v22 = vadd.f32 %v1683_v45, %v1645_v21  ;;  %v1833_v2 = vand.u32 255, %v1809_v36  ;;  %v8866_v21 = vld [vmem:[%s13959_s1 + $0x494] sm:$0xf]  ;;  %v7718_v36 = vld [vmem:[%s13959_s1 + $0x498] sm:$0xf0] }
 0x1f1   : > { %14340 = vst [vmem:[#allocation158_spill] sm:$0xff] %v10995_v38  ;;  %v7710_v45 = vld [vmem:[%s13959_s1 + $0x488] sm:$0xf0] }
 0x1f2   : > { %2442 = vmatpush.bf16.msrb.mxu0 %v10978_v15  ;;  %v11002_v15 = vor.u32 %v8884_v47, %v7790_v26  ;;  %v1646_v52 = vpop.f32.mrf.mxu1  ;;  %v8864_v47 = vld [vmem:[%s13959_s1 + $0x484] sm:$0xf]  ;;  %v7774_v26 = vld [vmem:[%s13959_s1 + $0x508] sm:$0xf0] }
 0x1f3   : > { %v1647_v56 = vadd.f32 %v1646_v52, %v10696_v16  ;;  %v11019_v16 = vor.u32 %v8866_v21, %v7718_v36  ;;  %v1857_v52 = vcvt.s32.f32 %v1833_v2 }
 0x1f4   : > { %v1758_v37 = vpop.f32.mrf.mxu2  ;;  %14341 = vst [vmem:[#allocation159_spill] sm:$0xff] %v11002_v15  ;;  %2482 = vmatpush.bf16.msrb.mxu2 %v11002_v15 }
 0x1f5   : > { %v11004_v3 = vadd.f32 %v1758_v37, %v1720_v41  ;;  %v1722_v19 = vpop.f32.mrf.mxu0  ;;  %v8882_v41 = vld [vmem:[%s13959_s1 + $0x514] sm:$0xf]  ;;  %14342 = vst [vmem:[#allocation160_spill] sm:$0xff] %v11019_v16  ;;  %v11049_v21 = vpack.c.bf16 %v1859_v1, %v1857_v52 }
 0x1f6   : > { %v1723_v10 = vadd.f32 %v1722_v19, %v10701_v42  ;;  %2443 = vmatpush.bf16.msrb.mxu0 %v10995_v38  ;;  %v7782_v42 = vld [vmem:[%s13959_s1 + $0x518] sm:$0xf0]  ;;  %v1858_v19 = vcvt.s32.f32 %v1834_v53  ;;  %v11040_v53 = vor.u32 %v8864_v47, %v7710_v45 }
 0x1f7   : > { %v11025_v49 = vor.u32 %v8882_v41, %v7782_v42  ;;  %v1685_v39 = vpop.f32.mrf.mxu3  ;;  %v11051_v41 = vor.u32 %v8880_v50, %v7774_v26 }
 0x1f8   : > { %2141 = vmatmul.bf16.gmra.mxu0 %v10941_v54  ;;  %14344 = vst [vmem:[#allocation162_spill] sm:$0xff] %v11040_v53  ;;  %v11045_v37 = vadd.f32 %v1685_v39, %v1647_v56  ;;  %v11047_v2 = vpack.c.bf16 %v1858_v19, %v1856_v59 }
 0x1f9   : > { %14343 = vst [vmem:[#allocation161_spill] sm:$0xff] %v11025_v49  ;;  %7680 = vmatmul.msk.bf16.gmra.mxu2 %vm735_vm0, %v10957_v9 }
 0x1fa   : > { %2444 = vmatpush.bf16.msrb.mxu0 %v11019_v16  ;;  %2483 = vmatpush.bf16.msrb.mxu2 %v11025_v49  ;;  %14345 = vst [vmem:[#allocation163_spill] sm:$0xff] %v11051_v41  ;;  %v1649_v42 = vpop.f32.mrf.mxu1 }
 0x1fb   : > { %v1650_v47 = vadd.f32 %v1649_v42, %v10709_v58  ;;  %7675 = vmatmul.msk.bf16.gmra.mxu3 %vm735_vm0, %v11049_v21 }
 0x1fc   : > { %v1761_v36 = vpop.f32.mrf.mxu2 }
 0x1fd   : > { %v11053_v16 = vadd.f32 %v1761_v36, %v1723_v10  ;;  %v1724_v38 = vpop.f32.mrf.mxu0  ;;  %2068 = vmatmul.bf16.gmra.mxu1 %v11047_v2 }
 0x1fe   : > { %v1725_v45 = vadd.f32 %v1724_v38, %v10711_v13  ;;  %2445 = vmatpush.bf16.msrb.mxu0 %v11040_v53  ;;  %2484 = vmatpush.bf16.msrb.mxu2 %v11051_v41 }
 0x1ff   : > { %v1688_v56 = vpop.f32.mrf.mxu3 }
 0x200   : > { %v11062_v59 = vadd.f32 %v1688_v56, %v1650_v47 }
 0x202   : > { %v1651_v10 = vpop.f32.mrf.mxu1 }
 0x203   : > { %v1652_v58 = vadd.f32 %v1651_v10, %v10716_v55 }
 0x204   : > { %v1763_v19 = vpop.f32.mrf.mxu2 }
 0x205   : > { %v11064_v52 = vadd.f32 %v1763_v19, %v1725_v45  ;;  %v1727_v1 = vpop.f32.mrf.mxu0 }
 0x206   : > { %v1728_v13 = vadd.f32 %v1727_v1, %v10722_v6 }
 0x207   : > { %v1690_v38 = vpop.f32.mrf.mxu3 }
 0x208   : > { %2146 = vmatmul.bf16.gmra.mxu0 %v11047_v2  ;;  %v11071_v50 = vadd.f32 %v1690_v38, %v1652_v58 }
 0x209   : > { %7681 = vmatmul.msk.bf16.gmra.mxu2 %vm735_vm0, %v11049_v21 }
 0x20a   : > { %v1654_v26 = vpop.f32.mrf.mxu1 }
 0x20b   : > { %v1655_v47 = vadd.f32 %v1654_v26, %v10727_v4  ;;  %7802 = vmatmul.msk.bf16.vlgmr.msrb.gmra.mxu3 %vm735_vm0, %v10720_v62 }
 0x20c   : > { %v1766_v39 = vpop.f32.mrf.mxu2 }
 0x20d   : > { %v11073_v36 = vadd.f32 %v1766_v39, %v1728_v13  ;;  %v1729_v42 = vpop.f32.mrf.mxu0  ;;  %2368 = vmatmul.bf16.vlgmr.msrb.gmra.mxu1 %v10718_v25 }
 0x20e   : > { %v1730_v45 = vadd.f32 %v1729_v42, %v10729_v20 }
 0x20f   : > { %v1693_v55 = vpop.f32.mrf.mxu3 }
 0x210   : > { %v11080_v6 = vadd.f32 %v1693_v55, %v1655_v47 }
 0x212   : > { %v1656_v19 = vpop.f32.mrf.mxu1 }
 0x213   : > { %v1657_v58 = vadd.f32 %v1656_v19, %v10734_v8 }
 0x214   : > { %v1768_v56 = vpop.f32.mrf.mxu2 }
 0x215   : > { %v11082_v10 = vadd.f32 %v1768_v56, %v1730_v45  ;;  %v1732_v1 = vpop.f32.mrf.mxu0 }
 0x216   : > { %v1733_v13 = vadd.f32 %v1732_v1, %v10741_v61 }
 0x217   : > { %v1695_v4 = vpop.f32.mrf.mxu3 }
 0x218   : > { %2446 = vmatmul.bf16.vlgmr.msrb.gmra.mxu0 %v10718_v25  ;;  %v11089_v20 = vadd.f32 %v1695_v4, %v1657_v58 }
 0x219   : > { %7808 = vmatmul.msk.bf16.vlgmr.msrb.gmra.mxu2 %vm735_vm0, %v10720_v62 }
 0x21a   : > { %v1659_v39 = vpop.f32.mrf.mxu1 }
 0x21b   : > { %v1660_v47 = vadd.f32 %v1659_v39, %v10747_v43  ;;  %7803 = vmatmul.msk.bf16.gmra.mxu3 %vm735_vm0, %v10738_v60 }
 0x21c   : > { %v1771_v38 = vpop.f32.mrf.mxu2 }
 0x21d   : > { %v11091_v26 = vadd.f32 %v1771_v38, %v1733_v13  ;;  %v1734_v42 = vpop.f32.mrf.mxu0  ;;  %2373 = vmatmul.bf16.gmra.mxu1 %v10736_v33 }
 0x21e   : > { %v1735_v45 = vadd.f32 %v1734_v42, %v10749_v24 }
 0x21f   : > { %v1698_v25 = vpop.f32.mrf.mxu3 }
 0x220   : > { %v11098_v8 = vadd.f32 %v1698_v25, %v1660_v47 }
 0x222   : > { %v1661_v61 = vpop.f32.mrf.mxu1 }
 0x223   : > { %v1662_v19 = vadd.f32 %v1661_v61, %v10754_v0  ;;  %v7902_v0 = vld [vmem:[%s13959_s1 + $0x2b0] sm:$0xf] }
 0x224   : > { %v1773_v62 = vpop.f32.mrf.mxu2 }
 0x225   : > { %v11100_v55 = vadd.f32 %v1773_v62, %v1735_v45  ;;  %v1737_v56 = vpop.f32.mrf.mxu0 }
 0x226   : > { %v1738_v1 = vadd.f32 %v1737_v56, %v10760_v32 }
 0x227   : > { %v1700_v24 = vpop.f32.mrf.mxu3 }
 0x228   : > { %2451 = vmatmul.bf16.gmra.mxu0 %v10736_v33  ;;  %v11107_v43 = vadd.f32 %v1700_v24, %v1662_v19  ;;  %v8903_v33 = vld [vmem:[%s13959_s1 + $0x2b4] sm:$0xf0] }
 0x229   : > { %7809 = vmatmul.msk.bf16.gmra.mxu2 %vm735_vm0, %v10738_v60  ;;  %v11118_v32 = vor.u32 %v8903_v33, %v7902_v0  ;;  %v8901_v60 = vld [vmem:[%s13959_s1 + $0x2a4] sm:$0xf0]  ;;  %v8899_v24 = vld [vmem:[%s13959_s1 + $0x294] sm:$0xf0] }
 0x22a   : > { %v2044_v13 = vpop.f32.mrf.mxu1 }
 0x22b   : > { %14346 = vst [vmem:[#allocation164_spill] sm:$0xff] %v11118_v32  ;;  %7804 = vmatmul.msk.bf16.gmra.mxu3 %vm735_vm0, %v10758_v40  ;;  %2794 = vmatpush.bf16.msra.mxu1 %v11118_v32 }
 0x22c   : > { %v1776_v58 = vpop.f32.mrf.mxu2 }
 0x22d   : > { %v11109_v4 = vadd.f32 %v1776_v58, %v1738_v1  ;;  %v1739_v38 = vpop.f32.mrf.mxu0  ;;  %2378 = vmatmul.bf16.gmra.mxu1 %v10756_v28  ;;  %v7886_v1 = vld [vmem:[%s13959_s1 + $0x290] sm:$0xf] }
 0x22e   : > { %v1740_v39 = vadd.f32 %v1739_v38, %v10785_v11  ;;  %v7894_v11 = vld [vmem:[%s13959_s1 + $0x2a0] sm:$0xf]  ;;  %v11144_v58 = vor.u32 %v8899_v24, %v7886_v1  ;;  %v8902_v1 = vld [vmem:[%s13959_s1 + $0x2b4] sm:$0xf]  ;;  %v7904_v24 = vld [vmem:[%s13959_s1 + $0x2b8] sm:$0xf0] }
 0x22f   : > { %v2083_v42 = vpop.f32.mrf.mxu3  ;;  %v11130_v47 = vor.u32 %v8901_v60, %v7894_v11 }
 0x230   : > { %v2084_v45 = vadd.f32 %v2083_v42, %v2044_v13  ;;  %14348 = vst [vmem:[#allocation166_spill] sm:$0xff] %v11144_v58  ;;  %v8897_v13 = vld [vmem:[%s13959_s1 + $0x284] sm:$0xf0]  ;;  %v7870_v42 = vld [vmem:[%s13959_s1 + $0x270] sm:$0xf] }
 0x231   : > { %14347 = vst [vmem:[#allocation165_spill] sm:$0xff] %v11130_v47  ;;  %2795 = vmatpush.bf16.msra.mxu1 %v11130_v47 }
 0x232   : > { %v2046_v62 = vpop.f32.mrf.mxu1  ;;  %v11136_v19 = vadd.f32 %v2084_v45, %v10143_v35  ;;  %v7878_v35 = vld [vmem:[%s13959_s1 + $0x280] sm:$0xf]  ;;  %v8895_v45 = vld [vmem:[%s13959_s1 + $0x274] sm:$0xf0] }
 0x234   : > { %v1778_v25 = vpop.f32.mrf.mxu2 }
 0x235   : > { %v11132_v61 = vadd.f32 %v1778_v25, %v1740_v39  ;;  %v2122_v56 = vpop.f32.mrf.mxu0  ;;  %2796 = vmatpush.bf16.msra.mxu1 %v11144_v58  ;;  %v11156_v39 = vor.u32 %v8897_v13, %v7878_v35  ;;  %v7934_v25 = vld [vmem:[%s13959_s1 + $0x2f0] sm:$0xf]  ;;  %v11190_v35 = vor.u32 %v8902_v1, %v7904_v24  ;;  %v7862_v13 = vld [vmem:[%s13959_s1 + $0x260] sm:$0xf] }
 0x237   : > { %v2085_v38 = vpop.f32.mrf.mxu3  ;;  %14349 = vst [vmem:[#allocation167_spill] sm:$0xff] %v11156_v39  ;;  %2872 = vmatpush.bf16.msra.mxu0 %v11190_v35 }
 0x238   : > { %2456 = vmatmul.bf16.gmra.mxu0 %v10756_v28  ;;  %v2086_v0 = vadd.f32 %v2085_v38, %v2046_v62  ;;  %14352 = vst [vmem:[#allocation170_spill] sm:$0xff] %v11190_v35  ;;  %v8893_v38 = vld [vmem:[%s13959_s1 + $0x264] sm:$0xf0] }
 0x239   : > { %7810 = vmatmul.msk.bf16.gmra.mxu2 %vm735_vm0, %v10758_v40  ;;  %2797 = vmatpush.bf16.msra.mxu1 %v11156_v39 }
 0x23a   : > { %v2049_v11 = vpop.f32.mrf.mxu1  ;;  %v11160_v40 = vadd.f32 %v2086_v0, %v10170_v23  ;;  %v8911_v23 = vld [vmem:[%s13959_s1 + $0x2f4] sm:$0xf0]  ;;  %v7926_v0 = vld [vmem:[%s13959_s1 + $0x2e0] sm:$0xf] }
 0x23b   : > { %7805 = vmatmul.msk.bf16.gmra.mxu3 %vm735_vm0, %v10820_v29 }
 0x23c   : > { %v2161_v33 = vpop.f32.mrf.mxu2 }
 0x23d   : > { %v2162_v28 = vadd.f32 %v2161_v33, %v2122_v56  ;;  %v2124_v60 = vpop.f32.mrf.mxu0  ;;  %v11174_v56 = vor.u32 %v8895_v45, %v7870_v42  ;;  %2383 = vmatmul.bf16.gmra.mxu1 %v10818_v63  ;;  %v8909_v42 = vld [vmem:[%s13959_s1 + $0x2e4] sm:$0xf0]  ;;  %v8900_v45 = vld [vmem:[%s13959_s1 + $0x2a4] sm:$0xf] }
 0x23e   : > { %v11215_v24 = vor.u32 %v8909_v42, %v7926_v0  ;;  %v8891_v0 = vld [vmem:[%s13959_s1 + $0x254] sm:$0xf0] }
 0x23f   : > { %v11172_v62 = vadd.f32 %v2162_v28, %v10172_v46  ;;  %14350 = vst [vmem:[#allocation168_spill] sm:$0xff] %v11174_v56  ;;  %v11188_v46 = vor.u32 %v8911_v23, %v7934_v25  ;;  %2798 = vmatpush.bf16.msra.mxu1 %v11174_v56  ;;  %v2088_v33 = vpop.f32.mrf.mxu3  ;;  %v11204_v28 = vor.u32 %v8893_v38, %v7862_v13  ;;  %v7896_v25 = vld [vmem:[%s13959_s1 + $0x2a8] sm:$0xf0]  ;;  %v8907_v42 = vld [vmem:[%s13959_s1 + $0x2d4] sm:$0xf0] }
 0x240   : > { %v2089_v23 = vadd.f32 %v2088_v33, %v2049_v11  ;;  %14354 = vst [vmem:[#allocation172_spill] sm:$0xff] %v11215_v24  ;;  %v11217_v56 = vor.u32 %v8900_v45, %v7896_v25  ;;  %v7854_v11 = vld [vmem:[%s13959_s1 + $0x250] sm:$0xf]  ;;  %v8898_v45 = vld [vmem:[%s13959_s1 + $0x294] sm:$0xf] }
 0x241   : > { %14351 = vst [vmem:[#allocation169_spill] sm:$0xff] %v11188_v46  ;;  %2837 = vmatpush.bf16.msra.mxu3 %v11188_v46  ;;  %v7888_v25 = vld [vmem:[%s13959_s1 + $0x298] sm:$0xf0] }
 0x242   : > { %14353 = vst [vmem:[#allocation171_spill] sm:$0xff] %v11204_v28  ;;  %v2051_v13 = vpop.f32.mrf.mxu1  ;;  %v11221_v35 = vadd.f32 %v2089_v23, %v10227_v12  ;;  %2873 = vmatpush.bf16.msra.mxu0 %v11217_v56  ;;  %v11237_v12 = vor.u32 %v8891_v0, %v7854_v11  ;;  %v8889_v0 = vld [vmem:[%s13959_s1 + $0x244] sm:$0xf0] }
 0x243   : > { %14355 = vst [vmem:[#allocation173_spill] sm:$0xff] %v11217_v56  ;;  %2799 = vmatpush.bf16.msra.mxu1 %v11204_v28 }
 0x244   : > { %v2163_v1 = vpop.f32.mrf.mxu2  ;;  %14356 = vst [vmem:[#allocation174_spill] sm:$0xff] %v11237_v12 }
 0x245   : > { %v2164_v38 = vadd.f32 %v2163_v1, %v2124_v60  ;;  %v2127_v39 = vpop.f32.mrf.mxu0  ;;  %2838 = vmatpush.bf16.msra.mxu3 %v11215_v24  ;;  %v7918_v60 = vld [vmem:[%s13959_s1 + $0x2d0] sm:$0xf]  ;;  %v8910_v1 = vld [vmem:[%s13959_s1 + $0x2f4] sm:$0xf] }
 0x246   : > { %v11249_v23 = vor.u32 %v8907_v42, %v7918_v60 }
 0x247   : > { %v11235_v33 = vadd.f32 %v2164_v38, %v10233_v5  ;;  %v11251_v5 = vor.u32 %v8898_v45, %v7888_v25  ;;  %v7936_v38 = vld [vmem:[%s13959_s1 + $0x2f8] sm:$0xf0]  ;;  %2800 = vmatpush.bf16.msra.mxu1 %v11237_v12  ;;  %v2090_v60 = vpop.f32.mrf.mxu3  ;;  %v8905_v45 = vld [vmem:[%s13959_s1 + $0x2c4] sm:$0xf0]  ;;  %v8896_v25 = vld [vmem:[%s13959_s1 + $0x284] sm:$0xf] }
 0x248   : > { %2461 = vmatmul.bf16.gmra.mxu0 %v10818_v63  ;;  %14357 = vst [vmem:[#allocation175_spill] sm:$0xff] %v11249_v23  ;;  %v11262_v11 = vor.u32 %v8910_v1, %v7936_v38  ;;  %v7846_v63 = vld [vmem:[%s13959_s1 + $0x240] sm:$0xf]  ;;  %v7880_v1 = vld [vmem:[%s13959_s1 + $0x288] sm:$0xf0]  ;;  %v2091_v38 = vadd.f32 %v2090_v60, %v2051_v13 }
 0x249   : > { %14358 = vst [vmem:[#allocation176_spill] sm:$0xff] %v11251_v5  ;;  %7811 = vmatmul.msk.bf16.gmra.mxu2 %vm735_vm0, %v10820_v29  ;;  %2839 = vmatpush.bf16.msra.mxu3 %v11249_v23  ;;  %v7910_v29 = vld [vmem:[%s13959_s1 + $0x2c0] sm:$0xf]  ;;  %v11276_v42 = vor.u32 %v8889_v0, %v7846_v63  ;;  %v8894_v13 = vld [vmem:[%s13959_s1 + $0x274] sm:$0xf] }
 0x24a   : > { %14359 = vst [vmem:[#allocation177_spill] sm:$0xff] %v11262_v11  ;;  %2874 = vmatpush.bf16.msra.mxu0 %v11251_v5  ;;  %2915 = vmatpush.bf16.msra.mxu2 %v11262_v11  ;;  %v11287_v28 = vor.u32 %v8905_v45, %v7910_v29  ;;  %v11289_v5 = vor.u32 %v8896_v25, %v7880_v1  ;;  %v2054_v63 = vpop.f32.mrf.mxu1  ;;  %v7872_v29 = vld [vmem:[%s13959_s1 + $0x278] sm:$0xf0]  ;;  %v7864_v60 = vld [vmem:[%s13959_s1 + $0x268] sm:$0xf0] }
 0x24b   : > { %14360 = vst [vmem:[#allocation178_spill] sm:$0xff] %v11276_v42  ;;  %2801 = vmatpush.bf16.msra.mxu1 %v11276_v42  ;;  %v11293_v11 = vadd.f32 %v2091_v38, %v10299_v18  ;;  %7806 = vmatmul.msk.bf16.gmra.mxu3 %vm735_vm0, %v10957_v9  ;;  %v11309_v18 = vor.u32 %v8894_v13, %v7872_v29  ;;  %v7928_v1 = vld [vmem:[%s13959_s1 + $0x2e8] sm:$0xf0] }
 0x24c   : > { %v2166_v12 = vpop.f32.mrf.mxu2  ;;  %14361 = vst [vmem:[#allocation179_spill] sm:$0xff] %v11287_v28 }
 0x24d   : > { %14362 = vst [vmem:[#allocation180_spill] sm:$0xff] %v11289_v5  ;;  %v2167_v0 = vadd.f32 %v2166_v12, %v2127_v39  ;;  %v2129_v56 = vpop.f32.mrf.mxu0  ;;  %2840 = vmatpush.bf16.msra.mxu3 %v11287_v28  ;;  %2388 = vmatmul.bf16.gmra.mxu1 %v10941_v54  ;;  %v8892_v12 = vld [vmem:[%s13959_s1 + $0x264] sm:$0xf] }
 0x24e   : > { %2875 = vmatpush.bf16.msra.mxu0 %v11289_v5  ;;  %14363 = vst [vmem:[#allocation181_spill] sm:$0xff] %v11309_v18  ;;  %v11321_v25 = vor.u32 %v8892_v12, %v7864_v60  ;;  %v8890_v12 = vld [vmem:[%s13959_s1 + $0x254] sm:$0xf] }
 0x24f   : > { %v11304_v39 = vadd.f32 %v2167_v0, %v10305_v7  ;;  %v8908_v7 = vld [vmem:[%s13959_s1 + $0x2e4] sm:$0xf]  ;;  %v2093_v45 = vpop.f32.mrf.mxu3 }
 0x250   : > { %14364 = vst [vmem:[#allocation182_spill] sm:$0xff] %v11321_v25  ;;  %v2094_v38 = vadd.f32 %v2093_v45, %v2054_v63  ;;  %v11326_v13 = vor.u32 %v8908_v7, %v7928_v1  ;;  %v7856_v63 = vld [vmem:[%s13959_s1 + $0x258] sm:$0xf0] }
 0x251   : > { %v7920_v7 = vld [vmem:[%s13959_s1 + $0x2d8] sm:$0xf0] }
 0x252   : > { %2876 = vmatpush.bf16.msra.mxu0 %v11309_v18  ;;  %14365 = vst [vmem:[#allocation183_spill] sm:$0xff] %v11326_v13  ;;  %v2056_v29 = vpop.f32.mrf.mxu1  ;;  %v11329_v5 = vadd.f32 %v2094_v38, %v10338_v14  ;;  %2916 = vmatpush.bf16.msra.mxu2 %v11326_v13  ;;  %v11345_v14 = vor.u32 %v8890_v12, %v7856_v63  ;;  %v7814_v63 = vld [vmem:[%s9415_s25 + $0x90] sm:$0xff] }
 0x254   : > { %v2168_v0 = vpop.f32.mrf.mxu2  ;;  %14366 = vst [vmem:[#allocation184_spill] sm:$0xff] %v11345_v14 }
 0x255   : > { %v2169_v42 = vadd.f32 %v2168_v0, %v2129_v56  ;;  %v2132_v18 = vpop.f32.mrf.mxu0  ;;  %v8906_v56 = vld [vmem:[%s13959_s1 + $0x2d4] sm:$0xf] }
 0x256   : > { %2877 = vmatpush.bf16.msra.mxu0 %v11321_v25  ;;  %v11351_v45 = vor.u32 %v8906_v56, %v7920_v7 }
 0x257   : > { %v11343_v60 = vadd.f32 %v2169_v42, %v10342_v51  ;;  %v8888_v51 = vld [vmem:[%s13959_s1 + $0x244] sm:$0xf]  ;;  %v7848_v42 = vld [vmem:[%s13959_s1 + $0x248] sm:$0xf0]  ;;  %v2095_v1 = vpop.f32.mrf.mxu3 }
 0x258   : > { %2466 = vmatmul.bf16.gmra.mxu0 %v10941_v54  ;;  %14367 = vst [vmem:[#allocation185_spill] sm:$0xff] %v11351_v45  ;;  %2917 = vmatpush.bf16.msra.mxu2 %v11351_v45  ;;  %v8904_v54 = vld [vmem:[%s13959_s1 + $0x2c4] sm:$0xf]  ;;  %v11366_v38 = vor.u32 %v8888_v51, %v7848_v42  ;;  %v2096_v0 = vadd.f32 %v2095_v1, %v2056_v29  ;;  %v7815_v45 = vld [vmem:[%s9415_s25 + $0x98] sm:$0xff]  ;;  %v2547_v42 = vunpack.c.0.s8 %v7814_v63  ;;  %v2549_v29 = vunpack.c.1.s8 %v7814_v63 }
 0x259   : > { %7812 = vmatmul.msk.bf16.gmra.mxu2 %vm735_vm0, %v10957_v9  ;;  %v7912_v9 = vld [vmem:[%s13959_s1 + $0x2c8] sm:$0xf0] }
 0x25a   : > { %2878 = vmatpush.bf16.msra.mxu0 %v11345_v14  ;;  %14368 = vst [vmem:[#allocation186_spill] sm:$0xff] %v11366_v38  ;;  %v11372_v56 = vor.u32 %v8904_v54, %v7912_v9  ;;  %v2059_v7 = vpop.f32.mrf.mxu1  ;;  %v11376_v13 = vadd.f32 %v2096_v0, %v10383_v27  ;;  %v2550_v54 = vunpack.c.1.s8 %v7815_v45  ;;  %v2571_v9 = vand.u32 255, %v2547_v42 }
 0x25b   : > { %7807 = vmatmul.msk.bf16.gmra.mxu3 %vm735_vm0, %v11049_v21 }
 0x25c   : > { %v2171_v12 = vpop.f32.mrf.mxu2  ;;  %14369 = vst [vmem:[#allocation187_spill] sm:$0xff] %v11372_v56  ;;  %2918 = vmatpush.bf16.msra.mxu2 %v11372_v56  ;;  %v2574_v28 = vand.u32 255, %v2550_v54  ;;  %v2595_v24 = vcvt.s32.f32 %v2571_v9 }
 0x25d   : > { %v2172_v14 = vadd.f32 %v2171_v12, %v2132_v18  ;;  %v2134_v25 = vpop.f32.mrf.mxu0  ;;  %2393 = vmatmul.bf16.gmra.mxu1 %v11047_v2  ;;  %v2548_v18 = vunpack.c.0.s8 %v7815_v45  ;;  %v2573_v12 = vand.u32 255, %v2549_v29 }
 0x25e   : > { %2879 = vmatpush.bf16.msra.mxu0 %v11366_v38  ;;  %v2598_v42 = vcvt.s32.f32 %v2574_v28  ;;  %v2551_v28 = vunpack.c.2.s8 %v7814_v63 }
 0x25f   : > { %v11381_v51 = vadd.f32 %v2172_v14, %v10387_v31  ;;  %v2098_v1 = vpop.f32.mrf.mxu3  ;;  %v2572_v38 = vand.u32 255, %v2548_v18  ;;  %v2597_v47 = vcvt.s32.f32 %v2573_v12 }
 0x260   : > { %v2099_v27 = vadd.f32 %v2098_v1, %v2059_v7 }
 0x261   : > { %v2596_v46 = vcvt.s32.f32 %v2572_v38  ;;  %v11395_v18 = vpack.c.bf16 %v2597_v47, %v2595_v24  ;;  %v2552_v47 = vunpack.c.2.s8 %v7815_v45  ;;  %v2575_v38 = vand.u32 255, %v2551_v28 }
 0x262   : > { %v2061_v56 = vpop.f32.mrf.mxu1  ;;  %v11387_v14 = vadd.f32 %v2099_v27, %v10396_v57 }
 0x264   : > { %v2173_v0 = vpop.f32.mrf.mxu2 }
 0x265   : > { %v2174_v23 = vadd.f32 %v2173_v0, %v2134_v25  ;;  %v2137_v31 = vpop.f32.mrf.mxu0  ;;  %v11397_v25 = vpack.c.bf16 %v2598_v42, %v2596_v46  ;;  %v2554_v46 = vunpack.c.3.s8 %v7815_v45 }
 0x267   : > { %v11390_v58 = vadd.f32 %v2174_v23, %v10398_v48  ;;  %v2100_v7 = vpop.f32.mrf.mxu3  ;;  %v14371_v23 = vld [vmem:[#allocation102_spill] sm:$0xff]  ;;  %v2578_v42 = vand.u32 255, %v2554_v46 }
 0x268   : > { %2471 = vmatmul.bf16.gmra.mxu0 %v11047_v2  ;;  %v2101_v29 = vadd.f32 %v2100_v7, %v2061_v56  ;;  %v14373_v2 = vld [vmem:[#allocation103_spill] sm:$0xff] }
 0x269   : > { %14370 = vst [vmem:[#allocation188_spill] sm:$0xff] %v11390_v58  ;;  %7813 = vmatmul.msk.bf16.gmra.mxu2 %vm735_vm0, %v11049_v21  ;;  %v2553_v21 = vunpack.c.3.s8 %v7814_v63  ;;  %v2599_v63 = vcvt.s32.f32 %v2575_v38  ;;  %v2602_v28 = vcvt.s32.f32 %v2578_v42  ;;  %v7817_v38 = vld [vmem:[%s9415_s25 + $0xa8] sm:$0xff] }
 0x26a   : > { %v2064_v54 = vpop.f32.mrf.mxu1  ;;  %v11400_v27 = vadd.f32 %v2101_v29, %v14371_v23  ;;  %v14381_v42 = vld [vmem:[#allocation107_spill] sm:$0xff] }
 0x26b   : > { %7940 = vmatmul.msk.bf16.vlgmr.msra.gmra.mxu3 %vm735_vm0, %v11397_v25  ;;  %v2577_v12 = vand.u32 255, %v2553_v21 }
 0x26c   : > { %v2176_v57 = vpop.f32.mrf.mxu2  ;;  %14372 = vst [vmem:[#allocation102_spill] sm:$0xff] %v11400_v27 }
 0x26d   : > { %v2177_v1 = vadd.f32 %v2176_v57, %v2137_v31  ;;  %v2139_v48 = vpop.f32.mrf.mxu0  ;;  %2802 = vmatmul.bf16.vlgmr.msra.gmra.mxu1 %v11395_v18  ;;  %v2576_v31 = vand.u32 255, %v2552_v47  ;;  %v2601_v45 = vcvt.s32.f32 %v2577_v12  ;;  %v14379_v12 = vld [vmem:[#allocation106_spill] sm:$0xff] }
 0x26f   : > { %v11403_v9 = vadd.f32 %v2177_v1, %v14373_v2  ;;  %v2103_v24 = vpop.f32.mrf.mxu3  ;;  %v14375_v1 = vld [vmem:[#allocation104_spill] sm:$0xff]  ;;  %v14377_v2 = vld [vmem:[#allocation105_spill] sm:$0xff]  ;;  %v2600_v53 = vcvt.s32.f32 %v2576_v31 }
 0x270   : > { %v2104_v56 = vadd.f32 %v2103_v24, %v2064_v54  ;;  %v7816_v24 = vld [vmem:[%s9415_s25 + $0xa0] sm:$0xff] }
 0x271   : > { %14374 = vst [vmem:[#allocation103_spill] sm:$0xff] %v11403_v9  ;;  %v11419_v47 = vpack.c.bf16 %v2602_v28, %v2600_v53  ;;  %v2557_v53 = vunpack.c.1.s8 %v7816_v24 }
 0x272   : > { %v2066_v7 = vpop.f32.mrf.mxu1  ;;  %v11409_v23 = vadd.f32 %v2104_v56, %v14375_v1 }
 0x274   : > { %v2178_v0 = vpop.f32.mrf.mxu2  ;;  %14376 = vst [vmem:[#allocation104_spill] sm:$0xff] %v11409_v23 }
 0x275   : > { %v2179_v29 = vadd.f32 %v2178_v0, %v2139_v48  ;;  %v2142_v57 = vpop.f32.mrf.mxu0  ;;  %v11417_v48 = vpack.c.bf16 %v2601_v45, %v2599_v63  ;;  %v2558_v63 = vunpack.c.1.s8 %v7817_v38 }
 0x277   : > { %v11412_v32 = vadd.f32 %v2179_v29, %v14377_v2  ;;  %v2105_v54 = vpop.f32.mrf.mxu3  ;;  %v2555_v2 = vunpack.c.0.s8 %v7816_v24 }
 0x278   : > { %2880 = vmatmul.bf16.vlgmr.msra.gmra.mxu0 %v11395_v18  ;;  %v2106_v21 = vadd.f32 %v2105_v54, %v2066_v7  ;;  %v2556_v7 = vunpack.c.0.s8 %v7817_v38 }
 0x279   : > { %14378 = vst [vmem:[#allocation105_spill] sm:$0xff] %v11412_v32  ;;  %7946 = vmatmul.msk.bf16.vlgmr.msra.gmra.mxu2 %vm735_vm0, %v11397_v25  ;;  %v2579_v28 = vand.u32 255, %v2555_v2 }
 0x27a   : > { %v2069_v56 = vpop.f32.mrf.mxu1  ;;  %v11424_v31 = vadd.f32 %v2106_v21, %v14379_v12  ;;  %v2580_v41 = vand.u32 255, %v2556_v7  ;;  %v2582_v21 = vand.u32 255, %v2558_v63 }
 0x27b   : > { %7941 = vmatmul.msk.bf16.gmra.mxu3 %vm735_vm0, %v11419_v47  ;;  %v2603_v32 = vcvt.s32.f32 %v2579_v28 }
 0x27c   : > { %v2181_v46 = vpop.f32.mrf.mxu2  ;;  %14380 = vst [vmem:[#allocation106_spill] sm:$0xff] %v11424_v31  ;;  %v2604_v9 = vcvt.s32.f32 %v2580_v41  ;;  %v2606_v27 = vcvt.s32.f32 %v2582_v21  ;;  %v8034_v41 = vld [vmem:[%s13959_s1 + $0x5b0] sm:$0xf]  ;;  %v2562_v21 = vunpack.c.3.s8 %v7817_v38 }
 0x27d   : > { %v2182_v0 = vadd.f32 %v2181_v46, %v2142_v57  ;;  %v2144_v29 = vpop.f32.mrf.mxu0  ;;  %2807 = vmatmul.bf16.gmra.mxu1 %v11417_v48  ;;  %v2581_v46 = vand.u32 255, %v2557_v53 }
 0x27f   : > { %v11427_v1 = vadd.f32 %v2182_v0, %v14381_v42  ;;  %v2108_v45 = vpop.f32.mrf.mxu3  ;;  %v14383_v42 = vld [vmem:[#allocation108_spill] sm:$0xff]  ;;  %v2605_v23 = vcvt.s32.f32 %v2581_v46  ;;  %v2560_v46 = vunpack.c.2.s8 %v7817_v38 }
 0x280   : > { %v2109_v57 = vadd.f32 %v2108_v45, %v2069_v56 }
 0x281   : > { %14382 = vst [vmem:[#allocation107_spill] sm:$0xff] %v11427_v1  ;;  %v14385_v1 = vld [vmem:[#allocation109_spill] sm:$0xff]  ;;  %v11441_v53 = vpack.c.bf16 %v2605_v23, %v2603_v32  ;;  %v2561_v23 = vunpack.c.3.s8 %v7816_v24 }
 0x282   : > { %v2071_v12 = vpop.f32.mrf.mxu1  ;;  %v11433_v15 = vadd.f32 %v2109_v57, %v14383_v42  ;;  %v8927_v57 = vld [vmem:[%s13959_s1 + $0x5b4] sm:$0xf0] }
 0x284   : > { %v2183_v54 = vpop.f32.mrf.mxu2  ;;  %14384 = vst [vmem:[#allocation108_spill] sm:$0xff] %v11433_v15 }
 0x285   : > { %v2184_v49 = vadd.f32 %v2183_v54, %v2144_v29  ;;  %v2147_v0 = vpop.f32.mrf.mxu0  ;;  %v11443_v29 = vpack.c.bf16 %v2606_v27, %v2604_v9  ;;  %v14389_v54 = vld [vmem:[#allocation111_spill] sm:$0xff]  ;;  %v2559_v27 = vunpack.c.2.s8 %v7816_v24  ;;  %v11457_v9 = vor.u32 %v8927_v57, %v8034_v41 }
 0x286   : > { %v2584_v24 = vand.u32 255, %v2560_v46  ;;  %v2586_v41 = vand.u32 255, %v2562_v21 }
 0x287   : > { %v11436_v31 = vadd.f32 %v2184_v49, %v14385_v1  ;;  %v2110_v56 = vpop.f32.mrf.mxu3  ;;  %v14387_v1 = vld [vmem:[#allocation110_spill] sm:$0xff]  ;;  %14391 = vst [vmem:[#allocation189_spill] sm:$0xff] %v11457_v9  ;;  %3119 = vmatpush.bf16.msrb.mxu1 %v11457_v9  ;;  %v14393_v9 = vld [vmem:[#allocation139_spill] sm:$0xff] }
 0x288   : > { %2885 = vmatmul.bf16.gmra.mxu0 %v11417_v48  ;;  %v2111_v2 = vadd.f32 %v2110_v56, %v2071_v12  ;;  %v8026_v12 = vld [vmem:[%s13959_s1 + $0x5a0] sm:$0xf]  ;;  %v2583_v56 = vand.u32 255, %v2559_v27  ;;  %v8018_v27 = vld [vmem:[%s13959_s1 + $0x590] sm:$0xf] }
 0x289   : > { %14386 = vst [vmem:[#allocation109_spill] sm:$0xff] %v11436_v31  ;;  %7947 = vmatmul.msk.bf16.gmra.mxu2 %vm735_vm0, %v11419_v47  ;;  %v14399_v31 = vld [vmem:[#allocation142_spill] sm:$0xff] }
 0x28a   : > { %v2369_v63 = vpop.f32.mrf.mxu1  ;;  %v11446_v28 = vadd.f32 %v2111_v2, %v14387_v1  ;;  %v2585_v1 = vand.u32 255, %v2561_v23  ;;  %v14395_v23 = vld [vmem:[#allocation114_spill] sm:$0xff] }
 0x28b   : > { %7942 = vmatmul.msk.bf16.gmra.mxu3 %vm735_vm0, %v11443_v29 }
 0x28c   : > { %v2186_v7 = vpop.f32.mrf.mxu2  ;;  %14388 = vst [vmem:[#allocation110_spill] sm:$0xff] %v11446_v28 }
 0x28d   : > { %v2187_v45 = vadd.f32 %v2186_v7, %v2147_v0  ;;  %v2149_v49 = vpop.f32.mrf.mxu0  ;;  %2812 = vmatmul.bf16.gmra.mxu1 %v11441_v53  ;;  %v8925_v0 = vld [vmem:[%s13959_s1 + $0x5a4] sm:$0xf0] }
 0x28e   : > { %v11469_v2 = vor.u32 %v8925_v0, %v8026_v12  ;;  %v2609_v12 = vcvt.s32.f32 %v2585_v1  ;;  %v2608_v0 = vcvt.s32.f32 %v2584_v24 }
 0x28f   : > { %v11455_v32 = vadd.f32 %v2187_v45, %v14389_v54  ;;  %v2408_v42 = vpop.f32.mrf.mxu3 }
 0x290   : > { %14392 = vst [vmem:[#allocation190_spill] sm:$0xff] %v11469_v2  ;;  %v2409_v7 = vadd.f32 %v2408_v42, %v2369_v63  ;;  %3120 = vmatpush.bf16.msrb.mxu1 %v11469_v2  ;;  %v8923_v63 = vld [vmem:[%s13959_s1 + $0x594] sm:$0xf0]  ;;  %v2610_v42 = vcvt.s32.f32 %v2586_v41 }
 0x291   : > { %14390 = vst [vmem:[#allocation111_spill] sm:$0xff] %v11455_v32  ;;  %v11484_v21 = vor.u32 %v8923_v63, %v8018_v27 }
 0x292   : > { %v2371_v38 = vpop.f32.mrf.mxu1  ;;  %v11473_v32 = vadd.f32 %v2409_v7, %v14393_v9  ;;  %v11490_v9 = vld [vmem:[%s9415_s25 + $0xb0] sm:$0xff]  ;;  %v11494_v7 = vld [vmem:[%s9415_s25 + $0xb8] sm:$0xff]  ;;  %v11506_v27 = vpack.c.bf16 %v2610_v42, %v2608_v0 }
 0x293   : > { %14397 = vst [vmem:[#allocation191_spill] sm:$0xff] %v11484_v21  ;;  %v2564_v28 = vunpack.c.0.s8 %v11494_v7 }
 0x294   : > { %v2188_v45 = vpop.f32.mrf.mxu2  ;;  %14394 = vst [vmem:[#allocation139_spill] sm:$0xff] %v11473_v32  ;;  %3121 = vmatpush.bf16.msrb.mxu1 %v11484_v21  ;;  %v2565_v32 = vunpack.c.1.s8 %v11490_v9 }
 0x295   : > { %v2189_v57 = vadd.f32 %v2188_v45, %v2149_v49  ;;  %v2447_v54 = vpop.f32.mrf.mxu0  ;;  %v2607_v49 = vcvt.s32.f32 %v2583_v56  ;;  %v8010_v45 = vld [vmem:[%s13959_s1 + $0x580] sm:$0xf]  ;;  %v8921_v56 = vld [vmem:[%s13959_s1 + $0x584] sm:$0xf0] }
 0x296   : > { %v11502_v24 = vor.u32 %v8921_v56, %v8010_v45  ;;  %v8926_v56 = vld [vmem:[%s13959_s1 + $0x5b4] sm:$0xf] }
 0x297   : > { %v11482_v46 = vadd.f32 %v2189_v57, %v14395_v23  ;;  %v2410_v1 = vpop.f32.mrf.mxu3  ;;  %v11504_v57 = vpack.c.bf16 %v2609_v12, %v2607_v49  ;;  %v8066_v49 = vld [vmem:[%s13959_s1 + $0x5f0] sm:$0xf]  ;;  %v14401_v12 = vld [vmem:[#allocation143_spill] sm:$0xff] }
 0x298   : > { %2890 = vmatmul.bf16.gmra.mxu0 %v11441_v53  ;;  %14398 = vst [vmem:[#allocation192_spill] sm:$0xff] %v11502_v24  ;;  %v2411_v41 = vadd.f32 %v2410_v1, %v2371_v38  ;;  %3122 = vmatpush.bf16.msrb.mxu1 %v11502_v24  ;;  %v8002_v38 = vld [vmem:[%s13959_s1 + $0x570] sm:$0xf]  ;;  %v8036_v1 = vld [vmem:[%s13959_s1 + $0x5b8] sm:$0xf0] }
 0x299   : > { %14396 = vst [vmem:[#allocation114_spill] sm:$0xff] %v11482_v46  ;;  %7948 = vmatmul.msk.bf16.gmra.mxu2 %vm735_vm0, %v11443_v29  ;;  %v2563_v46 = vunpack.c.0.s8 %v11490_v9  ;;  %v7994_v24 = vld [vmem:[%s13959_s1 + $0x560] sm:$0xf] }
 0x29a   : > { %v2374_v23 = vpop.f32.mrf.mxu1  ;;  %v11513_v45 = vadd.f32 %v2411_v41, %v14399_v31  ;;  %v8935_v31 = vld [vmem:[%s13959_s1 + $0x5f4] sm:$0xf0] }
 0x29b   : > { %7943 = vmatmul.msk.bf16.gmra.mxu3 %vm735_vm0, %v11506_v27  ;;  %v11542_v41 = vor.u32 %v8935_v31, %v8066_v49  ;;  %v8917_v49 = vld [vmem:[%s13959_s1 + $0x564] sm:$0xf0] }
 0x29c   : > { %v2486_v63 = vpop.f32.mrf.mxu2  ;;  %14400 = vst [vmem:[#allocation142_spill] sm:$0xff] %v11513_v45  ;;  %v8933_v31 = vld [vmem:[%s13959_s1 + $0x5e4] sm:$0xf0] }
 0x29d   : > { %v2487_v21 = vadd.f32 %v2486_v63, %v2447_v54  ;;  %v2449_v2 = vpop.f32.mrf.mxu0  ;;  %v8919_v54 = vld [vmem:[%s13959_s1 + $0x574] sm:$0xf0]  ;;  %2817 = vmatmul.bf16.gmra.mxu1 %v11504_v57  ;;  %14404 = vst [vmem:[#allocation194_spill] sm:$0xff] %v11542_v41  ;;  %v11544_v63 = vor.u32 %v8926_v56, %v8036_v1  ;;  %3162 = vmatpush.bf16.msrb.mxu3 %v11542_v41  ;;  %v8924_v56 = vld [vmem:[%s13959_s1 + $0x5a4] sm:$0xf] }
 0x29e   : > { %v11527_v42 = vor.u32 %v8919_v54, %v8002_v38  ;;  %v2587_v38 = vand.u32 255, %v2563_v46  ;;  %v2589_v54 = vand.u32 255, %v2565_v32  ;;  %v8058_v46 = vld [vmem:[%s13959_s1 + $0x5e0] sm:$0xf]  ;;  %v8028_v1 = vld [vmem:[%s13959_s1 + $0x5a8] sm:$0xf0] }
 0x29f   : > { %v11525_v0 = vadd.f32 %v2487_v21, %v14401_v12  ;;  %v2566_v21 = vunpack.c.1.s8 %v11494_v7  ;;  %14405 = vst [vmem:[#allocation195_spill] sm:$0xff] %v11544_v63  ;;  %v2588_v12 = vand.u32 255, %v2564_v28  ;;  %3197 = vmatpush.bf16.msrb.mxu0 %v11544_v63  ;;  %v2413_v32 = vpop.f32.mrf.mxu3  ;;  %v11558_v28 = vor.u32 %v8917_v49, %v7994_v24 }
 0x2a0   : > { %14403 = vst [vmem:[#allocation193_spill] sm:$0xff] %v11527_v42  ;;  %3123 = vmatpush.bf16.msrb.mxu1 %v11527_v42  ;;  %v2414_v42 = vadd.f32 %v2413_v32, %v2374_v23  ;;  %v11571_v45 = vor.u32 %v8924_v56, %v8028_v1  ;;  %v7986_v23 = vld [vmem:[%s13959_s1 + $0x550] sm:$0xf]  ;;  %v8931_v32 = vld [vmem:[%s13959_s1 + $0x5d4] sm:$0xf0] }
 0x2a1   : > { %14402 = vst [vmem:[#allocation143_spill] sm:$0xff] %v11525_v0  ;;  %v2590_v41 = vand.u32 255, %v2566_v21  ;;  %v11569_v0 = vor.u32 %v8933_v31, %v8058_v46  ;;  %v8915_v21 = vld [vmem:[%s13959_s1 + $0x554] sm:$0xf0]  ;;  %v8922_v31 = vld [vmem:[%s13959_s1 + $0x594] sm:$0xf]  ;;  %v2612_v1 = vcvt.s32.f32 %v2588_v12 }
 0x2a2   : > { %14406 = vst [vmem:[#allocation196_spill] sm:$0xff] %v11558_v28  ;;  %v2376_v24 = vpop.f32.mrf.mxu1  ;;  %v11575_v58 = vadd.f32 %v2414_v42, %v10881_v44  ;;  %v2611_v44 = vcvt.s32.f32 %v2587_v38  ;;  %v2613_v42 = vcvt.s32.f32 %v2589_v54  ;;  %v11591_v46 = vor.u32 %v8915_v21, %v7986_v23  ;;  %v8020_v56 = vld [vmem:[%s13959_s1 + $0x598] sm:$0xf0]  ;;  %v8934_v54 = vld [vmem:[%s13959_s1 + $0x5f4] sm:$0xf] }
 0x2a3   : > { %14407 = vst [vmem:[#allocation197_spill] sm:$0xff] %v11569_v0  ;;  %3163 = vmatpush.bf16.msrb.mxu3 %v11569_v0  ;;  %3198 = vmatpush.bf16.msrb.mxu0 %v11571_v45  ;;  %v11605_v38 = vor.u32 %v8922_v31, %v8020_v56  ;;  %v7978_v12 = vld [vmem:[%s13959_s1 + $0x540] sm:$0xf]  ;;  %v8913_v23 = vld [vmem:[%s13959_s1 + $0x544] sm:$0xf0] }
 0x2a4   : > { %v2488_v63 = vpop.f32.mrf.mxu2  ;;  %14408 = vst [vmem:[#allocation198_spill] sm:$0xff] %v11571_v45  ;;  %3124 = vmatpush.bf16.msrb.mxu1 %v11558_v28  ;;  %v2614_v28 = vcvt.s32.f32 %v2590_v41  ;;  %v8042_v21 = vld [vmem:[%s13959_s1 + $0x5c0] sm:$0xf]  ;;  %v11632_v31 = vor.u32 %v8913_v23, %v7978_v12  ;;  %v8929_v56 = vld [vmem:[%s13959_s1 + $0x5c4] sm:$0xf0] }
 0x2a5   : > { %v2489_v49 = vadd.f32 %v2488_v63, %v2449_v2  ;;  %v2452_v15 = vpop.f32.mrf.mxu0  ;;  %v8050_v2 = vld [vmem:[%s13959_s1 + $0x5d0] sm:$0xf]  ;;  %14409 = vst [vmem:[#allocation199_spill] sm:$0xff] %v11591_v46 }
 0x2a6   : > { %14411 = vst [vmem:[#allocation201_spill] sm:$0xff] %v11605_v38 }
 0x2a7   : > { %v11589_v63 = vadd.f32 %v2489_v49, %v10887_v30  ;;  %v11603_v30 = vor.u32 %v8931_v32, %v8050_v2  ;;  %v8068_v49 = vld [vmem:[%s13959_s1 + $0x5f8] sm:$0xf0]  ;;  %3199 = vmatpush.bf16.msrb.mxu0 %v11605_v38  ;;  %v2415_v2 = vpop.f32.mrf.mxu3  ;;  %v11629_v32 = vpack.c.bf16 %v2613_v42, %v2611_v44  ;;  %14413 = vst [vmem:[#allocation203_spill] sm:$0xff] %v11632_v31 }
 0x2a8   : > { %2895 = vmatmul.bf16.gmra.mxu0 %v11504_v57  ;;  %3125 = vmatpush.bf16.msrb.mxu1 %v11591_v46  ;;  %v11616_v41 = vor.u32 %v8934_v54, %v8068_v49  ;;  %v8920_v54 = vld [vmem:[%s13959_s1 + $0x584] sm:$0xf]  ;;  %v8012_v49 = vld [vmem:[%s13959_s1 + $0x588] sm:$0xf0]  ;;  %v2416_v46 = vadd.f32 %v2415_v2, %v2376_v24  ;;  %v11643_v38 = vpack.c.bf16 %v2614_v28, %v2612_v1  ;;  %v8918_v28 = vld [vmem:[%s13959_s1 + $0x574] sm:$0xf]  ;;  %v2567_v1 = vunpack.c.2.s8 %v11490_v9 }
 0x2a9   : > { %14410 = vst [vmem:[#allocation200_spill] sm:$0xff] %v11603_v30  ;;  %7949 = vmatmul.msk.bf16.gmra.mxu2 %vm735_vm0, %v11506_v27  ;;  %3164 = vmatpush.bf16.msrb.mxu3 %v11603_v30  ;;  %v11645_v42 = vor.u32 %v8929_v56, %v8042_v21  ;;  %v11647_v12 = vor.u32 %v8920_v54, %v8012_v49  ;;  %v8004_v24 = vld [vmem:[%s13959_s1 + $0x578] sm:$0xf0]  ;;  %v14419_v21 = vld [vmem:[#allocation78_spill] sm:$0xff]  ;;  %v14420_v2 = vld [vmem:[#allocation83_spill] sm:$0xff]  ;;  %v2568_v56 = vunpack.c.2.s8 %v11494_v7 }
 0x2aa   : > { %14412 = vst [vmem:[#allocation202_spill] sm:$0xff] %v11616_v41  ;;  %3240 = vmatpush.bf16.msrb.mxu2 %v11616_v41  ;;  %v2379_v23 = vpop.f32.mrf.mxu1  ;;  %v11651_v30 = vadd.f32 %v2416_v46, %v10955_v17  ;;  %v2569_v17 = vunpack.c.3.s8 %v11490_v9  ;;  %v11666_v46 = vor.u32 %v8918_v28, %v8004_v24  ;;  %v8916_v9 = vld [vmem:[%s13959_s1 + $0x564] sm:$0xf] }
 0x2ab   : > { %14414 = vst [vmem:[#allocation204_spill] sm:$0xff] %v11645_v42  ;;  %3200 = vmatpush.bf16.msrb.mxu0 %v11647_v12  ;;  %7944 = vmatmul.msk.bf16.gmra.mxu3 %vm735_vm0, %v11643_v38  ;;  %v8932_v54 = vld [vmem:[%s13959_s1 + $0x5e4] sm:$0xf] }
 0x2ac   : > { %v2491_v44 = vpop.f32.mrf.mxu2  ;;  %14415 = vst [vmem:[#allocation205_spill] sm:$0xff] %v11647_v12  ;;  %3126 = vmatpush.bf16.msrb.mxu1 %v11632_v31  ;;  %v2593_v28 = vand.u32 255, %v2569_v17  ;;  %v2592_v12 = vand.u32 255, %v2568_v56  ;;  %v8052_v56 = vld [vmem:[%s13959_s1 + $0x5d8] sm:$0xf0] }
 0x2ad   : > { %v2492_v45 = vadd.f32 %v2491_v44, %v2452_v15  ;;  %v2454_v41 = vpop.f32.mrf.mxu0  ;;  %14416 = vst [vmem:[#allocation206_spill] sm:$0xff] %v11651_v30  ;;  %3165 = vmatpush.bf16.msrb.mxu3 %v11645_v42  ;;  %2822 = vmatmul.bf16.gmra.mxu1 %v11629_v32  ;;  %v2591_v44 = vand.u32 255, %v2567_v1 }
 0x2ae   : > { %14418 = vst [vmem:[#allocation208_spill] sm:$0xff] %v11666_v46 }
 0x2af   : > { %v11662_v15 = vadd.f32 %v2492_v45, %v10963_v34  ;;  %v2570_v34 = vunpack.c.3.s8 %v11494_v7  ;;  %3201 = vmatpush.bf16.msrb.mxu0 %v11666_v46  ;;  %v7996_v45 = vld [vmem:[%s13959_s1 + $0x568] sm:$0xf0]  ;;  %v2418_v49 = vpop.f32.mrf.mxu3 }
 0x2b0   : > { %3408 = vmatpush.bf16.msra.mxu1 %v14419_v21  ;;  %v11685_v24 = vor.u32 %v8916_v9, %v7996_v45  ;;  %v8060_v7 = vld [vmem:[%s13959_s1 + $0x5e8] sm:$0xf0]  ;;  %v2419_v31 = vadd.f32 %v2418_v49, %v2379_v23  ;;  %v8914_v9 = vld [vmem:[%s13959_s1 + $0x554] sm:$0xf]  ;;  %v7988_v23 = vld [vmem:[%s13959_s1 + $0x558] sm:$0xf0]  ;;  %v2616_v49 = vcvt.s32.f32 %v2592_v12 }
 0x2b1   : > { %14417 = vst [vmem:[#allocation207_spill] sm:$0xff] %v11662_v15  ;;  %3451 = vmatpush.bf16.msra.mxu3 %v14420_v2  ;;  %v14422_v21 = vld [vmem:[#allocation79_spill] sm:$0xff]  ;;  %v14423_v2 = vld [vmem:[#allocation86_spill] sm:$0xff]  ;;  %v2594_v42 = vand.u32 255, %v2570_v34  ;;  %v11692_v0 = vor.u32 %v8932_v54, %v8060_v7  ;;  %v14426_v34 = vld [vmem:[#allocation80_spill] sm:$0xff]  ;;  %v2617_v54 = vcvt.s32.f32 %v2593_v28 }
 0x2b2   : > { %14421 = vst [vmem:[#allocation78_spill] sm:$0xff] %v11685_v24  ;;  %v2381_v15 = vpop.f32.mrf.mxu1  ;;  %v11695_v17 = vadd.f32 %v2419_v31, %v11000_v22  ;;  %v2615_v22 = vcvt.s32.f32 %v2591_v44  ;;  %v11711_v31 = vor.u32 %v8914_v9, %v7988_v23  ;;  %v14427_v45 = vld [vmem:[#allocation89_spill] sm:$0xff]  ;;  %v8044_v28 = vld [vmem:[%s13959_s1 + $0x5c8] sm:$0xf0] }
 0x2b3   : > { %14424 = vst [vmem:[#allocation83_spill] sm:$0xff] %v11692_v0  ;;  %3202 = vmatpush.bf16.msrb.mxu0 %v11685_v24  ;;  %3241 = vmatpush.bf16.msrb.mxu2 %v11692_v0  ;;  %v2618_v7 = vcvt.s32.f32 %v2594_v42  ;;  %v8928_v42 = vld [vmem:[%s13959_s1 + $0x5c4] sm:$0xf]  ;;  %v14431_v9 = vld [vmem:[#allocation93_spill] sm:$0xff]  ;;  %v14501_v0 = vld [vmem:[#allocation24_spill] sm:$0xff] }
 0x2b4   : > { %3409 = vmatpush.bf16.msra.mxu1 %v14422_v21  ;;  %v2493_v46 = vpop.f32.mrf.mxu2  ;;  %14425 = vst [vmem:[#allocation79_spill] sm:$0xff] %v11711_v31 }
 0x2b5   : > { %3452 = vmatpush.bf16.msra.mxu3 %v14423_v2  ;;  %v2494_v30 = vadd.f32 %v2493_v46, %v2454_v41  ;;  %v2457_v1 = vpop.f32.mrf.mxu0  ;;  %v8930_v41 = vld [vmem:[%s13959_s1 + $0x5d4] sm:$0xf]  ;;  %v14430_v2 = vld [vmem:[#allocation81_spill] sm:$0xff] }
 0x2b6   : > { %v11719_v21 = vor.u32 %v8930_v41, %v8052_v56  ;;  %v11741_v41 = vpack.c.bf16 %v2617_v54, %v2615_v22  ;;  %v11743_v56 = vpack.c.bf16 %v2618_v7, %v2616_v49  ;;  %v14434_v22 = vld [vmem:[#allocation84_spill] sm:$0xff]  ;;  %v14436_v54 = vld [vmem:[#allocation85_spill] sm:$0xff]  ;;  %v14437_v49 = vld [vmem:[#allocation87_spill] sm:$0xff] }
 0x2b7   : > { %v11709_v46 = vadd.f32 %v2494_v30, %v11004_v3  ;;  %3203 = vmatpush.bf16.msrb.mxu0 %v11711_v31  ;;  %v8912_v3 = vld [vmem:[%s13959_s1 + $0x544] sm:$0xf]  ;;  %v7980_v30 = vld [vmem:[%s13959_s1 + $0x548] sm:$0xf0]  ;;  %v2420_v12 = vpop.f32.mrf.mxu3 }
 0x2b8   : > { %3410 = vmatpush.bf16.msra.mxu1 %v14426_v34  ;;  %2900 = vmatmul.bf16.gmra.mxu0 %v11629_v32  ;;  %14428 = vst [vmem:[#allocation86_spill] sm:$0xff] %v11719_v21  ;;  %v11734_v44 = vor.u32 %v8912_v3, %v7980_v30  ;;  %v2421_v23 = vadd.f32 %v2420_v12, %v2381_v15  ;;  %v14433_v15 = vld [vmem:[#allocation82_spill] sm:$0xff] }
 0x2b9   : > { %3453 = vmatpush.bf16.msra.mxu3 %v14427_v45  ;;  %7950 = vmatmul.msk.bf16.gmra.mxu2 %vm735_vm0, %v11643_v38  ;;  %v11745_v45 = vor.u32 %v8928_v42, %v8044_v28  ;;  %v14438_v28 = vld [vmem:[#allocation97_spill] sm:$0xff] }
 0x2ba   : > { %3242 = vmatpush.bf16.msrb.mxu2 %v11719_v21  ;;  %14429 = vst [vmem:[#allocation80_spill] sm:$0xff] %v11734_v44  ;;  %v2384_v31 = vpop.f32.mrf.mxu1  ;;  %v11748_v30 = vadd.f32 %v2421_v23, %v11045_v37 }
 0x2bb   : > { %14432 = vst [vmem:[#allocation89_spill] sm:$0xff] %v11745_v45  ;;  %3204 = vmatpush.bf16.msrb.mxu0 %v11734_v44  ;;  %7945 = vmatmul.msk.bf16.gmra.mxu3 %vm735_vm0, %v11743_v56 }
 0x2bc   : > { %3411 = vmatpush.bf16.msra.mxu1 %v14430_v2  ;;  %v2496_v34 = vpop.f32.mrf.mxu2 }
 0x2bd   : > { %3454 = vmatpush.bf16.msra.mxu3 %v14431_v9  ;;  %v2497_v24 = vadd.f32 %v2496_v34, %v2457_v1  ;;  %v2459_v3 = vpop.f32.mrf.mxu0  ;;  %2827 = vmatmul.bf16.gmra.mxu1 %v11741_v41  ;;  %v14435_v1 = vld [vmem:[#allocation91_spill] sm:$0xff]  ;;  %v14439_v34 = vld [vmem:[#allocation88_spill] sm:$0xff] }
 0x2be   : > { %3243 = vmatpush.bf16.msrb.mxu2 %v11745_v45 }
 0x2bf   : > { %v11753_v2 = vadd.f32 %v2497_v24, %v11053_v16  ;;  %3486 = vmatpush.bf16.msra.mxu0 %v14434_v22  ;;  %v2423_v37 = vpop.f32.mrf.mxu3  ;;  %v14442_v22 = vld [vmem:[#allocation92_spill] sm:$0xff] }
 0x2c0   : > { %3412 = vmatpush.bf16.msra.mxu1 %v14433_v15  ;;  %v2424_v7 = vadd.f32 %v2423_v37, %v2384_v31  ;;  %v14440_v15 = vld [vmem:[#allocation90_spill] sm:$0xff]  ;;  %v14441_v31 = vld [vmem:[#allocation99_spill] sm:$0xff] }
 0x2c2   : > { %3529 = vmatpush.bf16.msra.mxu2 %v14435_v1  ;;  %v2386_v16 = vpop.f32.mrf.mxu1  ;;  %v11765_v9 = vadd.f32 %v2424_v7, %v11062_v59  ;;  %v14443_v1 = vld [vmem:[#allocation94_spill] sm:$0xff] }
 0x2c3   : > { %3487 = vmatpush.bf16.msra.mxu0 %v14437_v49 }
 0x2c4   : > { %3413 = vmatpush.bf16.msra.mxu1 %v14436_v54  ;;  %v2498_v42 = vpop.f32.mrf.mxu2 }
 0x2c5   : > { %v2499_v24 = vadd.f32 %v2498_v42, %v2459_v3  ;;  %v2462_v12 = vpop.f32.mrf.mxu0  ;;  %v14444_v42 = vld [vmem:[#allocation101_spill] sm:$0xff] }
 0x2c6   : > { %3530 = vmatpush.bf16.msra.mxu2 %v14438_v28  ;;  %v14445_v28 = vld [vmem:[#allocation95_spill] sm:$0xff] }
 0x2c7   : > { %v11768_v23 = vadd.f32 %v2499_v24, %v11064_v52  ;;  %3488 = vmatpush.bf16.msra.mxu0 %v14440_v15  ;;  %v2425_v3 = vpop.f32.mrf.mxu3  ;;  %v14448_v15 = vld [vmem:[#allocation96_spill] sm:$0xff] }
 0x2c8   : > { %3414 = vmatpush.bf16.msra.mxu1 %v14439_v34  ;;  %2905 = vmatmul.bf16.gmra.mxu0 %v11741_v41  ;;  %v2426_v59 = vadd.f32 %v2425_v3, %v2386_v16  ;;  %v14446_v16 = vld [vmem:[#allocation54_spill] sm:$0xff]  ;;  %v14447_v34 = vld [vmem:[#allocation59_spill] sm:$0xff] }
 0x2c9   : > { %7951 = vmatmul.msk.bf16.gmra.mxu2 %vm735_vm0, %v11743_v56 }
 0x2ca   : > { %3531 = vmatpush.bf16.msra.mxu2 %v14441_v31  ;;  %v2389_v52 = vpop.f32.mrf.mxu1  ;;  %v11779_v7 = vadd.f32 %v2426_v59, %v11071_v50  ;;  %v14450_v59 = vld [vmem:[#allocation62_spill] sm:$0xff] }
 0x2cb   : > { %3489 = vmatpush.bf16.msra.mxu0 %v14443_v1  ;;  %8072 = vmatmul.msk.bf16.vlgmr.msrb.gmra.mxu3 %vm735_vm0, %v11397_v25  ;;  %v14449_v1 = vld [vmem:[#allocation55_spill] sm:$0xff] }
 0x2cc   : > { %3415 = vmatpush.bf16.msra.mxu1 %v14442_v22  ;;  %v2501_v37 = vpop.f32.mrf.mxu2  ;;  %3740 = vmatpush.bf16.msrb.mxu3 %v14447_v34  ;;  %v14455_v34 = vld [vmem:[#allocation100_spill] sm:$0xff] }
 0x2cd   : > { %v2502_v54 = vadd.f32 %v2501_v37, %v2462_v12  ;;  %v2464_v49 = vpop.f32.mrf.mxu0  ;;  %3127 = vmatmul.bf16.vlgmr.msrb.gmra.mxu1 %v11395_v18 }
 0x2ce   : > { %3532 = vmatpush.bf16.msra.mxu2 %v14444_v42  ;;  %v14451_v42 = vld [vmem:[#allocation98_spill] sm:$0xff] }
 0x2cf   : > { %v11783_v24 = vadd.f32 %v2502_v54, %v11073_v36  ;;  %3490 = vmatpush.bf16.msra.mxu0 %v14445_v28  ;;  %v2428_v12 = vpop.f32.mrf.mxu3  ;;  %v14454_v28 = vld [vmem:[#allocation67_spill] sm:$0xff] }
 0x2d0   : > { %3697 = vmatpush.bf16.msrb.mxu1 %v14446_v16  ;;  %v2429_v50 = vadd.f32 %v2428_v12, %v2389_v52  ;;  %3741 = vmatpush.bf16.msrb.mxu3 %v14450_v59  ;;  %v14452_v52 = vld [vmem:[#allocation56_spill] sm:$0xff] }
 0x2d2   : > { %v2391_v3 = vpop.f32.mrf.mxu1  ;;  %v11795_v37 = vadd.f32 %v2429_v50, %v11080_v6 }
 0x2d3   : > { %3491 = vmatpush.bf16.msra.mxu0 %v14448_v15 }
 0x2d4   : > { %v2503_v31 = vpop.f32.mrf.mxu2  ;;  %3698 = vmatpush.bf16.msrb.mxu1 %v14449_v1  ;;  %v14459_v1 = vld [vmem:[#allocation73_spill] sm:$0xff] }
 0x2d5   : > { %v2504_v22 = vadd.f32 %v2503_v31, %v2464_v49  ;;  %v2467_v36 = vpop.f32.mrf.mxu0  ;;  %v14453_v49 = vld [vmem:[#allocation65_spill] sm:$0xff] }
 0x2d6   : > { %3742 = vmatpush.bf16.msrb.mxu3 %v14453_v49 }
 0x2d7   : > { %v11798_v54 = vadd.f32 %v2504_v22, %v11082_v10  ;;  %3492 = vmatpush.bf16.msra.mxu0 %v14451_v42  ;;  %v2430_v16 = vpop.f32.mrf.mxu3  ;;  %v14456_v10 = vld [vmem:[#allocation60_spill] sm:$0xff]  ;;  %v14458_v22 = vld [vmem:[#allocation69_spill] sm:$0xff]  ;;  %v14462_v42 = vld [vmem:[#allocation75_spill] sm:$0xff] }
 0x2d8   : > { %3205 = vmatmul.bf16.vlgmr.msrb.gmra.mxu0 %v11395_v18  ;;  %3699 = vmatpush.bf16.msrb.mxu1 %v14452_v52  ;;  %v2431_v6 = vadd.f32 %v2430_v16, %v2391_v3  ;;  %v14457_v18 = vld [vmem:[#allocation57_spill] sm:$0xff]  ;;  %v14460_v3 = vld [vmem:[#allocation58_spill] sm:$0xff] }
 0x2d9   : > { %8078 = vmatmul.msk.bf16.vlgmr.msrb.gmra.mxu2 %vm735_vm0, %v11397_v25 }
 0x2da   : > { %3818 = vmatpush.bf16.msrb.mxu2 %v14454_v28  ;;  %v2394_v15 = vpop.f32.mrf.mxu1  ;;  %v11811_v25 = vadd.f32 %v2431_v6, %v11089_v20  ;;  %3743 = vmatpush.bf16.msrb.mxu3 %v14458_v22  ;;  %v14463_v6 = vld [vmem:[#allocation61_spill] sm:$0xff] }
 0x2db   : > { %3493 = vmatpush.bf16.msra.mxu0 %v14455_v34  ;;  %8073 = vmatmul.msk.bf16.gmra.mxu3 %vm735_vm0, %v11419_v47 }
 0x2dc   : > { %v2506_v12 = vpop.f32.mrf.mxu2  ;;  %3700 = vmatpush.bf16.msrb.mxu1 %v14457_v18 }
 0x2dd   : > { %v2507_v50 = vadd.f32 %v2506_v12, %v2467_v36  ;;  %v2469_v31 = vpop.f32.mrf.mxu0  ;;  %3132 = vmatmul.bf16.gmra.mxu1 %v11417_v48  ;;  %v14461_v36 = vld [vmem:[#allocation63_spill] sm:$0xff] }
 0x2de   : > { %3819 = vmatpush.bf16.msrb.mxu2 %v14459_v1 }
 0x2df   : > { %3775 = vmatpush.bf16.msrb.mxu0 %v14456_v10  ;;  %v11816_v59 = vadd.f32 %v2507_v50, %v11091_v26  ;;  %v2433_v20 = vpop.f32.mrf.mxu3  ;;  %v14464_v26 = vld [vmem:[#allocation66_spill] sm:$0xff]  ;;  %v14465_v10 = vld [vmem:[#allocation77_spill] sm:$0xff] }
 0x2e0   : > { %3701 = vmatpush.bf16.msrb.mxu1 %v14460_v3  ;;  %v2434_v52 = vadd.f32 %v2433_v20, %v2394_v15  ;;  %v14466_v15 = vld [vmem:[#allocation64_spill] sm:$0xff]  ;;  %v14469_v20 = vld [vmem:[#allocation71_spill] sm:$0xff] }
 0x2e2   : > { %3820 = vmatpush.bf16.msrb.mxu2 %v14462_v42  ;;  %v2396_v28 = vpop.f32.mrf.mxu1  ;;  %v11827_v12 = vadd.f32 %v2434_v52, %v11098_v8  ;;  %v14468_v42 = vld [vmem:[#allocation68_spill] sm:$0xff] }
 0x2e3   : > { %3776 = vmatpush.bf16.msrb.mxu0 %v14461_v36 }
 0x2e4   : > { %v2508_v49 = vpop.f32.mrf.mxu2  ;;  %3702 = vmatpush.bf16.msrb.mxu1 %v14463_v6 }
 0x2e5   : > { %v2509_v16 = vadd.f32 %v2508_v49, %v2469_v31  ;;  %v2472_v34 = vpop.f32.mrf.mxu0  ;;  %v14467_v31 = vld [vmem:[#allocation70_spill] sm:$0xff] }
 0x2e6   : > { %3821 = vmatpush.bf16.msrb.mxu2 %v14465_v10  ;;  %v14472_v10 = vld [vmem:[#allocation76_spill] sm:$0xff] }
 0x2e7   : > { %3777 = vmatpush.bf16.msrb.mxu0 %v14464_v26  ;;  %v11831_v50 = vadd.f32 %v2509_v16, %v11100_v55  ;;  %v2435_v18 = vpop.f32.mrf.mxu3  ;;  %v14471_v26 = vld [vmem:[#allocation74_spill] sm:$0xff] }
 0x2e8   : > { %3210 = vmatmul.bf16.gmra.mxu0 %v11417_v48  ;;  %3703 = vmatpush.bf16.msrb.mxu1 %v14466_v15  ;;  %v2436_v22 = vadd.f32 %v2435_v18, %v2396_v28 }
 0x2e9   : > { %8079 = vmatmul.msk.bf16.gmra.mxu2 %vm735_vm0, %v11419_v47  ;;  %v14470_v47 = vld [vmem:[#allocation72_spill] sm:$0xff] }
 0x2ea   : > { %v2803_v3 = vpop.f32.mrf.mxu1  ;;  %v11840_v55 = vadd.f32 %v2436_v22, %v11107_v43 }
 0x2eb   : > { %3778 = vmatpush.bf16.msrb.mxu0 %v14467_v31  ;;  %8074 = vmatmul.msk.bf16.gmra.mxu3 %vm735_vm0, %v11443_v29 }
 0x2ec   : > { %v2511_v1 = vpop.f32.mrf.mxu2  ;;  %3704 = vmatpush.bf16.msrb.mxu1 %v14468_v42 }
 0x2ed   : > { %v2512_v8 = vadd.f32 %v2511_v1, %v2472_v34  ;;  %v2474_v36 = vpop.f32.mrf.mxu0  ;;  %3137 = vmatmul.bf16.gmra.mxu1 %v11441_v53 }
 0x2ef   : > { %3779 = vmatpush.bf16.msrb.mxu0 %v14469_v20  ;;  %v11844_v48 = vadd.f32 %v2512_v8, %v11109_v4  ;;  %v2842_v52 = vpop.f32.mrf.mxu3 }
 0x2f0   : > { %v2843_v49 = vadd.f32 %v2842_v52, %v2803_v3 }
 0x2f2   : > { %v2805_v16 = vpop.f32.mrf.mxu1  ;;  %v11851_v43 = vadd.f32 %v2843_v49, %v11136_v19 }
 0x2f3   : > { %3780 = vmatpush.bf16.msrb.mxu0 %v14470_v47 }
 0x2f4   : > { %v2513_v28 = vpop.f32.mrf.mxu2 }
 0x2f5   : > { %v2514_v34 = vadd.f32 %v2513_v28, %v2474_v36  ;;  %v2881_v6 = vpop.f32.mrf.mxu0 }
 0x2f7   : > { %3781 = vmatpush.bf16.msrb.mxu0 %v14471_v26  ;;  %v11855_v4 = vadd.f32 %v2514_v34, %v11132_v61  ;;  %v2844_v15 = vpop.f32.mrf.mxu3 }
 0x2f8   : > { %3215 = vmatmul.bf16.gmra.mxu0 %v11441_v53  ;;  %v2845_v31 = vadd.f32 %v2844_v15, %v2805_v16 }
 0x2f9   : > { %8080 = vmatmul.msk.bf16.gmra.mxu2 %vm735_vm0, %v11443_v29 }
 0x2fa   : > { %v2808_v22 = vpop.f32.mrf.mxu1  ;;  %v11862_v19 = vadd.f32 %v2845_v31, %v11160_v40 }
 0x2fb   : > { %3782 = vmatpush.bf16.msrb.mxu0 %v14472_v10  ;;  %8075 = vmatmul.msk.bf16.gmra.mxu3 %vm735_vm0, %v11506_v27 }
 0x2fc   : > { %v2920_v18 = vpop.f32.mrf.mxu2 }
 0x2fd   : > { %v2921_v1 = vadd.f32 %v2920_v18, %v2881_v6  ;;  %v2883_v3 = vpop.f32.mrf.mxu0  ;;  %3142 = vmatmul.bf16.gmra.mxu1 %v11504_v57 }
 0x2ff   : > { %v11865_v8 = vadd.f32 %v2921_v1, %v11172_v62  ;;  %v2847_v61 = vpop.f32.mrf.mxu3  ;;  %v8084_v1 = vld [vmem:[%s9415_s25 + $0xc0] sm:$0xff] }
 0x300   : > { %v2848_v53 = vadd.f32 %v2847_v61, %v2808_v22 }
 0x302   : > { %v2810_v36 = vpop.f32.mrf.mxu1  ;;  %v11871_v47 = vadd.f32 %v2848_v53, %v11221_v35 }
 0x304   : > { %v2922_v29 = vpop.f32.mrf.mxu2 }
 0x305   : > { %v2923_v42 = vadd.f32 %v2922_v29, %v2883_v3  ;;  %v2886_v20 = vpop.f32.mrf.mxu0  ;;  %v8085_v29 = vld [vmem:[%s9415_s25 + $0xc8] sm:$0xff] }
 0x307   : > { %v11874_v40 = vadd.f32 %v2923_v42, %v11235_v33  ;;  %v2849_v62 = vpop.f32.mrf.mxu3  ;;  %v3309_v42 = vunpack.c.1.s8 %v8085_v29 }
 0x308   : > { %3220 = vmatmul.bf16.gmra.mxu0 %v11504_v57  ;;  %v2850_v52 = vadd.f32 %v2849_v62, %v2810_v36 }
 0x309   : > { %8081 = vmatmul.msk.bf16.gmra.mxu2 %vm735_vm0, %v11506_v27 }
 0x30a   : > { %v2813_v28 = vpop.f32.mrf.mxu1  ;;  %v11880_v6 = vadd.f32 %v2850_v52, %v11293_v11 }
 0x30b   : > { %8076 = vmatmul.msk.bf16.gmra.mxu3 %vm735_vm0, %v11643_v38 }
 0x30c   : > { %v2925_v49 = vpop.f32.mrf.mxu2 }
 0x30d   : > { %v2926_v16 = vadd.f32 %v2925_v49, %v2886_v20  ;;  %v2888_v34 = vpop.f32.mrf.mxu0  ;;  %3147 = vmatmul.bf16.gmra.mxu1 %v11629_v32 }
 0x30f   : > { %v11883_v35 = vadd.f32 %v2926_v16, %v11304_v39  ;;  %v2852_v33 = vpop.f32.mrf.mxu3 }
 0x310   : > { %v2853_v57 = vadd.f32 %v2852_v33, %v2813_v28 }
 0x312   : > { %v2815_v26 = vpop.f32.mrf.mxu1  ;;  %v11889_v31 = vadd.f32 %v2853_v57, %v11329_v5 }
 0x314   : > { %v2927_v27 = vpop.f32.mrf.mxu2 }
 0x315   : > { %v2928_v10 = vadd.f32 %v2927_v27, %v2888_v34  ;;  %v2891_v15 = vpop.f32.mrf.mxu0  ;;  %v14473_v27 = vld [vmem:[#allocation188_spill] sm:$0xff] }
 0x317   : > { %v11892_v11 = vadd.f32 %v2928_v10, %v11343_v60  ;;  %v2854_v39 = vpop.f32.mrf.mxu3  ;;  %v3306_v60 = vunpack.c.0.s8 %v8084_v1 }
 0x318   : > { %3225 = vmatmul.bf16.gmra.mxu0 %v11629_v32  ;;  %v2855_v18 = vadd.f32 %v2854_v39, %v2815_v26  ;;  %v3307_v32 = vunpack.c.0.s8 %v8085_v29 }
 0x319   : > { %8082 = vmatmul.msk.bf16.gmra.mxu2 %vm735_vm0, %v11643_v38  ;;  %v3308_v38 = vunpack.c.1.s8 %v8084_v1  ;;  %v3330_v62 = vand.u32 255, %v3306_v60 }
 0x31a   : > { %v2818_v3 = vpop.f32.mrf.mxu1  ;;  %v11900_v36 = vadd.f32 %v2855_v18, %v11376_v13  ;;  %v3331_v16 = vand.u32 255, %v3307_v32  ;;  %v3333_v13 = vand.u32 255, %v3309_v42  ;;  %v14476_v42 = vld [vmem:[#allocation102_spill] sm:$0xff] }
 0x31b   : > { %8077 = vmatmul.msk.bf16.gmra.mxu3 %vm735_vm0, %v11743_v56  ;;  %v3332_v28 = vand.u32 255, %v3308_v38  ;;  %v3354_v10 = vcvt.s32.f32 %v3330_v62 }
 0x31c   : > { %v2930_v22 = vpop.f32.mrf.mxu2  ;;  %v3355_v39 = vcvt.s32.f32 %v3331_v16  ;;  %v3357_v18 = vcvt.s32.f32 %v3333_v13  ;;  %v14478_v16 = vld [vmem:[#allocation6_spill] sm:$0xff]  ;;  %v14479_v13 = vld [vmem:[#allocation7_spill] sm:$0xff] }
 0x31d   : > { %v2931_v61 = vadd.f32 %v2930_v22, %v2891_v15  ;;  %v2893_v53 = vpop.f32.mrf.mxu0  ;;  %3152 = vmatmul.bf16.gmra.mxu1 %v11741_v41  ;;  %v3356_v15 = vcvt.s32.f32 %v3332_v28  ;;  %v3313_v28 = vunpack.c.3.s8 %v8085_v29 }
 0x31f   : > { %v11903_v5 = vadd.f32 %v2931_v61, %v11381_v51  ;;  %v2857_v20 = vpop.f32.mrf.mxu3  ;;  %v11917_v61 = vpack.c.bf16 %v3356_v15, %v3354_v10 }
 0x320   : > { %v2858_v52 = vadd.f32 %v2857_v20, %v2818_v3 }
 0x321   : > { %14474 = vst [vmem:[#allocation81_spill] sm:$0xff] %v11917_v61 }
 0x322   : > { %v2820_v34 = vpop.f32.mrf.mxu1  ;;  %v11909_v57 = vadd.f32 %v2858_v52, %v11387_v14  ;;  %v3310_v52 = vunpack.c.2.s8 %v8084_v1 }
 0x324   : > { %v2932_v49 = vpop.f32.mrf.mxu2 }
 0x325   : > { %v2933_v33 = vadd.f32 %v2932_v49, %v2893_v53  ;;  %v2896_v51 = vpop.f32.mrf.mxu0  ;;  %v11919_v53 = vpack.c.bf16 %v3357_v18, %v3355_v39  ;;  %v3311_v49 = vunpack.c.2.s8 %v8085_v29  ;;  %v3337_v39 = vand.u32 255, %v3313_v28  ;;  %v14486_v28 = vld [vmem:[#allocation15_spill] sm:$0xff] }
 0x327   : > { %v11912_v26 = vadd.f32 %v2933_v33, %v14473_v27  ;;  %v2859_v22 = vpop.f32.mrf.mxu3  ;;  %14475 = vst [vmem:[#allocation93_spill] sm:$0xff] %v11919_v53  ;;  %v3334_v33 = vand.u32 255, %v3310_v52  ;;  %v3335_v15 = vand.u32 255, %v3311_v49  ;;  %v14485_v49 = vld [vmem:[#allocation8_spill] sm:$0xff] }
 0x328   : > { %3230 = vmatmul.bf16.gmra.mxu0 %v11741_v41  ;;  %v2860_v3 = vadd.f32 %v2859_v22, %v2820_v34  ;;  %v14477_v41 = vld [vmem:[#allocation103_spill] sm:$0xff] }
 0x329   : > { %8083 = vmatmul.msk.bf16.gmra.mxu2 %vm735_vm0, %v11743_v56  ;;  %v3312_v56 = vunpack.c.3.s8 %v8084_v1  ;;  %v14482_v1 = vld [vmem:[#allocation104_spill] sm:$0xff]  ;;  %v3358_v52 = vcvt.s32.f32 %v3334_v33 }
 0x32a   : > { %v2823_v60 = vpop.f32.mrf.mxu1  ;;  %v11922_v20 = vadd.f32 %v2860_v3, %v14476_v42  ;;  %v14483_v42 = vld [vmem:[#allocation105_spill] sm:$0xff] }
 0x32b   : > { %8090 = vmatmul.msk.bf16.vlgmr.msra.gmra.mxu3 %vm735_vm0, %v11919_v53  ;;  %v3336_v10 = vand.u32 255, %v3312_v56  ;;  %v3361_v56 = vcvt.s32.f32 %v3337_v39 }
 0x32c   : > { %v2935_v14 = vpop.f32.mrf.mxu2  ;;  %3920 = vmatpush.bf16.msra.mxu3 %v14479_v13 }
 0x32d   : > { %v2936_v38 = vadd.f32 %v2935_v14, %v2896_v51  ;;  %v2898_v32 = vpop.f32.mrf.mxu0  ;;  %3416 = vmatmul.bf16.vlgmr.msra.gmra.mxu1 %v11917_v61  ;;  %v14480_v14 = vld [vmem:[#allocation10_spill] sm:$0xff] }
 0x32e   : > { %3877 = vmatpush.bf16.msra.mxu1 %v14478_v16  ;;  %v3359_v16 = vcvt.s32.f32 %v3335_v15  ;;  %v11952_v15 = vld [vmem:[%s9415_s25 + $0xd0] sm:$0xff] }
 0x32f   : > { %v11925_v62 = vadd.f32 %v2936_v38, %v14477_v41  ;;  %v2862_v34 = vpop.f32.mrf.mxu3  ;;  %v14481_v38 = vld [vmem:[#allocation11_spill] sm:$0xff] }
 0x330   : > { %v2863_v51 = vadd.f32 %v2862_v34, %v2823_v60  ;;  %3921 = vmatpush.bf16.msra.mxu3 %v14481_v38  ;;  %v3360_v60 = vcvt.s32.f32 %v3336_v10  ;;  %v14487_v34 = vld [vmem:[#allocation9_spill] sm:$0xff] }
 0x331   : > { %v11955_v38 = vld [vmem:[%s9415_s25 + $0xd8] sm:$0xff] }
 0x332   : > { %v2825_v18 = vpop.f32.mrf.mxu1  ;;  %3878 = vmatpush.bf16.msra.mxu1 %v14480_v14  ;;  %v11935_v29 = vadd.f32 %v2863_v51, %v14482_v1  ;;  %v11947_v33 = vpack.c.bf16 %v3360_v60, %v3358_v52  ;;  %v14490_v1 = vld [vmem:[#allocation18_spill] sm:$0xff]  ;;  %v14495_v52 = vld [vmem:[#allocation107_spill] sm:$0xff] }
 0x334   : > { %v2937_v27 = vpop.f32.mrf.mxu2  ;;  %3922 = vmatpush.bf16.msra.mxu3 %v14486_v28  ;;  %14488 = vst [vmem:[#allocation82_spill] sm:$0xff] %v11947_v33  ;;  %v3315_v28 = vunpack.c.0.s8 %v11955_v38 }
 0x335   : > { %v2938_v22 = vadd.f32 %v2937_v27, %v2898_v32  ;;  %v2901_v3 = vpop.f32.mrf.mxu0  ;;  %v14484_v32 = vld [vmem:[#allocation14_spill] sm:$0xff]  ;;  %v11949_v27 = vpack.c.bf16 %v3361_v56, %v3359_v16  ;;  %v3314_v16 = vunpack.c.0.s8 %v11952_v15  ;;  %v14497_v56 = vld [vmem:[#allocation13_spill] sm:$0xff] }
 0x336   : > { %3879 = vmatpush.bf16.msra.mxu1 %v14484_v32 }
 0x337   : > { %v11938_v41 = vadd.f32 %v2938_v22, %v14483_v42  ;;  %v2864_v13 = vpop.f32.mrf.mxu3  ;;  %14489 = vst [vmem:[#allocation84_spill] sm:$0xff] %v11949_v27  ;;  %v14491_v42 = vld [vmem:[#allocation106_spill] sm:$0xff] }
 0x338   : > { %3494 = vmatmul.bf16.vlgmr.msra.gmra.mxu0 %v11917_v61  ;;  %v2865_v51 = vadd.f32 %v2864_v13, %v2825_v18  ;;  %v14494_v18 = vld [vmem:[#allocation19_spill] sm:$0xff]  ;;  %v3317_v13 = vunpack.c.1.s8 %v11955_v38 }
 0x339   : > { %8096 = vmatmul.msk.bf16.vlgmr.msra.gmra.mxu2 %vm735_vm0, %v11919_v53  ;;  %3955 = vmatpush.bf16.msra.mxu0 %v14485_v49  ;;  %v14493_v49 = vld [vmem:[#allocation12_spill] sm:$0xff] }
 0x33a   : > { %3998 = vmatpush.bf16.msra.mxu2 %v14487_v34  ;;  %v2828_v39 = vpop.f32.mrf.mxu1  ;;  %3880 = vmatpush.bf16.msra.mxu1 %v14490_v1  ;;  %v11959_v32 = vadd.f32 %v2865_v51, %v14491_v42  ;;  %v14498_v34 = vld [vmem:[#allocation22_spill] sm:$0xff]  ;;  %v14499_v51 = vld [vmem:[#allocation16_spill] sm:$0xff]  ;;  %v14500_v1 = vld [vmem:[#allocation17_spill] sm:$0xff] }
 0x33b   : > { %3923 = vmatpush.bf16.msra.mxu3 %v14494_v18  ;;  %v14502_v53 = vld [vmem:[#allocation108_spill] sm:$0xff] }
 0x33c   : > { %v2940_v10 = vpop.f32.mrf.mxu2  ;;  %14492 = vst [vmem:[#allocation91_spill] sm:$0xff] %v11959_v32  ;;  %8091 = vmatmul.msk.bf16.gmra.mxu3 %vm735_vm0, %v11949_v27 }
 0x33d   : > { %v2941_v22 = vadd.f32 %v2940_v10, %v2901_v3  ;;  %v2903_v14 = vpop.f32.mrf.mxu0  ;;  %3956 = vmatpush.bf16.msra.mxu0 %v14493_v49  ;;  %3421 = vmatmul.bf16.gmra.mxu1 %v11947_v33  ;;  %v3316_v3 = vunpack.c.1.s8 %v11952_v15 }
 0x33e   : > { %3999 = vmatpush.bf16.msra.mxu2 %v14497_v56  ;;  %3881 = vmatpush.bf16.msra.mxu1 %v14498_v34  ;;  %v3341_v56 = vand.u32 255, %v3317_v13  ;;  %v14504_v34 = vld [vmem:[#allocation20_spill] sm:$0xff] }
 0x33f   : > { %v11964_v60 = vadd.f32 %v2941_v22, %v14495_v52  ;;  %v2867_v10 = vpop.f32.mrf.mxu3  ;;  %v3338_v22 = vand.u32 255, %v3314_v16  ;;  %v3340_v18 = vand.u32 255, %v3316_v3  ;;  %v3339_v52 = vand.u32 255, %v3315_v28  ;;  %v14507_v16 = vld [vmem:[#allocation21_spill] sm:$0xff] }
 0x340   : > { %v2868_v42 = vadd.f32 %v2867_v10, %v2828_v39  ;;  %v3365_v28 = vcvt.s32.f32 %v3341_v56  ;;  %v14513_v56 = vld [vmem:[#allocation110_spill] sm:$0xff] }
 0x341   : > { %14496 = vst [vmem:[#allocation85_spill] sm:$0xff] %v11964_v60  ;;  %3957 = vmatpush.bf16.msra.mxu0 %v14499_v51  ;;  %v14505_v51 = vld [vmem:[#allocation109_spill] sm:$0xff]  ;;  %v3362_v39 = vcvt.s32.f32 %v3338_v22  ;;  %v3364_v10 = vcvt.s32.f32 %v3340_v18  ;;  %v3363_v3 = vcvt.s32.f32 %v3339_v52  ;;  %v14512_v52 = vld [vmem:[#allocation28_spill] sm:$0xff] }
 0x342   : > { %4000 = vmatpush.bf16.msra.mxu2 %v14500_v1  ;;  %v2830_v44 = vpop.f32.mrf.mxu1  ;;  %3882 = vmatpush.bf16.msra.mxu1 %v14501_v0  ;;  %v11979_v61 = vadd.f32 %v2868_v42, %v14502_v53  ;;  %v14508_v0 = vld [vmem:[#allocation26_spill] sm:$0xff]  ;;  %v14509_v53 = vld [vmem:[#allocation23_spill] sm:$0xff] }
 0x343   : > { %v11991_v1 = vpack.c.bf16 %v3364_v10, %v3362_v39  ;;  %v3319_v39 = vunpack.c.2.s8 %v11955_v38  ;;  %v3321_v10 = vunpack.c.3.s8 %v11955_v38 }
 0x344   : > { %v2942_v49 = vpop.f32.mrf.mxu2  ;;  %14503 = vst [vmem:[#allocation87_spill] sm:$0xff] %v11979_v61 }
 0x345   : > { %v2943_v45 = vadd.f32 %v2942_v49, %v2903_v14  ;;  %v2906_v21 = vpop.f32.mrf.mxu0  ;;  %3958 = vmatpush.bf16.msra.mxu0 %v14504_v34  ;;  %14510 = vst [vmem:[#allocation88_spill] sm:$0xff] %v11991_v1 }
 0x346   : > { %4001 = vmatpush.bf16.msra.mxu2 %v14507_v16  ;;  %3883 = vmatpush.bf16.msra.mxu1 %v14508_v0  ;;  %v14516_v16 = vld [vmem:[#allocation111_spill] sm:$0xff] }
 0x347   : > { %v11983_v60 = vadd.f32 %v2943_v45, %v14505_v51  ;;  %v2869_v14 = vpop.f32.mrf.mxu3  ;;  %v11993_v45 = vpack.c.bf16 %v3365_v28, %v3363_v3  ;;  %v14515_v51 = vld [vmem:[#allocation25_spill] sm:$0xff]  ;;  %v14518_v3 = vld [vmem:[#allocation27_spill] sm:$0xff] }
 0x348   : > { %3499 = vmatmul.bf16.gmra.mxu0 %v11947_v33  ;;  %v2870_v13 = vadd.f32 %v2869_v14, %v2830_v44  ;;  %v3318_v44 = vunpack.c.2.s8 %v11952_v15 }
 0x349   : > { %14506 = vst [vmem:[#allocation97_spill] sm:$0xff] %v11983_v60  ;;  %8097 = vmatmul.msk.bf16.gmra.mxu2 %vm735_vm0, %v11949_v27  ;;  %3959 = vmatpush.bf16.msra.mxu0 %v14509_v53  ;;  %v14519_v27 = vld [vmem:[#allocation139_spill] sm:$0xff] }
 0x34a   : > { %14511 = vst [vmem:[#allocation90_spill] sm:$0xff] %v11993_v45  ;;  %v3128_v22 = vpop.f32.mrf.mxu1  ;;  %3884 = vmatpush.bf16.msra.mxu1 %v14512_v52  ;;  %v11997_v34 = vadd.f32 %v2870_v13, %v14513_v56  ;;  %v3342_v53 = vand.u32 255, %v3318_v44  ;;  %v3345_v52 = vand.u32 255, %v3321_v10 }
 0x34c   : > { %v2945_v42 = vpop.f32.mrf.mxu2  ;;  %14514 = vst [vmem:[#allocation99_spill] sm:$0xff] %v11997_v34  ;;  %8092 = vmatmul.msk.bf16.gmra.mxu3 %vm735_vm0, %v11993_v45 }
 0x34d   : > { %v2946_v49 = vadd.f32 %v2945_v42, %v2906_v21  ;;  %v2908_v18 = vpop.f32.mrf.mxu0  ;;  %3960 = vmatpush.bf16.msra.mxu0 %v14515_v51  ;;  %3426 = vmatmul.bf16.gmra.mxu1 %v11991_v1  ;;  %v3320_v21 = vunpack.c.3.s8 %v11952_v15  ;;  %v14521_v15 = vld [vmem:[#allocation29_spill] sm:$0xff] }
 0x34f   : > { %v12001_v0 = vadd.f32 %v2946_v49, %v14516_v16  ;;  %v3167_v28 = vpop.f32.mrf.mxu3  ;;  %v3344_v42 = vand.u32 255, %v3320_v21  ;;  %v3343_v49 = vand.u32 255, %v3319_v39 }
 0x350   : > { %v3168_v14 = vadd.f32 %v3167_v28, %v3128_v22  ;;  %v3369_v28 = vcvt.s32.f32 %v3345_v52  ;;  %v14526_v52 = vld [vmem:[#allocation143_spill] sm:$0xff] }
 0x351   : > { %14517 = vst [vmem:[#allocation92_spill] sm:$0xff] %v12001_v0  ;;  %3961 = vmatpush.bf16.msra.mxu0 %v14518_v3  ;;  %v14522_v0 = vld [vmem:[#allocation114_spill] sm:$0xff]  ;;  %v3366_v3 = vcvt.s32.f32 %v3342_v53  ;;  %v3368_v44 = vcvt.s32.f32 %v3344_v42  ;;  %v3367_v22 = vcvt.s32.f32 %v3343_v49  ;;  %v8089_v53 = vld [vmem:[%s9415_s25 + $0xe8] sm:$0xff] }
 0x352   : > { %v3130_v56 = vpop.f32.mrf.mxu1  ;;  %v12012_v33 = vadd.f32 %v3168_v14, %v14519_v27  ;;  %v8088_v14 = vld [vmem:[%s9415_s25 + $0xe0] sm:$0xff] }
 0x353   : > { %v12021_v39 = vpack.c.bf16 %v3368_v44, %v3366_v3  ;;  %v12023_v27 = vpack.c.bf16 %v3369_v28, %v3367_v22  ;;  %v14524_v42 = vld [vmem:[#allocation142_spill] sm:$0xff]  ;;  %v3325_v3 = vunpack.c.1.s8 %v8089_v53 }
 0x354   : > { %v2947_v13 = vpop.f32.mrf.mxu2  ;;  %14520 = vst [vmem:[#allocation94_spill] sm:$0xff] %v12012_v33  ;;  %v3322_v33 = vunpack.c.0.s8 %v8088_v14 }
 0x355   : > { %v2948_v51 = vadd.f32 %v2947_v13, %v2908_v18  ;;  %v3206_v16 = vpop.f32.mrf.mxu0  ;;  %3962 = vmatpush.bf16.msra.mxu0 %v14521_v15 }
 0x356   : > { %v3346_v22 = vand.u32 255, %v3322_v33 }
 0x357   : > { %v12016_v38 = vadd.f32 %v2948_v51, %v14522_v0  ;;  %v3169_v18 = vpop.f32.mrf.mxu3 }
 0x358   : > { %3504 = vmatmul.bf16.gmra.mxu0 %v11991_v1  ;;  %v3170_v21 = vadd.f32 %v3169_v18, %v3130_v56  ;;  %v3323_v56 = vunpack.c.0.s8 %v8089_v53 }
 0x359   : > { %14523 = vst [vmem:[#allocation101_spill] sm:$0xff] %v12016_v38  ;;  %8098 = vmatmul.msk.bf16.gmra.mxu2 %vm735_vm0, %v11993_v45  ;;  %v3324_v45 = vunpack.c.1.s8 %v8088_v14  ;;  %v3370_v38 = vcvt.s32.f32 %v3346_v22  ;;  %v14530_v22 = vld [vmem:[#allocation206_spill] sm:$0xff] }
 0x35a   : > { %v3133_v0 = vpop.f32.mrf.mxu1  ;;  %v12028_v49 = vadd.f32 %v3170_v21, %v14524_v42  ;;  %v3349_v21 = vand.u32 255, %v3325_v3 }
 0x35c   : > { %v3245_v10 = vpop.f32.mrf.mxu2  ;;  %14525 = vst [vmem:[#allocation95_spill] sm:$0xff] %v12028_v49  ;;  %8093 = vmatmul.msk.bf16.gmra.mxu3 %vm735_vm0, %v12023_v27  ;;  %v14175_v60 = vrot.slane %v12028_v49, 1  ;;  %v3373_v33 = vcvt.s32.f32 %v3349_v21 }
 0x35d   : > { %v3246_v13 = vadd.f32 %v3245_v10, %v3206_v16  ;;  %v3208_v51 = vpop.f32.mrf.mxu0  ;;  %3431 = vmatmul.bf16.gmra.mxu1 %v12021_v39  ;;  %v3348_v16 = vand.u32 255, %v3324_v45  ;;  %v3347_v10 = vand.u32 255, %v3323_v56 }
 0x35f   : > { %v12031_v15 = vadd.f32 %v3246_v13, %v14526_v52  ;;  %v3172_v44 = vpop.f32.mrf.mxu3  ;;  %v3372_v34 = vcvt.s32.f32 %v3348_v16  ;;  %v3371_v32 = vcvt.s32.f32 %v3347_v10  ;;  %v3326_v10 = vunpack.c.2.s8 %v8088_v14 }
 0x360   : > { %v3173_v28 = vadd.f32 %v3172_v44, %v3133_v0 }
 0x361   : > { %14527 = vst [vmem:[#allocation54_spill] sm:$0xff] %v12031_v15  ;;  %v12049_v45 = vpack.c.bf16 %v3372_v34, %v3370_v38  ;;  %v12051_v0 = vpack.c.bf16 %v3373_v33, %v3371_v32  ;;  %v3327_v34 = vunpack.c.2.s8 %v8089_v53  ;;  %v3329_v38 = vunpack.c.3.s8 %v8089_v53 }
 0x362   : > { %v3135_v42 = vpop.f32.mrf.mxu1  ;;  %v3279_v52 = vadd.f32 %v3173_v28, %v11575_v58  ;;  %v14531_v28 = vld [vmem:[#allocation207_spill] sm:$0xff] }
 0x364   : > { %v3247_v18 = vpop.f32.mrf.mxu2  ;;  %v5224_v61 = vrot.slane %v3279_v52, 1 }
 0x365   : > { %v3248_v1 = vadd.f32 %v3247_v18, %v3208_v51  ;;  %v3211_v13 = vpop.f32.mrf.mxu0 }
 0x366   : > { %v12047_v58 = vsel %vm5217_vm1, %v14175_v60, %v5224_v61 }
 0x367   : > { %v12038_v15 = vadd.f32 %v3248_v1, %v11589_v63  ;;  %14529 = vst [vmem:[#allocation96_spill] sm:$0xff] %v12047_v58  ;;  %v3174_v63 = vpop.f32.mrf.mxu3 }
 0x368   : > { %3509 = vmatmul.bf16.gmra.mxu0 %v12021_v39  ;;  %v3175_v1 = vadd.f32 %v3174_v63, %v3135_v42  ;;  %v3328_v42 = vunpack.c.3.s8 %v8088_v14  ;;  %v3350_v63 = vand.u32 255, %v3326_v10  ;;  %v3353_v14 = vand.u32 255, %v3329_v38 }
 0x369   : > { %14528 = vst [vmem:[#allocation59_spill] sm:$0xff] %v12038_v15  ;;  %8099 = vmatmul.msk.bf16.gmra.mxu2 %vm735_vm0, %v12023_v27  ;;  %v14177_v32 = vrot.slane %v12038_v15, 1 }
 0x36a   : > { %v3138_v56 = vpop.f32.mrf.mxu1  ;;  %v3281_v16 = vadd.f32 %v3175_v1, %v14530_v22  ;;  %v3352_v22 = vand.u32 255, %v3328_v42 }
 0x36c   : > { %v3250_v51 = vpop.f32.mrf.mxu2  ;;  %v5228_v21 = vrot.slane %v3281_v16, 1  ;;  %8094 = vmatmul.msk.bf16.gmra.mxu3 %vm735_vm0, %v12051_v0  ;;  %v3351_v16 = vand.u32 255, %v3327_v34  ;;  %v3376_v58 = vcvt.s32.f32 %v3352_v22 }
 0x36d   : > { %v3251_v3 = vadd.f32 %v3250_v51, %v3211_v13  ;;  %v3213_v44 = vpop.f32.mrf.mxu0  ;;  %3436 = vmatmul.bf16.gmra.mxu1 %v12049_v45 }
 0x36e   : > { %v12060_v13 = vsel %vm5217_vm1, %v5224_v61, %v5228_v21  ;;  %v3375_v15 = vcvt.s32.f32 %v3351_v16  ;;  %v12086_v16 = vld [vmem:[%s9415_s25 + $0xf8] sm:$0xff] }
 0x36f   : > { %v3280_v18 = vadd.f32 %v3251_v3, %v14531_v28  ;;  %14532 = vst [vmem:[#allocation55_spill] sm:$0xff] %v12060_v13  ;;  %v3177_v33 = vpop.f32.mrf.mxu3  ;;  %v3374_v13 = vcvt.s32.f32 %v3350_v63  ;;  %v12083_v63 = vld [vmem:[%s9415_s25 + $0xf0] sm:$0xff] }
 0x370   : > { %v3178_v51 = vadd.f32 %v3177_v33, %v3138_v56 }
 0x371   : > { %v5226_v52 = vrot.slane %v3280_v18, 1  ;;  %v12078_v34 = vpack.c.bf16 %v3376_v58, %v3374_v13  ;;  %v3596_v58 = vunpack.c.0.s8 %v12086_v16 }
 0x372   : > { %v3140_v28 = vpop.f32.mrf.mxu1  ;;  %v3283_v18 = vadd.f32 %v3178_v51, %v11695_v17 }
 0x373   : > { %v12065_v1 = vsel %vm5217_vm1, %v14177_v32, %v5226_v52  ;;  %v3377_v32 = vcvt.s32.f32 %v3353_v14 }
 0x374   : > { %14533 = vst [vmem:[#allocation62_spill] sm:$0xff] %v12065_v1  ;;  %v3252_v3 = vpop.f32.mrf.mxu2  ;;  %v5232_v10 = vrot.slane %v3283_v18, 1 }
 0x375   : > { %v3253_v53 = vadd.f32 %v3252_v3, %v3213_v44  ;;  %v3216_v60 = vpop.f32.mrf.mxu0  ;;  %v12080_v38 = vpack.c.bf16 %v3377_v32, %v3375_v15  ;;  %v3597_v15 = vunpack.c.1.s8 %v12083_v63 }
 0x376   : > { %v12073_v44 = vsel %vm5217_vm1, %v5228_v21, %v5232_v10 }
 0x377   : > { %v3282_v61 = vadd.f32 %v3253_v53, %v11709_v46  ;;  %14534 = vst [vmem:[#allocation98_spill] sm:$0xff] %v12073_v44  ;;  %v3179_v42 = vpop.f32.mrf.mxu3 }
 0x378   : > { %3514 = vmatmul.bf16.gmra.mxu0 %v12049_v45  ;;  %v3180_v46 = vadd.f32 %v3179_v42, %v3140_v28  ;;  %v3621_v42 = vand.u32 255, %v3597_v15 }
 0x379   : > { %v5230_v56 = vrot.slane %v3282_v61, 1  ;;  %8100 = vmatmul.msk.bf16.gmra.mxu2 %vm735_vm0, %v12051_v0 }
 0x37a   : > { %v3143_v51 = vpop.f32.mrf.mxu1  ;;  %v3285_v21 = vadd.f32 %v3180_v46, %v11748_v30  ;;  %v3620_v46 = vand.u32 255, %v3596_v58 }
 0x37b   : > { %v12076_v17 = vsel %vm5217_vm1, %v5226_v52, %v5230_v56  ;;  %v3595_v52 = vunpack.c.0.s8 %v12083_v63 }
 0x37c   : > { %14535 = vst [vmem:[#allocation56_spill] sm:$0xff] %v12076_v17  ;;  %v3255_v33 = vpop.f32.mrf.mxu2  ;;  %v5236_v53 = vrot.slane %v3285_v21, 1  ;;  %8095 = vmatmul.msk.bf16.gmra.mxu3 %vm735_vm0, %v12080_v38 }
 0x37d   : > { %v3256_v3 = vadd.f32 %v3255_v33, %v3216_v60  ;;  %v3218_v22 = vpop.f32.mrf.mxu0  ;;  %3441 = vmatmul.bf16.gmra.mxu1 %v12078_v34  ;;  %v3598_v60 = vunpack.c.1.s8 %v12086_v16 }
 0x37e   : > { %v12098_v13 = vsel %vm5217_vm1, %v5232_v10, %v5236_v53 }
 0x37f   : > { %v3284_v14 = vadd.f32 %v3256_v3, %v11753_v2  ;;  %14536 = vst [vmem:[#allocation65_spill] sm:$0xff] %v12098_v13  ;;  %v3182_v30 = vpop.f32.mrf.mxu3  ;;  %v3619_v2 = vand.u32 255, %v3595_v52  ;;  %v3622_v33 = vand.u32 255, %v3598_v60  ;;  %v3645_v52 = vcvt.s32.f32 %v3621_v42 }
 0x380   : > { %v3183_v18 = vadd.f32 %v3182_v30, %v3143_v51  ;;  %v3644_v13 = vcvt.s32.f32 %v3620_v46  ;;  %v14540_v46 = vld [vmem:[#allocation30_spill] sm:$0xff] }
 0x381   : > { %v5234_v32 = vrot.slane %v3284_v14, 1  ;;  %v3643_v1 = vcvt.s32.f32 %v3619_v2 }
 0x382   : > { %v3145_v3 = vpop.f32.mrf.mxu1  ;;  %v3287_v44 = vadd.f32 %v3183_v18, %v11765_v9 }
 0x383   : > { %v12101_v28 = vsel %vm5217_vm1, %v5230_v56, %v5234_v32  ;;  %v3646_v56 = vcvt.s32.f32 %v3622_v33 }
 0x384   : > { %14537 = vst [vmem:[#allocation67_spill] sm:$0xff] %v12101_v28  ;;  %v3257_v61 = vpop.f32.mrf.mxu2  ;;  %v5240_v10 = vrot.slane %v3287_v44, 1 }
 0x385   : > { %v3258_v21 = vadd.f32 %v3257_v61, %v3218_v22  ;;  %v3221_v17 = vpop.f32.mrf.mxu0  ;;  %v12116_v44 = vpack.c.bf16 %v3646_v56, %v3644_v13  ;;  %v3602_v13 = vunpack.c.3.s8 %v12086_v16 }
 0x386   : > { %v12109_v51 = vsel %vm5217_vm1, %v5236_v53, %v5240_v10  ;;  %v3599_v53 = vunpack.c.2.s8 %v12083_v63 }
 0x387   : > { %v3286_v14 = vadd.f32 %v3258_v21, %v11768_v23  ;;  %14538 = vst [vmem:[#allocation100_spill] sm:$0xff] %v12109_v51  ;;  %v3184_v22 = vpop.f32.mrf.mxu3  ;;  %v12114_v23 = vpack.c.bf16 %v3645_v52, %v3643_v1  ;;  %v3601_v1 = vunpack.c.3.s8 %v12083_v63  ;;  %v14656_v51 = vld [vmem:[#allocation192_spill] sm:$0xff] }
 0x388   : > { %3519 = vmatmul.bf16.gmra.mxu0 %v12078_v34  ;;  %v3185_v9 = vadd.f32 %v3184_v22, %v3145_v3  ;;  %v3623_v3 = vand.u32 255, %v3599_v53  ;;  %v3626_v22 = vand.u32 255, %v3602_v13 }
 0x389   : > { %v5238_v28 = vrot.slane %v3286_v14, 1  ;;  %8101 = vmatmul.msk.bf16.gmra.mxu2 %vm735_vm0, %v12080_v38  ;;  %v3625_v63 = vand.u32 255, %v3601_v1 }
 0x38a   : > { %v3148_v60 = vpop.f32.mrf.mxu1  ;;  %v3289_v18 = vadd.f32 %v3185_v9, %v11779_v7  ;;  %v14541_v7 = vld [vmem:[#allocation35_spill] sm:$0xff]  ;;  %v3647_v53 = vcvt.s32.f32 %v3623_v3 }
 0x38b   : > { %v12112_v15 = vsel %vm5217_vm1, %v5234_v32, %v5238_v28  ;;  %v3600_v32 = vunpack.c.2.s8 %v12086_v16 }
 0x38c   : > { %14539 = vst [vmem:[#allocation60_spill] sm:$0xff] %v12112_v15  ;;  %v3260_v58 = vpop.f32.mrf.mxu2  ;;  %v5244_v42 = vrot.slane %v3289_v18, 1  ;;  %8108 = vmatmul.msk.bf16.vlgmr.msrb.gmra.mxu3 %vm735_vm0, %v12116_v44  ;;  %v14545_v18 = vld [vmem:[#allocation38_spill] sm:$0xff] }
 0x38d   : > { %v3261_v30 = vadd.f32 %v3260_v58, %v3221_v17  ;;  %v3223_v2 = vpop.f32.mrf.mxu0  ;;  %3705 = vmatmul.bf16.vlgmr.msrb.gmra.mxu1 %v12114_v23  ;;  %4076 = vmatpush.bf16.msrb.mxu3 %v14541_v7  ;;  %v3624_v56 = vand.u32 255, %v3600_v32  ;;  %v14547_v32 = vld [vmem:[#allocation36_spill] sm:$0xff]  ;;  %v14650_v15 = vld [vmem:[#allocation190_spill] sm:$0xff] }
 0x38e   : > { %4033 = vmatpush.bf16.msrb.mxu1 %v14540_v46 }
 0x38f   : > { %v3288_v61 = vadd.f32 %v3261_v30, %v11783_v24  ;;  %v12130_v24 = vsel %vm5217_vm1, %v5240_v10, %v5244_v42  ;;  %v3187_v33 = vpop.f32.mrf.mxu3  ;;  %v14544_v30 = vld [vmem:[#allocation31_spill] sm:$0xff]  ;;  %v3648_v7 = vcvt.s32.f32 %v3624_v56 }
 0x390   : > { %14542 = vst [vmem:[#allocation57_spill] sm:$0xff] %v12130_v24  ;;  %v3188_v14 = vadd.f32 %v3187_v33, %v3148_v60  ;;  %v3650_v60 = vcvt.s32.f32 %v3626_v22  ;;  %v14550_v33 = vld [vmem:[#allocation41_spill] sm:$0xff]  ;;  %v12157_v22 = vld [vmem:[%s9415_s25 + $0x100] sm:$0xff] }
 0x391   : > { %v5242_v17 = vrot.slane %v3288_v61, 1  ;;  %4077 = vmatpush.bf16.msrb.mxu3 %v14545_v18 }
 0x392   : > { %v3150_v9 = vpop.f32.mrf.mxu1  ;;  %4034 = vmatpush.bf16.msrb.mxu1 %v14544_v30  ;;  %v3291_v10 = vadd.f32 %v3188_v14, %v11795_v37  ;;  %v14548_v37 = vld [vmem:[#allocation42_spill] sm:$0xff] }
 0x393   : > { %v12133_v21 = vsel %vm5217_vm1, %v5238_v28, %v5242_v17  ;;  %v3649_v28 = vcvt.s32.f32 %v3625_v63  ;;  %v12154_v63 = vpack.c.bf16 %v3650_v60, %v3648_v7 }
 0x394   : > { %14543 = vst [vmem:[#allocation69_spill] sm:$0xff] %v12133_v21  ;;  %v3262_v52 = vpop.f32.mrf.mxu2  ;;  %v5248_v46 = vrot.slane %v3291_v10, 1  ;;  %v12160_v10 = vld [vmem:[%s9415_s25 + $0x108] sm:$0xff] }
 0x395   : > { %v3263_v16 = vadd.f32 %v3262_v52, %v3223_v2  ;;  %v3226_v58 = vpop.f32.mrf.mxu0  ;;  %v14546_v2 = vld [vmem:[#allocation32_spill] sm:$0xff]  ;;  %4078 = vmatpush.bf16.msrb.mxu3 %v14548_v37  ;;  %v12152_v52 = vpack.c.bf16 %v3649_v28, %v3647_v53  ;;  %v3603_v53 = vunpack.c.0.s8 %v12157_v22  ;;  %v14555_v28 = vld [vmem:[#allocation49_spill] sm:$0xff]  ;;  %v3606_v60 = vunpack.c.1.s8 %v12160_v10  ;;  %v14556_v37 = vld [vmem:[#allocation34_spill] sm:$0xff] }
 0x396   : > { %4035 = vmatpush.bf16.msrb.mxu1 %v14546_v2  ;;  %v14553_v2 = vld [vmem:[#allocation39_spill] sm:$0xff] }
 0x397   : > { %v3290_v61 = vadd.f32 %v3263_v16, %v11798_v54  ;;  %v12146_v54 = vsel %vm5217_vm1, %v5244_v42, %v5248_v46  ;;  %v3189_v13 = vpop.f32.mrf.mxu3  ;;  %v14552_v42 = vld [vmem:[#allocation33_spill] sm:$0xff] }
 0x398   : > { %3783 = vmatmul.bf16.vlgmr.msrb.gmra.mxu0 %v12114_v23  ;;  %14549 = vst [vmem:[#allocation73_spill] sm:$0xff] %v12146_v54  ;;  %v3190_v14 = vadd.f32 %v3189_v13, %v3150_v9  ;;  %v14561_v54 = vld [vmem:[#allocation37_spill] sm:$0xff] }
 0x399   : > { %v5246_v1 = vrot.slane %v3290_v61, 1  ;;  %8114 = vmatmul.msk.bf16.vlgmr.msrb.gmra.mxu2 %vm735_vm0, %v12116_v44  ;;  %4111 = vmatpush.bf16.msrb.mxu0 %v14547_v32 }
 0x39a   : > { %4154 = vmatpush.bf16.msrb.mxu2 %v14550_v33  ;;  %v3153_v16 = vpop.f32.mrf.mxu1  ;;  %4036 = vmatpush.bf16.msrb.mxu1 %v14552_v42  ;;  %v3293_v61 = vadd.f32 %v3190_v14, %v11811_v25  ;;  %v3604_v25 = vunpack.c.0.s8 %v12160_v10  ;;  %v3627_v14 = vand.u32 255, %v3603_v53 }
 0x39b   : > { %v12150_v3 = vsel %vm5217_vm1, %v5242_v17, %v5246_v1  ;;  %v14554_v17 = vld [vmem:[#allocation45_spill] sm:$0xff] }
 0x39c   : > { %14551 = vst [vmem:[#allocation58_spill] sm:$0xff] %v12150_v3  ;;  %v3265_v56 = vpop.f32.mrf.mxu2  ;;  %4079 = vmatpush.bf16.msrb.mxu3 %v14554_v17  ;;  %v5252_v7 = vrot.slane %v3293_v61, 1  ;;  %v3628_v17 = vand.u32 255, %v3604_v25 }
 0x39d   : > { %v3266_v30 = vadd.f32 %v3265_v56, %v3226_v58  ;;  %v3228_v18 = vpop.f32.mrf.mxu0  ;;  %4112 = vmatpush.bf16.msrb.mxu0 %v14553_v2  ;;  %3710 = vmatmul.bf16.gmra.mxu1 %v12152_v52  ;;  %v3605_v58 = vunpack.c.1.s8 %v12157_v22  ;;  %v14559_v56 = vld [vmem:[#allocation50_spill] sm:$0xff] }
 0x39e   : > { %4155 = vmatpush.bf16.msrb.mxu2 %v14555_v28  ;;  %8109 = vmatmul.msk.bf16.gmra.mxu3 %vm735_vm0, %v12154_v63  ;;  %v12178_v13 = vsel %vm5217_vm1, %v5248_v46, %v5252_v7  ;;  %v3630_v28 = vand.u32 255, %v3606_v60 }
 0x39f   : > { %v3292_v9 = vadd.f32 %v3266_v30, %v11816_v59  ;;  %4037 = vmatpush.bf16.msrb.mxu1 %v14556_v37  ;;  %v14557_v59 = vld [vmem:[#allocation43_spill] sm:$0xff]  ;;  %14558 = vst [vmem:[#allocation63_spill] sm:$0xff] %v12178_v13  ;;  %v3192_v33 = vpop.f32.mrf.mxu3  ;;  %v3629_v2 = vand.u32 255, %v3605_v58  ;;  %v14563_v13 = vld [vmem:[#allocation52_spill] sm:$0xff] }
 0x3a0   : > { %v3193_v42 = vadd.f32 %v3192_v33, %v3153_v16  ;;  %v3652_v33 = vcvt.s32.f32 %v3628_v17  ;;  %v3654_v58 = vcvt.s32.f32 %v3630_v28  ;;  %v14568_v28 = vld [vmem:[#allocation44_spill] sm:$0xff] }
 0x3a1   : > { %v5250_v32 = vrot.slane %v3292_v9, 1  ;;  %4113 = vmatpush.bf16.msrb.mxu0 %v14557_v59  ;;  %v14562_v59 = vld [vmem:[#allocation46_spill] sm:$0xff]  ;;  %v3653_v16 = vcvt.s32.f32 %v3629_v2 }
 0x3a2   : > { %4156 = vmatpush.bf16.msrb.mxu2 %v14559_v56  ;;  %v3155_v9 = vpop.f32.mrf.mxu1  ;;  %v3295_v46 = vadd.f32 %v3193_v42, %v11827_v12  ;;  %v3651_v56 = vcvt.s32.f32 %v3627_v14  ;;  %v14565_v12 = vld [vmem:[#allocation47_spill] sm:$0xff]  ;;  %v12202_v14 = vpack.c.bf16 %v3654_v58, %v3652_v33 }
 0x3a3   : > { %v12182_v30 = vsel %vm5217_vm1, %v5246_v1, %v5250_v32  ;;  %4038 = vmatpush.bf16.msrb.mxu1 %v14561_v54  ;;  %v14564_v54 = vld [vmem:[#allocation40_spill] sm:$0xff] }
 0x3a4   : > { %14560 = vst [vmem:[#allocation75_spill] sm:$0xff] %v12182_v30  ;;  %v3267_v61 = vpop.f32.mrf.mxu2  ;;  %v5256_v1 = vrot.slane %v3295_v46, 1 }
 0x3a5   : > { %v3268_v3 = vadd.f32 %v3267_v61, %v3228_v18  ;;  %v3231_v37 = vpop.f32.mrf.mxu0  ;;  %4114 = vmatpush.bf16.msrb.mxu0 %v14562_v59 }
 0x3a6   : > { %4157 = vmatpush.bf16.msrb.mxu2 %v14563_v13  ;;  %v12195_v18 = vsel %vm5217_vm1, %v5252_v7, %v5256_v1  ;;  %v12200_v13 = vpack.c.bf16 %v3653_v16, %v3651_v56  ;;  %v14570_v7 = vld [vmem:[#allocation48_spill] sm:$0xff]  ;;  %v14571_v16 = vld [vmem:[#allocation51_spill] sm:$0xff] }
 0x3a7   : > { %v3294_v53 = vadd.f32 %v3268_v3, %v11831_v50  ;;  %4039 = vmatpush.bf16.msrb.mxu1 %v14564_v54  ;;  %14566 = vst [vmem:[#allocation61_spill] sm:$0xff] %v12195_v18  ;;  %v3194_v50 = vpop.f32.mrf.mxu3 }
 0x3a8   : > { %3788 = vmatmul.bf16.gmra.mxu0 %v12152_v52  ;;  %v3195_v60 = vadd.f32 %v3194_v50, %v3155_v9 }
 0x3a9   : > { %v5254_v25 = vrot.slane %v3294_v53, 1  ;;  %8115 = vmatmul.msk.bf16.gmra.mxu2 %vm735_vm0, %v12154_v63  ;;  %4115 = vmatpush.bf16.msrb.mxu0 %v14565_v12  ;;  %v3608_v53 = vunpack.c.2.s8 %v12160_v10 }
 0x3aa   : > { %v3417_v61 = vpop.f32.mrf.mxu1  ;;  %v12206_v46 = vadd.f32 %v3195_v60, %v11840_v55  ;;  %v3610_v55 = vunpack.c.3.s8 %v12160_v10 }
 0x3ab   : > { %v12198_v3 = vsel %vm5217_vm1, %v5250_v32, %v5254_v25  ;;  %4040 = vmatpush.bf16.msrb.mxu1 %v14568_v28  ;;  %v3607_v32 = vunpack.c.2.s8 %v12157_v22  ;;  %v3632_v60 = vand.u32 255, %v3608_v53 }
 0x3ac   : > { %14567 = vst [vmem:[#allocation66_spill] sm:$0xff] %v12198_v3  ;;  %v3270_v42 = vpop.f32.mrf.mxu2  ;;  %v14179_v9 = vrot.slane %v12206_v46, 1 }
 0x3ad   : > { %v3271_v2 = vadd.f32 %v3270_v42, %v3231_v37  ;;  %v3233_v17 = vpop.f32.mrf.mxu0  ;;  %14569 = vst [vmem:[#allocation77_spill] sm:$0xff] %v12206_v46  ;;  %4116 = vmatpush.bf16.msrb.mxu0 %v14570_v7  ;;  %3715 = vmatmul.bf16.gmra.mxu1 %v12200_v13  ;;  %v3609_v37 = vunpack.c.3.s8 %v12157_v22  ;;  %v3631_v58 = vand.u32 255, %v3607_v32  ;;  %v3634_v42 = vand.u32 255, %v3610_v55 }
 0x3ae   : > { %8110 = vmatmul.msk.bf16.gmra.mxu3 %vm735_vm0, %v12202_v14 }
 0x3af   : > { %v3296_v59 = vadd.f32 %v3271_v2, %v11844_v48  ;;  %v12222_v48 = vsel %vm5217_vm1, %v5256_v1, %v14179_v9  ;;  %v3456_v33 = vpop.f32.mrf.mxu3  ;;  %v3633_v22 = vand.u32 255, %v3609_v37  ;;  %v3655_v32 = vcvt.s32.f32 %v3631_v58  ;;  %v8106_v58 = vld [vmem:[%s9415_s25 + $0x110] sm:$0xff] }
 0x3b0   : > { %14572 = vst [vmem:[#allocation64_spill] sm:$0xff] %v12222_v48  ;;  %v3457_v12 = vadd.f32 %v3456_v33, %v3417_v61  ;;  %v3656_v61 = vcvt.s32.f32 %v3632_v60  ;;  %v8107_v60 = vld [vmem:[%s9415_s25 + $0x118] sm:$0xff] }
 0x3b1   : > { %v5258_v56 = vrot.slane %v3296_v59, 1  ;;  %4117 = vmatpush.bf16.msrb.mxu0 %v14571_v16  ;;  %v14574_v59 = vld [vmem:[#allocation53_spill] sm:$0xff]  ;;  %v3658_v16 = vcvt.s32.f32 %v3634_v42 }
 0x3b2   : > { %v3419_v2 = vpop.f32.mrf.mxu1  ;;  %v12228_v7 = vadd.f32 %v3457_v12, %v11851_v43 }
 0x3b3   : > { %v12225_v54 = vsel %vm5217_vm1, %v5254_v25, %v5258_v56  ;;  %v3657_v25 = vcvt.s32.f32 %v3633_v22  ;;  %v12245_v55 = vpack.c.bf16 %v3658_v16, %v3656_v61 }
 0x3b4   : > { %14573 = vst [vmem:[#allocation70_spill] sm:$0xff] %v12225_v54  ;;  %v3272_v50 = vpop.f32.mrf.mxu2 }
 0x3b5   : > { %v3273_v10 = vadd.f32 %v3272_v50, %v3233_v17  ;;  %v3495_v28 = vpop.f32.mrf.mxu0  ;;  %4118 = vmatpush.bf16.msrb.mxu0 %v14574_v59  ;;  %v12243_v53 = vpack.c.bf16 %v3657_v25, %v3655_v32  ;;  %v3611_v59 = vunpack.c.0.s8 %v8106_v58  ;;  %v3614_v32 = vunpack.c.1.s8 %v8107_v60 }
 0x3b7   : > { %v12232_v1 = vadd.f32 %v3273_v10, %v11855_v4  ;;  %v3458_v43 = vpop.f32.mrf.mxu3  ;;  %v3635_v61 = vand.u32 255, %v3611_v59 }
 0x3b8   : > { %3793 = vmatmul.bf16.gmra.mxu0 %v12200_v13  ;;  %v3459_v4 = vadd.f32 %v3458_v43, %v3419_v2  ;;  %v3612_v2 = vunpack.c.0.s8 %v8107_v60 }
 0x3b9   : > { %14575 = vst [vmem:[#allocation68_spill] sm:$0xff] %v12232_v1  ;;  %v14178_v37 = vrot.slane %v12232_v1, 1  ;;  %8116 = vmatmul.msk.bf16.gmra.mxu2 %vm735_vm0, %v12202_v14  ;;  %v3659_v1 = vcvt.s32.f32 %v3635_v61  ;;  %v3615_v61 = vunpack.c.2.s8 %v8106_v58 }
 0x3ba   : > { %v3422_v12 = vpop.f32.mrf.mxu1  ;;  %v12250_v42 = vadd.f32 %v3459_v4, %v11862_v19  ;;  %v3638_v19 = vand.u32 255, %v3614_v32 }
 0x3bb   : > { %v12241_v17 = vsel %vm5217_vm1, %v5258_v56, %v14178_v37  ;;  %v3613_v56 = vunpack.c.1.s8 %v8106_v58 }
 0x3bc   : > { %14576 = vst [vmem:[#allocation71_spill] sm:$0xff] %v12241_v17  ;;  %v3534_v33 = vpop.f32.mrf.mxu2  ;;  %v3662_v54 = vcvt.s32.f32 %v3638_v19 }
 0x3bd   : > { %v3535_v50 = vadd.f32 %v3534_v33, %v3495_v28  ;;  %v3497_v22 = vpop.f32.mrf.mxu0  ;;  %3720 = vmatmul.bf16.gmra.mxu1 %v12243_v53  ;;  %v3637_v43 = vand.u32 255, %v3613_v56  ;;  %v3636_v33 = vand.u32 255, %v3612_v2 }
 0x3be   : > { %8111 = vmatmul.msk.bf16.gmra.mxu3 %vm735_vm0, %v12245_v55 }
 0x3bf   : > { %v12253_v10 = vadd.f32 %v3535_v50, %v11865_v8  ;;  %v3461_v25 = vpop.f32.mrf.mxu3  ;;  %v3661_v17 = vcvt.s32.f32 %v3637_v43  ;;  %v3660_v46 = vcvt.s32.f32 %v3636_v33 }
 0x3c0   : > { %v3462_v28 = vadd.f32 %v3461_v25, %v3422_v12 }
 0x3c1   : > { %v12267_v56 = vpack.c.bf16 %v3661_v17, %v3659_v1  ;;  %v3617_v1 = vunpack.c.3.s8 %v8106_v58  ;;  %v3616_v17 = vunpack.c.2.s8 %v8107_v60 }
 0x3c2   : > { %v3424_v4 = vpop.f32.mrf.mxu1  ;;  %v12259_v50 = vadd.f32 %v3462_v28, %v11871_v47  ;;  %v3639_v28 = vand.u32 255, %v3615_v61 }
 0x3c3   : > { %v3641_v33 = vand.u32 255, %v3617_v1  ;;  %v3640_v19 = vand.u32 255, %v3616_v17 }
 0x3c4   : > { %v3536_v16 = vpop.f32.mrf.mxu2 }
 0x3c5   : > { %v3537_v37 = vadd.f32 %v3536_v16, %v3497_v22  ;;  %v3500_v8 = vpop.f32.mrf.mxu0  ;;  %v12269_v22 = vpack.c.bf16 %v3662_v54, %v3660_v46  ;;  %v3618_v46 = vunpack.c.3.s8 %v8107_v60  ;;  %v3665_v58 = vcvt.s32.f32 %v3641_v33 }
 0x3c7   : > { %v12262_v9 = vadd.f32 %v3537_v37, %v11874_v40  ;;  %v3463_v12 = vpop.f32.mrf.mxu3 }
 0x3c8   : > { %3798 = vmatmul.bf16.gmra.mxu0 %v12243_v53  ;;  %v3464_v59 = vadd.f32 %v3463_v12, %v3424_v4 }
 0x3c9   : > { %8117 = vmatmul.msk.bf16.gmra.mxu2 %vm735_vm0, %v12245_v55 }
 0x3ca   : > { %v3427_v2 = vpop.f32.mrf.mxu1  ;;  %v12272_v37 = vadd.f32 %v3464_v59, %v11880_v6  ;;  %v3642_v6 = vand.u32 255, %v3618_v46 }
 0x3cc   : > { %v3539_v47 = vpop.f32.mrf.mxu2  ;;  %v3666_v60 = vcvt.s32.f32 %v3642_v6 }
 0x3cd   : > { %v3540_v32 = vadd.f32 %v3539_v47, %v3500_v8  ;;  %v3502_v40 = vpop.f32.mrf.mxu0  ;;  %3725 = vmatmul.bf16.gmra.mxu1 %v12267_v56  ;;  %v3663_v47 = vcvt.s32.f32 %v3639_v28 }
 0x3ce   : > { %8112 = vmatmul.msk.bf16.gmra.mxu3 %vm735_vm0, %v12269_v22 }
 0x3cf   : > { %v12275_v25 = vadd.f32 %v3540_v32, %v11883_v35  ;;  %v3466_v54 = vpop.f32.mrf.mxu3  ;;  %v3664_v32 = vcvt.s32.f32 %v3640_v19  ;;  %v12289_v1 = vpack.c.bf16 %v3665_v58, %v3663_v47 }
 0x3d0   : > { %v3467_v16 = vadd.f32 %v3466_v54, %v3427_v2 }
 0x3d2   : > { %v3429_v4 = vpop.f32.mrf.mxu1  ;;  %v12281_v12 = vadd.f32 %v3467_v16, %v11889_v31 }
 0x3d4   : > { %v3541_v43 = vpop.f32.mrf.mxu2 }
 0x3d5   : > { %v3542_v8 = vadd.f32 %v3541_v43, %v3502_v40  ;;  %v3505_v35 = vpop.f32.mrf.mxu0  ;;  %v12291_v40 = vpack.c.bf16 %v3666_v60, %v3664_v32 }
 0x3d7   : > { %v12284_v59 = vadd.f32 %v3542_v8, %v11892_v11  ;;  %v3468_v2 = vpop.f32.mrf.mxu3 }
 0x3d8   : > { %3803 = vmatmul.bf16.gmra.mxu0 %v12267_v56  ;;  %v3469_v61 = vadd.f32 %v3468_v2, %v3429_v4 }
 0x3d9   : > { %8118 = vmatmul.msk.bf16.gmra.mxu2 %vm735_vm0, %v12269_v22 }
 0x3da   : > { %v3432_v17 = vpop.f32.mrf.mxu1  ;;  %v12294_v54 = vadd.f32 %v3469_v61, %v11900_v36  ;;  %v14578_v61 = vld [vmem:[#allocation145_spill] sm:$0xff] }
 0x3dc   : > { %v3544_v31 = vpop.f32.mrf.mxu2 }
 0x3dd   : > { %v3545_v46 = vadd.f32 %v3544_v31, %v3505_v35  ;;  %v3507_v11 = vpop.f32.mrf.mxu0  ;;  %3730 = vmatmul.bf16.gmra.mxu1 %v12289_v1 }
 0x3de   : > { %8113 = vmatmul.msk.bf16.gmra.mxu3 %vm735_vm0, %v12291_v40 }
 0x3df   : > { %v12297_v28 = vadd.f32 %v3545_v46, %v11903_v5  ;;  %v3471_v16 = vpop.f32.mrf.mxu3 }
 0x3e0   : > { %v3472_v43 = vadd.f32 %v3471_v16, %v3432_v17 }
 0x3e2   : > { %v3434_v19 = vpop.f32.mrf.mxu1  ;;  %v12303_v8 = vadd.f32 %v3472_v43, %v11909_v57 }
 0x3e4   : > { %v3546_v33 = vpop.f32.mrf.mxu2 }
 0x3e5   : > { %v3547_v6 = vadd.f32 %v3546_v33, %v3507_v11  ;;  %v3510_v4 = vpop.f32.mrf.mxu0  ;;  %v14580_v33 = vld [vmem:[#allocation148_spill] sm:$0xff] }
 0x3e7   : > { %v12306_v36 = vadd.f32 %v3547_v6, %v11912_v26  ;;  %v3473_v5 = vpop.f32.mrf.mxu3  ;;  %v14577_v26 = vld [vmem:[#allocation137_spill] sm:$0xff]  ;;  %v14581_v6 = vld [vmem:[#allocation140_spill] sm:$0xff] }
 0x3e8   : > { %3808 = vmatmul.bf16.gmra.mxu0 %v12289_v1  ;;  %v3474_v35 = vadd.f32 %v3473_v5, %v3434_v19  ;;  %v14583_v5 = vld [vmem:[#allocation151_spill] sm:$0xff] }
 0x3e9   : > { %8119 = vmatmul.msk.bf16.gmra.mxu2 %vm735_vm0, %v12291_v40 }
 0x3ea   : > { %v3437_v58 = vpop.f32.mrf.mxu1  ;;  %v12312_v2 = vadd.f32 %v3474_v35, %v11922_v20  ;;  %v14579_v20 = vld [vmem:[#allocation138_spill] sm:$0xff] }
 0x3ec   : > { %v3549_v47 = vpop.f32.mrf.mxu2 }
 0x3ed   : > { %v3550_v32 = vadd.f32 %v3549_v47, %v3510_v4  ;;  %v3512_v60 = vpop.f32.mrf.mxu0  ;;  %3885 = vmatmul.bf16.vlgmr.msra.gmra.mxu1 %v12114_v23  ;;  %v14582_v4 = vld [vmem:[#allocation146_spill] sm:$0xff]  ;;  %v14584_v47 = vld [vmem:[#allocation153_spill] sm:$0xff] }
 0x3ee   : > { %8120 = vmatmul.msk.bf16.vlgmr.msra.gmra.mxu3 %vm735_vm0, %v12116_v44  ;;  %4298 = vmatpush.bf16.msra.mxu1 %v14577_v26  ;;  %v14585_v26 = vld [vmem:[#allocation141_spill] sm:$0xff] }
 0x3ef   : > { %v12315_v57 = vadd.f32 %v3550_v32, %v11925_v62  ;;  %4341 = vmatpush.bf16.msra.mxu3 %v14578_v61  ;;  %v3476_v31 = vpop.f32.mrf.mxu3 }
 0x3f0   : > { %v3477_v17 = vadd.f32 %v3476_v31, %v3437_v58  ;;  %v14588_v31 = vld [vmem:[#allocation155_spill] sm:$0xff] }
 0x3f2   : > { %v3439_v11 = vpop.f32.mrf.mxu1  ;;  %4299 = vmatpush.bf16.msra.mxu1 %v14579_v20  ;;  %v12325_v62 = vadd.f32 %v3477_v17, %v11935_v29  ;;  %v14589_v17 = vld [vmem:[#allocation85_spill] sm:$0xff] }
 0x3f3   : > { %4342 = vmatpush.bf16.msra.mxu3 %v14580_v33  ;;  %v14593_v33 = vld [vmem:[#allocation161_spill] sm:$0xff] }
 0x3f4   : > { %v3551_v46 = vpop.f32.mrf.mxu2 }
 0x3f5   : > { %v3552_v16 = vadd.f32 %v3551_v46, %v3512_v60  ;;  %v3515_v43 = vpop.f32.mrf.mxu0 }
 0x3f6   : > { %4300 = vmatpush.bf16.msra.mxu1 %v14581_v6 }
 0x3f7   : > { %v12328_v19 = vadd.f32 %v3552_v16, %v11938_v41  ;;  %4343 = vmatpush.bf16.msra.mxu3 %v14583_v5  ;;  %v3478_v35 = vpop.f32.mrf.mxu3  ;;  %v14590_v16 = vld [vmem:[#allocation159_spill] sm:$0xff] }
 0x3f8   : > { %3963 = vmatmul.bf16.vlgmr.msra.gmra.mxu0 %v12114_v23  ;;  %v3479_v58 = vadd.f32 %v3478_v35, %v3439_v11  ;;  %v14586_v23 = vld [vmem:[#allocation91_spill] sm:$0xff]  ;;  %v14591_v11 = vld [vmem:[#allocation144_spill] sm:$0xff] }
 0x3f9   : > { %8126 = vmatmul.msk.bf16.vlgmr.msra.gmra.mxu2 %vm735_vm0, %v12116_v44  ;;  %4376 = vmatpush.bf16.msra.mxu0 %v14582_v4  ;;  %v14587_v44 = vld [vmem:[#allocation149_spill] sm:$0xff] }
 0x3fa   : > { %4419 = vmatpush.bf16.msra.mxu2 %v14584_v47  ;;  %v3442_v32 = vpop.f32.mrf.mxu1  ;;  %4301 = vmatpush.bf16.msra.mxu1 %v14585_v26  ;;  %v12339_v61 = vadd.f32 %v3479_v58, %v14586_v23  ;;  %v14594_v58 = vld [vmem:[#allocation147_spill] sm:$0xff]  ;;  %v14596_v26 = vld [vmem:[#allocation156_spill] sm:$0xff]  ;;  %v14597_v23 = vld [vmem:[#allocation97_spill] sm:$0xff] }
 0x3fb   : > { %4344 = vmatpush.bf16.msra.mxu3 %v14588_v31  ;;  %v14598_v31 = vld [vmem:[#allocation163_spill] sm:$0xff] }
 0x3fc   : > { %v3554_v29 = vpop.f32.mrf.mxu2 }
 0x3fd   : > { %v3555_v60 = vadd.f32 %v3554_v29, %v3515_v43  ;;  %v3517_v41 = vpop.f32.mrf.mxu0  ;;  %4377 = vmatpush.bf16.msra.mxu0 %v14587_v44  ;;  %3890 = vmatmul.bf16.gmra.mxu1 %v12152_v52  ;;  %v14592_v43 = vld [vmem:[#allocation152_spill] sm:$0xff]  ;;  %v14595_v29 = vld [vmem:[#allocation87_spill] sm:$0xff] }
 0x3fe   : > { %4420 = vmatpush.bf16.msra.mxu2 %v14590_v16  ;;  %8121 = vmatmul.msk.bf16.gmra.mxu3 %vm735_vm0, %v12154_v63 }
 0x3ff   : > { %v12344_v46 = vadd.f32 %v3555_v60, %v14589_v17  ;;  %4302 = vmatpush.bf16.msra.mxu1 %v14591_v11  ;;  %v3481_v20 = vpop.f32.mrf.mxu3 }
 0x400   : > { %v3482_v6 = vadd.f32 %v3481_v20, %v3442_v32  ;;  %v14599_v32 = vld [vmem:[#allocation150_spill] sm:$0xff] }
 0x401   : > { %4378 = vmatpush.bf16.msra.mxu0 %v14592_v43 }
 0x402   : > { %4421 = vmatpush.bf16.msra.mxu2 %v14593_v33  ;;  %v3444_v5 = vpop.f32.mrf.mxu1  ;;  %v12355_v60 = vadd.f32 %v3482_v6, %v14595_v29  ;;  %v14601_v6 = vld [vmem:[#allocation154_spill] sm:$0xff] }
 0x403   : > { %4303 = vmatpush.bf16.msra.mxu1 %v14594_v58  ;;  %v14603_v58 = vld [vmem:[#allocation158_spill] sm:$0xff] }
 0x404   : > { %v3556_v4 = vpop.f32.mrf.mxu2 }
 0x405   : > { %v3557_v35 = vadd.f32 %v3556_v4, %v3517_v41  ;;  %v3520_v47 = vpop.f32.mrf.mxu0  ;;  %4379 = vmatpush.bf16.msra.mxu0 %v14596_v26  ;;  %v14600_v41 = vld [vmem:[#allocation157_spill] sm:$0xff]  ;;  %v14602_v4 = vld [vmem:[#allocation99_spill] sm:$0xff] }
 0x406   : > { %4422 = vmatpush.bf16.msra.mxu2 %v14598_v31 }
 0x407   : > { %v12359_v44 = vadd.f32 %v3557_v35, %v14597_v23  ;;  %4304 = vmatpush.bf16.msra.mxu1 %v14599_v32  ;;  %v3483_v17 = vpop.f32.mrf.mxu3 }
 0x408   : > { %3968 = vmatmul.bf16.gmra.mxu0 %v12152_v52  ;;  %v3484_v16 = vadd.f32 %v3483_v17, %v3444_v5  ;;  %v14604_v52 = vld [vmem:[#allocation92_spill] sm:$0xff]  ;;  %v14606_v17 = vld [vmem:[#allocation162_spill] sm:$0xff] }
 0x409   : > { %8127 = vmatmul.msk.bf16.gmra.mxu2 %vm735_vm0, %v12154_v63  ;;  %4380 = vmatpush.bf16.msra.mxu0 %v14600_v41  ;;  %v14605_v63 = vld [vmem:[#allocation160_spill] sm:$0xff] }
 0x40a   : > { %v3706_v43 = vpop.f32.mrf.mxu1  ;;  %v12369_v35 = vadd.f32 %v3484_v16, %v14602_v4  ;;  %v14607_v16 = vld [vmem:[#allocation101_spill] sm:$0xff] }
 0x40b   : > { %4305 = vmatpush.bf16.msra.mxu1 %v14601_v6 }
 0x40c   : > { %v3559_v11 = vpop.f32.mrf.mxu2 }
 0x40d   : > { %v3560_v20 = vadd.f32 %v3559_v11, %v3520_v47  ;;  %v3522_v33 = vpop.f32.mrf.mxu0  ;;  %4381 = vmatpush.bf16.msra.mxu0 %v14603_v58  ;;  %3895 = vmatmul.bf16.gmra.mxu1 %v12200_v13 }
 0x40e   : > { %8122 = vmatmul.msk.bf16.gmra.mxu3 %vm735_vm0, %v12202_v14 }
 0x40f   : > { %v12373_v29 = vadd.f32 %v3560_v20, %v14604_v52  ;;  %v3745_v5 = vpop.f32.mrf.mxu3 }
 0x410   : > { %v3746_v47 = vadd.f32 %v3745_v5, %v3706_v43 }
 0x411   : > { %4382 = vmatpush.bf16.msra.mxu0 %v14605_v63 }
 0x412   : > { %v3708_v23 = vpop.f32.mrf.mxu1  ;;  %v12380_v41 = vadd.f32 %v3746_v47, %v12228_v7 }
 0x414   : > { %v3561_v26 = vpop.f32.mrf.mxu2 }
 0x415   : > { %v3562_v31 = vadd.f32 %v3561_v26, %v3522_v33  ;;  %v3784_v32 = vpop.f32.mrf.mxu0  ;;  %4383 = vmatpush.bf16.msra.mxu0 %v14606_v17 }
 0x417   : > { %v12384_v11 = vadd.f32 %v3562_v31, %v14607_v16  ;;  %v3747_v20 = vpop.f32.mrf.mxu3 }
 0x418   : > { %3973 = vmatmul.bf16.gmra.mxu0 %v12200_v13  ;;  %v3748_v6 = vadd.f32 %v3747_v20, %v3708_v23 }
 0x419   : > { %8128 = vmatmul.msk.bf16.gmra.mxu2 %vm735_vm0, %v12202_v14 }
 0x41a   : > { %v3711_v4 = vpop.f32.mrf.mxu1  ;;  %v12390_v52 = vadd.f32 %v3748_v6, %v12250_v42 }
 0x41c   : > { %v3823_v43 = vpop.f32.mrf.mxu2 }
 0x41d   : > { %v3824_v58 = vadd.f32 %v3823_v43, %v3784_v32  ;;  %v3786_v33 = vpop.f32.mrf.mxu0  ;;  %3900 = vmatmul.bf16.gmra.mxu1 %v12243_v53 }
 0x41e   : > { %8123 = vmatmul.msk.bf16.gmra.mxu3 %vm735_vm0, %v12245_v55 }
 0x41f   : > { %v12393_v7 = vadd.f32 %v3824_v58, %v12253_v10 }
 0x421   : > { %v3750_v13 = vpop.f32.mrf.mxu3 }
 0x422   : > { %v3751_v63 = vadd.f32 %v3750_v13, %v3711_v4  ;;  %v3713_v5 = vpop.f32.mrf.mxu1 }
 0x424   : > { %v3825_v14 = vpop.f32.mrf.mxu2  ;;  %v12399_v23 = vadd.f32 %v3751_v63, %v12259_v50 }
 0x425   : > { %v3826_v47 = vadd.f32 %v3825_v14, %v3786_v33  ;;  %v3789_v26 = vpop.f32.mrf.mxu0 }
 0x427   : > { %v12402_v42 = vadd.f32 %v3826_v47, %v12262_v9 }
 0x428   : > { %3978 = vmatmul.bf16.gmra.mxu0 %v12243_v53 }
 0x429   : > { %8129 = vmatmul.msk.bf16.gmra.mxu2 %vm735_vm0, %v12245_v55  ;;  %v3752_v10 = vpop.f32.mrf.mxu3 }
 0x42a   : > { %v3753_v31 = vadd.f32 %v3752_v10, %v3713_v5  ;;  %v3716_v17 = vpop.f32.mrf.mxu1 }
 0x42c   : > { %v3828_v32 = vpop.f32.mrf.mxu2  ;;  %v12408_v6 = vadd.f32 %v3753_v31, %v12272_v37 }
 0x42d   : > { %v3829_v16 = vadd.f32 %v3828_v32, %v3789_v26  ;;  %v3791_v20 = vpop.f32.mrf.mxu0  ;;  %3905 = vmatmul.bf16.gmra.mxu1 %v12267_v56 }
 0x42e   : > { %8124 = vmatmul.msk.bf16.gmra.mxu3 %vm735_vm0, %v12269_v22 }
 0x42f   : > { %v12411_v50 = vadd.f32 %v3829_v16, %v12275_v25 }
 0x431   : > { %v3755_v9 = vpop.f32.mrf.mxu3 }
 0x432   : > { %v3756_v53 = vadd.f32 %v3755_v9, %v3716_v17  ;;  %v3718_v43 = vpop.f32.mrf.mxu1 }
 0x434   : > { %v3830_v55 = vpop.f32.mrf.mxu2  ;;  %v12417_v33 = vadd.f32 %v3756_v53, %v12281_v12 }
 0x435   : > { %v3831_v4 = vadd.f32 %v3830_v55, %v3791_v20  ;;  %v3794_v58 = vpop.f32.mrf.mxu0 }
 0x437   : > { %v12420_v37 = vadd.f32 %v3831_v4, %v12284_v59  ;;  %v14609_v4 = vld [vmem:[#allocation81_spill] sm:$0xff] }
 0x438   : > { %3983 = vmatmul.bf16.gmra.mxu0 %v12267_v56 }
 0x439   : > { %8130 = vmatmul.msk.bf16.gmra.mxu2 %vm735_vm0, %v12269_v22  ;;  %v3757_v25 = vpop.f32.mrf.mxu3 }
 0x43a   : > { %v3758_v13 = vadd.f32 %v3757_v25, %v3718_v43  ;;  %v3721_v14 = vpop.f32.mrf.mxu1 }
 0x43c   : > { %v3833_v63 = vpop.f32.mrf.mxu2  ;;  %v12426_v26 = vadd.f32 %v3758_v13, %v12294_v54 }
 0x43d   : > { %v3834_v5 = vadd.f32 %v3833_v63, %v3794_v58  ;;  %v3796_v47 = vpop.f32.mrf.mxu0  ;;  %3910 = vmatmul.bf16.gmra.mxu1 %v12289_v1 }
 0x43e   : > { %8125 = vmatmul.msk.bf16.gmra.mxu3 %vm735_vm0, %v12291_v40 }
 0x43f   : > { %v12429_v12 = vadd.f32 %v3834_v5, %v12297_v28 }
 0x441   : > { %v3760_v56 = vpop.f32.mrf.mxu3 }
 0x442   : > { %v3761_v59 = vadd.f32 %v3760_v56, %v3721_v14  ;;  %v3723_v10 = vpop.f32.mrf.mxu1 }
 0x444   : > { %v3835_v22 = vpop.f32.mrf.mxu2  ;;  %v12435_v17 = vadd.f32 %v3761_v59, %v12303_v8  ;;  %v14617_v59 = vld [vmem:[#allocation115_spill] sm:$0xff] }
 0x445   : > { %v3836_v31 = vadd.f32 %v3835_v22, %v3796_v47  ;;  %v3799_v32 = vpop.f32.mrf.mxu0  ;;  %v14614_v47 = vld [vmem:[#allocation121_spill] sm:$0xff]  ;;  %v14618_v22 = vld [vmem:[#allocation119_spill] sm:$0xff] }
 0x447   : > { %v12438_v54 = vadd.f32 %v3836_v31, %v12306_v36  ;;  %v14610_v36 = vld [vmem:[#allocation93_spill] sm:$0xff] }
 0x448   : > { %3988 = vmatmul.bf16.gmra.mxu0 %v12289_v1  ;;  %v14611_v1 = vld [vmem:[#allocation112_spill] sm:$0xff] }
 0x449   : > { %8131 = vmatmul.msk.bf16.gmra.mxu2 %vm735_vm0, %v12291_v40  ;;  %v3762_v28 = vpop.f32.mrf.mxu3  ;;  %v14612_v40 = vld [vmem:[#allocation118_spill] sm:$0xff] }
 0x44a   : > { %v3763_v16 = vadd.f32 %v3762_v28, %v3723_v10  ;;  %v3726_v9 = vpop.f32.mrf.mxu1  ;;  %v14619_v10 = vld [vmem:[#allocation124_spill] sm:$0xff] }
 0x44c   : > { %v3838_v20 = vpop.f32.mrf.mxu2  ;;  %v12444_v43 = vadd.f32 %v3763_v16, %v12312_v2  ;;  %v14613_v2 = vld [vmem:[#allocation113_spill] sm:$0xff] }
 0x44d   : > { %v3839_v53 = vadd.f32 %v3838_v20, %v3799_v32  ;;  %v3801_v55 = vpop.f32.mrf.mxu0  ;;  %4041 = vmatmul.bf16.vlgmr.msrb.gmra.mxu1 %v14609_v4  ;;  %v14620_v32 = vld [vmem:[#allocation126_spill] sm:$0xff] }
 0x44e   : > { %8132 = vmatmul.msk.bf16.vlgmr.msrb.gmra.mxu3 %vm735_vm0, %v14610_v36  ;;  %4478 = vmatpush.bf16.msrb.mxu1 %v14611_v1  ;;  %v14626_v1 = vld [vmem:[#allocation132_spill] sm:$0xff] }
 0x44f   : > { %v12447_v8 = vadd.f32 %v3839_v53, %v12315_v57  ;;  %4521 = vmatpush.bf16.msrb.mxu3 %v14612_v40  ;;  %v14627_v40 = vld [vmem:[#allocation82_spill] sm:$0xff] }
 0x451   : > { %14608 = vst [vmem:[#allocation72_spill] sm:$0xff] %v12447_v8  ;;  %v3765_v58 = vpop.f32.mrf.mxu3 }
 0x452   : > { %v3766_v25 = vadd.f32 %v3765_v58, %v3726_v9  ;;  %v3728_v63 = vpop.f32.mrf.mxu1  ;;  %4479 = vmatpush.bf16.msrb.mxu1 %v14613_v2  ;;  %v14621_v9 = vld [vmem:[#allocation116_spill] sm:$0xff] }
 0x453   : > { %4522 = vmatpush.bf16.msrb.mxu3 %v14614_v47  ;;  %v14628_v58 = vld [vmem:[#allocation84_spill] sm:$0xff] }
 0x454   : > { %v3840_v13 = vpop.f32.mrf.mxu2  ;;  %v12457_v57 = vadd.f32 %v3766_v25, %v12325_v62  ;;  %v14629_v25 = vld [vmem:[#allocation117_spill] sm:$0xff] }
 0x455   : > { %v3841_v14 = vadd.f32 %v3840_v13, %v3801_v55  ;;  %v3804_v5 = vpop.f32.mrf.mxu0  ;;  %v14623_v55 = vld [vmem:[#allocation122_spill] sm:$0xff]  ;;  %v14630_v13 = vld [vmem:[#allocation125_spill] sm:$0xff] }
 0x456   : > { %14615 = vst [vmem:[#allocation74_spill] sm:$0xff] %v12457_v57  ;;  %4480 = vmatpush.bf16.msrb.mxu1 %v14617_v59  ;;  %v14632_v59 = vld [vmem:[#allocation120_spill] sm:$0xff] }
 0x457   : > { %v12460_v56 = vadd.f32 %v3841_v14, %v12328_v19  ;;  %4523 = vmatpush.bf16.msrb.mxu3 %v14619_v10  ;;  %v14634_v10 = vld [vmem:[#allocation129_spill] sm:$0xff] }
 0x458   : > { %4119 = vmatmul.bf16.vlgmr.msrb.gmra.mxu0 %v14609_v4  ;;  %v14624_v4 = vld [vmem:[#allocation128_spill] sm:$0xff] }
 0x459   : > { %14616 = vst [vmem:[#allocation76_spill] sm:$0xff] %v12460_v56  ;;  %8138 = vmatmul.msk.bf16.vlgmr.msrb.gmra.mxu2 %vm735_vm0, %v14610_v36  ;;  %4556 = vmatpush.bf16.msrb.mxu0 %v14618_v22  ;;  %v3767_v31 = vpop.f32.mrf.mxu3 }
 0x45a   : > { %4599 = vmatpush.bf16.msrb.mxu2 %v14620_v32  ;;  %v3768_v28 = vadd.f32 %v3767_v31, %v3728_v63  ;;  %v3731_v16 = vpop.f32.mrf.mxu1  ;;  %4481 = vmatpush.bf16.msrb.mxu1 %v14621_v9  ;;  %v14631_v63 = vld [vmem:[#allocation134_spill] sm:$0xff]  ;;  %v14636_v32 = vld [vmem:[#allocation136_spill] sm:$0xff] }
 0x45b   : > { %4524 = vmatpush.bf16.msrb.mxu3 %v14624_v4  ;;  %v14639_v4 = vld [vmem:[#allocation127_spill] sm:$0xff] }
 0x45c   : > { %v3843_v62 = vpop.f32.mrf.mxu2  ;;  %v12471_v53 = vadd.f32 %v3768_v28, %v12339_v61  ;;  %v14637_v28 = vld [vmem:[#allocation123_spill] sm:$0xff] }
 0x45d   : > { %v3844_v20 = vadd.f32 %v3843_v62, %v3804_v5  ;;  %v3806_v19 = vpop.f32.mrf.mxu0  ;;  %4557 = vmatpush.bf16.msrb.mxu0 %v14623_v55  ;;  %4046 = vmatmul.bf16.gmra.mxu1 %v14627_v40  ;;  %v14638_v62 = vld [vmem:[#allocation130_spill] sm:$0xff] }
 0x45e   : > { %14622 = vst [vmem:[#allocation188_spill] sm:$0xff] %v12471_v53  ;;  %4600 = vmatpush.bf16.msrb.mxu2 %v14626_v1  ;;  %8133 = vmatmul.msk.bf16.gmra.mxu3 %vm735_vm0, %v14628_v58  ;;  %v14641_v1 = vld [vmem:[#allocation131_spill] sm:$0xff] }
 0x45f   : > { %v12476_v36 = vadd.f32 %v3844_v20, %v12344_v46  ;;  %4482 = vmatpush.bf16.msrb.mxu1 %v14629_v25  ;;  %v14644_v25 = vld [vmem:[#allocation90_spill] sm:$0xff] }
 0x461   : > { %14625 = vst [vmem:[#allocation102_spill] sm:$0xff] %v12476_v36  ;;  %4558 = vmatpush.bf16.msrb.mxu0 %v14630_v13  ;;  %v3770_v61 = vpop.f32.mrf.mxu3  ;;  %v14645_v13 = vld [vmem:[#allocation133_spill] sm:$0xff] }
 0x462   : > { %4601 = vmatpush.bf16.msrb.mxu2 %v14631_v63  ;;  %v3771_v14 = vadd.f32 %v3770_v61, %v3731_v16  ;;  %v3733_v2 = vpop.f32.mrf.mxu1  ;;  %v14664_v36 = vld [vmem:[#allocation205_spill] sm:$0xff] }
 0x463   : > { %4483 = vmatpush.bf16.msrb.mxu1 %v14632_v59 }
 0x464   : > { %v3845_v5 = vpop.f32.mrf.mxu2  ;;  %v12487_v22 = vadd.f32 %v3771_v14, %v12355_v60 }
 0x465   : > { %v3846_v47 = vadd.f32 %v3845_v5, %v3806_v19  ;;  %v3809_v46 = vpop.f32.mrf.mxu0  ;;  %4559 = vmatpush.bf16.msrb.mxu0 %v14634_v10 }
 0x466   : > { %14633 = vst [vmem:[#allocation103_spill] sm:$0xff] %v12487_v22  ;;  %4602 = vmatpush.bf16.msrb.mxu2 %v14636_v32  ;;  %v14663_v22 = vld [vmem:[#allocation196_spill] sm:$0xff] }
 0x467   : > { %v12491_v31 = vadd.f32 %v3846_v47, %v12359_v44  ;;  %4484 = vmatpush.bf16.msrb.mxu1 %v14637_v28  ;;  %v14646_v47 = vld [vmem:[#allocation135_spill] sm:$0xff] }
 0x468   : > { %4124 = vmatmul.bf16.gmra.mxu0 %v14627_v40 }
 0x469   : > { %14635 = vst [vmem:[#allocation6_spill] sm:$0xff] %v12491_v31  ;;  %8139 = vmatmul.msk.bf16.gmra.mxu2 %vm735_vm0, %v14628_v58  ;;  %4560 = vmatpush.bf16.msrb.mxu0 %v14638_v62  ;;  %v3772_v16 = vpop.f32.mrf.mxu3  ;;  %v14643_v58 = vld [vmem:[#allocation88_spill] sm:$0xff] }
 0x46a   : > { %v3773_v20 = vadd.f32 %v3772_v16, %v3733_v2  ;;  %v3886_v19 = vpop.f32.mrf.mxu1 }
 0x46b   : > { %4485 = vmatpush.bf16.msrb.mxu1 %v14639_v4 }
 0x46c   : > { %v3848_v60 = vpop.f32.mrf.mxu2  ;;  %v12501_v44 = vadd.f32 %v3773_v20, %v12369_v35 }
 0x46d   : > { %v3849_v9 = vadd.f32 %v3848_v60, %v3809_v46  ;;  %v3811_v55 = vpop.f32.mrf.mxu0  ;;  %4561 = vmatpush.bf16.msrb.mxu0 %v14641_v1  ;;  %4051 = vmatmul.bf16.gmra.mxu1 %v14643_v58 }
 0x46e   : > { %14640 = vst [vmem:[#allocation7_spill] sm:$0xff] %v12501_v44  ;;  %8134 = vmatmul.msk.bf16.gmra.mxu3 %vm735_vm0, %v14644_v25 }
 0x46f   : > { %v12505_v40 = vadd.f32 %v3849_v9, %v12373_v29 }
 0x471   : > { %14642 = vst [vmem:[#allocation10_spill] sm:$0xff] %v12505_v40  ;;  %4562 = vmatpush.bf16.msrb.mxu0 %v14645_v13  ;;  %v3925_v61 = vpop.f32.mrf.mxu3 }
 0x472   : > { %v12511_v63 = vadd.f32 %v3925_v61, %v3886_v19  ;;  %v3888_v5 = vpop.f32.mrf.mxu1 }
 0x474   : > { %v3850_v14 = vpop.f32.mrf.mxu2 }
 0x475   : > { %v3851_v2 = vadd.f32 %v3850_v14, %v3811_v55  ;;  %v3964_v35 = vpop.f32.mrf.mxu0  ;;  %4563 = vmatpush.bf16.msrb.mxu0 %v14646_v47 }
 0x477   : > { %v12515_v46 = vadd.f32 %v3851_v2, %v12384_v11 }
 0x478   : > { %4129 = vmatmul.bf16.gmra.mxu0 %v14643_v58 }
 0x479   : > { %14647 = vst [vmem:[#allocation11_spill] sm:$0xff] %v12515_v46  ;;  %8140 = vmatmul.msk.bf16.gmra.mxu2 %vm735_vm0, %v14644_v25  ;;  %v3927_v29 = vpop.f32.mrf.mxu3 }
 0x47a   : > { %v12520_v59 = vadd.f32 %v3927_v29, %v3888_v5  ;;  %v3891_v32 = vpop.f32.mrf.mxu1 }
 0x47c   : > { %v4003_v10 = vpop.f32.mrf.mxu2 }
 0x47d   : > { %v12522_v28 = vadd.f32 %v4003_v10, %v3964_v35  ;;  %v3966_v62 = vpop.f32.mrf.mxu0  ;;  %4056 = vmatmul.bf16.gmra.mxu1 %v12021_v39  ;;  %v8145_v10 = vld [vmem:[%s9415_s25 + $0x128] sm:$0xff] }
 0x47e   : > { %8135 = vmatmul.msk.bf16.gmra.mxu3 %vm735_vm0, %v12023_v27 }
 0x481   : > { %v3930_v11 = vpop.f32.mrf.mxu3 }
 0x482   : > { %v12527_v16 = vadd.f32 %v3930_v11, %v3891_v32  ;;  %v3893_v60 = vpop.f32.mrf.mxu1 }
 0x484   : > { %v4005_v20 = vpop.f32.mrf.mxu2 }
 0x485   : > { %v12529_v19 = vadd.f32 %v4005_v20, %v3966_v62  ;;  %v3969_v9 = vpop.f32.mrf.mxu0  ;;  %v8144_v20 = vld [vmem:[%s9415_s25 + $0x120] sm:$0xff] }
 0x488   : > { %4134 = vmatmul.bf16.gmra.mxu0 %v12021_v39 }
 0x489   : > { %8141 = vmatmul.msk.bf16.gmra.mxu2 %vm735_vm0, %v12023_v27  ;;  %v3932_v55 = vpop.f32.mrf.mxu3 }
 0x48a   : > { %v12534_v4 = vadd.f32 %v3932_v55, %v3893_v60  ;;  %v3896_v58 = vpop.f32.mrf.mxu1  ;;  %v4197_v60 = vunpack.c.0.s8 %v8145_v10  ;;  %v4198_v55 = vunpack.c.1.s8 %v8144_v20 }
 0x48c   : > { %v4008_v1 = vpop.f32.mrf.mxu2 }
 0x48d   : > { %v12536_v25 = vadd.f32 %v4008_v1, %v3969_v9  ;;  %v3971_v13 = vpop.f32.mrf.mxu0  ;;  %4061 = vmatmul.bf16.gmra.mxu1 %v12049_v45  ;;  %v4196_v9 = vunpack.c.0.s8 %v8144_v20  ;;  %v4221_v1 = vand.u32 255, %v4197_v60 }
 0x48e   : > { %8136 = vmatmul.msk.bf16.gmra.mxu3 %vm735_vm0, %v12051_v0 }
 0x48f   : > { %v4245_v48 = vcvt.s32.f32 %v4221_v1  ;;  %v4203_v1 = vunpack.c.3.s8 %v8145_v10 }
 0x491   : > { %v3935_v61 = vpop.f32.mrf.mxu3 }
 0x492   : > { %v12541_v39 = vadd.f32 %v3935_v61, %v3896_v58  ;;  %v3898_v27 = vpop.f32.mrf.mxu1 }
 0x494   : > { %v4010_v14 = vpop.f32.mrf.mxu2 }
 0x495   : > { %v12543_v5 = vadd.f32 %v4010_v14, %v3971_v13  ;;  %v3974_v2 = vpop.f32.mrf.mxu0  ;;  %v4220_v14 = vand.u32 255, %v4196_v9 }
 0x497   : > { %v4244_v18 = vcvt.s32.f32 %v4220_v14  ;;  %v14648_v14 = vld [vmem:[#allocation189_spill] sm:$0xff] }
 0x498   : > { %4139 = vmatmul.bf16.gmra.mxu0 %v12049_v45  ;;  %v4199_v45 = vunpack.c.1.s8 %v8145_v10 }
 0x499   : > { %8142 = vmatmul.msk.bf16.gmra.mxu2 %vm735_vm0, %v12051_v0  ;;  %v3937_v35 = vpop.f32.mrf.mxu3 }
 0x49a   : > { %v12548_v47 = vadd.f32 %v3937_v35, %v3898_v27  ;;  %v3901_v32 = vpop.f32.mrf.mxu1  ;;  %v4223_v61 = vand.u32 255, %v4199_v45  ;;  %v4222_v27 = vand.u32 255, %v4198_v55 }
 0x49c   : > { %v4013_v29 = vpop.f32.mrf.mxu2  ;;  %v4247_v3 = vcvt.s32.f32 %v4223_v61  ;;  %v4246_v30 = vcvt.s32.f32 %v4222_v27  ;;  %v4202_v61 = vunpack.c.3.s8 %v8144_v20 }
 0x49d   : > { %v12551_v62 = vadd.f32 %v4013_v29, %v3974_v2  ;;  %v3976_v11 = vpop.f32.mrf.mxu0  ;;  %4066 = vmatmul.bf16.gmra.mxu1 %v12078_v34 }
 0x49e   : > { %8137 = vmatmul.msk.bf16.gmra.mxu3 %vm735_vm0, %v12080_v38  ;;  %v12568_v9 = vpack.c.bf16 %v4246_v30, %v4244_v18 }
 0x4a1   : > { %v3940_v0 = vpop.f32.mrf.mxu3 }
 0x4a2   : > { %v12557_v58 = vadd.f32 %v3940_v0, %v3901_v32  ;;  %v3903_v2 = vpop.f32.mrf.mxu1  ;;  %v12566_v0 = vpack.c.bf16 %v4247_v3, %v4245_v48  ;;  %v14649_v3 = vld [vmem:[#allocation194_spill] sm:$0xff] }
 0x4a4   : > { %v4015_v13 = vpop.f32.mrf.mxu2 }
 0x4a5   : > { %v12559_v35 = vadd.f32 %v4015_v13, %v3976_v11  ;;  %v3979_v29 = vpop.f32.mrf.mxu0 }
 0x4a8   : > { %4144 = vmatmul.bf16.gmra.mxu0 %v12078_v34  ;;  %v4201_v34 = vunpack.c.2.s8 %v8145_v10  ;;  %v14651_v10 = vld [vmem:[#allocation197_spill] sm:$0xff] }
 0x4a9   : > { %8143 = vmatmul.msk.bf16.gmra.mxu2 %vm735_vm0, %v12080_v38  ;;  %v3942_v60 = vpop.f32.mrf.mxu3  ;;  %v4200_v38 = vunpack.c.2.s8 %v8144_v20 }
 0x4aa   : > { %v12564_v32 = vadd.f32 %v3942_v60, %v3903_v2  ;;  %v3906_v11 = vpop.f32.mrf.mxu1  ;;  %v4225_v30 = vand.u32 255, %v4201_v34  ;;  %v4227_v2 = vand.u32 255, %v4203_v1  ;;  %v4226_v60 = vand.u32 255, %v4202_v61  ;;  %v14652_v1 = vld [vmem:[#allocation191_spill] sm:$0xff]  ;;  %v14655_v61 = vld [vmem:[#allocation202_spill] sm:$0xff] }
 0x4ac   : > { %v4018_v45 = vpop.f32.mrf.mxu2  ;;  %v4249_v20 = vcvt.s32.f32 %v4225_v30 }
 0x4ad   : > { %v12570_v55 = vadd.f32 %v4018_v45, %v3979_v29  ;;  %v3981_v13 = vpop.f32.mrf.mxu0  ;;  %4306 = vmatmul.bf16.vlgmr.msra.gmra.mxu1 %v12568_v9  ;;  %v4224_v29 = vand.u32 255, %v4200_v38  ;;  %v14654_v38 = vld [vmem:[#allocation200_spill] sm:$0xff] }
 0x4ae   : > { %8150 = vmatmul.msk.bf16.vlgmr.msra.gmra.mxu3 %vm735_vm0, %v12566_v0  ;;  %4767 = vmatpush.bf16.msra.mxu1 %v14648_v14  ;;  %v4251_v14 = vcvt.s32.f32 %v4227_v2  ;;  %v8147_v2 = vld [vmem:[%s9415_s25 + $0x138] sm:$0xff] }
 0x4af   : > { %4810 = vmatpush.bf16.msra.mxu3 %v14649_v3  ;;  %v4248_v34 = vcvt.s32.f32 %v4224_v29 }
 0x4b1   : > { %v3945_v48 = vpop.f32.mrf.mxu3 }
 0x4b2   : > { %v12577_v18 = vadd.f32 %v3945_v48, %v3906_v11  ;;  %v3908_v45 = vpop.f32.mrf.mxu1  ;;  %4768 = vmatpush.bf16.msra.mxu1 %v14650_v15  ;;  %v4250_v11 = vcvt.s32.f32 %v4226_v60  ;;  %v12592_v48 = vpack.c.bf16 %v4251_v14, %v4249_v20  ;;  %v4207_v20 = vunpack.c.1.s8 %v8147_v2 }
 0x4b3   : > { %4811 = vmatpush.bf16.msra.mxu3 %v14651_v10 }
 0x4b4   : > { %v4020_v27 = vpop.f32.mrf.mxu2 }
 0x4b5   : > { %v12579_v21 = vadd.f32 %v4020_v27, %v3981_v13  ;;  %v3984_v24 = vpop.f32.mrf.mxu0  ;;  %v14653_v13 = vld [vmem:[#allocation195_spill] sm:$0xff]  ;;  %v12594_v27 = vpack.c.bf16 %v4250_v11, %v4248_v34  ;;  %v14660_v34 = vld [vmem:[#allocation193_spill] sm:$0xff] }
 0x4b6   : > { %4769 = vmatpush.bf16.msra.mxu1 %v14652_v1  ;;  %v8146_v1 = vld [vmem:[%s9415_s25 + $0x130] sm:$0xff]  ;;  %v14661_v11 = vld [vmem:[#allocation201_spill] sm:$0xff] }
 0x4b7   : > { %4812 = vmatpush.bf16.msra.mxu3 %v14654_v38  ;;  %v14658_v38 = vld [vmem:[#allocation204_spill] sm:$0xff]  ;;  %v4204_v14 = vunpack.c.0.s8 %v8146_v1 }
 0x4b8   : > { %4384 = vmatmul.bf16.vlgmr.msra.gmra.mxu0 %v12568_v9 }
 0x4b9   : > { %8156 = vmatmul.msk.bf16.vlgmr.msra.gmra.mxu2 %vm735_vm0, %v12566_v0  ;;  %4845 = vmatpush.bf16.msra.mxu0 %v14653_v13  ;;  %v3947_v15 = vpop.f32.mrf.mxu3  ;;  %v14657_v13 = vld [vmem:[#allocation198_spill] sm:$0xff]  ;;  %v4228_v49 = vand.u32 255, %v4204_v14 }
 0x4ba   : > { %4888 = vmatpush.bf16.msra.mxu2 %v14655_v61  ;;  %v12590_v3 = vadd.f32 %v3947_v15, %v3908_v45  ;;  %v3911_v29 = vpop.f32.mrf.mxu1  ;;  %4770 = vmatpush.bf16.msra.mxu1 %v14656_v51  ;;  %v4205_v61 = vunpack.c.0.s8 %v8147_v2  ;;  %v14659_v45 = vld [vmem:[#allocation83_spill] sm:$0xff] }
 0x4bb   : > { %4813 = vmatpush.bf16.msra.mxu3 %v14658_v38 }
 0x4bc   : > { %v4023_v30 = vpop.f32.mrf.mxu2  ;;  %v4229_v15 = vand.u32 255, %v4205_v61 }
 0x4bd   : > { %v12597_v60 = vadd.f32 %v4023_v30, %v3984_v24  ;;  %v3986_v10 = vpop.f32.mrf.mxu0  ;;  %4846 = vmatpush.bf16.msra.mxu0 %v14657_v13  ;;  %4311 = vmatmul.bf16.gmra.mxu1 %v12594_v27  ;;  %v4206_v24 = vunpack.c.1.s8 %v8146_v1  ;;  %v14662_v30 = vld [vmem:[#allocation86_spill] sm:$0xff] }
 0x4be   : > { %4889 = vmatpush.bf16.msra.mxu2 %v14659_v45  ;;  %8151 = vmatmul.msk.bf16.gmra.mxu3 %vm735_vm0, %v12592_v48  ;;  %v4231_v45 = vand.u32 255, %v4207_v20  ;;  %v14666_v20 = vld [vmem:[#allocation199_spill] sm:$0xff] }
 0x4bf   : > { %4771 = vmatpush.bf16.msra.mxu1 %v14660_v34  ;;  %v4230_v46 = vand.u32 255, %v4206_v24  ;;  %v14665_v34 = vld [vmem:[#allocation89_spill] sm:$0xff] }
 0x4c0   : > { %v4255_v61 = vcvt.s32.f32 %v4231_v45 }
 0x4c1   : > { %4847 = vmatpush.bf16.msra.mxu0 %v14661_v11  ;;  %v3950_v51 = vpop.f32.mrf.mxu3  ;;  %v4253_v11 = vcvt.s32.f32 %v4229_v15 }
 0x4c2   : > { %4890 = vmatpush.bf16.msra.mxu2 %v14662_v30  ;;  %v12610_v13 = vadd.f32 %v3950_v51, %v3911_v29  ;;  %v3913_v40 = vpop.f32.mrf.mxu1  ;;  %v4252_v29 = vcvt.s32.f32 %v4228_v49  ;;  %v4254_v51 = vcvt.s32.f32 %v4230_v46  ;;  %v14668_v46 = vld [vmem:[#allocation203_spill] sm:$0xff] }
 0x4c3   : > { %4772 = vmatpush.bf16.msra.mxu1 %v14663_v22  ;;  %v12624_v22 = vpack.c.bf16 %v4255_v61, %v4253_v11  ;;  %v4208_v11 = vunpack.c.2.s8 %v8146_v1  ;;  %v4210_v61 = vunpack.c.3.s8 %v8146_v1  ;;  %v14672_v1 = vld [vmem:[#allocation80_spill] sm:$0xff] }
 0x4c4   : > { %v4025_v38 = vpop.f32.mrf.mxu2  ;;  %v12626_v30 = vpack.c.bf16 %v4254_v51, %v4252_v29  ;;  %v14670_v29 = vld [vmem:[#allocation79_spill] sm:$0xff] }
 0x4c5   : > { %v12612_v44 = vadd.f32 %v4025_v38, %v3986_v10  ;;  %v3989_v31 = vpop.f32.mrf.mxu0  ;;  %4848 = vmatpush.bf16.msra.mxu0 %v14664_v36  ;;  %v14667_v10 = vld [vmem:[#allocation208_spill] sm:$0xff] }
 0x4c6   : > { %4891 = vmatpush.bf16.msra.mxu2 %v14665_v34  ;;  %v14669_v34 = vld [vmem:[#allocation78_spill] sm:$0xff] }
 0x4c7   : > { %4773 = vmatpush.bf16.msra.mxu1 %v14666_v20  ;;  %v4209_v20 = vunpack.c.2.s8 %v8147_v2 }
 0x4c8   : > { %4389 = vmatmul.bf16.gmra.mxu0 %v12594_v27 }
 0x4c9   : > { %8157 = vmatmul.msk.bf16.gmra.mxu2 %vm735_vm0, %v12592_v48  ;;  %4849 = vmatpush.bf16.msra.mxu0 %v14667_v10  ;;  %v3952_v14 = vpop.f32.mrf.mxu3  ;;  %v4233_v51 = vand.u32 255, %v4209_v20 }
 0x4ca   : > { %v12622_v24 = vadd.f32 %v3952_v14, %v3913_v40  ;;  %v4042_v15 = vpop.f32.mrf.mxu1  ;;  %v4211_v40 = vunpack.c.3.s8 %v8147_v2 }
 0x4cb   : > { %4774 = vmatpush.bf16.msra.mxu1 %v14668_v46  ;;  %v4043_v45 = vadd.f32 %v4042_v15, %v12511_v63  ;;  %v4232_v63 = vand.u32 255, %v4208_v11  ;;  %v4234_v15 = vand.u32 255, %v4210_v61 }
 0x4cc   : > { %v4028_v36 = vpop.f32.mrf.mxu2 }
 0x4cd   : > { %v12628_v38 = vadd.f32 %v4028_v36, %v3989_v31  ;;  %v3991_v49 = vpop.f32.mrf.mxu0  ;;  %4850 = vmatpush.bf16.msra.mxu0 %v14669_v34  ;;  %4316 = vmatmul.bf16.gmra.mxu1 %v12626_v30  ;;  %v4235_v36 = vand.u32 255, %v4211_v40  ;;  %v4258_v40 = vcvt.s32.f32 %v4234_v15 }
 0x4ce   : > { %8152 = vmatmul.msk.bf16.gmra.mxu3 %vm735_vm0, %v12624_v22 }
 0x4cf   : > { %v4259_v20 = vcvt.s32.f32 %v4235_v36  ;;  %v8148_v36 = vld [vmem:[%s9415_s25 + $0x140] sm:$0xff] }
 0x4d1   : > { %4851 = vmatpush.bf16.msra.mxu0 %v14670_v29  ;;  %v4081_v31 = vpop.f32.mrf.mxu3  ;;  %v4257_v29 = vcvt.s32.f32 %v4233_v51 }
 0x4d2   : > { %v12637_v10 = vadd.f32 %v4081_v31, %v4043_v45  ;;  %v4044_v46 = vpop.f32.mrf.mxu1  ;;  %v4256_v45 = vcvt.s32.f32 %v4232_v63 }
 0x4d3   : > { %v4045_v56 = vadd.f32 %v4044_v46, %v12520_v59  ;;  %v12649_v61 = vpack.c.bf16 %v4259_v20, %v4257_v29  ;;  %v4214_v29 = vunpack.c.1.s8 %v8148_v36 }
 0x4d4   : > { %14671 = vst [vmem:[#allocation104_spill] sm:$0xff] %v12637_v10  ;;  %v4030_v14 = vpop.f32.mrf.mxu2  ;;  %v12651_v31 = vpack.c.bf16 %v4258_v40, %v4256_v45 }
 0x4d5   : > { %v12639_v34 = vadd.f32 %v4030_v14, %v3991_v49  ;;  %v4120_v53 = vpop.f32.mrf.mxu0  ;;  %4852 = vmatpush.bf16.msra.mxu0 %v14672_v1  ;;  %v4212_v1 = vunpack.c.0.s8 %v8148_v36 }
 0x4d6   : > { %v4121_v2 = vadd.f32 %v4120_v53, %v12522_v28  ;;  %v8149_v53 = vld [vmem:[%s9415_s25 + $0x148] sm:$0xff] }
 0x4d7   : > { %v4213_v46 = vunpack.c.0.s8 %v8149_v53 }
 0x4d8   : > { %4394 = vmatmul.bf16.gmra.mxu0 %v12626_v30 }
 0x4d9   : > { %8158 = vmatmul.msk.bf16.gmra.mxu2 %vm735_vm0, %v12624_v22  ;;  %v4083_v49 = vpop.f32.mrf.mxu3  ;;  %v4237_v45 = vand.u32 255, %v4213_v46 }
 0x4da   : > { %v12647_v11 = vadd.f32 %v4083_v49, %v4045_v56  ;;  %v4047_v28 = vpop.f32.mrf.mxu1  ;;  %v4215_v56 = vunpack.c.1.s8 %v8149_v53 }
 0x4db   : > { %v4048_v63 = vadd.f32 %v4047_v28, %v12527_v16  ;;  %v4261_v10 = vcvt.s32.f32 %v4237_v45 }
 0x4dc   : > { %14673 = vst [vmem:[#allocation105_spill] sm:$0xff] %v12647_v11  ;;  %v4159_v59 = vpop.f32.mrf.mxu2  ;;  %v4239_v49 = vand.u32 255, %v4215_v56 }
 0x4dd   : > { %v12654_v14 = vadd.f32 %v4159_v59, %v4121_v2  ;;  %v4122_v51 = vpop.f32.mrf.mxu0  ;;  %4321 = vmatmul.bf16.gmra.mxu1 %v12651_v31  ;;  %v4236_v59 = vand.u32 255, %v4212_v1 }
 0x4de   : > { %v4123_v15 = vadd.f32 %v4122_v51, %v12529_v19  ;;  %8153 = vmatmul.msk.bf16.gmra.mxu3 %vm735_vm0, %v12649_v61  ;;  %v4263_v57 = vcvt.s32.f32 %v4239_v49  ;;  %v4219_v49 = vunpack.c.3.s8 %v8149_v53 }
 0x4df   : > { %14674 = vst [vmem:[#allocation14_spill] sm:$0xff] %v12654_v14  ;;  %v4238_v14 = vand.u32 255, %v4214_v29  ;;  %v4260_v8 = vcvt.s32.f32 %v4236_v59 }
 0x4e0   : > { %v12673_v1 = vpack.c.bf16 %v4263_v57, %v4261_v10  ;;  %v4216_v57 = vunpack.c.2.s8 %v8148_v36  ;;  %v4218_v10 = vunpack.c.3.s8 %v8148_v36 }
 0x4e1   : > { %v4086_v20 = vpop.f32.mrf.mxu3  ;;  %v4262_v46 = vcvt.s32.f32 %v4238_v14  ;;  %v4217_v14 = vunpack.c.2.s8 %v8149_v53 }
 0x4e2   : > { %v12662_v40 = vadd.f32 %v4086_v20, %v4048_v63  ;;  %v4049_v16 = vpop.f32.mrf.mxu1 }
 0x4e3   : > { %v4050_v51 = vadd.f32 %v4049_v16, %v12534_v4  ;;  %v12675_v29 = vpack.c.bf16 %v4262_v46, %v4260_v8  ;;  %v4241_v8 = vand.u32 255, %v4217_v14  ;;  %v4242_v46 = vand.u32 255, %v4218_v10 }
 0x4e4   : > { %v4161_v2 = vpop.f32.mrf.mxu2 }
 0x4e5   : > { %v12664_v28 = vadd.f32 %v4161_v2, %v4123_v15  ;;  %v4125_v19 = vpop.f32.mrf.mxu0  ;;  %v4266_v14 = vcvt.s32.f32 %v4242_v46 }
 0x4e6   : > { %v4126_v11 = vadd.f32 %v4125_v19, %v12536_v25  ;;  %v4243_v19 = vand.u32 255, %v4219_v49 }
 0x4e8   : > { %4399 = vmatmul.bf16.gmra.mxu0 %v12651_v31  ;;  %v4267_v53 = vcvt.s32.f32 %v4243_v19 }
 0x4e9   : > { %8159 = vmatmul.msk.bf16.gmra.mxu2 %vm735_vm0, %v12649_v61  ;;  %v4088_v63 = vpop.f32.mrf.mxu3 }
 0x4ea   : > { %v12671_v56 = vadd.f32 %v4088_v63, %v4050_v51  ;;  %v4052_v4 = vpop.f32.mrf.mxu1  ;;  %v4240_v51 = vand.u32 255, %v4216_v57 }
 0x4eb   : > { %v4053_v45 = vadd.f32 %v4052_v4, %v12541_v39 }
 0x4ec   : > { %v4164_v15 = vpop.f32.mrf.mxu2  ;;  %v4264_v36 = vcvt.s32.f32 %v4240_v51 }
 0x4ed   : > { %v12677_v20 = vadd.f32 %v4164_v15, %v4126_v11  ;;  %v4127_v25 = vpop.f32.mrf.mxu0  ;;  %4326 = vmatmul.bf16.gmra.mxu1 %v12675_v29 }
 0x4ee   : > { %v4128_v2 = vadd.f32 %v4127_v25, %v12543_v5  ;;  %8154 = vmatmul.msk.bf16.gmra.mxu3 %vm735_vm0, %v12673_v1  ;;  %v4265_v25 = vcvt.s32.f32 %v4241_v8  ;;  %v12697_v10 = vpack.c.bf16 %v4266_v14, %v4264_v36 }
 0x4f0   : > { %v12695_v57 = vpack.c.bf16 %v4267_v53, %v4265_v25 }
 0x4f1   : > { %v4091_v59 = vpop.f32.mrf.mxu3 }
 0x4f2   : > { %v12684_v16 = vadd.f32 %v4091_v59, %v4053_v45  ;;  %v4054_v39 = vpop.f32.mrf.mxu1 }
 0x4f3   : > { %v4055_v15 = vadd.f32 %v4054_v39, %v12548_v47 }
 0x4f4   : > { %v4166_v11 = vpop.f32.mrf.mxu2 }
 0x4f5   : > { %v12686_v63 = vadd.f32 %v4166_v11, %v4128_v2  ;;  %v4130_v5 = vpop.f32.mrf.mxu0 }
 0x4f6   : > { %v4131_v4 = vadd.f32 %v4130_v5, %v12551_v62 }
 0x4f8   : > { %4404 = vmatmul.bf16.gmra.mxu0 %v12675_v29 }
 0x4f9   : > { %8160 = vmatmul.msk.bf16.gmra.mxu2 %vm735_vm0, %v12673_v1  ;;  %v4093_v45 = vpop.f32.mrf.mxu3 }
 0x4fa   : > { %v12693_v49 = vadd.f32 %v4093_v45, %v4055_v15  ;;  %v4057_v47 = vpop.f32.mrf.mxu1 }
 0x4fb   : > { %v4058_v8 = vadd.f32 %v4057_v47, %v12557_v58 }
 0x4fc   : > { %v4169_v2 = vpop.f32.mrf.mxu2 }
 0x4fd   : > { %v12699_v59 = vadd.f32 %v4169_v2, %v4131_v4  ;;  %v4132_v62 = vpop.f32.mrf.mxu0  ;;  %4331 = vmatmul.bf16.gmra.mxu1 %v12697_v10 }
 0x4fe   : > { %v4133_v11 = vadd.f32 %v4132_v62, %v12559_v35  ;;  %8155 = vmatmul.msk.bf16.gmra.mxu3 %vm735_vm0, %v12695_v57 }
 0x501   : > { %v4096_v19 = vpop.f32.mrf.mxu3 }
 0x502   : > { %v12706_v51 = vadd.f32 %v4096_v19, %v4058_v8  ;;  %v4059_v39 = vpop.f32.mrf.mxu1 }
 0x503   : > { %v4060_v4 = vadd.f32 %v4059_v39, %v12564_v32  ;;  %v14675_v32 = vld [vmem:[#allocation164_spill] sm:$0xff] }
 0x504   : > { %v4171_v46 = vpop.f32.mrf.mxu2 }
 0x505   : > { %v12708_v5 = vadd.f32 %v4171_v46, %v4133_v11  ;;  %v4135_v15 = vpop.f32.mrf.mxu0 }
 0x506   : > { %v4136_v25 = vadd.f32 %v4135_v15, %v12570_v55  ;;  %v14676_v55 = vld [vmem:[#allocation169_spill] sm:$0xff] }
 0x508   : > { %4409 = vmatmul.bf16.gmra.mxu0 %v12697_v10 }
 0x509   : > { %8161 = vmatmul.msk.bf16.gmra.mxu2 %vm735_vm0, %v12695_v57  ;;  %v4098_v58 = vpop.f32.mrf.mxu3 }
 0x50a   : > { %v12715_v35 = vadd.f32 %v4098_v58, %v4060_v4  ;;  %v4062_v36 = vpop.f32.mrf.mxu1  ;;  %v14680_v58 = vld [vmem:[#allocation170_spill] sm:$0xff] }
 0x50b   : > { %v4063_v2 = vadd.f32 %v4062_v36, %v12577_v18  ;;  %v14677_v18 = vld [vmem:[#allocation165_spill] sm:$0xff] }
 0x50c   : > { %v4174_v53 = vpop.f32.mrf.mxu2 }
 0x50d   : > { %v12717_v14 = vadd.f32 %v4174_v53, %v4136_v25  ;;  %v4137_v45 = vpop.f32.mrf.mxu0  ;;  %4486 = vmatmul.bf16.vlgmr.msrb.gmra.mxu1 %v12568_v9  ;;  %v14679_v25 = vld [vmem:[#allocation166_spill] sm:$0xff]  ;;  %v14681_v53 = vld [vmem:[#allocation175_spill] sm:$0xff] }
 0x50e   : > { %v4138_v47 = vadd.f32 %v4137_v45, %v12579_v21  ;;  %8162 = vmatmul.msk.bf16.vlgmr.msrb.gmra.mxu3 %vm735_vm0, %v12566_v0  ;;  %4947 = vmatpush.bf16.msrb.mxu1 %v14675_v32  ;;  %v14678_v21 = vld [vmem:[#allocation172_spill] sm:$0xff]  ;;  %v14682_v45 = vld [vmem:[#allocation177_spill] sm:$0xff] }
 0x50f   : > { %4990 = vmatpush.bf16.msrb.mxu3 %v14676_v55 }
 0x511   : > { %v4101_v62 = vpop.f32.mrf.mxu3 }
 0x512   : > { %v12726_v8 = vadd.f32 %v4101_v62, %v4063_v2  ;;  %v4064_v19 = vpop.f32.mrf.mxu1  ;;  %4948 = vmatpush.bf16.msrb.mxu1 %v14677_v18  ;;  %v14684_v62 = vld [vmem:[#allocation173_spill] sm:$0xff]  ;;  %v14688_v18 = vld [vmem:[#allocation176_spill] sm:$0xff] }
 0x513   : > { %4991 = vmatpush.bf16.msrb.mxu3 %v14678_v21  ;;  %v4065_v15 = vadd.f32 %v4064_v19, %v12590_v3  ;;  %v14686_v19 = vld [vmem:[#allocation183_spill] sm:$0xff] }
 0x514   : > { %v4176_v11 = vpop.f32.mrf.mxu2 }
 0x515   : > { %v12728_v46 = vadd.f32 %v4176_v11, %v4138_v47  ;;  %v4140_v39 = vpop.f32.mrf.mxu0  ;;  %v14685_v11 = vld [vmem:[#allocation179_spill] sm:$0xff] }
 0x516   : > { %v4141_v4 = vadd.f32 %v4140_v39, %v12597_v60  ;;  %4949 = vmatpush.bf16.msrb.mxu1 %v14679_v25  ;;  %v14687_v39 = vld [vmem:[#allocation168_spill] sm:$0xff] }
 0x517   : > { %4992 = vmatpush.bf16.msrb.mxu3 %v14681_v53  ;;  %v14690_v53 = vld [vmem:[#allocation171_spill] sm:$0xff] }
 0x518   : > { %4564 = vmatmul.bf16.vlgmr.msrb.gmra.mxu0 %v12568_v9  ;;  %v14683_v9 = vld [vmem:[#allocation167_spill] sm:$0xff] }
 0x519   : > { %8168 = vmatmul.msk.bf16.vlgmr.msrb.gmra.mxu2 %vm735_vm0, %v12566_v0  ;;  %5025 = vmatpush.bf16.msrb.mxu0 %v14680_v58  ;;  %v4103_v36 = vpop.f32.mrf.mxu3 }
 0x51a   : > { %5068 = vmatpush.bf16.msrb.mxu2 %v14682_v45  ;;  %v12741_v2 = vadd.f32 %v4103_v36, %v4065_v15  ;;  %v4067_v3 = vpop.f32.mrf.mxu1  ;;  %4950 = vmatpush.bf16.msrb.mxu1 %v14683_v9  ;;  %v14689_v15 = vld [vmem:[#allocation185_spill] sm:$0xff] }
 0x51b   : > { %v4068_v0 = vadd.f32 %v4067_v3, %v12610_v13  ;;  %4993 = vmatpush.bf16.msrb.mxu3 %v14685_v11  ;;  %v14692_v3 = vld [vmem:[#allocation187_spill] sm:$0xff]  ;;  %v14694_v9 = vld [vmem:[#allocation181_spill] sm:$0xff] }
 0x51c   : > { %v4179_v47 = vpop.f32.mrf.mxu2 }
 0x51d   : > { %v12743_v32 = vadd.f32 %v4179_v47, %v4141_v4  ;;  %v4142_v60 = vpop.f32.mrf.mxu0  ;;  %5026 = vmatpush.bf16.msrb.mxu0 %v14684_v62  ;;  %4491 = vmatmul.bf16.gmra.mxu1 %v12594_v27  ;;  %v14691_v47 = vld [vmem:[#allocation180_spill] sm:$0xff] }
 0x51e   : > { %v4143_v55 = vadd.f32 %v4142_v60, %v12612_v44  ;;  %5069 = vmatpush.bf16.msrb.mxu2 %v14686_v19  ;;  %8163 = vmatmul.msk.bf16.gmra.mxu3 %vm735_vm0, %v12592_v48  ;;  %v14693_v60 = vld [vmem:[#allocation174_spill] sm:$0xff] }
 0x51f   : > { %4951 = vmatpush.bf16.msrb.mxu1 %v14687_v39  ;;  %v14695_v19 = vld [vmem:[#allocation178_spill] sm:$0xff] }
 0x521   : > { %5027 = vmatpush.bf16.msrb.mxu0 %v14688_v18  ;;  %v4106_v21 = vpop.f32.mrf.mxu3 }
 0x522   : > { %5070 = vmatpush.bf16.msrb.mxu2 %v14689_v15  ;;  %v12757_v13 = vadd.f32 %v4106_v21, %v4068_v0  ;;  %v4069_v4 = vpop.f32.mrf.mxu1 }
 0x523   : > { %4952 = vmatpush.bf16.msrb.mxu1 %v14690_v53  ;;  %v4070_v36 = vadd.f32 %v4069_v4, %v12622_v24 }
 0x524   : > { %v4181_v44 = vpop.f32.mrf.mxu2 }
 0x525   : > { %v12759_v25 = vadd.f32 %v4181_v44, %v4143_v55  ;;  %v4145_v58 = vpop.f32.mrf.mxu0  ;;  %5028 = vmatpush.bf16.msrb.mxu0 %v14691_v47 }
 0x526   : > { %v4146_v45 = vadd.f32 %v4145_v58, %v12628_v38  ;;  %5071 = vmatpush.bf16.msrb.mxu2 %v14692_v3 }
 0x527   : > { %4953 = vmatpush.bf16.msrb.mxu1 %v14693_v60 }
 0x528   : > { %4569 = vmatmul.bf16.gmra.mxu0 %v12594_v27  ;;  %v14696_v27 = vld [vmem:[#allocation182_spill] sm:$0xff] }
 0x529   : > { %8169 = vmatmul.msk.bf16.gmra.mxu2 %vm735_vm0, %v12592_v48  ;;  %5029 = vmatpush.bf16.msrb.mxu0 %v14694_v9  ;;  %v4108_v0 = vpop.f32.mrf.mxu3  ;;  %v14697_v48 = vld [vmem:[#allocation184_spill] sm:$0xff] }
 0x52a   : > { %v12771_v55 = vadd.f32 %v4108_v0, %v4070_v36  ;;  %v4307_v38 = vpop.f32.mrf.mxu1 }
 0x52b   : > { %4954 = vmatpush.bf16.msrb.mxu1 %v14695_v19 }
 0x52c   : > { %v4184_v62 = vpop.f32.mrf.mxu2 }
 0x52d   : > { %v12773_v24 = vadd.f32 %v4184_v62, %v4146_v45  ;;  %v4147_v11 = vpop.f32.mrf.mxu0  ;;  %5030 = vmatpush.bf16.msrb.mxu0 %v14696_v27  ;;  %4496 = vmatmul.bf16.gmra.mxu1 %v12626_v30 }
 0x52e   : > { %v4148_v39 = vadd.f32 %v4147_v11, %v12639_v34  ;;  %8164 = vmatmul.msk.bf16.gmra.mxu3 %vm735_vm0, %v12624_v22  ;;  %v14698_v34 = vld [vmem:[#allocation186_spill] sm:$0xff] }
 0x531   : > { %5031 = vmatpush.bf16.msrb.mxu0 %v14697_v48  ;;  %v4346_v18 = vpop.f32.mrf.mxu3 }
 0x532   : > { %v4347_v21 = vadd.f32 %v4346_v18, %v4307_v38  ;;  %v4309_v4 = vpop.f32.mrf.mxu1 }
 0x534   : > { %v4186_v15 = vpop.f32.mrf.mxu2  ;;  %v12785_v53 = vadd.f32 %v4347_v21, %v12380_v41 }
 0x535   : > { %v12782_v44 = vadd.f32 %v4186_v15, %v4148_v39  ;;  %v4385_v58 = vpop.f32.mrf.mxu0  ;;  %5032 = vmatpush.bf16.msrb.mxu0 %v14698_v34 }
 0x538   : > { %4574 = vmatmul.bf16.gmra.mxu0 %v12626_v30 }
 0x539   : > { %8170 = vmatmul.msk.bf16.gmra.mxu2 %vm735_vm0, %v12624_v22  ;;  %v4348_v36 = vpop.f32.mrf.mxu3 }
 0x53a   : > { %v4349_v45 = vadd.f32 %v4348_v36, %v4309_v4  ;;  %v4312_v3 = vpop.f32.mrf.mxu1 }
 0x53c   : > { %v4424_v47 = vpop.f32.mrf.mxu2  ;;  %v12792_v0 = vadd.f32 %v4349_v45, %v12390_v52 }
 0x53d   : > { %v4425_v60 = vadd.f32 %v4424_v47, %v4385_v58  ;;  %v4387_v9 = vpop.f32.mrf.mxu0  ;;  %4501 = vmatmul.bf16.gmra.mxu1 %v12651_v31 }
 0x53e   : > { %8165 = vmatmul.msk.bf16.gmra.mxu3 %vm735_vm0, %v12649_v61 }
 0x53f   : > { %v12795_v62 = vadd.f32 %v4425_v60, %v12393_v7  ;;  %v8175_v60 = vld [vmem:[%s9415_s25 + $0x158] sm:$0xff] }
 0x541   : > { %v4351_v41 = vpop.f32.mrf.mxu3 }
 0x542   : > { %v4352_v30 = vadd.f32 %v4351_v41, %v4312_v3  ;;  %v4314_v38 = vpop.f32.mrf.mxu1 }
 0x544   : > { %v4426_v22 = vpop.f32.mrf.mxu2  ;;  %v12801_v39 = vadd.f32 %v4352_v30, %v12399_v23 }
 0x545   : > { %v4427_v11 = vadd.f32 %v4426_v22, %v4387_v9  ;;  %v4390_v19 = vpop.f32.mrf.mxu0  ;;  %v8174_v22 = vld [vmem:[%s9415_s25 + $0x150] sm:$0xff] }
 0x547   : > { %v12804_v52 = vadd.f32 %v4427_v11, %v12402_v42  ;;  %v4667_v11 = vunpack.c.1.s8 %v8174_v22 }
 0x548   : > { %4579 = vmatmul.bf16.gmra.mxu0 %v12651_v31 }
 0x549   : > { %8171 = vmatmul.msk.bf16.gmra.mxu2 %vm735_vm0, %v12649_v61  ;;  %v4353_v7 = vpop.f32.mrf.mxu3 }
 0x54a   : > { %v4354_v27 = vadd.f32 %v4353_v7, %v4314_v38  ;;  %v4317_v18 = vpop.f32.mrf.mxu1 }
 0x54c   : > { %v4429_v48 = vpop.f32.mrf.mxu2  ;;  %v12810_v4 = vadd.f32 %v4354_v27, %v12408_v6 }
 0x54d   : > { %v4430_v21 = vadd.f32 %v4429_v48, %v4390_v19  ;;  %v4392_v15 = vpop.f32.mrf.mxu0  ;;  %4506 = vmatmul.bf16.gmra.mxu1 %v12675_v29 }
 0x54e   : > { %8166 = vmatmul.msk.bf16.gmra.mxu3 %vm735_vm0, %v12673_v1 }
 0x54f   : > { %v12813_v23 = vadd.f32 %v4430_v21, %v12411_v50 }
 0x551   : > { %v4356_v42 = vpop.f32.mrf.mxu3 }
 0x552   : > { %v4357_v61 = vadd.f32 %v4356_v42, %v4317_v18  ;;  %v4319_v58 = vpop.f32.mrf.mxu1 }
 0x554   : > { %v4431_v31 = vpop.f32.mrf.mxu2  ;;  %v12819_v45 = vadd.f32 %v4357_v61, %v12417_v33 }
 0x555   : > { %v4432_v34 = vadd.f32 %v4431_v31, %v4392_v15  ;;  %v4395_v36 = vpop.f32.mrf.mxu0 }
 0x557   : > { %v12822_v6 = vadd.f32 %v4432_v34, %v12420_v37  ;;  %v4666_v37 = vunpack.c.0.s8 %v8175_v60 }
 0x558   : > { %4584 = vmatmul.bf16.gmra.mxu0 %v12675_v29  ;;  %v4665_v29 = vunpack.c.0.s8 %v8174_v22 }
 0x559   : > { %8172 = vmatmul.msk.bf16.gmra.mxu2 %vm735_vm0, %v12673_v1  ;;  %v4358_v50 = vpop.f32.mrf.mxu3  ;;  %v4668_v1 = vunpack.c.1.s8 %v8175_v60  ;;  %v4690_v7 = vand.u32 255, %v4666_v37 }
 0x55a   : > { %v4359_v47 = vadd.f32 %v4358_v50, %v4319_v58  ;;  %v4322_v9 = vpop.f32.mrf.mxu1  ;;  %v4689_v21 = vand.u32 255, %v4665_v29 }
 0x55b   : > { %v4692_v18 = vand.u32 255, %v4668_v1  ;;  %v4714_v58 = vcvt.s32.f32 %v4690_v7  ;;  %v4671_v7 = vunpack.c.3.s8 %v8174_v22 }
 0x55c   : > { %v4434_v3 = vpop.f32.mrf.mxu2  ;;  %v12830_v38 = vadd.f32 %v4359_v47, %v12426_v26  ;;  %v4691_v26 = vand.u32 255, %v4667_v11  ;;  %v4670_v11 = vunpack.c.2.s8 %v8175_v60 }
 0x55d   : > { %v4435_v41 = vadd.f32 %v4434_v3, %v4395_v36  ;;  %v4397_v30 = vpop.f32.mrf.mxu0  ;;  %4511 = vmatmul.bf16.gmra.mxu1 %v12697_v10  ;;  %v4716_v34 = vcvt.s32.f32 %v4692_v18  ;;  %v4713_v36 = vcvt.s32.f32 %v4689_v21 }
 0x55e   : > { %8167 = vmatmul.msk.bf16.gmra.mxu3 %vm735_vm0, %v12695_v57  ;;  %v4715_v50 = vcvt.s32.f32 %v4691_v26 }
 0x55f   : > { %v12833_v33 = vadd.f32 %v4435_v41, %v12429_v12 }
 0x561   : > { %v4361_v19 = vpop.f32.mrf.mxu3 }
 0x562   : > { %v4362_v27 = vadd.f32 %v4361_v19, %v4322_v9  ;;  %v4324_v15 = vpop.f32.mrf.mxu1  ;;  %v12847_v9 = vpack.c.bf16 %v4716_v34, %v4714_v58  ;;  %v4669_v19 = vunpack.c.2.s8 %v8174_v22  ;;  %v14703_v34 = vld [vmem:[#allocation74_spill] sm:$0xff] }
 0x564   : > { %v4436_v48 = vpop.f32.mrf.mxu2  ;;  %v12839_v61 = vadd.f32 %v4362_v27, %v12435_v17 }
 0x565   : > { %v4437_v42 = vadd.f32 %v4436_v48, %v4397_v30  ;;  %v4400_v12 = vpop.f32.mrf.mxu0  ;;  %v12849_v30 = vpack.c.bf16 %v4715_v50, %v4713_v36  ;;  %v4694_v48 = vand.u32 255, %v4670_v11  ;;  %v14705_v50 = vld [vmem:[#allocation76_spill] sm:$0xff] }
 0x566   : > { %14699 = vst [vmem:[#allocation8_spill] sm:$0xff] %v12839_v61 }
 0x567   : > { %v12842_v31 = vadd.f32 %v4437_v42, %v12438_v54 }
 0x568   : > { %4589 = vmatmul.bf16.gmra.mxu0 %v12697_v10  ;;  %v14701_v10 = vld [vmem:[#allocation72_spill] sm:$0xff] }
 0x569   : > { %8173 = vmatmul.msk.bf16.gmra.mxu2 %vm735_vm0, %v12695_v57  ;;  %v4363_v47 = vpop.f32.mrf.mxu3  ;;  %v4672_v57 = vunpack.c.3.s8 %v8175_v60  ;;  %v4718_v60 = vcvt.s32.f32 %v4694_v48  ;;  %v8176_v48 = vld [vmem:[%s9415_s25 + $0x160] sm:$0xff] }
 0x56a   : > { %v4364_v3 = vadd.f32 %v4363_v47, %v4324_v15  ;;  %v4327_v17 = vpop.f32.mrf.mxu1  ;;  %v4693_v15 = vand.u32 255, %v4669_v19 }
 0x56b   : > { %v4696_v26 = vand.u32 255, %v4672_v57  ;;  %v8177_v57 = vld [vmem:[%s9415_s25 + $0x168] sm:$0xff] }
 0x56c   : > { %v4439_v41 = vpop.f32.mrf.mxu2  ;;  %v12852_v1 = vadd.f32 %v4364_v3, %v12444_v43  ;;  %v4695_v43 = vand.u32 255, %v4671_v7  ;;  %v4717_v3 = vcvt.s32.f32 %v4693_v15 }
 0x56d   : > { %v4440_v37 = vadd.f32 %v4439_v41, %v4400_v12  ;;  %v4402_v54 = vpop.f32.mrf.mxu0  ;;  %4775 = vmatmul.bf16.vlgmr.msra.gmra.mxu1 %v12849_v30  ;;  %v4720_v22 = vcvt.s32.f32 %v4696_v26  ;;  %v14709_v26 = vld [vmem:[#allocation102_spill] sm:$0xff] }
 0x56e   : > { %14700 = vst [vmem:[#allocation15_spill] sm:$0xff] %v12852_v1  ;;  %8180 = vmatmul.msk.bf16.vlgmr.msra.gmra.mxu3 %vm735_vm0, %v12847_v9  ;;  %v4719_v41 = vcvt.s32.f32 %v4695_v43  ;;  %v4674_v43 = vunpack.c.0.s8 %v8177_v57 }
 0x56f   : > { %v12855_v29 = vadd.f32 %v4440_v37, %v14701_v10 }
 0x570   : > { %v12871_v11 = vpack.c.bf16 %v4719_v41, %v4717_v3 }
 0x571   : > { %14702 = vst [vmem:[#allocation9_spill] sm:$0xff] %v12855_v29  ;;  %v4366_v27 = vpop.f32.mrf.mxu3 }
 0x572   : > { %v4367_v18 = vadd.f32 %v4366_v27, %v4327_v17  ;;  %v4329_v42 = vpop.f32.mrf.mxu1 }
 0x574   : > { %v4441_v21 = vpop.f32.mrf.mxu2  ;;  %v12861_v36 = vadd.f32 %v4367_v18, %v14703_v34  ;;  %v14707_v18 = vld [vmem:[#allocation188_spill] sm:$0xff]  ;;  %v4675_v34 = vunpack.c.1.s8 %v8176_v48 }
 0x575   : > { %v4442_v12 = vadd.f32 %v4441_v21, %v4402_v54  ;;  %v4405_v58 = vpop.f32.mrf.mxu0  ;;  %v12869_v54 = vpack.c.bf16 %v4720_v22, %v4718_v60  ;;  %v4698_v60 = vand.u32 255, %v4674_v43 }
 0x576   : > { %14704 = vst [vmem:[#allocation18_spill] sm:$0xff] %v12861_v36 }
 0x577   : > { %v12864_v47 = vadd.f32 %v4442_v12, %v14705_v50  ;;  %v4673_v12 = vunpack.c.0.s8 %v8176_v48  ;;  %v4722_v36 = vcvt.s32.f32 %v4698_v60 }
 0x578   : > { %4853 = vmatmul.bf16.vlgmr.msra.gmra.mxu0 %v12849_v30 }
 0x579   : > { %14706 = vst [vmem:[#allocation106_spill] sm:$0xff] %v12864_v47  ;;  %8186 = vmatmul.msk.bf16.vlgmr.msra.gmra.mxu2 %vm735_vm0, %v12847_v9  ;;  %v4368_v17 = vpop.f32.mrf.mxu3  ;;  %v4697_v41 = vand.u32 255, %v4673_v12 }
 0x57a   : > { %v4369_v37 = vadd.f32 %v4368_v17, %v4329_v42  ;;  %v4332_v19 = vpop.f32.mrf.mxu1  ;;  %v4676_v42 = vunpack.c.1.s8 %v8177_v57  ;;  %v4699_v17 = vand.u32 255, %v4675_v34 }
 0x57b   : > { %v4721_v29 = vcvt.s32.f32 %v4697_v41  ;;  %v4678_v41 = vunpack.c.2.s8 %v8177_v57 }
 0x57c   : > { %v4444_v10 = vpop.f32.mrf.mxu2  ;;  %v12876_v21 = vadd.f32 %v4369_v37, %v14707_v18  ;;  %v4700_v3 = vand.u32 255, %v4676_v42  ;;  %v14711_v18 = vld [vmem:[#allocation103_spill] sm:$0xff]  ;;  %v4723_v43 = vcvt.s32.f32 %v4699_v17  ;;  %v4679_v17 = vunpack.c.3.s8 %v8176_v48 }
 0x57d   : > { %v4445_v7 = vadd.f32 %v4444_v10, %v4405_v58  ;;  %v4407_v27 = vpop.f32.mrf.mxu0  ;;  %4780 = vmatmul.bf16.gmra.mxu1 %v12871_v11 }
 0x57e   : > { %14708 = vst [vmem:[#allocation12_spill] sm:$0xff] %v12876_v21  ;;  %8181 = vmatmul.msk.bf16.gmra.mxu3 %vm735_vm0, %v12869_v54  ;;  %v4724_v47 = vcvt.s32.f32 %v4700_v3  ;;  %v12895_v34 = vpack.c.bf16 %v4723_v43, %v4721_v29  ;;  %v14717_v3 = vld [vmem:[#allocation10_spill] sm:$0xff] }
 0x57f   : > { %v12879_v15 = vadd.f32 %v4445_v7, %v14709_v26 }
 0x580   : > { %v12893_v12 = vpack.c.bf16 %v4724_v47, %v4722_v36  ;;  %v4680_v36 = vunpack.c.3.s8 %v8177_v57  ;;  %v4677_v47 = vunpack.c.2.s8 %v8176_v48 }
 0x581   : > { %14710 = vst [vmem:[#allocation19_spill] sm:$0xff] %v12879_v15  ;;  %v4371_v50 = vpop.f32.mrf.mxu3  ;;  %v14713_v15 = vld [vmem:[#allocation6_spill] sm:$0xff] }
 0x582   : > { %v4372_v58 = vadd.f32 %v4371_v50, %v4332_v19  ;;  %v4334_v37 = vpop.f32.mrf.mxu1  ;;  %v4704_v43 = vand.u32 255, %v4680_v36 }
 0x584   : > { %v4446_v22 = vpop.f32.mrf.mxu2  ;;  %v12885_v26 = vadd.f32 %v4372_v58, %v14711_v18  ;;  %v4728_v48 = vcvt.s32.f32 %v4704_v43  ;;  %v14723_v43 = vld [vmem:[#allocation105_spill] sm:$0xff] }
 0x585   : > { %v4447_v10 = vadd.f32 %v4446_v22, %v4407_v27  ;;  %v4410_v7 = vpop.f32.mrf.mxu0  ;;  %v14715_v22 = vld [vmem:[#allocation7_spill] sm:$0xff] }
 0x586   : > { %14712 = vst [vmem:[#allocation107_spill] sm:$0xff] %v12885_v26 }
 0x587   : > { %v12888_v21 = vadd.f32 %v4447_v10, %v14713_v15 }
 0x588   : > { %4858 = vmatmul.bf16.gmra.mxu0 %v12871_v11 }
 0x589   : > { %14714 = vst [vmem:[#allocation13_spill] sm:$0xff] %v12888_v21  ;;  %8187 = vmatmul.msk.bf16.gmra.mxu2 %vm735_vm0, %v12869_v54  ;;  %v4373_v19 = vpop.f32.mrf.mxu3 }
 0x58a   : > { %v4374_v42 = vadd.f32 %v4373_v19, %v4334_v37  ;;  %v4487_v58 = vpop.f32.mrf.mxu1  ;;  %v4702_v37 = vand.u32 255, %v4678_v41  ;;  %v4701_v19 = vand.u32 255, %v4677_v47 }
 0x58c   : > { %v4449_v27 = vpop.f32.mrf.mxu2  ;;  %v12898_v60 = vadd.f32 %v4374_v42, %v14715_v22  ;;  %v4703_v42 = vand.u32 255, %v4679_v17  ;;  %v4726_v57 = vcvt.s32.f32 %v4702_v37  ;;  %v8178_v37 = vld [vmem:[%s9415_s25 + $0x170] sm:$0xff] }
 0x58d   : > { %v4450_v50 = vadd.f32 %v4449_v27, %v4410_v7  ;;  %v4412_v15 = vpop.f32.mrf.mxu0  ;;  %4785 = vmatmul.bf16.gmra.mxu1 %v12895_v34 }
 0x58e   : > { %14716 = vst [vmem:[#allocation22_spill] sm:$0xff] %v12898_v60  ;;  %8182 = vmatmul.msk.bf16.gmra.mxu3 %vm735_vm0, %v12893_v12  ;;  %v14721_v60 = vld [vmem:[#allocation11_spill] sm:$0xff]  ;;  %v4727_v41 = vcvt.s32.f32 %v4703_v42  ;;  %v12915_v47 = vpack.c.bf16 %v4728_v48, %v4726_v57  ;;  %v4681_v57 = vunpack.c.0.s8 %v8178_v37  ;;  %v4683_v48 = vunpack.c.1.s8 %v8178_v37 }
 0x58f   : > { %v12901_v10 = vadd.f32 %v4450_v50, %v14717_v3  ;;  %v14719_v3 = vld [vmem:[#allocation104_spill] sm:$0xff] }
 0x591   : > { %14718 = vst [vmem:[#allocation16_spill] sm:$0xff] %v12901_v10  ;;  %v4526_v29 = vpop.f32.mrf.mxu3 }
 0x592   : > { %v4527_v7 = vadd.f32 %v4526_v29, %v4487_v58  ;;  %v4489_v50 = vpop.f32.mrf.mxu1  ;;  %v4725_v58 = vcvt.s32.f32 %v4701_v19  ;;  %v14725_v19 = vld [vmem:[#allocation14_spill] sm:$0xff] }
 0x594   : > { %v4451_v18 = vpop.f32.mrf.mxu2  ;;  %v12907_v10 = vadd.f32 %v4527_v7, %v14719_v3  ;;  %v12917_v29 = vpack.c.bf16 %v4727_v41, %v4725_v58  ;;  %v8179_v7 = vld [vmem:[%s9415_s25 + $0x178] sm:$0xff]  ;;  %s9100_s25 = scalar_lea.hbm %s9099_s17, 32 }
 0x595   : > { %v4452_v27 = vadd.f32 %v4451_v18, %v4412_v15  ;;  %v4565_v22 = vpop.f32.mrf.mxu0  ;;  %p9101_p11 = scmp.ne.s32.totalorder %s9099_s17, %s9100_s25  ;;  %p9106_p1 = scmp.lt.s32.totalorder %s9104_s28, %s9100_s25 }
 0x596   : > { %14720 = vst [vmem:[#allocation17_spill] sm:$0xff] %v12907_v10  ;;  %v4705_v10 = vand.u32 255, %v4681_v57 }
 0x597   : > { %v12910_v26 = vadd.f32 %v4452_v27, %v14721_v60  ;;  %p9102_p12 = pnand %p9101_p11, %p9243_p5  ;;  %p9107_p2 = por %p9106_p1, %p9105_p0 }
 0x598   : > { %4863 = vmatmul.bf16.gmra.mxu0 %v12895_v34  ;;  %v4729_v61 = vcvt.s32.f32 %v4705_v10  ;;  %v4686_v10 = vunpack.c.2.s8 %v8179_v7 }
 0x599   : > { %14722 = vst [vmem:[#allocation24_spill] sm:$0xff] %v12910_v26  ;;  %8188 = vmatmul.msk.bf16.gmra.mxu2 %vm735_vm0, %v12893_v12  ;;  %v4528_v15 = vpop.f32.mrf.mxu3  ;;  %v4682_v26 = vunpack.c.0.s8 %v8179_v7  ;;  %p9103_p13 = pneg %p9102_p12 }
 0x59a   : > { %v4529_v36 = vadd.f32 %v4528_v15, %v4489_v50  ;;  %v4492_v60 = vpop.f32.mrf.mxu1  ;;  %v4684_v50 = vunpack.c.1.s8 %v8179_v7 }
 0x59b   : > { %v4706_v41 = vand.u32 255, %v4682_v26  ;;  %p9108_p3 = pnand %p9107_p2, %p9103_p13 }
 0x59c   : > { %v4604_v17 = vpop.f32.mrf.mxu2  ;;  %v12922_v3 = vadd.f32 %v4529_v36, %v14723_v43  ;;  %v4707_v36 = vand.u32 255, %v4683_v48 }
 0x59d   : > { %v4605_v18 = vadd.f32 %v4604_v17, %v4565_v22  ;;  %v4567_v27 = vpop.f32.mrf.mxu0  ;;  %4790 = vmatmul.bf16.gmra.mxu1 %v12917_v29  ;;  %v4708_v17 = vand.u32 255, %v4684_v50  ;;  %v4730_v21 = vcvt.s32.f32 %v4706_v41 }
 0x59e   : > { %14724 = vst [vmem:[#allocation108_spill] sm:$0xff] %v12922_v3  ;;  %8183 = vmatmul.msk.bf16.gmra.mxu3 %vm735_vm0, %v12915_v47  ;;  %v4731_v26 = vcvt.s32.f32 %v4707_v36 }
 0x59f   : > { %v12925_v42 = vadd.f32 %v4605_v18, %v14725_v19  ;;  %v4732_v1 = vcvt.s32.f32 %v4708_v17 }
 0x5a0   : > { %v12941_v48 = vpack.c.bf16 %v4731_v26, %v4729_v61 }
 0x5a1   : > { %14726 = vst [vmem:[#allocation20_spill] sm:$0xff] %v12925_v42  ;;  %v4531_v58 = vpop.f32.mrf.mxu3  ;;  %v12939_v57 = vpack.c.bf16 %v4732_v1, %v4730_v21  ;;  %v4688_v1 = vunpack.c.3.s8 %v8179_v7  ;;  %v4685_v21 = vunpack.c.2.s8 %v8178_v37 }
 0x5a2   : > { %v4532_v22 = vadd.f32 %v4531_v58, %v4492_v60  ;;  %v4494_v43 = vpop.f32.mrf.mxu1 }
 0x5a4   : > { %v4606_v15 = vpop.f32.mrf.mxu2  ;;  %v12931_v19 = vadd.f32 %v4532_v22, %v12662_v40  ;;  %v4687_v22 = vunpack.c.3.s8 %v8178_v37 }
 0x5a5   : > { %v4607_v3 = vadd.f32 %v4606_v15, %v4567_v27  ;;  %v4570_v18 = vpop.f32.mrf.mxu0  ;;  %v4710_v15 = vand.u32 255, %v4686_v10 }
 0x5a7   : > { %v12934_v42 = vadd.f32 %v4607_v3, %v12664_v28 }
 0x5a8   : > { %4868 = vmatmul.bf16.gmra.mxu0 %v12917_v29 }
 0x5a9   : > { %8189 = vmatmul.msk.bf16.gmra.mxu2 %vm735_vm0, %v12915_v47  ;;  %v4533_v60 = vpop.f32.mrf.mxu3 }
 0x5aa   : > { %v4534_v50 = vadd.f32 %v4533_v60, %v4494_v43  ;;  %v4497_v40 = vpop.f32.mrf.mxu1  ;;  %v4712_v43 = vand.u32 255, %v4688_v1 }
 0x5ac   : > { %v4609_v27 = vpop.f32.mrf.mxu2  ;;  %v12944_v3 = vadd.f32 %v4534_v50, %v12671_v56  ;;  %v4711_v56 = vand.u32 255, %v4687_v22  ;;  %v4736_v7 = vcvt.s32.f32 %v4712_v43 }
 0x5ad   : > { %v4610_v58 = vadd.f32 %v4609_v27, %v4570_v18  ;;  %v4572_v28 = vpop.f32.mrf.mxu0  ;;  %4795 = vmatmul.bf16.gmra.mxu1 %v12941_v48  ;;  %v4709_v18 = vand.u32 255, %v4685_v21 }
 0x5ae   : > { %8184 = vmatmul.msk.bf16.gmra.mxu3 %vm735_vm0, %v12939_v57  ;;  %v4735_v10 = vcvt.s32.f32 %v4711_v56 }
 0x5af   : > { %v12947_v41 = vadd.f32 %v4610_v58, %v12677_v20  ;;  %v4734_v58 = vcvt.s32.f32 %v4710_v15  ;;  %v4733_v37 = vcvt.s32.f32 %v4709_v18 }
 0x5b1   : > { %v4536_v61 = vpop.f32.mrf.mxu3  ;;  %v12961_v21 = vpack.c.bf16 %v4736_v7, %v4734_v58  ;;  %v12963_v22 = vpack.c.bf16 %v4735_v10, %v4733_v37 }
 0x5b2   : > { %v4537_v17 = vadd.f32 %v4536_v61, %v4497_v40  ;;  %v4499_v26 = vpop.f32.mrf.mxu1 }
 0x5b4   : > { %v4611_v36 = vpop.f32.mrf.mxu2  ;;  %v12953_v50 = vadd.f32 %v4537_v17, %v12684_v16 }
 0x5b5   : > { %v4612_v60 = vadd.f32 %v4611_v36, %v4572_v28  ;;  %v4575_v20 = vpop.f32.mrf.mxu0 }
 0x5b7   : > { %v12956_v27 = vadd.f32 %v4612_v60, %v12686_v63 }
 0x5b8   : > { %4873 = vmatmul.bf16.gmra.mxu0 %v12941_v48 }
 0x5b9   : > { %8190 = vmatmul.msk.bf16.gmra.mxu2 %vm735_vm0, %v12939_v57  ;;  %v4538_v40 = vpop.f32.mrf.mxu3 }
 0x5ba   : > { %v4539_v1 = vadd.f32 %v4538_v40, %v4499_v26  ;;  %v4502_v16 = vpop.f32.mrf.mxu1 }
 0x5bc   : > { %v4614_v28 = vpop.f32.mrf.mxu2  ;;  %v12966_v15 = vadd.f32 %v4539_v1, %v12693_v49 }
 0x5bd   : > { %v4615_v61 = vadd.f32 %v4614_v28, %v4575_v20  ;;  %v4577_v63 = vpop.f32.mrf.mxu0  ;;  %4800 = vmatmul.bf16.gmra.mxu1 %v12963_v22 }
 0x5be   : > { %8185 = vmatmul.msk.bf16.gmra.mxu3 %vm735_vm0, %v12961_v21 }
 0x5bf   : > { %v12969_v17 = vadd.f32 %v4615_v61, %v12699_v59 }
 0x5c1   : > { %v4541_v36 = vpop.f32.mrf.mxu3 }
 0x5c2   : > { %v4542_v43 = vadd.f32 %v4541_v36, %v4502_v16  ;;  %v4504_v56 = vpop.f32.mrf.mxu1 }
 0x5c4   : > { %v4616_v18 = vpop.f32.mrf.mxu2  ;;  %v12975_v20 = vadd.f32 %v4542_v43, %v12706_v51 }
 0x5c5   : > { %v4617_v26 = vadd.f32 %v4616_v18, %v4577_v63  ;;  %v4580_v60 = vpop.f32.mrf.mxu0 }
 0x5c7   : > { %v12978_v49 = vadd.f32 %v4617_v26, %v12708_v5 }
 0x5c8   : > { %4878 = vmatmul.bf16.gmra.mxu0 %v12963_v22 }
 0x5c9   : > { %8191 = vmatmul.msk.bf16.gmra.mxu2 %vm735_vm0, %v12961_v21  ;;  %v4543_v59 = vpop.f32.mrf.mxu3 }
 0x5ca   : > { %v4544_v58 = vadd.f32 %v4543_v59, %v4504_v56  ;;  %v4507_v37 = vpop.f32.mrf.mxu1 }
 0x5cc   : > { %v4619_v7 = vpop.f32.mrf.mxu2  ;;  %v12984_v1 = vadd.f32 %v4544_v58, %v12715_v35 }
 0x5cd   : > { %v4620_v10 = vadd.f32 %v4619_v7, %v4580_v60  ;;  %v4582_v40 = vpop.f32.mrf.mxu0  ;;  %4955 = vmatmul.bf16.vlgmr.msrb.gmra.mxu1 %v12849_v30 }
 0x5ce   : > { %8192 = vmatmul.msk.bf16.vlgmr.msrb.gmra.mxu3 %vm735_vm0, %v12847_v9 }
 0x5cf   : > { %v12987_v51 = vadd.f32 %v4620_v10, %v12717_v14 }
 0x5d1   : > { %v4546_v5 = vpop.f32.mrf.mxu3 }
 0x5d2   : > { %v4547_v28 = vadd.f32 %v4546_v5, %v4507_v37  ;;  %v4509_v61 = vpop.f32.mrf.mxu1 }
 0x5d4   : > { %v4621_v16 = vpop.f32.mrf.mxu2  ;;  %v12993_v43 = vadd.f32 %v4547_v28, %v12726_v8 }
 0x5d5   : > { %v4622_v63 = vadd.f32 %v4621_v16, %v4582_v40  ;;  %v4585_v36 = vpop.f32.mrf.mxu0 }
 0x5d7   : > { %v12996_v35 = vadd.f32 %v4622_v63, %v12728_v46 }
 0x5d8   : > { %5033 = vmatmul.bf16.vlgmr.msrb.gmra.mxu0 %v12849_v30 }
 0x5d9   : > { %8198 = vmatmul.msk.bf16.vlgmr.msrb.gmra.mxu2 %vm735_vm0, %v12847_v9  ;;  %v4548_v14 = vpop.f32.mrf.mxu3 }
 0x5da   : > { %v4549_v18 = vadd.f32 %v4548_v14, %v4509_v61  ;;  %v4512_v26 = vpop.f32.mrf.mxu1 }
 0x5dc   : > { %v4624_v56 = vpop.f32.mrf.mxu2  ;;  %v13002_v58 = vadd.f32 %v4549_v18, %v12741_v2 }
 0x5dd   : > { %v4625_v60 = vadd.f32 %v4624_v56, %v4585_v36  ;;  %v4587_v59 = vpop.f32.mrf.mxu0  ;;  %4960 = vmatmul.bf16.gmra.mxu1 %v12871_v11 }
 0x5de   : > { %8193 = vmatmul.msk.bf16.gmra.mxu3 %vm735_vm0, %v12869_v54 }
 0x5df   : > { %v13005_v8 = vadd.f32 %v4625_v60, %v12743_v32 }
 0x5e1   : > { %v4551_v46 = vpop.f32.mrf.mxu3 }
 0x5e2   : > { %v4552_v30 = vadd.f32 %v4551_v46, %v4512_v26  ;;  %v4514_v7 = vpop.f32.mrf.mxu1  ;;  %v5127_v26 = vld [vmem:[%s13960_s2] sm:$0x3] }
 0x5e3   : > { %v13038_v60 = vperm.slane %v5127_v26, 0 }
 0x5e4   : > { %v4626_v9 = vpop.f32.mrf.mxu2  ;;  %v13011_v40 = vadd.f32 %v4552_v30, %v12757_v13 }
 0x5e5   : > { %v4627_v37 = vadd.f32 %v4626_v9, %v4587_v59  ;;  %v4590_v10 = vpop.f32.mrf.mxu0 }
 0x5e7   : > { %v13014_v2 = vadd.f32 %v4627_v37, %v12759_v25 }
 0x5e8   : > { %5038 = vmatmul.bf16.gmra.mxu0 %v12871_v11 }
 0x5e9   : > { %8199 = vmatmul.msk.bf16.gmra.mxu2 %vm735_vm0, %v12869_v54  ;;  %v4553_v32 = vpop.f32.mrf.mxu3 }
 0x5ea   : > { %v4554_v5 = vadd.f32 %v4553_v32, %v4514_v7  ;;  %v4776_v61 = vpop.f32.mrf.mxu1 }
 0x5ec   : > { %v4629_v28 = vpop.f32.mrf.mxu2  ;;  %v13020_v36 = vadd.f32 %v4554_v5, %v12771_v55 }
 0x5ed   : > { %v4630_v16 = vadd.f32 %v4629_v28, %v4590_v10  ;;  %v4592_v63 = vpop.f32.mrf.mxu0  ;;  %4965 = vmatmul.bf16.gmra.mxu1 %v12895_v34 }
 0x5ee   : > { %8194 = vmatmul.msk.bf16.gmra.mxu3 %vm735_vm0, %v12893_v12 }
 0x5ef   : > { %v13023_v13 = vadd.f32 %v4630_v16, %v12773_v24  ;;  %v13050_v16 = vperm.slane %v5127_v26, 1 }
 0x5f1   : > { %v4815_v25 = vpop.f32.mrf.mxu3 }
 0x5f2   : > { %v4778_v14 = vpop.f32.mrf.mxu1  ;;  %v4816_v56 = vadd.f32 %v4815_v25, %v4776_v61 }
 0x5f4   : > { %v4631_v11 = vpop.f32.mrf.mxu2  ;;  %v4923_v24 = vadd.f32 %v4816_v56, %v12785_v53 }
 0x5f5   : > { %v4632_v54 = vadd.f32 %v4631_v11, %v4592_v63  ;;  %v4854_v18 = vpop.f32.mrf.mxu0 }
 0x5f6   : > { %v5133_v37 = vadd.f32 %v13038_v60, %v4923_v24 }
 0x5f7   : > { %v13032_v55 = vadd.f32 %v4632_v54, %v12782_v44 }
 0x5f8   : > { %5043 = vmatmul.bf16.gmra.mxu0 %v12895_v34  ;;  %v8943_v34 = vld [vmem:[%s13961_s3 + $0x38] sm:$0xff]  ;;  %v5157_v53 = vmax.f32 %v5133_v37, 0.0 }
 0x5f9   : > { %8200 = vmatmul.msk.bf16.gmra.mxu2 %vm735_vm0, %v12893_v12  ;;  %v4817_v59 = vpop.f32.mrf.mxu3  ;;  %5668 = vmatpush.bf16.msra.mxu0 %v8943_v34 }
 0x5fa   : > { %v4818_v46 = vadd.f32 %v4817_v59, %v4778_v14  ;;  %v4781_v9 = vpop.f32.mrf.mxu1 }
 0x5fc   : > { %v4893_v30 = vpop.f32.mrf.mxu2  ;;  %v4925_v10 = vadd.f32 %v4818_v46, %v12792_v0  ;;  %v8942_v0 = vld [vmem:[%s13961_s3 + $0x30] sm:$0xff] }
 0x5fd   : > { %v4856_v7 = vpop.f32.mrf.mxu0  ;;  %v4894_v44 = vadd.f32 %v4893_v30, %v4854_v18  ;;  %4970 = vmatmul.bf16.gmra.mxu1 %v12917_v29  ;;  %5669 = vmatpush.bf16.msra.mxu0 %v8942_v0  ;;  %v8946_v0 = vld [vmem:[%s13961_s3 + $0x50] sm:$0xff] }
 0x5fe   : > { %v5135_v12 = vadd.f32 %v13038_v60, %v4925_v10  ;;  %8195 = vmatmul.msk.bf16.gmra.mxu3 %vm735_vm0, %v12915_v47  ;;  %5712 = vmatpush.bf16.msra.mxu2 %v8946_v0 }
 0x5ff   : > { %v4924_v28 = vadd.f32 %v4894_v44, %v12795_v62  ;;  %v8941_v62 = vld [vmem:[%s13961_s3 + $0x28] sm:$0xff] }
 0x600   : > { %v5159_v32 = vmax.f32 %v5135_v12, 0.0 }
 0x601   : > { %v4820_v5 = vpop.f32.mrf.mxu3  ;;  %v5134_v18 = vadd.f32 %v13050_v16, %v4924_v28  ;;  %5670 = vmatpush.bf16.msra.mxu0 %v8941_v62  ;;  %v8937_v62 = vld [vmem:[%s13961_s3 + $0x8] sm:$0xff] }
 0x602   : > { %v13055_v61 = vpack.c.bf16 %v5159_v32, %v5157_v53  ;;  %v4783_v25 = vpop.f32.mrf.mxu1  ;;  %v4821_v14 = vadd.f32 %v4820_v5, %v4781_v9 }
 0x603   : > { %v5158_v59 = vmax.f32 %v5134_v18, 0.0 }
 0x604   : > { %v4895_v63 = vpop.f32.mrf.mxu2  ;;  %v4927_v24 = vadd.f32 %v4821_v14, %v12801_v39  ;;  %v8939_v39 = vld [vmem:[%s13961_s3 + $0x18] sm:$0xff] }
 0x605   : > { %v4896_v11 = vadd.f32 %v4895_v63, %v4856_v7  ;;  %v4859_v54 = vpop.f32.mrf.mxu0 }
 0x606   : > { %v5137_v44 = vadd.f32 %v13038_v60, %v4927_v24 }
 0x607   : > { %v4926_v56 = vadd.f32 %v4896_v11, %v12804_v52  ;;  %v8940_v52 = vld [vmem:[%s13961_s3 + $0x20] sm:$0xff] }
 0x608   : > { %5048 = vmatmul.bf16.gmra.mxu0 %v12917_v29  ;;  %v5161_v53 = vmax.f32 %v5137_v44, 0.0 }
 0x609   : > { %v5136_v26 = vadd.f32 %v13050_v16, %v4926_v56  ;;  %8201 = vmatmul.msk.bf16.gmra.mxu2 %vm735_vm0, %v12915_v47  ;;  %v4822_v46 = vpop.f32.mrf.mxu3  ;;  %5671 = vmatpush.bf16.msra.mxu0 %v8940_v52  ;;  %v8936_v52 = vld [vmem:[%s13961_s3] sm:$0xff] }
 0x60a   : > { %v4823_v9 = vadd.f32 %v4822_v46, %v4783_v25  ;;  %v4786_v29 = vpop.f32.mrf.mxu1 }
 0x60b   : > { %v5160_v30 = vmax.f32 %v5136_v26, 0.0  ;;  %v8945_v26 = vld [vmem:[%s13961_s3 + $0x48] sm:$0xff] }
 0x60c   : > { %v4898_v7 = vpop.f32.mrf.mxu2  ;;  %v4929_v47 = vadd.f32 %v4823_v9, %v12810_v4  ;;  %v8938_v4 = vld [vmem:[%s13961_s3 + $0x10] sm:$0xff]  ;;  %5713 = vmatpush.bf16.msra.mxu2 %v8945_v26 }
 0x60d   : > { %v13070_v37 = vpack.c.bf16 %v5160_v30, %v5158_v59  ;;  %v4861_v10 = vpop.f32.mrf.mxu0  ;;  %v4899_v34 = vadd.f32 %v4898_v7, %v4859_v54  ;;  %4975 = vmatmul.bf16.gmra.mxu1 %v12941_v48  ;;  %5672 = vmatpush.bf16.msra.mxu0 %v8939_v39 }
 0x60e   : > { %v5139_v12 = vadd.f32 %v13038_v60, %v4929_v47  ;;  %8196 = vmatmul.msk.bf16.gmra.mxu3 %vm735_vm0, %v12939_v57 }
 0x60f   : > { %v4928_v28 = vadd.f32 %v4899_v34, %v12813_v23 }
 0x610   : > { %v5163_v32 = vmax.f32 %v5139_v12, 0.0 }
 0x611   : > { %v4825_v5 = vpop.f32.mrf.mxu3  ;;  %5673 = vmatpush.bf16.msra.mxu0 %v8938_v4  ;;  %v5138_v56 = vadd.f32 %v13050_v16, %v4928_v28 }
 0x612   : > { %v13088_v25 = vpack.c.bf16 %v5163_v32, %v5161_v53  ;;  %v4788_v11 = vpop.f32.mrf.mxu1  ;;  %v4826_v18 = vadd.f32 %v4825_v5, %v4786_v29 }
 0x614   : > { %v4900_v63 = vpop.f32.mrf.mxu2  ;;  %v4931_v59 = vadd.f32 %v4826_v18, %v12819_v45 }
 0x615   : > { %v4901_v54 = vadd.f32 %v4900_v63, %v4861_v10  ;;  %v4864_v14 = vpop.f32.mrf.mxu0  ;;  %5674 = vmatpush.bf16.msra.mxu0 %v8937_v62 }
 0x616   : > { %v5141_v45 = vadd.f32 %v13038_v60, %v4931_v59 }
 0x617   : > { %v4930_v23 = vadd.f32 %v4901_v54, %v12822_v6  ;;  %v5162_v6 = vmax.f32 %v5138_v56, 0.0 }
 0x618   : > { %5053 = vmatmul.bf16.gmra.mxu0 %v12941_v48  ;;  %v8944_v48 = vld [vmem:[%s13961_s3 + $0x40] sm:$0xff]  ;;  %v5165_v39 = vmax.f32 %v5141_v45, 0.0 }
 0x619   : > { %v5140_v24 = vadd.f32 %v13050_v16, %v4930_v23  ;;  %8202 = vmatmul.msk.bf16.gmra.mxu2 %vm735_vm0, %v12939_v57  ;;  %v4827_v46 = vpop.f32.mrf.mxu3  ;;  %5675 = vmatpush.bf16.msra.mxu0 %v8936_v52 }
 0x61a   : > { %v4828_v9 = vadd.f32 %v4827_v46, %v4788_v11  ;;  %v4791_v29 = vpop.f32.mrf.mxu1  ;;  %5714 = vmatpush.bf16.msra.mxu2 %v8944_v48 }
 0x61b   : > { %v5164_v30 = vmax.f32 %v5140_v24, 0.0 }
 0x61c   : > { %v4903_v7 = vpop.f32.mrf.mxu2  ;;  %v4933_v44 = vadd.f32 %v4828_v9, %v12830_v38  ;;  %v8952_v9 = vld [vmem:[%s13961_s3 + $0x80] sm:$0xff] }
 0x61d   : > { %v4866_v10 = vpop.f32.mrf.mxu0  ;;  %v13109_v57 = vpack.c.bf16 %v5164_v30, %v5162_v6  ;;  %v4904_v47 = vadd.f32 %v4903_v7, %v4864_v14  ;;  %4980 = vmatmul.bf16.gmra.mxu1 %v12963_v22  ;;  %v8954_v14 = vld [vmem:[%s13961_s3 + $0x90] sm:$0xff] }
 0x61e   : > { %v5143_v34 = vadd.f32 %v13038_v60, %v4933_v44  ;;  %8197 = vmatmul.msk.bf16.gmra.mxu3 %vm735_vm0, %v12961_v21  ;;  %5506 = vmatpush.bf16.msra.mxu1 %v8954_v14  ;;  %v14729_v44 = vld [vmem:[#allocation9_spill] sm:$0xff]  ;;  %v14731_v14 = vld [vmem:[#allocation18_spill] sm:$0xff] }
 0x61f   : > { %v4932_v32 = vadd.f32 %v4904_v47, %v12833_v33  ;;  %v14727_v33 = vld [vmem:[#allocation8_spill] sm:$0xff] }
 0x620   : > { %v5167_v12 = vmax.f32 %v5143_v34, 0.0  ;;  %v8951_v34 = vld [vmem:[%s13961_s3 + $0x78] sm:$0xff] }
 0x621   : > { %v4830_v53 = vpop.f32.mrf.mxu3  ;;  %v5142_v11 = vadd.f32 %v13050_v16, %v4932_v32 }
 0x622   : > { %v13118_v28 = vpack.c.bf16 %v5167_v12, %v5165_v39  ;;  %v4793_v4 = vpop.f32.mrf.mxu1  ;;  %v4831_v63 = vadd.f32 %v4830_v53, %v4791_v29 }
 0x623   : > { %v5166_v23 = vmax.f32 %v5142_v11, 0.0  ;;  %v8950_v11 = vld [vmem:[%s13961_s3 + $0x70] sm:$0xff] }
 0x624   : > { %v4905_v5 = vpop.f32.mrf.mxu2  ;;  %v4935_v56 = vadd.f32 %v4831_v63, %v14727_v33 }
 0x625   : > { %v4906_v0 = vadd.f32 %v4905_v5, %v4866_v10  ;;  %v4869_v38 = vpop.f32.mrf.mxu0 }
 0x626   : > { %v5145_v30 = vadd.f32 %v13038_v60, %v4935_v56 }
 0x627   : > { %v4934_v54 = vadd.f32 %v4906_v0, %v12842_v31  ;;  %v8953_v31 = vld [vmem:[%s13961_s3 + $0x88] sm:$0xff] }
 0x628   : > { %5058 = vmatmul.bf16.gmra.mxu0 %v12963_v22  ;;  %5507 = vmatpush.bf16.msra.mxu1 %v8953_v31  ;;  %v5169_v29 = vmax.f32 %v5145_v30, 0.0  ;;  %v14732_v30 = vld [vmem:[#allocation12_spill] sm:$0xff] }
 0x629   : > { %v5144_v18 = vadd.f32 %v13050_v16, %v4934_v54  ;;  %8203 = vmatmul.msk.bf16.gmra.mxu2 %vm735_vm0, %v12961_v21  ;;  %v4832_v62 = vpop.f32.mrf.mxu3  ;;  %v14728_v21 = vld [vmem:[#allocation15_spill] sm:$0xff] }
 0x62a   : > { %v4833_v24 = vadd.f32 %v4832_v62, %v4793_v4  ;;  %v4796_v6 = vpop.f32.mrf.mxu1  ;;  %v8949_v62 = vld [vmem:[%s13961_s3 + $0x68] sm:$0xff] }
 0x62b   : > { %v5168_v26 = vmax.f32 %v5144_v18, 0.0 }
 0x62c   : > { %v4908_v59 = vpop.f32.mrf.mxu2  ;;  %v4937_v52 = vadd.f32 %v4833_v24, %v14728_v21  ;;  %5508 = vmatpush.bf16.msra.mxu1 %v8952_v9 }
 0x62d   : > { %v4871_v46 = vpop.f32.mrf.mxu0  ;;  %v13133_v22 = vpack.c.bf16 %v5168_v26, %v5166_v23  ;;  %v4909_v48 = vadd.f32 %v4908_v59, %v4869_v38  ;;  %v14730_v38 = vld [vmem:[#allocation106_spill] sm:$0xff] }
 0x62e   : > { %v5147_v7 = vadd.f32 %v13038_v60, %v4937_v52 }
 0x62f   : > { %v4936_v47 = vadd.f32 %v4909_v48, %v14729_v44  ;;  %v8948_v48 = vld [vmem:[%s13961_s3 + $0x60] sm:$0xff] }
 0x630   : > { %v5171_v10 = vmax.f32 %v5147_v7, 0.0  ;;  %5509 = vmatpush.bf16.msra.mxu1 %v8951_v34 }
 0x631   : > { %v4835_v45 = vpop.f32.mrf.mxu3  ;;  %v5146_v0 = vadd.f32 %v13050_v16, %v4936_v47  ;;  %v8947_v47 = vld [vmem:[%s13961_s3 + $0x58] sm:$0xff] }
 0x632   : > { %v13145_v12 = vpack.c.bf16 %v5171_v10, %v5169_v29  ;;  %v4798_v53 = vpop.f32.mrf.mxu1  ;;  %v4836_v4 = vadd.f32 %v4835_v45, %v4796_v6  ;;  %v14733_v45 = vld [vmem:[#allocation19_spill] sm:$0xff] }
 0x633   : > { %v5170_v33 = vmax.f32 %v5146_v0, 0.0  ;;  %v8957_v0 = vld [vmem:[%s13961_s3 + $0xa8] sm:$0xff] }
 0x634   : > { %v4910_v39 = vpop.f32.mrf.mxu2  ;;  %5510 = vmatpush.bf16.msra.mxu1 %v8950_v11  ;;  %v4939_v18 = vadd.f32 %v4836_v4, %v14731_v14  ;;  %5550 = vmatpush.bf16.msra.mxu3 %v8957_v0  ;;  %v14735_v14 = vld [vmem:[#allocation107_spill] sm:$0xff] }
 0x635   : > { %v4911_v32 = vadd.f32 %v4910_v39, %v4871_v46  ;;  %v4874_v5 = vpop.f32.mrf.mxu0 }
 0x636   : > { %v5149_v46 = vadd.f32 %v13038_v60, %v4939_v18 }
 0x637   : > { %v4938_v63 = vadd.f32 %v4911_v32, %v14730_v38 }
 0x638   : > { %5676 = vmatmul.bf16.vlgmr.msra.gmra.mxu0 %v13055_v61  ;;  %5511 = vmatpush.bf16.msra.mxu1 %v8949_v62  ;;  %v5173_v7 = vmax.f32 %v5149_v46, 0.0 }
 0x639   : > { %v5148_v54 = vadd.f32 %v13050_v16, %v4938_v63  ;;  %8320 = vmatmul.msk.bf16.vlgmr.msra.gmra.mxu2 %vm5487_vm2, %v13070_v37  ;;  %v4837_v56 = vpop.f32.mrf.mxu3  ;;  %v14734_v63 = vld [vmem:[#allocation13_spill] sm:$0xff] }
 0x63a   : > { %v4838_v26 = vadd.f32 %v4837_v56, %v4798_v53  ;;  %v4801_v24 = vpop.f32.mrf.mxu1 }
 0x63b   : > { %v5172_v23 = vmax.f32 %v5148_v54, 0.0 }
 0x63c   : > { %v4913_v31 = vpop.f32.mrf.mxu2  ;;  %v4941_v21 = vadd.f32 %v4838_v26, %v14732_v30  ;;  %5512 = vmatpush.bf16.msra.mxu1 %v8948_v48  ;;  %v14736_v30 = vld [vmem:[#allocation22_spill] sm:$0xff] }
 0x63d   : > { %v4876_v59 = vpop.f32.mrf.mxu0  ;;  %v13160_v6 = vpack.c.bf16 %v5172_v23, %v5170_v33  ;;  %v4914_v52 = vadd.f32 %v4913_v31, %v4874_v5  ;;  %v8956_v48 = vld [vmem:[%s13961_s3 + $0xa0] sm:$0xff] }
 0x63e   : > { %v5151_v9 = vadd.f32 %v13038_v60, %v4941_v21  ;;  %5551 = vmatpush.bf16.msra.mxu3 %v8956_v48 }
 0x63f   : > { %v4940_v44 = vadd.f32 %v4914_v52, %v14733_v45 }
 0x640   : > { %v5175_v29 = vmax.f32 %v5151_v9, 0.0  ;;  %5513 = vmatpush.bf16.msra.mxu1 %v8947_v47  ;;  %v8955_v47 = vld [vmem:[%s13961_s3 + $0x98] sm:$0xff] }
 0x641   : > { %v4840_v10 = vpop.f32.mrf.mxu3  ;;  %v5150_v38 = vadd.f32 %v13050_v16, %v4940_v44 }
 0x642   : > { %v13172_v39 = vpack.c.bf16 %v5175_v29, %v5173_v7  ;;  %v4803_v53 = vpop.f32.mrf.mxu1  ;;  %v4841_v4 = vadd.f32 %v4840_v10, %v4801_v24  ;;  %v14737_v10 = vld [vmem:[#allocation16_spill] sm:$0xff]  ;;  %5552 = vmatpush.bf16.msra.mxu3 %v8955_v47 }
 0x643   : > { %v5174_v33 = vmax.f32 %v5150_v38, 0.0 }
 0x644   : > { %v4915_v34 = vpop.f32.mrf.mxu2  ;;  %v4943_v18 = vadd.f32 %v4841_v4, %v14735_v14 }
 0x645   : > { %v4916_v32 = vadd.f32 %v4915_v34, %v4876_v59  ;;  %v4879_v5 = vpop.f32.mrf.mxu0 }
 0x646   : > { %v5153_v46 = vadd.f32 %v13038_v60, %v4943_v18  ;;  %v14740_v18 = vld [vmem:[#allocation95_spill] sm:$0xff] }
 0x647   : > { %v4942_v11 = vadd.f32 %v4916_v32, %v14734_v63 }
 0x648   : > { %5681 = vmatmul.bf16.gmra.mxu0 %v13088_v25  ;;  %v5177_v7 = vmax.f32 %v5153_v46, 0.0 }
 0x649   : > { %v5152_v54 = vadd.f32 %v13050_v16, %v4942_v11  ;;  %8321 = vmatmul.msk.bf16.gmra.mxu2 %vm5487_vm2, %v13109_v57  ;;  %v4842_v56 = vpop.f32.mrf.mxu3  ;;  %v14739_v11 = vld [vmem:[#allocation17_spill] sm:$0xff] }
 0x64a   : > { %v4843_v62 = vadd.f32 %v4842_v56, %v4803_v53  ;;  %v4956_v31 = vpop.f32.mrf.mxu1 }
 0x64b   : > { %v5176_v23 = vmax.f32 %v5152_v54, 0.0 }
 0x64c   : > { %v4918_v26 = vpop.f32.mrf.mxu2  ;;  %v4945_v21 = vadd.f32 %v4843_v62, %v14736_v30 }
 0x64d   : > { %v4881_v24 = vpop.f32.mrf.mxu0  ;;  %v13184_v59 = vpack.c.bf16 %v5176_v23, %v5174_v33  ;;  %v4919_v52 = vadd.f32 %v4918_v26, %v4879_v5  ;;  %v14738_v5 = vld [vmem:[#allocation94_spill] sm:$0xff]  ;;  %v14741_v33 = vrot.slane %v14740_v18, 1  ;;  %v14742_v23 = vld [vmem:[#allocation24_spill] sm:$0xff] }
 0x64e   : > { %v5155_v9 = vadd.f32 %v13038_v60, %v4945_v21  ;;  %v5218_v4 = vrot.slane %v14738_v5, 1 }
 0x64f   : > { %v4944_v45 = vadd.f32 %v4919_v52, %v14737_v10  ;;  %v14743_v10 = vld [vmem:[#allocation54_spill] sm:$0xff] }
 0x650   : > { %v5179_v29 = vmax.f32 %v5155_v9, 0.0  ;;  %v5220_v56 = vsel %vm5217_vm1, %v5218_v4, %v14741_v33 }
 0x651   : > { %v4995_v44 = vpop.f32.mrf.mxu3  ;;  %v5154_v14 = vadd.f32 %v13050_v16, %v4944_v45  ;;  %v5221_v45 = vrot.slane %v14743_v10, 1 }
 0x652   : > { %v4996_v34 = vadd.f32 %v4995_v44, %v4956_v31  ;;  %v13196_v32 = vpack.c.bf16 %v5179_v29, %v5177_v7  ;;  %v4958_v38 = vpop.f32.mrf.mxu1  ;;  %v14744_v44 = vld [vmem:[#allocation108_spill] sm:$0xff] }
 0x654   : > { %v4920_v53 = vpop.f32.mrf.mxu2  ;;  %v5103_v54 = vadd.f32 %v4996_v34, %v14739_v11  ;;  %v14745_v34 = vld [vmem:[#allocation20_spill] sm:$0xff] }
 0x655   : > { %v4921_v0 = vadd.f32 %v4920_v53, %v4881_v24  ;;  %v5034_v63 = vpop.f32.mrf.mxu0  ;;  %v5178_v24 = vmax.f32 %v5154_v14, 0.0  ;;  %v14747_v14 = vld [vmem:[#allocation59_spill] sm:$0xff] }
 0x656   : > { %v5292_v26 = vadd.f32 %v5220_v56, %v5103_v54  ;;  %v14746_v54 = vld [vmem:[#allocation96_spill] sm:$0xff]  ;;  %v14748_v18 = vrot.slane %v14747_v14, 1 }
 0x657   : > { %v4946_v62 = vadd.f32 %v4921_v0, %v14742_v23  ;;  %v8965_v0 = vld [vmem:[%s13961_s3 + $0xe8] sm:$0xff] }
 0x658   : > { %5686 = vmatmul.bf16.gmra.mxu0 %v13118_v28  ;;  %v5316_v11 = vadd.f32 %v5292_v26, %v13038_v60 }
 0x659   : > { %v5156_v31 = vadd.f32 %v13050_v16, %v4946_v62  ;;  %8322 = vmatmul.msk.bf16.gmra.mxu2 %vm5487_vm2, %v13133_v22  ;;  %v4997_v30 = vpop.f32.mrf.mxu3  ;;  %6002 = vmatpush.bf16.msrb.mxu0 %v8965_v0  ;;  %v8964_v62 = vld [vmem:[%s13961_s3 + $0xe0] sm:$0xff] }
 0x65a   : > { %v4998_v21 = vadd.f32 %v4997_v30, %v4958_v38  ;;  %v4961_v48 = vpop.f32.mrf.mxu1 }
 0x65b   : > { %v5180_v46 = vmax.f32 %v5156_v31, 0.0  ;;  %v5340_v31 = vmax.f32 %v5316_v11, 0.0 }
 0x65c   : > { %v5073_v52 = vpop.f32.mrf.mxu2  ;;  %v5105_v47 = vadd.f32 %v4998_v21, %v14744_v44 }
 0x65d   : > { %v5074_v9 = vadd.f32 %v5073_v52, %v5034_v63  ;;  %v5036_v7 = vpop.f32.mrf.mxu0  ;;  %v13211_v29 = vpack.c.bf16 %v5180_v46, %v5178_v24  ;;  %v5223_v63 = vsel %vm5217_vm1, %v5221_v45, %v14748_v18  ;;  %6003 = vmatpush.bf16.msrb.mxu0 %v8964_v62 }
 0x65e   : > { %v5294_v38 = vadd.f32 %v14746_v54, %v5105_v47  ;;  %v8962_v54 = vld [vmem:[%s13961_s3 + $0xd0] sm:$0xff] }
 0x65f   : > { %v5104_v53 = vadd.f32 %v5074_v9, %v14745_v34  ;;  %v8963_v34 = vld [vmem:[%s13961_s3 + $0xd8] sm:$0xff] }
 0x660   : > { %v5318_v56 = vadd.f32 %v5294_v38, %v13038_v60 }
 0x661   : > { %v5293_v33 = vadd.f32 %v5223_v63, %v5104_v53  ;;  %v5000_v23 = vpop.f32.mrf.mxu3  ;;  %v14749_v53 = vld [vmem:[#allocation55_spill] sm:$0xff]  ;;  %6004 = vmatpush.bf16.msrb.mxu0 %v8963_v34  ;;  %v8968_v34 = vld [vmem:[%s13961_s3 + $0x100] sm:$0xff] }
 0x662   : > { %v5342_v24 = vmax.f32 %v5318_v56, 0.0  ;;  %v5001_v26 = vadd.f32 %v5000_v23, %v4961_v48  ;;  %v4963_v30 = vpop.f32.mrf.mxu1  ;;  %6046 = vmatpush.bf16.msrb.mxu2 %v8968_v34 }
 0x663   : > { %v5317_v48 = vadd.f32 %v5293_v33, %v13050_v16 }
 0x664   : > { %v5075_v46 = vpop.f32.mrf.mxu2  ;;  %v13230_v9 = vpack.c.bf16 %v5342_v24, %v5340_v31  ;;  %v5107_v44 = vadd.f32 %v5001_v26, %v12931_v19  ;;  %v8961_v26 = vld [vmem:[%s13961_s3 + $0xc8] sm:$0xff] }
 0x665   : > { %v5076_v21 = vadd.f32 %v5075_v46, %v5036_v7  ;;  %v5039_v52 = vpop.f32.mrf.mxu0  ;;  %v14750_v7 = vld [vmem:[#allocation62_spill] sm:$0xff]  ;;  %v5341_v18 = vmax.f32 %v5317_v48, 0.0  ;;  %6005 = vmatpush.bf16.msrb.mxu0 %v8962_v54 }
 0x666   : > { %v5296_v0 = vadd.f32 %v14749_v53, %v5107_v44  ;;  %5514 = vmatmul.bf16.vlgmr.msra.gmra.mxu1 %v13230_v9  ;;  %v14751_v46 = vld [vmem:[#allocation98_spill] sm:$0xff]  ;;  %v14752_v44 = vld [vmem:[#allocation56_spill] sm:$0xff] }
 0x667   : > { %v5106_v47 = vadd.f32 %v5076_v21, %v12934_v42 }
 0x668   : > { %5691 = vmatmul.bf16.gmra.mxu0 %v13145_v12 }
 0x669   : > { %v5295_v11 = vadd.f32 %v14750_v7, %v5106_v47  ;;  %8323 = vmatmul.msk.bf16.gmra.mxu2 %vm5487_vm2, %v13160_v6  ;;  %v5002_v19 = vpop.f32.mrf.mxu3  ;;  %6006 = vmatpush.bf16.msrb.mxu0 %v8961_v26  ;;  %v8958_v26 = vld [vmem:[%s13961_s3 + $0xb0] sm:$0xff] }
 0x66a   : > { %v5003_v38 = vadd.f32 %v5002_v19, %v4963_v30  ;;  %v4966_v56 = vpop.f32.mrf.mxu1  ;;  %v5320_v30 = vadd.f32 %v5296_v0, %v13038_v60 }
 0x66b   : > { %v5319_v42 = vadd.f32 %v5295_v11, %v13050_v16 }
 0x66c   : > { %v5078_v14 = vpop.f32.mrf.mxu2  ;;  %v5109_v62 = vadd.f32 %v5003_v38, %v12944_v3  ;;  %v5344_v48 = vmax.f32 %v5320_v30, 0.0 }
 0x66d   : > { %v5343_v63 = vmax.f32 %v5319_v42, 0.0  ;;  %v5079_v23 = vadd.f32 %v5078_v14, %v5039_v52  ;;  %v5041_v33 = vpop.f32.mrf.mxu0 }
 0x66e   : > { %v5298_v21 = vadd.f32 %v14751_v46, %v5109_v62  ;;  %v8966_v46 = vld [vmem:[%s13961_s3 + $0xf0] sm:$0xff] }
 0x66f   : > { %v13249_v31 = vpack.c.bf16 %v5343_v63, %v5341_v18  ;;  %v5108_v24 = vadd.f32 %v5079_v23, %v12947_v41  ;;  %v8960_v41 = vld [vmem:[%s13961_s3 + $0xc0] sm:$0xff]  ;;  %v8959_v18 = vld [vmem:[%s13961_s3 + $0xb8] sm:$0xff] }
 0x670   : > { %v5322_v3 = vadd.f32 %v5298_v21, %v13038_v60  ;;  %6007 = vmatpush.bf16.msrb.mxu0 %v8960_v41  ;;  %v8967_v63 = vld [vmem:[%s13961_s3 + $0xf8] sm:$0xff] }
 0x671   : > { %v5297_v47 = vadd.f32 %v14752_v44, %v5108_v24  ;;  %8270 = vmatmul.msk.bf16.vlgmr.msra.gmra.mxu3 %vm5487_vm2, %v13249_v31  ;;  %v5005_v52 = vpop.f32.mrf.mxu3  ;;  %6047 = vmatpush.bf16.msrb.mxu2 %v8967_v63 }
 0x672   : > { %v5006_v53 = vadd.f32 %v5005_v52, %v4966_v56  ;;  %v5346_v0 = vmax.f32 %v5322_v3, 0.0  ;;  %v4968_v11 = vpop.f32.mrf.mxu1  ;;  %v14753_v56 = vld [vmem:[#allocation65_spill] sm:$0xff] }
 0x674   : > { %v5080_v7 = vpop.f32.mrf.mxu2  ;;  %v5111_v54 = vadd.f32 %v5006_v53, %v12953_v50  ;;  %v13268_v38 = vpack.c.bf16 %v5346_v0, %v5344_v48  ;;  %v5321_v50 = vadd.f32 %v5297_v47, %v13050_v16  ;;  %6008 = vmatpush.bf16.msrb.mxu0 %v8959_v18  ;;  %v14755_v0 = vld [vmem:[#allocation100_spill] sm:$0xff] }
 0x675   : > { %v5081_v19 = vadd.f32 %v5080_v7, %v5041_v33  ;;  %v5044_v42 = vpop.f32.mrf.mxu0  ;;  %v14754_v33 = vld [vmem:[#allocation67_spill] sm:$0xff]  ;;  %6048 = vmatpush.bf16.msrb.mxu2 %v8966_v46 }
 0x676   : > { %v5300_v23 = vadd.f32 %v14753_v56, %v5111_v54  ;;  %5519 = vmatmul.bf16.gmra.mxu1 %v13268_v38  ;;  %v5345_v44 = vmax.f32 %v5321_v50, 0.0  ;;  %v14756_v54 = vld [vmem:[#allocation60_spill] sm:$0xff] }
 0x677   : > { %v5110_v14 = vadd.f32 %v5081_v19, %v12956_v27 }
 0x678   : > { %5696 = vmatmul.bf16.gmra.mxu0 %v13172_v39  ;;  %v5324_v19 = vadd.f32 %v5300_v23, %v13038_v60 }
 0x679   : > { %v5299_v62 = vadd.f32 %v14754_v33, %v5110_v14  ;;  %8324 = vmatmul.msk.bf16.gmra.mxu2 %vm5487_vm2, %v13184_v59  ;;  %v5007_v27 = vpop.f32.mrf.mxu3  ;;  %6009 = vmatpush.bf16.msrb.mxu0 %v8958_v26  ;;  %v14757_v26 = vld [vmem:[#allocation57_spill] sm:$0xff] }
 0x67a   : > { %v5008_v21 = vadd.f32 %v5007_v27, %v4968_v11  ;;  %v4971_v3 = vpop.f32.mrf.mxu1  ;;  %v5348_v63 = vmax.f32 %v5324_v19, 0.0 }
 0x67b   : > { %v5323_v24 = vadd.f32 %v5299_v62, %v13050_v16 }
 0x67c   : > { %v5083_v30 = vpop.f32.mrf.mxu2  ;;  %v5113_v34 = vadd.f32 %v5008_v21, %v12966_v15 }
 0x67d   : > { %v5347_v47 = vmax.f32 %v5323_v24, 0.0  ;;  %v5084_v52 = vadd.f32 %v5083_v30, %v5044_v42  ;;  %v5046_v41 = vpop.f32.mrf.mxu0  ;;  %v8976_v24 = vld [vmem:[%s13961_s3 + $0x140] sm:$0xff]  ;;  %v14758_v30 = vld [vmem:[#allocation69_spill] sm:$0xff] }
 0x67e   : > { %v5302_v7 = vadd.f32 %v14755_v0, %v5113_v34  ;;  %5858 = vmatpush.bf16.msrb.mxu1 %v8976_v24 }
 0x67f   : > { %v5112_v53 = vadd.f32 %v5084_v52, %v12969_v17  ;;  %v13293_v48 = vpack.c.bf16 %v5347_v47, %v5345_v44  ;;  %v8975_v47 = vld [vmem:[%s13961_s3 + $0x138] sm:$0xff] }
 0x680   : > { %v5326_v42 = vadd.f32 %v5302_v7, %v13038_v60 }
 0x681   : > { %v5301_v11 = vadd.f32 %v14756_v54, %v5112_v53  ;;  %8271 = vmatmul.msk.bf16.gmra.mxu3 %vm5487_vm2, %v13293_v48  ;;  %v5010_v14 = vpop.f32.mrf.mxu3 }
 0x682   : > { %v5011_v18 = vadd.f32 %v5010_v14, %v4971_v3  ;;  %v5350_v15 = vmax.f32 %v5326_v42, 0.0  ;;  %v4973_v50 = vpop.f32.mrf.mxu1  ;;  %5859 = vmatpush.bf16.msrb.mxu1 %v8975_v47  ;;  %v8974_v42 = vld [vmem:[%s13961_s3 + $0x130] sm:$0xff]  ;;  %v14759_v14 = vld [vmem:[#allocation73_spill] sm:$0xff] }
 0x683   : > { %v5325_v21 = vadd.f32 %v5301_v11, %v13050_v16 }
 0x684   : > { %v5085_v56 = vpop.f32.mrf.mxu2  ;;  %v5115_v62 = vadd.f32 %v5011_v18, %v12975_v20  ;;  %v13302_v27 = vpack.c.bf16 %v5350_v15, %v5348_v63  ;;  %v14760_v15 = vld [vmem:[#allocation58_spill] sm:$0xff] }
 0x685   : > { %v5086_v17 = vadd.f32 %v5085_v56, %v5046_v41  ;;  %v5049_v33 = vpop.f32.mrf.mxu0  ;;  %v5349_v41 = vmax.f32 %v5325_v21, 0.0 }
 0x686   : > { %v5304_v46 = vadd.f32 %v14757_v26, %v5115_v62  ;;  %5524 = vmatmul.bf16.gmra.mxu1 %v13302_v27 }
 0x687   : > { %v5114_v23 = vadd.f32 %v5086_v17, %v12978_v49  ;;  %5860 = vmatpush.bf16.msrb.mxu1 %v8974_v42 }
 0x688   : > { %5701 = vmatmul.bf16.gmra.mxu0 %v13196_v32  ;;  %v5328_v63 = vadd.f32 %v5304_v46, %v13038_v60 }
 0x689   : > { %v5303_v44 = vadd.f32 %v14758_v30, %v5114_v23  ;;  %8325 = vmatmul.msk.bf16.gmra.mxu2 %vm5487_vm2, %v13211_v29  ;;  %v5012_v20 = vpop.f32.mrf.mxu3 }
 0x68a   : > { %v5013_v3 = vadd.f32 %v5012_v20, %v4973_v50  ;;  %v4976_v53 = vpop.f32.mrf.mxu1  ;;  %v8972_v20 = vld [vmem:[%s13961_s3 + $0x120] sm:$0xff] }
 0x68b   : > { %v5327_v49 = vadd.f32 %v5303_v44, %v13050_v16 }
 0x68c   : > { %v5088_v52 = vpop.f32.mrf.mxu2  ;;  %v5117_v19 = vadd.f32 %v5013_v3, %v12984_v1 }
 0x68d   : > { %v5351_v34 = vmax.f32 %v5327_v49, 0.0  ;;  %v5089_v0 = vadd.f32 %v5088_v52, %v5049_v33  ;;  %v5051_v7 = vpop.f32.mrf.mxu0  ;;  %v5352_v33 = vmax.f32 %v5328_v63, 0.0  ;;  %v14761_v49 = vld [vmem:[#allocation63_spill] sm:$0xff] }
 0x68e   : > { %v5306_v18 = vadd.f32 %v14759_v14, %v5117_v19  ;;  %v14762_v52 = vld [vmem:[#allocation75_spill] sm:$0xff] }
 0x68f   : > { %v5116_v54 = vadd.f32 %v5089_v0, %v12987_v51  ;;  %v13321_v11 = vpack.c.bf16 %v5351_v34, %v5349_v41  ;;  %v8973_v51 = vld [vmem:[%s13961_s3 + $0x128] sm:$0xff]  ;;  %v8971_v34 = vld [vmem:[%s13961_s3 + $0x118] sm:$0xff] }
 0x690   : > { %v5330_v1 = vadd.f32 %v5306_v18, %v13038_v60  ;;  %5861 = vmatpush.bf16.msrb.mxu1 %v8973_v51  ;;  %v14764_v51 = vld [vmem:[#allocation66_spill] sm:$0xff] }
 0x691   : > { %v5305_v56 = vadd.f32 %v14760_v15, %v5116_v54  ;;  %8272 = vmatmul.msk.bf16.gmra.mxu3 %vm5487_vm2, %v13321_v11  ;;  %v5015_v50 = vpop.f32.mrf.mxu3  ;;  %v8970_v54 = vld [vmem:[%s13961_s3 + $0x110] sm:$0xff]  ;;  %v14763_v15 = vld [vmem:[#allocation61_spill] sm:$0xff] }
 0x692   : > { %v5016_v17 = vadd.f32 %v5015_v50, %v4976_v53  ;;  %v5354_v62 = vmax.f32 %v5330_v1, 0.0  ;;  %v4978_v24 = vpop.f32.mrf.mxu1 }
 0x693   : > { %v5329_v3 = vadd.f32 %v5305_v56, %v13050_v16 }
 0x694   : > { %v5090_v23 = vpop.f32.mrf.mxu2  ;;  %v5119_v46 = vadd.f32 %v5016_v17, %v12993_v43  ;;  %v13336_v21 = vpack.c.bf16 %v5354_v62, %v5352_v33  ;;  %5862 = vmatpush.bf16.msrb.mxu1 %v8972_v20 }
 0x695   : > { %v5091_v26 = vadd.f32 %v5090_v23, %v5051_v7  ;;  %v5054_v30 = vpop.f32.mrf.mxu0  ;;  %v5353_v7 = vmax.f32 %v5329_v3, 0.0 }
 0x696   : > { %v5308_v47 = vadd.f32 %v14761_v49, %v5119_v46  ;;  %5529 = vmatmul.bf16.gmra.mxu1 %v13336_v21  ;;  %v14765_v49 = vld [vmem:[#allocation64_spill] sm:$0xff] }
 0x697   : > { %v5118_v44 = vadd.f32 %v5091_v26, %v12996_v35 }
 0x698   : > { %6010 = vmatmul.bf16.vlgmr.msrb.gmra.mxu0 %v13055_v61  ;;  %5863 = vmatpush.bf16.msrb.mxu1 %v8971_v34  ;;  %v5332_v50 = vadd.f32 %v5308_v47, %v13038_v60 }
 0x699   : > { %v5307_v41 = vadd.f32 %v14762_v52, %v5118_v44  ;;  %8464 = vmatmul.msk.bf16.vlgmr.msrb.gmra.mxu2 %vm5487_vm2, %v13070_v37  ;;  %v5017_v43 = vpop.f32.mrf.mxu3  ;;  %v8979_v37 = vld [vmem:[%s13961_s3 + $0x158] sm:$0xff] }
 0x69a   : > { %v5018_v53 = vadd.f32 %v5017_v43, %v4978_v24  ;;  %v4981_v14 = vpop.f32.mrf.mxu1  ;;  %5902 = vmatpush.bf16.msrb.mxu3 %v8979_v37  ;;  %v5356_v23 = vmax.f32 %v5332_v50, 0.0 }
 0x69b   : > { %v5331_v35 = vadd.f32 %v5307_v41, %v13050_v16  ;;  %v14766_v41 = vld [vmem:[#allocation70_spill] sm:$0xff] }
 0x69c   : > { %v5093_v0 = vpop.f32.mrf.mxu2  ;;  %v5121_v42 = vadd.f32 %v5018_v53, %v13002_v58  ;;  %5864 = vmatpush.bf16.msrb.mxu1 %v8970_v54  ;;  %v8969_v58 = vld [vmem:[%s13961_s3 + $0x108] sm:$0xff]  ;;  %v14767_v54 = vld [vmem:[#allocation77_spill] sm:$0xff] }
 0x69d   : > { %v5355_v19 = vmax.f32 %v5331_v35, 0.0  ;;  %v5094_v61 = vadd.f32 %v5093_v0, %v5054_v30  ;;  %v5056_v1 = vpop.f32.mrf.mxu0  ;;  %v14768_v37 = vrot.slane %v14767_v54, 1 }
 0x69e   : > { %v5310_v56 = vadd.f32 %v14763_v15, %v5121_v42 }
 0x69f   : > { %v5120_v18 = vadd.f32 %v5094_v61, %v13005_v8  ;;  %v13361_v63 = vpack.c.bf16 %v5355_v19, %v5353_v7  ;;  %v8977_v61 = vld [vmem:[%s13961_s3 + $0x148] sm:$0xff]  ;;  %v5290_v42 = vsel %vm5217_vm1, %v14768_v37, %v5218_v4 }
 0x6a0   : > { %v5334_v8 = vadd.f32 %v5310_v56, %v13038_v60  ;;  %5865 = vmatpush.bf16.msrb.mxu1 %v8969_v58 }
 0x6a1   : > { %v5309_v17 = vadd.f32 %v14764_v51, %v5120_v18  ;;  %8273 = vmatmul.msk.bf16.gmra.mxu3 %vm5487_vm2, %v13361_v63  ;;  %v5020_v33 = vpop.f32.mrf.mxu3 }
 0x6a2   : > { %v5021_v62 = vadd.f32 %v5020_v33, %v4981_v14  ;;  %v5358_v24 = vmax.f32 %v5334_v8, 0.0  ;;  %v4983_v52 = vpop.f32.mrf.mxu1  ;;  %v14770_v33 = vld [vmem:[#allocation68_spill] sm:$0xff] }
 0x6a3   : > { %v5333_v3 = vadd.f32 %v5309_v17, %v13050_v16 }
 0x6a4   : > { %v5095_v26 = vpop.f32.mrf.mxu2  ;;  %v5123_v30 = vadd.f32 %v5021_v62, %v13011_v40  ;;  %v13373_v44 = vpack.c.bf16 %v5358_v24, %v5356_v23  ;;  %v8978_v40 = vld [vmem:[%s13961_s3 + $0x150] sm:$0xff]  ;;  %v14771_v62 = vrot.slane %v14770_v33, 1 }
 0x6a5   : > { %v5096_v46 = vadd.f32 %v5095_v26, %v5056_v1  ;;  %v5059_v35 = vpop.f32.mrf.mxu0  ;;  %5903 = vmatpush.bf16.msrb.mxu3 %v8978_v40  ;;  %v14769_v1 = vld [vmem:[#allocation71_spill] sm:$0xff] }
 0x6a6   : > { %v5312_v47 = vadd.f32 %v14765_v49, %v5123_v30  ;;  %5534 = vmatmul.bf16.gmra.mxu1 %v13373_v44  ;;  %v5291_v23 = vsel %vm5217_vm1, %v14771_v62, %v5221_v45 }
 0x6a7   : > { %v5122_v20 = vadd.f32 %v5096_v46, %v13014_v2 }
 0x6a8   : > { %6015 = vmatmul.bf16.gmra.mxu0 %v13088_v25  ;;  %v5357_v25 = vmax.f32 %v5333_v3, 0.0  ;;  %v5336_v56 = vadd.f32 %v5312_v47, %v13038_v60 }
 0x6a9   : > { %v5311_v43 = vadd.f32 %v14766_v41, %v5122_v20  ;;  %8465 = vmatmul.msk.bf16.gmra.mxu2 %vm5487_vm2, %v13109_v57  ;;  %v5022_v2 = vpop.f32.mrf.mxu3  ;;  %5904 = vmatpush.bf16.msrb.mxu3 %v8977_v61 }
 0x6aa   : > { %v5023_v53 = vadd.f32 %v5022_v2, %v4983_v52  ;;  %v5360_v51 = vmax.f32 %v5336_v56, 0.0 }
 0x6ab   : > { %v5335_v34 = vadd.f32 %v5311_v43, %v13050_v16 }
 0x6ac   : > { %v5098_v0 = vpop.f32.mrf.mxu2  ;;  %v5125_v57 = vadd.f32 %v5023_v53, %v13020_v36 }
 0x6ad   : > { %v5359_v7 = vmax.f32 %v5335_v34, 0.0  ;;  %v5099_v19 = vadd.f32 %v5098_v0, %v5059_v35  ;;  %v5061_v5 = vpop.f32.mrf.mxu0 }
 0x6ae   : > { %v5314_v15 = vadd.f32 %v5290_v42, %v5125_v57 }
 0x6af   : > { %v5124_v14 = vadd.f32 %v5099_v19, %v13023_v13  ;;  %v13397_v18 = vpack.c.bf16 %v5359_v7, %v5357_v25 }
 0x6b0   : > { %v5338_v36 = vadd.f32 %v5314_v15, %v13038_v60 }
 0x6b1   : > { %v5313_v50 = vadd.f32 %v14769_v1, %v5124_v14  ;;  %8274 = vmatmul.msk.bf16.gmra.mxu3 %vm5487_vm2, %v13397_v18 }
 0x6b2   : > { %v5362_v17 = vmax.f32 %v5338_v36, 0.0 }
 0x6b3   : > { %v5337_v60 = vadd.f32 %v5313_v50, %v13050_v16 }
 0x6b4   : > { %v5100_v58 = vpop.f32.mrf.mxu2  ;;  %v13404_v8 = vpack.c.bf16 %v5362_v17, %v5360_v51 }
 0x6b5   : > { %v5101_v4 = vadd.f32 %v5100_v58, %v5061_v5  ;;  %v5361_v46 = vmax.f32 %v5337_v60, 0.0  ;;  %v5677_v10 = vpop.f32.mrf.mxu0 }
 0x6b6   : > { %5539 = vmatmul.bf16.gmra.mxu1 %v13404_v8 }
 0x6b7   : > { %v5126_v13 = vadd.f32 %v5101_v4, %v13032_v55 }
 0x6b8   : > { %6020 = vmatmul.bf16.gmra.mxu0 %v13118_v28 }
 0x6b9   : > { %v5315_v24 = vadd.f32 %v5291_v23, %v5126_v13  ;;  %8466 = vmatmul.msk.bf16.gmra.mxu2 %vm5487_vm2, %v13133_v22 }
 0x6bb   : > { %v5339_v26 = vadd.f32 %v5315_v24, %v13050_v16 }
 0x6bc   : > { %v5716_v28 = vpop.f32.mrf.mxu2 }
 0x6bd   : > { %v5363_v55 = vmax.f32 %v5339_v26, 0.0  ;;  %v13425_v22 = vpop.f32.mrf.mxu0  ;;  %v8995_v26 = vld [vmem:[%s13963_s5 + $0x78] sm:$0xff] }
 0x6be   : > { %6256 = vmatpush.bf16.msra.mxu1 %v8995_v26  ;;  %v8988_v26 = vld [vmem:[%s13963_s5 + $0x40] sm:$0xff] }
 0x6bf   : > { %v5375_v30 = vpack.c.bf16 %v5363_v55, %v5361_v46  ;;  %v8987_v46 = vld [vmem:[%s13963_s5 + $0x38] sm:$0xff] }
 0x6c0   : > { %v9003_v55 = vld [vmem:[%s13963_s5 + $0xb8] sm:$0xff]  ;;  %6392 = vmatpush.bf16.msra.mxu3 %v8987_v46  ;;  %v8980_v46 = vld [vmem:[%s13963_s5] sm:$0xff] }
 0x6c1   : > { %8275 = vmatmul.msk.bf16.gmra.mxu3 %vm5487_vm2, %v5375_v30  ;;  %6496 = vmatpush.bf16.msra.mxu0 %v9003_v55  ;;  %v8996_v55 = vld [vmem:[%s13963_s5 + $0x80] sm:$0xff] }
 0x6c4   : > { %v13427_v16 = vpop.f32.mrf.mxu2 }
 0x6c5   : > { %v5682_v45 = vpop.f32.mrf.mxu0 }
 0x6c6   : > { %5866 = vmatmul.bf16.vlgmr.msrb.gmra.mxu1 %v13230_v9 }
 0x6c8   : > { %6025 = vmatmul.bf16.gmra.mxu0 %v13145_v12 }
 0x6c9   : > { %8467 = vmatmul.msk.bf16.gmra.mxu2 %vm5487_vm2, %v13160_v6 }
 0x6cc   : > { %v5721_v12 = vpop.f32.mrf.mxu2 }
 0x6cd   : > { %v13435_v9 = vpop.f32.mrf.mxu0 }
 0x6d1   : > { %8414 = vmatmul.msk.bf16.vlgmr.msrb.gmra.mxu3 %vm5487_vm2, %v13249_v31 }
 0x6d4   : > { %v13437_v31 = vpop.f32.mrf.mxu2 }
 0x6d6   : > { %5871 = vmatmul.bf16.gmra.mxu1 %v13268_v38 }
 0x6d8   : > { %6030 = vmatmul.bf16.gmra.mxu0 %v13172_v39 }
 0x6d9   : > { %8468 = vmatmul.msk.bf16.gmra.mxu2 %vm5487_vm2, %v13184_v59  ;;  %v5687_v59 = vpop.f32.mrf.mxu0 }
 0x6dc   : > { %v5726_v38 = vpop.f32.mrf.mxu2 }
 0x6e1   : > { %8415 = vmatmul.msk.bf16.gmra.mxu3 %vm5487_vm2, %v13293_v48 }
 0x6e3   : > { %v5515_v6 = vpop.f32.mrf.mxu1 }
 0x6e6   : > { %5876 = vmatmul.bf16.gmra.mxu1 %v13302_v27  ;;  %v13450_v27 = vpop.f32.mrf.mxu0 }
 0x6e8   : > { %6035 = vmatmul.bf16.gmra.mxu0 %v13196_v32  ;;  %v13452_v32 = vpop.f32.mrf.mxu2 }
 0x6e9   : > { %8469 = vmatmul.msk.bf16.gmra.mxu2 %vm5487_vm2, %v13211_v29 }
 0x6eb   : > { %v13443_v39 = vpop.f32.mrf.mxu1 }
 0x6f0   : > { %v5731_v35 = vpop.f32.mrf.mxu2 }
 0x6f1   : > { %8416 = vmatmul.msk.bf16.gmra.mxu3 %vm5487_vm2, %v13321_v11  ;;  %v5692_v11 = vpop.f32.mrf.mxu0 }
 0x6f3   : > { %v5520_v20 = vpop.f32.mrf.mxu1 }
 0x6f4   : > { %v5554_v48 = vpop.f32.mrf.mxu3 }
 0x6f5   : > { %v5555_v49 = vadd.f32 %v5554_v48, %v5515_v6  ;;  %v8985_v48 = vld [vmem:[%s13963_s5 + $0x28] sm:$0xff] }
 0x6f6   : > { %5881 = vmatmul.bf16.gmra.mxu1 %v13336_v21 }
 0x6f7   : > { %v5678_v47 = vadd.f32 %v5677_v10, %v5555_v49  ;;  %v8994_v10 = vld [vmem:[%s13963_s5 + $0x70] sm:$0xff] }
 0x6f8   : > { %v13469_v25 = vpop.f32.mrf.mxu2  ;;  %6257 = vmatpush.bf16.msra.mxu1 %v8994_v10 }
 0x6f9   : > { %v13448_v3 = vadd.f32 %v5716_v28, %v5678_v47  ;;  %v13467_v0 = vpop.f32.mrf.mxu0  ;;  %v8986_v28 = vld [vmem:[%s13963_s5 + $0x30] sm:$0xff] }
 0x6fa   : > { %6393 = vmatpush.bf16.msra.mxu3 %v8986_v28 }
 0x6fb   : > { %v13456_v52 = vpop.f32.mrf.mxu1 }
 0x6fc   : > { %v13454_v29 = vpop.f32.mrf.mxu3 }
 0x6fe   : > { %6394 = vmatpush.bf16.msra.mxu3 %v8985_v48 }
 0x700   : > { %v5736_v54 = vpop.f32.mrf.mxu2 }
 0x701   : > { %8417 = vmatmul.msk.bf16.gmra.mxu3 %vm5487_vm2, %v13361_v63  ;;  %v5697_v57 = vpop.f32.mrf.mxu0 }
 0x703   : > { %v5525_v43 = vpop.f32.mrf.mxu1 }
 0x704   : > { %v5559_v41 = vpop.f32.mrf.mxu3 }
 0x705   : > { %v5560_v40 = vadd.f32 %v5559_v41, %v5520_v20  ;;  %v9001_v20 = vld [vmem:[%s13963_s5 + $0xa8] sm:$0xff]  ;;  %v8992_v41 = vld [vmem:[%s13963_s5 + $0x60] sm:$0xff] }
 0x706   : > { %5886 = vmatmul.bf16.gmra.mxu1 %v13373_v44 }
 0x707   : > { %v5683_v2 = vadd.f32 %v5682_v45, %v5560_v40  ;;  %v9002_v45 = vld [vmem:[%s13963_s5 + $0xb0] sm:$0xff]  ;;  %v9000_v40 = vld [vmem:[%s13963_s5 + $0xa0] sm:$0xff] }
 0x708   : > { %v13483_v15 = vpop.f32.mrf.mxu2  ;;  %6497 = vmatpush.bf16.msra.mxu0 %v9002_v45 }
 0x709   : > { %v13461_v21 = vadd.f32 %v5721_v12, %v5683_v2  ;;  %v13481_v14 = vpop.f32.mrf.mxu0 }
 0x70b   : > { %v13465_v53 = vpop.f32.mrf.mxu1 }
 0x70c   : > { %v13463_v34 = vpop.f32.mrf.mxu3  ;;  %6498 = vmatpush.bf16.msra.mxu0 %v9001_v20 }
 0x710   : > { %v5741_v58 = vpop.f32.mrf.mxu2  ;;  %6499 = vmatpush.bf16.msra.mxu0 %v9000_v40  ;;  %v5557_v40 = vadd.f32 %v13454_v29, %v13443_v39  ;;  %v13590_v39 = vld [vmem:[%s13962_s4] ss:$0 sm:$0xff] }
 0x711   : > { %8418 = vmatmul.msk.bf16.gmra.mxu3 %vm5487_vm2, %v13397_v18  ;;  %v5702_v5 = vpop.f32.mrf.mxu0 }
 0x713   : > { %v5530_v7 = vpop.f32.mrf.mxu1 }
 0x714   : > { %v5564_v63 = vpop.f32.mrf.mxu3 }
 0x715   : > { %v5565_v19 = vadd.f32 %v5564_v63, %v5525_v43  ;;  %v8984_v43 = vld [vmem:[%s13963_s5 + $0x20] sm:$0xff] }
 0x716   : > { %5891 = vmatmul.bf16.gmra.mxu1 %v13404_v8  ;;  %6395 = vmatpush.bf16.msra.mxu3 %v8984_v43 }
 0x717   : > { %v5688_v61 = vadd.f32 %v5687_v59, %v5565_v19  ;;  %v8991_v19 = vld [vmem:[%s13963_s5 + $0x58] sm:$0xff] }
 0x718   : > { %v13493_v23 = vpop.f32.mrf.mxu2 }
 0x719   : > { %v13474_v44 = vadd.f32 %v5726_v38, %v5688_v61  ;;  %v13491_v33 = vpop.f32.mrf.mxu0  ;;  %v8993_v38 = vld [vmem:[%s13963_s5 + $0x68] sm:$0xff]  ;;  %v8983_v61 = vld [vmem:[%s13963_s5 + $0x18] sm:$0xff] }
 0x71a   : > { %6258 = vmatpush.bf16.msra.mxu1 %v8993_v38  ;;  %6396 = vmatpush.bf16.msra.mxu3 %v8983_v61 }
 0x71b   : > { %v13478_v42 = vpop.f32.mrf.mxu1 }
 0x71c   : > { %v13476_v37 = vpop.f32.mrf.mxu3 }
 0x71e   : > { %6259 = vmatpush.bf16.msra.mxu1 %v8992_v41 }
 0x720   : > { %v6050_v6 = vpop.f32.mrf.mxu2 }
 0x721   : > { %8419 = vmatmul.msk.bf16.gmra.mxu3 %vm5487_vm2, %v5375_v30  ;;  %v6011_v12 = vpop.f32.mrf.mxu0 }
 0x722   : > { %6260 = vmatpush.bf16.msra.mxu1 %v8991_v19 }
 0x723   : > { %v5535_v56 = vpop.f32.mrf.mxu1 }
 0x724   : > { %v5569_v18 = vpop.f32.mrf.mxu3 }
 0x725   : > { %v5570_v1 = vadd.f32 %v5569_v18, %v5530_v7  ;;  %v8990_v18 = vld [vmem:[%s13963_s5 + $0x50] sm:$0xff] }
 0x726   : > { %6261 = vmatpush.bf16.msra.mxu1 %v8990_v18 }
 0x727   : > { %v5693_v50 = vadd.f32 %v5692_v11, %v5570_v1  ;;  %v8998_v1 = vld [vmem:[%s13963_s5 + $0x90] sm:$0xff] }
 0x728   : > { %v6052_v63 = vpop.f32.mrf.mxu2 }
 0x729   : > { %v13485_v36 = vadd.f32 %v5731_v35, %v5693_v50  ;;  %v6013_v2 = vpop.f32.mrf.mxu0 }
 0x72b   : > { %v13489_v17 = vpop.f32.mrf.mxu1 }
 0x72c   : > { %v13487_v51 = vpop.f32.mrf.mxu3 }
 0x731   : > { %v6016_v50 = vpop.f32.mrf.mxu0 }
 0x733   : > { %v5540_v8 = vpop.f32.mrf.mxu1 }
 0x734   : > { %v5574_v4 = vpop.f32.mrf.mxu3 }
 0x735   : > { %v5575_v13 = vadd.f32 %v5574_v4, %v5535_v56  ;;  %v8982_v56 = vld [vmem:[%s13963_s5 + $0x10] sm:$0xff]  ;;  %v8981_v4 = vld [vmem:[%s13963_s5 + $0x8] sm:$0xff] }
 0x736   : > { %6397 = vmatpush.bf16.msra.mxu3 %v8982_v56 }
 0x737   : > { %v5698_v62 = vadd.f32 %v5697_v57, %v5575_v13  ;;  %v8999_v57 = vld [vmem:[%s13963_s5 + $0x98] sm:$0xff] }
 0x738   : > { %6500 = vmatpush.bf16.msra.mxu0 %v8999_v57 }
 0x739   : > { %v13495_v60 = vadd.f32 %v5736_v54, %v5698_v62  ;;  %v6055_v62 = vpop.f32.mrf.mxu2  ;;  %v6018_v48 = vpop.f32.mrf.mxu0 }
 0x73a   : > { %6398 = vmatpush.bf16.msra.mxu3 %v8981_v4 }
 0x73b   : > { %v13508_v30 = vpop.f32.mrf.mxu1 }
 0x73c   : > { %v13497_v24 = vpop.f32.mrf.mxu3  ;;  %6501 = vmatpush.bf16.msra.mxu0 %v8998_v1 }
 0x73e   : > { %6399 = vmatpush.bf16.msra.mxu3 %v8980_v46 }
 0x741   : > { %v6021_v18 = vpop.f32.mrf.mxu0 }
 0x743   : > { %v5867_v49 = vpop.f32.mrf.mxu1 }
 0x744   : > { %v5579_v59 = vpop.f32.mrf.mxu3 }
 0x745   : > { %v5580_v47 = vadd.f32 %v5579_v59, %v5540_v8  ;;  %v8997_v8 = vld [vmem:[%s13963_s5 + $0x88] sm:$0xff] }
 0x746   : > { %6502 = vmatpush.bf16.msra.mxu0 %v8997_v8 }
 0x747   : > { %v5703_v11 = vadd.f32 %v5702_v5, %v5580_v47  ;;  %v6057_v47 = vpop.f32.mrf.mxu2 }
 0x749   : > { %v13537_v35 = vadd.f32 %v5741_v58, %v5703_v11  ;;  %v8989_v58 = vld [vmem:[%s13963_s5 + $0x48] sm:$0xff] }
 0x74a   : > { %6262 = vmatpush.bf16.msra.mxu1 %v8989_v58  ;;  %6503 = vmatpush.bf16.msra.mxu0 %v8996_v55 }
 0x74b   : > { %v5869_v54 = vpop.f32.mrf.mxu1 }
 0x74c   : > { %v13539_v7 = vpop.f32.mrf.mxu3 }
 0x74e   : > { %6263 = vmatpush.bf16.msra.mxu1 %v8988_v26  ;;  %v6023_v26 = vpop.f32.mrf.mxu0 }
 0x74f   : > { %v6060_v56 = vpop.f32.mrf.mxu2 }
 0x753   : > { %v5872_v13 = vpop.f32.mrf.mxu1 }
 0x754   : > { %v5906_v5 = vpop.f32.mrf.mxu3 }
 0x755   : > { %v5907_v10 = vadd.f32 %v5906_v5, %v5867_v49 }
 0x757   : > { %v6012_v45 = vadd.f32 %v6011_v12, %v5907_v10 }
 0x759   : > { %v13577_v11 = vadd.f32 %v6050_v6, %v6012_v45 }
 0x75b   : > { %v5874_v59 = vpop.f32.mrf.mxu1  ;;  %v6092_v49 = vrot.slane %v13577_v11, 1 }
 0x75c   : > { %v5908_v28 = vpop.f32.mrf.mxu3 }
 0x75d   : > { %v5909_v38 = vadd.f32 %v5908_v28, %v5869_v54  ;;  %v5562_v28 = vadd.f32 %v13463_v34, %v13456_v52  ;;  %v6026_v52 = vpop.f32.mrf.mxu0 }
 0x75f   : > { %v6014_v20 = vadd.f32 %v6013_v2, %v5909_v38  ;;  %v5680_v2 = vadd.f32 %v13425_v22, %v5557_v40 }
 0x761   : > { %v6053_v41 = vadd.f32 %v6052_v63, %v6014_v20  ;;  %v5719_v1 = vadd.f32 %v13427_v16, %v5680_v2  ;;  %v6062_v16 = vpop.f32.mrf.mxu2 }
 0x763   : > { %v6093_v43 = vrot.slane %v6053_v41, 1  ;;  %v5877_v57 = vpop.f32.mrf.mxu1  ;;  %v5685_v41 = vadd.f32 %v13435_v9, %v5562_v28 }
 0x764   : > { %v5911_v19 = vpop.f32.mrf.mxu3 }
 0x765   : > { %v5912_v61 = vadd.f32 %v5911_v19, %v5872_v13  ;;  %v6094_v12 = vsel %vm5217_vm1, %v6092_v49, %v6093_v43 }
 0x766   : > { %v6129_v63 = vadd.f32 %v6094_v12, %v13448_v3 }
 0x767   : > { %v6017_v54 = vadd.f32 %v6016_v50, %v5912_v61  ;;  %v5724_v61 = vadd.f32 %v13437_v31, %v5685_v41 }
 0x768   : > { %v6145_v50 = vadd.f32 %v13590_v39, %v6129_v63 }
 0x769   : > { %v6056_v6 = vadd.f32 %v6055_v62, %v6017_v54  ;;  %v6065_v54 = vpop.f32.mrf.mxu2 }
 0x76a   : > { %v6157_v55 = vmax.f32 %v6145_v50, 0.0  ;;  %v6028_v50 = vpop.f32.mrf.mxu0 }
 0x76b   : > { %v6095_v29 = vrot.slane %v6056_v6, 1  ;;  %v5879_v62 = vpop.f32.mrf.mxu1 }
 0x76c   : > { %v5913_v5 = vpop.f32.mrf.mxu3 }
 0x76d   : > { %v6096_v58 = vsel %vm5217_vm1, %v6093_v43, %v6095_v29  ;;  %v5914_v4 = vadd.f32 %v5913_v5, %v5874_v59 }
 0x76e   : > { %v6130_v22 = vadd.f32 %v6096_v58, %v5719_v1 }
 0x76f   : > { %v6019_v8 = vadd.f32 %v6018_v48, %v5914_v4 }
 0x770   : > { %v6146_v13 = vadd.f32 %v13590_v39, %v6130_v22 }
 0x771   : > { %v6058_v3 = vadd.f32 %v6057_v47, %v6019_v8 }
 0x772   : > { %v6158_v46 = vmax.f32 %v6146_v13, 0.0 }
 0x773   : > { %v6097_v10 = vrot.slane %v6058_v3, 1  ;;  %v5882_v43 = vpop.f32.mrf.mxu1 }
 0x774   : > { %v5916_v45 = vpop.f32.mrf.mxu3  ;;  %v6169_v38 = vpack.c.bf16 %v6158_v46, %v6157_v55 }
 0x775   : > { %v5917_v20 = vadd.f32 %v5916_v45, %v5877_v57  ;;  %v6098_v48 = vsel %vm5217_vm1, %v6095_v29, %v6097_v10 }
 0x776   : > { %6264 = vmatmul.bf16.vlgmr.msra.gmra.mxu1 %v6169_v38  ;;  %6400 = vmatmul.bf16.vlgmr.msra.gmra.mxu3 %v6169_v38  ;;  %v6131_v40 = vadd.f32 %v6098_v48, %v13461_v21  ;;  %v5567_v21 = vadd.f32 %v13476_v37, %v13465_v53 }
 0x777   : > { %v6022_v59 = vadd.f32 %v6021_v18, %v5917_v20  ;;  %6504 = vmatmul.bf16.vlgmr.msra.gmra.mxu0 %v6169_v38  ;;  %v6031_v20 = vpop.f32.mrf.mxu0 }
 0x778   : > { %v6147_v18 = vadd.f32 %v13590_v39, %v6131_v40  ;;  %v5690_v13 = vadd.f32 %v13450_v27, %v5567_v21 }
 0x779   : > { %v6061_v47 = vadd.f32 %v6060_v56, %v6022_v59 }
 0x77a   : > { %v6159_v56 = vmax.f32 %v6147_v18, 0.0  ;;  %v5729_v53 = vadd.f32 %v13452_v32, %v5690_v13  ;;  %v5572_v32 = vadd.f32 %v13487_v51, %v13478_v42 }
 0x77b   : > { %v6099_v19 = vrot.slane %v6061_v47, 1  ;;  %v5884_v31 = vpop.f32.mrf.mxu1 }
 0x77c   : > { %v5918_v34 = vpop.f32.mrf.mxu3 }
 0x77d   : > { %v5919_v12 = vadd.f32 %v5918_v34, %v5879_v62  ;;  %v6100_v57 = vsel %vm5217_vm1, %v6097_v10, %v6099_v19  ;;  %v6067_v62 = vpop.f32.mrf.mxu2  ;;  %v5695_v34 = vadd.f32 %v13467_v0, %v5572_v32 }
 0x77e   : > { %v6132_v2 = vadd.f32 %v6100_v57, %v5724_v61 }
 0x77f   : > { %v6024_v6 = vadd.f32 %v6023_v26, %v5919_v12 }
 0x780   : > { %v6148_v63 = vadd.f32 %v13590_v39, %v6132_v2 }
 0x781   : > { %v6063_v9 = vadd.f32 %v6062_v16, %v6024_v6  ;;  %v5734_v6 = vadd.f32 %v13469_v25, %v5695_v34 }
 0x782   : > { %v6160_v29 = vmax.f32 %v6148_v63, 0.0 }
 0x783   : > { %v6101_v1 = vrot.slane %v6063_v9, 1  ;;  %v5887_v28 = vpop.f32.mrf.mxu1 }
 0x784   : > { %v5921_v5 = vpop.f32.mrf.mxu3  ;;  %v6170_v58 = vpack.c.bf16 %v6160_v29, %v6159_v56 }
 0x785   : > { %v5922_v4 = vadd.f32 %v5921_v5, %v5882_v43  ;;  %v6102_v8 = vsel %vm5217_vm1, %v6099_v19, %v6101_v1  ;;  %v6070_v48 = vpop.f32.mrf.mxu2 }
 0x786   : > { %6269 = vmatmul.bf16.gmra.mxu1 %v6170_v58  ;;  %6405 = vmatmul.bf16.gmra.mxu3 %v6170_v58  ;;  %v6133_v26 = vadd.f32 %v6102_v8, %v13474_v44 }
 0x787   : > { %v6027_v22 = vadd.f32 %v6026_v52, %v5922_v4  ;;  %6509 = vmatmul.bf16.gmra.mxu0 %v6170_v58 }
 0x788   : > { %v6149_v45 = vadd.f32 %v13590_v39, %v6133_v26 }
 0x789   : > { %v6066_v3 = vadd.f32 %v6065_v54, %v6027_v22  ;;  %v6033_v54 = vpop.f32.mrf.mxu0 }
 0x78a   : > { %v6161_v41 = vmax.f32 %v6149_v45, 0.0 }
 0x78b   : > { %v6103_v46 = vrot.slane %v6066_v3, 1  ;;  %v5889_v12 = vpop.f32.mrf.mxu1 }
 0x78c   : > { %v5923_v37 = vpop.f32.mrf.mxu3 }
 0x78d   : > { %v5924_v55 = vadd.f32 %v5923_v37, %v5884_v31  ;;  %v6104_v10 = vsel %vm5217_vm1, %v6101_v1, %v6103_v46  ;;  %v6072_v42 = vpop.f32.mrf.mxu2 }
 0x78e   : > { %v6134_v16 = vadd.f32 %v6104_v10, %v5729_v53 }
 0x78f   : > { %v6029_v38 = vadd.f32 %v6028_v50, %v5924_v55 }
 0x790   : > { %v6150_v59 = vadd.f32 %v13590_v39, %v6134_v16 }
 0x791   : > { %v6068_v27 = vadd.f32 %v6067_v62, %v6029_v38  ;;  %v6036_v25 = vpop.f32.mrf.mxu0 }
 0x792   : > { %v6162_v47 = vmax.f32 %v6150_v59, 0.0 }
 0x793   : > { %v6105_v44 = vrot.slane %v6068_v27, 1  ;;  %v5892_v31 = vpop.f32.mrf.mxu1 }
 0x794   : > { %v5926_v43 = vpop.f32.mrf.mxu3  ;;  %v6171_v40 = vpack.c.bf16 %v6162_v47, %v6161_v41 }
 0x795   : > { %v5927_v19 = vadd.f32 %v5926_v43, %v5887_v28  ;;  %v6106_v52 = vsel %vm5217_vm1, %v6103_v46, %v6105_v44  ;;  %v6075_v13 = vpop.f32.mrf.mxu2 }
 0x796   : > { %6274 = vmatmul.bf16.gmra.mxu1 %v6171_v40  ;;  %6410 = vmatmul.bf16.gmra.mxu3 %v6171_v40  ;;  %v6135_v2 = vadd.f32 %v6106_v52, %v13485_v36  ;;  %v5577_v36 = vadd.f32 %v13497_v24, %v13489_v17  ;;  %v5582_v17 = vadd.f32 %v13539_v7, %v13508_v30 }
 0x797   : > { %v6032_v61 = vadd.f32 %v6031_v20, %v5927_v19  ;;  %6514 = vmatmul.bf16.gmra.mxu0 %v6171_v40 }
 0x798   : > { %v6151_v29 = vadd.f32 %v13590_v39, %v6135_v2  ;;  %v5700_v26 = vadd.f32 %v13481_v14, %v5577_v36  ;;  %v5705_v14 = vadd.f32 %v13491_v33, %v5582_v17 }
 0x799   : > { %v6071_v57 = vadd.f32 %v6070_v48, %v6032_v61  ;;  %v6038_v45 = vpop.f32.mrf.mxu0 }
 0x79a   : > { %v6163_v5 = vmax.f32 %v6151_v29, 0.0  ;;  %v5739_v55 = vadd.f32 %v13483_v15, %v5700_v26  ;;  %v5744_v30 = vadd.f32 %v13493_v23, %v5705_v14 }
 0x79b   : > { %v6107_v18 = vrot.slane %v6071_v57, 1  ;;  %v5894_v24 = vpop.f32.mrf.mxu1 }
 0x79c   : > { %v5928_v51 = vpop.f32.mrf.mxu3 }
 0x79d   : > { %v5929_v63 = vadd.f32 %v5928_v51, %v5889_v12  ;;  %v6108_v9 = vsel %vm5217_vm1, %v6105_v44, %v6107_v18  ;;  %v6077_v27 = vpop.f32.mrf.mxu2 }
 0x79e   : > { %v6136_v56 = vadd.f32 %v6108_v9, %v5734_v6 }
 0x79f   : > { %v6034_v1 = vadd.f32 %v6033_v54, %v5929_v63 }
 0x7a0   : > { %v6152_v21 = vadd.f32 %v13590_v39, %v6136_v56 }
 0x7a1   : > { %v6073_v0 = vadd.f32 %v6072_v42, %v6034_v1 }
 0x7a2   : > { %v6164_v58 = vmax.f32 %v6152_v21, 0.0  ;;  %v13658_v21 = vld [vmem:[%s13964_s6] ss:$0 sm:$0xff] }
 0x7a3   : > { %v6109_v4 = vrot.slane %v6073_v0, 1 }
 0x7a4   : > { %v5931_v50 = vpop.f32.mrf.mxu3  ;;  %v6172_v22 = vpack.c.bf16 %v6164_v58, %v6163_v5 }
 0x7a5   : > { %v5932_v8 = vadd.f32 %v5931_v50, %v5892_v31  ;;  %v6110_v3 = vsel %vm5217_vm1, %v6107_v18, %v6109_v4 }
 0x7a6   : > { %6279 = vmatmul.bf16.gmra.mxu1 %v6172_v22  ;;  %6415 = vmatmul.bf16.gmra.mxu3 %v6172_v22  ;;  %v6137_v53 = vadd.f32 %v6110_v3, %v13495_v60 }
 0x7a7   : > { %v6037_v62 = vadd.f32 %v6036_v25, %v5932_v8  ;;  %6519 = vmatmul.bf16.gmra.mxu0 %v6172_v22 }
 0x7a8   : > { %v6153_v20 = vadd.f32 %v13590_v39, %v6137_v53 }
 0x7a9   : > { %v6076_v46 = vadd.f32 %v6075_v13, %v6037_v62 }
 0x7aa   : > { %v6165_v15 = vmax.f32 %v6153_v20, 0.0 }
 0x7ab   : > { %v6111_v37 = vrot.slane %v6076_v46, 1 }
 0x7ac   : > { %v5933_v10 = vpop.f32.mrf.mxu3 }
 0x7ad   : > { %v5934_v28 = vadd.f32 %v5933_v10, %v5894_v24  ;;  %v6112_v16 = vsel %vm5217_vm1, %v6109_v4, %v6111_v37 }
 0x7ae   : > { %v6138_v38 = vadd.f32 %v6112_v16, %v5739_v55 }
 0x7af   : > { %v6039_v59 = vadd.f32 %v6038_v45, %v5934_v28 }
 0x7b0   : > { %v6154_v60 = vadd.f32 %v13590_v39, %v6138_v38 }
 0x7b1   : > { %v6078_v48 = vadd.f32 %v6077_v27, %v6039_v59 }
 0x7b2   : > { %v6166_v41 = vmax.f32 %v6154_v60, 0.0 }
 0x7b3   : > { %v6113_v47 = vrot.slane %v6078_v48, 1 }
 0x7b4   : > { %v6173_v7 = vpack.c.bf16 %v6166_v41, %v6165_v15 }
 0x7b5   : > { %v6114_v44 = vsel %vm5217_vm1, %v6111_v37, %v6113_v47  ;;  %v6128_v32 = vsel %vm5217_vm1, %v6113_v47, %v6092_v49 }
 0x7b6   : > { %6284 = vmatmul.bf16.gmra.mxu1 %v6173_v7  ;;  %6420 = vmatmul.bf16.gmra.mxu3 %v6173_v7  ;;  %v6139_v33 = vadd.f32 %v6114_v44, %v13537_v35  ;;  %v6140_v43 = vadd.f32 %v6128_v32, %v5744_v30 }
 0x7b7   : > { %6524 = vmatmul.bf16.gmra.mxu0 %v6173_v7 }
 0x7b8   : > { %v6155_v40 = vadd.f32 %v13590_v39, %v6139_v33  ;;  %v6156_v19 = vadd.f32 %v13590_v39, %v6140_v43 }
 0x7ba   : > { %v6167_v61 = vmax.f32 %v6155_v40, 0.0  ;;  %v6168_v52 = vmax.f32 %v6156_v19, 0.0 }
 0x7bc   : > { %v6174_v23 = vpack.c.bf16 %v6168_v52, %v6167_v61 }
 0x7c6   : > { %6289 = vmatmul.bf16.gmra.mxu1 %v6174_v23  ;;  %6425 = vmatmul.bf16.gmra.mxu3 %v6174_v23 }
 0x7c7   : > { %6529 = vmatmul.bf16.gmra.mxu0 %v6174_v23 }
 0x7f3   : > { %v13643_v34 = vpop.f32.mrf.mxu1 }
 0x7f4   : > { %v13645_v11 = vpop.f32.mrf.mxu0  ;;  %v6307_v35 = vrot.slane %v13643_v34, 1 }
 0x7f5   : > { %v6548_v2 = vrot.slane %v13645_v11, 2 }
 0x7f9   : > { %v6401_v49 = vpop.f32.mrf.mxu3 }
 0x7fb   : > { %v6267_v12 = vpop.f32.mrf.mxu1 }
 0x7fc   : > { %v6308_v57 = vrot.slane %v6267_v12, 1  ;;  %v6507_v54 = vpop.f32.mrf.mxu0 }
 0x7fd   : > { %v6549_v39 = vrot.slane %v6507_v54, 2 }
 0x7fe   : > { %v6309_v18 = vsel %vm5217_vm1, %v6307_v35, %v6308_v57 }
 0x7ff   : > { %v6402_v6 = vadd.f32 %v6401_v49, %v6309_v18  ;;  %v6550_v42 = vsel %vm6547_vm3, %v6548_v2, %v6549_v39 }
 0x801   : > { %v6585_v51 = vadd.f32 %v6550_v42, %v6402_v6  ;;  %v6403_v63 = vpop.f32.mrf.mxu3 }
 0x803   : > { %v6270_v9 = vpop.f32.mrf.mxu1  ;;  %v6601_v36 = vadd.f32 %v13658_v21, %v6585_v51 }
 0x804   : > { %v6310_v56 = vrot.slane %v6270_v9, 1  ;;  %v6510_v29 = vpop.f32.mrf.mxu0 }
 0x805   : > { %v6551_v1 = vrot.slane %v6510_v29, 2  ;;  %v6613_v62 = vmax.f32 %v6601_v36, 0.0 }
 0x806   : > { %v6311_v0 = vsel %vm5217_vm1, %v6308_v57, %v6310_v56 }
 0x807   : > { %v6404_v31 = vadd.f32 %v6403_v63, %v6311_v0  ;;  %v6552_v5 = vsel %vm6547_vm3, %v6549_v39, %v6551_v1 }
 0x809   : > { %v6586_v58 = vadd.f32 %v6552_v5, %v6404_v31  ;;  %v6406_v4 = vpop.f32.mrf.mxu3 }
 0x80b   : > { %v6272_v25 = vpop.f32.mrf.mxu1  ;;  %v6602_v50 = vadd.f32 %v13658_v21, %v6586_v58 }
 0x80c   : > { %v6312_v22 = vrot.slane %v6272_v25, 1  ;;  %v6512_v8 = vpop.f32.mrf.mxu0 }
 0x80d   : > { %v6553_v13 = vrot.slane %v6512_v8, 2  ;;  %v6614_v3 = vmax.f32 %v6602_v50, 0.0 }
 0x80e   : > { %v6313_v26 = vsel %vm5217_vm1, %v6310_v56, %v6312_v22 }
 0x80f   : > { %v6407_v46 = vadd.f32 %v6406_v4, %v6313_v26  ;;  %v6554_v53 = vsel %vm6547_vm3, %v6551_v1, %v6553_v13  ;;  %v13666_v37 = vpack.c.bf16 %v6614_v3, %v6613_v62 }
 0x811   : > { %v6587_v55 = vadd.f32 %v6554_v53, %v6407_v46  ;;  %v6408_v17 = vpop.f32.mrf.mxu3 }
 0x813   : > { %v6275_v24 = vpop.f32.mrf.mxu1  ;;  %v6603_v27 = vadd.f32 %v13658_v21, %v6587_v55 }
 0x814   : > { %v6314_v10 = vrot.slane %v6275_v24, 1  ;;  %v6515_v28 = vpop.f32.mrf.mxu0 }
 0x815   : > { %v6555_v16 = vrot.slane %v6515_v28, 2  ;;  %v6615_v30 = vmax.f32 %v6603_v27, 0.0 }
 0x816   : > { %v6315_v45 = vsel %vm5217_vm1, %v6312_v22, %v6314_v10 }
 0x817   : > { %v6409_v38 = vadd.f32 %v6408_v17, %v6315_v45  ;;  %v6556_v20 = vsel %vm6547_vm3, %v6553_v13, %v6555_v16 }
 0x819   : > { %v6588_v59 = vadd.f32 %v6556_v20, %v6409_v38  ;;  %v6411_v14 = vpop.f32.mrf.mxu3 }
 0x81b   : > { %v6277_v60 = vpop.f32.mrf.mxu1  ;;  %v6604_v48 = vadd.f32 %v13658_v21, %v6588_v59 }
 0x81c   : > { %v6316_v15 = vrot.slane %v6277_v60, 1  ;;  %v13672_v41 = vpop.f32.mrf.mxu0 }
 0x81d   : > { %v6557_v47 = vrot.slane %v13672_v41, 2  ;;  %v6616_v7 = vmax.f32 %v6604_v48, 0.0 }
 0x81e   : > { %v6317_v44 = vsel %vm5217_vm1, %v6314_v10, %v6316_v15 }
 0x81f   : > { %v6412_v32 = vadd.f32 %v6411_v14, %v6317_v44  ;;  %v13676_v33 = vpack.c.bf16 %v6616_v7, %v6615_v30  ;;  %v6558_v43 = vsel %vm6547_vm3, %v6555_v16, %v6557_v47 }
 0x821   : > { %v13681_v40 = vadd.f32 %v6558_v43, %v6412_v32  ;;  %v6413_v19 = vpop.f32.mrf.mxu3 }
 0x823   : > { %v6280_v61 = vpop.f32.mrf.mxu1  ;;  %v6605_v41 = vadd.f32 %v13658_v21, %v13681_v40  ;;  %v9020_v40 = vld [vmem:[%s13965_s7 + $0x74] sm:$0xf0] }
 0x824   : > { %v13683_v52 = vpop.f32.mrf.mxu0  ;;  %v6318_v8 = vrot.slane %v6280_v61, 1 }
 0x826   : > { %v6319_v14 = vsel %vm5217_vm1, %v6316_v15, %v6318_v8 }
 0x827   : > { %v6414_v43 = vadd.f32 %v6413_v19, %v6319_v14  ;;  %v9036_v14 = vld [vmem:[%s13965_s7 + $0xf4] sm:$0xf] }
 0x829   : > { %v6416_v23 = vpop.f32.mrf.mxu3 }
 0x82b   : > { %v6282_v49 = vpop.f32.mrf.mxu1 }
 0x82c   : > { %v6522_v12 = vpop.f32.mrf.mxu0  ;;  %v6320_v58 = vrot.slane %v6282_v49, 1 }
 0x82d   : > { %v6561_v27 = vrot.slane %v6522_v12, 2 }
 0x82e   : > { %v6321_v53 = vsel %vm5217_vm1, %v6318_v8, %v6320_v58 }
 0x82f   : > { %v6417_v30 = vadd.f32 %v6416_v23, %v6321_v53  ;;  %v9029_v53 = vld [vmem:[%s13965_s7 + $0xb4] sm:$0xf0] }
 0x831   : > { %v6418_v57 = vpop.f32.mrf.mxu3 }
 0x833   : > { %v6285_v54 = vpop.f32.mrf.mxu1 }
 0x834   : > { %v6525_v39 = vpop.f32.mrf.mxu0  ;;  %v6322_v0 = vrot.slane %v6285_v54, 1 }
 0x835   : > { %v6563_v24 = vrot.slane %v6525_v39, 2 }
 0x836   : > { %v6323_v3 = vsel %vm5217_vm1, %v6320_v58, %v6322_v0  ;;  %v8668_v58 = vld [vmem:[%s13965_s7 + $0xf0] sm:$0xf] }
 0x837   : > { %v6419_v38 = vadd.f32 %v6418_v57, %v6323_v3  ;;  %v6564_v32 = vsel %vm6547_vm3, %v6561_v27, %v6563_v24  ;;  %v8644_v3 = vld [vmem:[%s13965_s7 + $0xc0] sm:$0xf] }
 0x839   : > { %v6421_v18 = vpop.f32.mrf.mxu3  ;;  %v6592_v61 = vadd.f32 %v6564_v32, %v6419_v38  ;;  %v8708_v38 = vld [vmem:[%s13965_s7 + $0x40] sm:$0xf]  ;;  %v9012_v32 = vld [vmem:[%s13965_s7 + $0x34] sm:$0xf0] }
 0x83b   : > { %v6287_v6 = vpop.f32.mrf.mxu1  ;;  %v6608_v19 = vadd.f32 %v13658_v21, %v6592_v61 }
 0x83c   : > { %v6527_v42 = vpop.f32.mrf.mxu0  ;;  %v6324_v29 = vrot.slane %v6287_v6, 1 }
 0x83d   : > { %v6565_v26 = vrot.slane %v6527_v42, 2 }
 0x83e   : > { %v6325_v25 = vsel %vm5217_vm1, %v6322_v0, %v6324_v29 }
 0x83f   : > { %v6422_v55 = vadd.f32 %v6421_v18, %v6325_v25  ;;  %v6566_v60 = vsel %vm6547_vm3, %v6563_v24, %v6565_v26  ;;  %v8660_v25 = vld [vmem:[%s13965_s7 + $0xe0] sm:$0xf]  ;;  %v9018_v24 = vld [vmem:[%s13965_s7 + $0x64] sm:$0xf0] }
 0x841   : > { %v6423_v51 = vpop.f32.mrf.mxu3  ;;  %v6593_v7 = vadd.f32 %v6566_v60, %v6422_v55  ;;  %v8628_v60 = vld [vmem:[%s13965_s7 + $0xa0] sm:$0xf] }
 0x843   : > { %v6290_v63 = vpop.f32.mrf.mxu1  ;;  %v6609_v23 = vadd.f32 %v13658_v21, %v6593_v7  ;;  %v8620_v7 = vld [vmem:[%s13965_s7 + $0x90] sm:$0xf] }
 0x844   : > { %v6530_v9 = vpop.f32.mrf.mxu0  ;;  %v6326_v56 = vrot.slane %v6290_v63, 1  ;;  %v6620_v63 = vmax.f32 %v6608_v19, 0.0  ;;  %v8662_v19 = vld [vmem:[%s13965_s7 + $0xe8] sm:$0xf0] }
 0x845   : > { %v6567_v50 = vrot.slane %v6530_v9, 2  ;;  %v6621_v6 = vmax.f32 %v6609_v23, 0.0  ;;  %v9023_v23 = vld [vmem:[%s13965_s7 + $0x84] sm:$0xf0] }
 0x846   : > { %v6327_v31 = vsel %vm5217_vm1, %v6324_v29, %v6326_v56 }
 0x847   : > { %v6424_v13 = vadd.f32 %v6423_v51, %v6327_v31  ;;  %v6568_v10 = vsel %vm6547_vm3, %v6565_v26, %v6567_v50  ;;  %v9004_v31 = vld [vmem:[%s13967_s9] sm:$0xff] }
 0x849   : > { %v6426_v1 = vpop.f32.mrf.mxu3  ;;  %v6594_v20 = vadd.f32 %v6568_v10, %v6424_v13  ;;  %v9033_v13 = vld [vmem:[%s13965_s7 + $0xd4] sm:$0xf0] }
 0x84b   : > { %v6292_v5 = vpop.f32.mrf.mxu1  ;;  %v6610_v49 = vadd.f32 %v13658_v21, %v6594_v20  ;;  %v9014_v20 = vld [vmem:[%s13965_s7 + $0x44] sm:$0xf0] }
 0x84c   : > { %v6328_v4 = vrot.slane %v6292_v5, 1  ;;  %v6532_v36 = vpop.f32.mrf.mxu0 }
 0x84d   : > { %v6569_v22 = vrot.slane %v6532_v36, 2  ;;  %v6622_v18 = vmax.f32 %v6610_v49, 0.0  ;;  %v9010_v49 = vld [vmem:[%s13965_s7 + $0x24] sm:$0xf0] }
 0x84e   : > { %v6329_v62 = vsel %vm5217_vm1, %v6326_v56, %v6328_v4  ;;  %v6343_v16 = vsel %vm5217_vm1, %v6328_v4, %v6307_v35  ;;  %v6559_v35 = vrot.slane %v13683_v52, 2  ;;  %v9037_v4 = vld [vmem:[%s13965_s7 + $0xf4] sm:$0xf0] }
 0x84f   : > { %v6427_v46 = vadd.f32 %v6426_v1, %v6329_v62  ;;  %v6570_v17 = vsel %vm6547_vm3, %v6567_v50, %v6569_v22  ;;  %v6584_v48 = vsel %vm6547_vm3, %v6569_v22, %v6548_v2  ;;  %v6629_v51 = vpack.c.bf16 %v6622_v18, %v6621_v6  ;;  %v9035_v50 = vld [vmem:[%s13965_s7 + $0xe4] sm:$0xf0]  ;;  %v9034_v18 = vld [vmem:[%s13965_s7 + $0xe4] sm:$0xf] }
 0x850   : > { %v6562_v12 = vsel %vm6547_vm3, %v6559_v35, %v6561_v27  ;;  %v6560_v54 = vsel %vm6547_vm3, %v6557_v47, %v6559_v35  ;;  %v6617_v1 = vmax.f32 %v6605_v41, 0.0  ;;  %v8669_v36 = vor.u32 %v9037_v4, %v8668_v58  ;;  %v9021_v22 = vld [vmem:[%s13967_s9 + $0x8] sm:$0xff]  ;;  %v8670_v27 = vld [vmem:[%s13965_s7 + $0xf8] sm:$0xf0]  ;;  %v8700_v35 = vld [vmem:[%s13965_s7 + $0x30] sm:$0xf] }
 0x851   : > { %v6595_v28 = vadd.f32 %v6570_v17, %v6427_v46  ;;  %v6428_v45 = vpop.f32.mrf.mxu3  ;;  %v6591_v11 = vadd.f32 %v6562_v12, %v6417_v30  ;;  %v6590_v52 = vadd.f32 %v6560_v54, %v6414_v43  ;;  %v8661_v8 = vor.u32 %v9035_v50, %v8660_v25  ;;  %v8636_v46 = vld [vmem:[%s13965_s7 + $0xb0] sm:$0xf]  ;;  %v8724_v17 = vld [vmem:[%s13965_s7 + $0x60] sm:$0xf]  ;;  %v9027_v30 = vld [vmem:[%s13965_s7 + $0xa4] sm:$0xf0] }
 0x852   : > { %v6429_v59 = vadd.f32 %v6428_v45, %v6343_v16  ;;  %v8637_v55 = vor.u32 %v9029_v53, %v8636_v46  ;;  %v8725_v10 = vor.u32 %v9018_v24, %v8724_v17  ;;  %v9016_v16 = vld [vmem:[%s13965_s7 + $0x54] sm:$0xf0]  ;;  %v8701_v43 = vor.u32 %v9012_v32, %v8700_v35  ;;  %v9019_v54 = vld [vmem:[%s13965_s7 + $0x74] sm:$0xf]  ;;  %v8654_v41 = vld [vmem:[%s13965_s7 + $0xd8] sm:$0xf0] }
 0x853   : > { %v6611_v44 = vadd.f32 %v13658_v21, %v6595_v28  ;;  %v6607_v42 = vadd.f32 %v13658_v21, %v6591_v11  ;;  %v6606_v9 = vadd.f32 %v13658_v21, %v6590_v52  ;;  %v8716_v28 = vld [vmem:[%s13965_s7 + $0x50] sm:$0xf]  ;;  %v8718_v4 = vld [vmem:[%s13965_s7 + $0x58] sm:$0xf0]  ;;  %v9011_v17 = vld [vmem:[%s13965_s7 + $0x34] sm:$0xf] }
 0x854   : > { %v6596_v34 = vadd.f32 %v6584_v48, %v6429_v59  ;;  %v8717_v45 = vor.u32 %v9016_v16, %v8716_v28  ;;  %v8709_v59 = vor.u32 %v9014_v20, %v8708_v38  ;;  %v8673_v48 = vor.u32 %v9036_v14, %v8670_v27  ;;  %v8684_v11 = vld [vmem:[%s13965_s7 + $0x10] sm:$0xf]  ;;  %v8638_v25 = vld [vmem:[%s13965_s7 + $0xb8] sm:$0xf0]  ;;  %v9009_v28 = vld [vmem:[%s13965_s7 + $0x24] sm:$0xf] }
 0x855   : > { %v6623_v57 = vmax.f32 %v6611_v44, 0.0  ;;  %v6619_v56 = vmax.f32 %v6607_v42, 0.0  ;;  %v6618_v47 = vmax.f32 %v6606_v9, 0.0  ;;  %v9025_v44 = vld [vmem:[%s13965_s7 + $0x94] sm:$0xf0] }
 0x856   : > { %v6612_v15 = vadd.f32 %v13658_v21, %v6596_v34  ;;  %v8732_v21 = vld [vmem:[%s13965_s7 + $0x70] sm:$0xf]  ;;  %v8629_v34 = vor.u32 %v9027_v30, %v8628_v60  ;;  %6809 = vmatpush.bf16.msrb.mxu1 %v8673_v48  ;;  %v8621_v61 = vor.u32 %v9025_v44, %v8620_v7  ;;  %v9006_v9 = vld [vmem:[%s13965_s7 + $0x4] sm:$0xf0]  ;;  %v8702_v24 = vld [vmem:[%s13965_s7 + $0x38] sm:$0xf0] }
 0x857   : > { %v6628_v29 = vpack.c.bf16 %v6620_v63, %v6619_v56  ;;  %v6627_v0 = vpack.c.bf16 %v6618_v47, %v6617_v1  ;;  %v8733_v5 = vor.u32 %v9020_v40, %v8732_v21  ;;  %v8676_v63 = vld [vmem:[%s13965_s7] sm:$0xf]  ;;  %v9032_v56 = vld [vmem:[%s13965_s7 + $0xd4] sm:$0xf]  ;;  %v9030_v1 = vld [vmem:[%s13965_s7 + $0xc4] sm:$0xf] }
 0x858   : > { %v6624_v2 = vmax.f32 %v6612_v15, 0.0  ;;  %v8692_v15 = vld [vmem:[%s13965_s7 + $0x20] sm:$0xf]  ;;  %v8677_v47 = vor.u32 %v9006_v9, %v8676_v63  ;;  %v9017_v21 = vld [vmem:[%s13965_s7 + $0x64] sm:$0xf] }
 0x859   : > { %6903 = vmatpush.bf16.msrb.mxu3 %v8733_v5  ;;  %v8693_v12 = vor.u32 %v9010_v49, %v8692_v15  ;;  %v8726_v40 = vld [vmem:[%s13965_s7 + $0x68] sm:$0xf0]  ;;  %v9015_v5 = vld [vmem:[%s13965_s7 + $0x54] sm:$0xf]  ;;  %v8686_v27 = vld [vmem:[%s13965_s7 + $0x18] sm:$0xf0] }
 0x85a   : > { %v6630_v39 = vpack.c.bf16 %v6624_v2, %v6623_v57  ;;  %v9008_v57 = vld [vmem:[%s13965_s7 + $0x14] sm:$0xf0]  ;;  %v8612_v2 = vld [vmem:[%s13965_s7 + $0x80] sm:$0xf]  ;;  %v8729_v58 = vor.u32 %v9017_v21, %v8726_v40  ;;  %v8694_v16 = vld [vmem:[%s13965_s7 + $0x28] sm:$0xf0] }
 0x85b   : > { %v8613_v52 = vor.u32 %v9023_v23, %v8612_v2  ;;  %v8685_v6 = vor.u32 %v9008_v57, %v8684_v11  ;;  %v8614_v38 = vld [vmem:[%s13965_s7 + $0x88] sm:$0xf0]  ;;  %v9007_v14 = vld [vmem:[%s13965_s7 + $0x14] sm:$0xf]  ;;  %v9005_v7 = vld [vmem:[%s13965_s7 + $0x4] sm:$0xf] }
 0x85c   : > { %6644 = vmatpush.bf16.msra.mxu2 %v6630_v39  ;;  %v8689_v30 = vor.u32 %v9007_v14, %v8686_v27  ;;  %v8678_v44 = vld [vmem:[%s13965_s7 + $0x8] sm:$0xf0] }
 0x85d   : > { %6904 = vmatpush.bf16.msrb.mxu3 %v8725_v10  ;;  %v8705_v10 = vor.u32 %v9011_v17, %v8702_v24 }
 0x860   : > { %6645 = vmatpush.bf16.msra.mxu2 %v6629_v51 }
 0x861   : > { %6905 = vmatpush.bf16.msrb.mxu3 %v8717_v45  ;;  %v9022_v45 = vld [vmem:[%s13965_s7 + $0x84] sm:$0xf] }
 0x862   : > { %v8617_v20 = vor.u32 %v9022_v45, %v8614_v38 }
 0x864   : > { %6646 = vmatpush.bf16.msra.mxu2 %v6628_v29 }
 0x865   : > { %6906 = vmatpush.bf16.msrb.mxu3 %v8709_v59  ;;  %v8697_v59 = vor.u32 %v9009_v28, %v8694_v16 }
 0x868   : > { %6647 = vmatpush.bf16.msra.mxu2 %v6627_v0 }
 0x869   : > { %6907 = vmatpush.bf16.msrb.mxu3 %v8701_v43 }
 0x86c   : > { %6648 = vmatpush.bf16.msra.mxu2 %v13676_v33 }
 0x86d   : > { %6908 = vmatpush.bf16.msrb.mxu3 %v8693_v12 }
 0x870   : > { %6649 = vmatpush.bf16.msra.mxu2 %v13666_v37 }
 0x871   : > { %6909 = vmatpush.bf16.msrb.mxu3 %v8685_v6 }
 0x873   : > { %8602 = vmatmul.msk.bf16.vlgmr.msra.gmra.mxu2 %vm6638_vm4, %v9004_v31 }
 0x874   : > { %6686 = vmatpush.bf16.msrb.mxu2 %v6630_v39  ;;  %v8734_v39 = vld [vmem:[%s13965_s7 + $0x78] sm:$0xf0] }
 0x875   : > { %v8737_v42 = vor.u32 %v9019_v54, %v8734_v39  ;;  %6910 = vmatpush.bf16.msrb.mxu3 %v8677_v47 }
 0x878   : > { %6687 = vmatpush.bf16.msrb.mxu2 %v6629_v51  ;;  %v8665_v51 = vor.u32 %v9034_v18, %v8662_v19 }
 0x87a   : > { %6810 = vmatpush.bf16.msrb.mxu1 %v8665_v51 }
 0x87c   : > { %6688 = vmatpush.bf16.msrb.mxu2 %v6628_v29  ;;  %v8657_v29 = vor.u32 %v9032_v56, %v8654_v41 }
 0x87e   : > { %6811 = vmatpush.bf16.msrb.mxu1 %v8657_v29 }
 0x880   : > { %6689 = vmatpush.bf16.msrb.mxu2 %v6627_v0  ;;  %v8646_v0 = vld [vmem:[%s13965_s7 + $0xc8] sm:$0xf0] }
 0x881   : > { %v8649_v31 = vor.u32 %v9030_v1, %v8646_v0 }
 0x883   : > { %6812 = vmatpush.bf16.msrb.mxu1 %v8649_v31 }
 0x884   : > { %6690 = vmatpush.bf16.msrb.mxu2 %v13676_v33  ;;  %v8652_v33 = vld [vmem:[%s13965_s7 + $0xd0] sm:$0xf] }
 0x885   : > { %v8653_v62 = vor.u32 %v9033_v13, %v8652_v33  ;;  %v8630_v33 = vld [vmem:[%s13965_s7 + $0xa8] sm:$0xf0] }
 0x888   : > { %6691 = vmatpush.bf16.msrb.mxu2 %v13666_v37  ;;  %v9031_v37 = vld [vmem:[%s13965_s7 + $0xc4] sm:$0xf0] }
 0x889   : > { %v8645_v26 = vor.u32 %v9031_v37, %v8644_v3  ;;  %v8622_v3 = vld [vmem:[%s13965_s7 + $0x98] sm:$0xf0]  ;;  %v9013_v37 = vld [vmem:[%s13965_s7 + $0x44] sm:$0xf] }
 0x88b   : > { %8609 = vmatmul.msk.bf16.vlgmr.msrb.gmra.mxu2 %vm6638_vm4, %v9021_v22  ;;  %v8721_v22 = vor.u32 %v9015_v5, %v8718_v4 }
 0x88c   : > { %6795 = vmatpush.bf16.msra.mxu2 %v8669_v36  ;;  %v9028_v36 = vld [vmem:[%s13965_s7 + $0xb4] sm:$0xf] }
 0x88d   : > { %v8641_v50 = vor.u32 %v9028_v36, %v8638_v25 }
 0x88f   : > { %6813 = vmatpush.bf16.msrb.mxu1 %v8641_v50 }
 0x890   : > { %6796 = vmatpush.bf16.msra.mxu2 %v8661_v8  ;;  %v9026_v8 = vld [vmem:[%s13965_s7 + $0xa4] sm:$0xf] }
 0x891   : > { %v8633_v13 = vor.u32 %v9026_v8, %v8630_v33 }
 0x893   : > { %6814 = vmatpush.bf16.msrb.mxu1 %v8633_v13 }
 0x894   : > { %6797 = vmatpush.bf16.msra.mxu2 %v8653_v62  ;;  %v9024_v62 = vld [vmem:[%s13965_s7 + $0x94] sm:$0xf] }
 0x895   : > { %v8625_v46 = vor.u32 %v9024_v62, %v8622_v3 }
 0x897   : > { %6815 = vmatpush.bf16.msrb.mxu1 %v8625_v46 }
 0x898   : > { %6798 = vmatpush.bf16.msra.mxu2 %v8645_v26  ;;  %v8710_v26 = vld [vmem:[%s13965_s7 + $0x48] sm:$0xf0] }
 0x899   : > { %v8713_v53 = vor.u32 %v9013_v37, %v8710_v26 }
 0x89b   : > { %6816 = vmatpush.bf16.msrb.mxu1 %v8617_v20 }
 0x89c   : > { %6799 = vmatpush.bf16.msra.mxu2 %v8637_v55 }
 0x8a0   : > { %6800 = vmatpush.bf16.msra.mxu2 %v8629_v34  ;;  %v8681_v34 = vor.u32 %v9005_v7, %v8678_v44 }
 0x8a4   : > { %6801 = vmatpush.bf16.msra.mxu2 %v8621_v61  ;;  %v6931_v61 = vld [vmem:[%s13966_s8] sm:$0x3] }
 0x8a5   : > { %v6933_v49 = vperm.slane %v6931_v61, 0  ;;  %v6934_v6 = vperm.slane %v6931_v61, 1 }
 0x8a8   : > { %6802 = vmatpush.bf16.msra.mxu2 %v8613_v52 }
 0x8ac   : > { %6917 = vmatpush.bf16.msrb.mxu2 %v8737_v42 }
 0x8b0   : > { %6918 = vmatpush.bf16.msrb.mxu2 %v8729_v58 }
 0x8b4   : > { %6919 = vmatpush.bf16.msrb.mxu2 %v8721_v22 }
 0x8b8   : > { %6920 = vmatpush.bf16.msrb.mxu2 %v8713_v53 }
 0x8bc   : > { %6921 = vmatpush.bf16.msrb.mxu2 %v8705_v10 }
 0x8c0   : > { %6922 = vmatpush.bf16.msrb.mxu2 %v8697_v59 }
 0x8c4   : > { %6923 = vmatpush.bf16.msrb.mxu2 %v8689_v30 }
 0x8c8   : > { %6924 = vmatpush.bf16.msrb.mxu2 %v8681_v34 }
 0x8f6   : > { %v6651_v55 = vpop.f32.mrf.mxu2 }
 0x8fe   : > { %v6653_v60 = vpop.f32.mrf.mxu2 }
 0x8ff   : > { %v6656_v48 = vpack.c.bf16 %v6653_v60, %v6651_v55 }
 0x901   : > { %6911 = vmatmul.bf16.vlgmr.msrb.gmra.mxu3 %v6656_v48 }
 0x90e   : > { %v6693_v35 = vpop.f32.mrf.mxu2 }
 0x916   : > { %v6695_v32 = vpop.f32.mrf.mxu2 }
 0x917   : > { %v6698_v43 = vpack.c.bf16 %v6695_v32, %v6693_v35 }
 0x919   : > { %6803 = vmatmul.bf16.vlgmr.msra.gmra.mxu2 %v6698_v43  ;;  %6817 = vmatmul.bf16.vlgmr.msrb.gmra.mxu1 %v6698_v43 }
 0x929   : > { %6925 = vmatmul.bf16.vlgmr.msrb.gmra.mxu2 %v6656_v48 }
 0x984   : > { %v6912_v15 = vpop.f32.mrf.mxu3 }
 0x98c   : > { %v6914_v54 = vpop.f32.mrf.mxu3 }
 0x996   : > { %v6818_v19 = vpop.f32.mrf.mxu1 }
 0x99c   : > { %v6804_v12 = vpop.f32.mrf.mxu2 }
 0x99d   : > { %v6913_v11 = vadd.f32 %v6912_v15, %v6804_v12 }
 0x99e   : > { %v6820_v56 = vpop.f32.mrf.mxu1 }
 0x99f   : > { %v6937_v57 = vadd.f32 %v6933_v49, %v6913_v11 }
 0x9a1   : > { %v6941_v2 = vmax.f32 %v6937_v57, 0.0 }
 0x9a3   : > { %6945 = vst [vmem:[%s352_s29] sm:$0xff] %v6941_v2 }
 0x9a4   : > { %v6806_v23 = vpop.f32.mrf.mxu2 }
 0x9a5   : > { %v6915_v52 = vadd.f32 %v6914_v54, %v6806_v23 }
 0x9a7   : > { %v6939_v39 = vadd.f32 %v6933_v49, %v6915_v52 }
 0x9a9   : > { %v6943_v18 = vmax.f32 %v6939_v39, 0.0 }
 0x9ab   : > { %6947 = vst [vmem:[%s352_s29 + $0x10] sm:$0xff] %v6943_v18 }
 0x9ac   : > { %v6926_v42 = vpop.f32.mrf.mxu2 }
 0x9ad   : > { %v6927_v51 = vadd.f32 %v6926_v42, %v6818_v19 }
 0x9af   : > { %v6938_v63 = vadd.f32 %v6934_v6, %v6927_v51 }
 0x9b1   : > { %v6942_v9 = vmax.f32 %v6938_v63, 0.0 }
 0x9b3   : > { %6946 = vst [vmem:[%s352_s29 + $0x8] sm:$0xff] %v6942_v9 }
 0x9b4   : > { %v6928_v41 = vpop.f32.mrf.mxu2 }
 0x9b5   : > { %v6929_v29 = vadd.f32 %v6928_v41, %v6820_v56 }
 0x9b7   : > { %v6940_v47 = vadd.f32 %v6934_v6, %v6929_v29 }
 0x9b9   : > { %v6944_v1 = vmax.f32 %v6940_v47, 0.0 }
 0x9bb   : > { %6948 = vst [vmem:[%s352_s29 + $0x18] sm:$0xff] %v6944_v1 }
 0x9bc   : > { %9111 = shalt.err (!%p9108_p3)
}
 0x9bd   : > { %s9148_s20 = smov 256   ;;  %s9149_s29 = smov 16  }
 0x9be   : > { %9041 = dma.vmem_to_hbm [thread:$0]  (%p9243_p5), %s6964_s22, 512, %s6966_s18, %s6950_s21, %s9148_s20, %s9148_s20, %s9149_s29  }
 0x9bf PF: > { %p9047_p4 = scmp.ge.s32.totalorder %s9146_s16, 2  ;;  %s6980_s12 = sand.u32 1, %s9134_s13  }
 0x9c0   : > { %s6981_s0 = scalar_lea.sflag [#allocation3], %s6980_s12 }
 0x9c1   : > { %p9044_p7 = pnand %p9047_p4, %p9247_p6 }
 0x9c3   : > { %p9045_p8 = pneg %p9044_p7 }
 0x9c5   : > { %9129 = dma.done.wait (%p9045_p8), %s6981_s0, 512  }
 0x9c6   : > { %9131 = vsyncadd (%p9045_p8), %s6981_s0, 4294966784  ;;  %s14772_s17 = sld [smem:[#allocation5_spill]]  ;;  %p20_p9 = scmp.ge.s32.totalorder %s9230_s19, 4  }
 0x9c7   : > { %s14773_s13 = smov %s9138_s14  ;;  %s14774_s14 = smov %s9142_s15 }
 0x9c8   : > { %s14776_s16 = smov %s9230_s19  ;;  %22 = sbr.rel (!%p20_p9) target bundleno = 5 (0x5), region = 115 }
 0x9cc   : > { %s14775_s15 = smov %s14772_s17 }
 0x9cd   :  { %6987 = vsyncpa [#allocation3], 1 }
 0x9ce   :  { %6989 = vsyncpa [#allocation3 + $0x1], 1 }

</bundles_post_ra>
